<compile_context>
chip_gen: v6e
topology: v6e:2x2x1
jax: 0.10.0
libtpu: 0.0.40
codegen_flags: <defaults>
</compile_context>

<pallas_src>
from functools import partial

import jax
import jax.numpy as jnp
from jax import lax
from jax.experimental import pallas as pl
from jax.experimental.pallas import tpu as pltpu

K_DIM = 3 + 16          # k = 19
EPS = 1e-5
C1, C2, C3 = 64, 128, 1024
LANE = 128


# ---------------------------------------------------------------------------
# kernels
# ---------------------------------------------------------------------------
def conv1_stats_kernel(x_ref, w1_ref, ss1_ref, *, nchunks):
    """z1 = W1 @ x (bias dropped: cancels in training-mode BN); accumulate sum(z1^2).

    Lane-dense (C1, 128) accumulator, pure VPU adds; the mean of z1 is recovered
    outside via linearity (W1 @ sum_n x), so no cross-lane reduce / width-1 stores.
    z1 is never written to HBM.
    """
    z = jnp.dot(w1_ref[...], x_ref[...], preferred_element_type=jnp.float32)

    @pl.when(pl.program_id(1) == 0)
    def _():
        ss1_ref[...] = jnp.zeros_like(ss1_ref)

    ss = ss1_ref[...]
    for j in range(nchunks):
        zc = z[:, j * LANE:(j + 1) * LANE]
        ss = ss + zc * zc
    ss1_ref[...] = ss


def conv2_stats_kernel(x_ref, sc1_ref, sh1_ref, w1_ref, w2_ref,
                       ss2_ref, a1s_ref, *, nchunks, tile_n, n_true, has_pad):
    """Recompute conv1 from x, fused BN1+ReLU, conv2; accumulate sum(z2^2), sum(a1)."""
    t = pl.program_id(1)
    z1 = jnp.dot(w1_ref[...], x_ref[...], preferred_element_type=jnp.float32)
    a1 = jnp.maximum(z1 * sc1_ref[...] + sh1_ref[...], 0.0)
    if has_pad:  # zero padded columns so they contribute nothing to conv2 / BN2 stats
        col = t * tile_n + lax.broadcasted_iota(jnp.int32, (1, tile_n), 1)
        a1 = jnp.where(col < n_true, a1, 0.0)
    a1_bf = a1.astype(jnp.bfloat16)
    z2 = jnp.dot(w2_ref[...], a1_bf, preferred_element_type=jnp.float32)

    @pl.when(t == 0)
    def _():
        ss2_ref[...] = jnp.zeros_like(ss2_ref)
        a1s_ref[...] = jnp.zeros_like(a1s_ref)

    ss, a1s = ss2_ref[...], a1s_ref[...]
    a1_f = a1_bf.astype(jnp.float32)   # accumulate exactly what the MXU consumed
    for j in range(nchunks):
        sl = slice(j * LANE, (j + 1) * LANE)
        zc = z2[:, sl]
        ss = ss + zc * zc
        a1s = a1s + a1_f[:, sl]
    ss2_ref[...] = ss
    a1s_ref[...] = a1s


def conv3_stats_kernel(x_ref, sc1_ref, sh1_ref, sc2_ref, sh2_ref,
                       w1_ref, w2_ref, w3_ref,
                       ss3_ref, a2s_ref, mx_ref, mn_ref,
                       *, nchunks, tile_n, n_true, has_pad):
    """Recompute conv1+conv2 from x, fused BN1/BN2+ReLU, conv3.

    Accumulates lane-dense sum(z3^2), sum(a2) (mean via linearity) and the running
    max / min of the raw conv3 output; BN3 + ReLU + global max-pool is finished in
    the FC-head kernel.  conv3 activations never touch HBM.
    """
    t = pl.program_id(1)
    z1 = jnp.dot(w1_ref[...], x_ref[...], preferred_element_type=jnp.float32)
    a1 = jnp.maximum(z1 * sc1_ref[...] + sh1_ref[...], 0.0)
    z2 = jnp.dot(w2_ref[...], a1.astype(jnp.bfloat16), preferred_element_type=jnp.float32)
    a2 = jnp.maximum(z2 * sc2_ref[...] + sh2_ref[...], 0.0)
    if has_pad:
        col = t * tile_n + lax.broadcasted_iota(jnp.int32, (1, tile_n), 1)
        a2 = jnp.where(col < n_true, a2, 0.0)
    a2_bf = a2.astype(jnp.bfloat16)
    z3 = jnp.dot(w3_ref[...], a2_bf, preferred_element_type=jnp.float32)   # (C3, tile_n)

    @pl.when(t == 0)
    def _():
        ss3_ref[...] = jnp.zeros_like(ss3_ref)
        a2s_ref[...] = jnp.zeros_like(a2s_ref)
        mx_ref[...] = jnp.full(mx_ref.shape, -jnp.inf, dtype=mx_ref.dtype)
        mn_ref[...] = jnp.full(mn_ref.shape, jnp.inf, dtype=mn_ref.dtype)

    ss, a2s = ss3_ref[...], a2s_ref[...]
    mx, mn = mx_ref[...], mn_ref[...]
    a2_f = a2_bf.astype(jnp.float32)
    for j in range(nchunks):
        sl = slice(j * LANE, (j + 1) * LANE)
        zc = z3[:, sl]
        ss = ss + zc * zc
        a2s = a2s + a2_f[:, sl]
        if has_pad:
            vm = (t * tile_n + j * LANE
                  + lax.broadcasted_iota(jnp.int32, (1, LANE), 1)) < n_true
            mx = jnp.maximum(mx, jnp.where(vm, zc, -jnp.inf))
            mn = jnp.minimum(mn, jnp.where(vm, zc, jnp.inf))
        else:
            mx = jnp.maximum(mx, zc)
            mn = jnp.minimum(mn, zc)
    ss3_ref[...] = ss
    a2s_ref[...] = a2s
    mx_ref[...] = mx
    mn_ref[...] = mn


def fc_head_kernel(mx_ref, mn_ref, sc3_ref, sh3_ref,
                   fw1_ref, g4_ref, be4_ref,
                   fw2_ref, g5_ref, be5_ref,
                   fw3_ref, fb3_ref, iden_ref, out_ref):
    """Finish BN3+ReLU+maxpool, then fc1/bn4/relu, fc2/bn5/relu, fc3 + identity."""
    sc3 = sc3_ref[...]
    # max_n relu(a*z + b) = relu(a*max_n z + b) if a >= 0 else relu(a*min_n z + b)
    g = jnp.maximum(jnp.where(sc3 >= 0.0, mx_ref[...], mn_ref[...]) * sc3
                    + sh3_ref[...], 0.0)                       # (B, C3) f32

    def bn_relu(z, gamma, beta):
        # training-mode BatchNorm1d over the batch axis, affine folded into one FMA
        mu = jnp.mean(z, axis=0, keepdims=True)
        zc = z - mu
        var = jnp.mean(zc * zc, axis=0, keepdims=True)
        scale = gamma * lax.rsqrt(var + EPS)
        shift = beta - mu * scale
        return jnp.maximum(z * scale + shift, 0.0)

    f = jnp.dot(g.astype(jnp.bfloat16), fw1_ref[...],
                preferred_element_type=jnp.float32)            # fb1 dropped (pre-BN)
    f = bn_relu(f, g4_ref[...], be4_ref[...])
    f = jnp.dot(f.astype(jnp.bfloat16), fw2_ref[...],
                preferred_element_type=jnp.float32)            # fb2 dropped (pre-BN)
    f = bn_relu(f, g5_ref[...], be5_ref[...])
    out = jnp.dot(f.astype(jnp.bfloat16), fw3_ref[...],
                  preferred_element_type=jnp.float32)
    out_ref[...] = out + fb3_ref[...] + iden_ref[...]


# ---------------------------------------------------------------------------
# wrapper
# ---------------------------------------------------------------------------
def _pick_tile(n_padded, cap):
    for t in (2048, 1024, 512, 256, 128):
        if t <= cap and n_padded % t == 0:
            return t
    return 128


def _bn_fold(z_sum, ssq, gamma, beta, count):
    """(total sum of z, lane/batch-split sum of z^2) -> per-channel (scale, shift)."""
    mu = z_sum / count
    var = jnp.maximum(jnp.sum(ssq, axis=(0, 2)) / count - mu * mu, 0.0)  # biased var
    scale = gamma * lax.rsqrt(var + EPS)
    shift = beta - mu * scale
    return scale.reshape(-1, 1), shift.reshape(-1, 1)


def stnkd_forward(x, p):
    """x: (B, k, N) float32, PyTorch Conv1d NCL layout."""
    B, k, N = x.shape
    kk = k * k
    n_pad = ((N + LANE - 1) // LANE) * LANE     # pad ragged N up to a lane multiple
    has_pad = n_pad != N
    count = float(B * N)

    # x is re-read by all three conv passes -> pre-cast to bf16 once.
    x_bf = x.astype(jnp.bfloat16)
    if has_pad:
        x_bf = jnp.pad(x_bf, ((0, 0), (0, 0), (0, n_pad - N)))

    tile12 = _pick_tile(n_pad, 2048)   # conv1/conv2 passes are HBM-bound: large tiles
    tile3 = _pick_tile(n_pad, 512)     # conv3 pass: keep f32 (1024, tile) temp small (v7x VMEM)
    nt12, nt3 = n_pad // tile12, n_pad // tile3

    pa = pltpu.CompilerParams(dimension_semantics=("parallel", "arbitrary"))
    # TODO(synk): if B == 1 on v7x, add a parallel output-channel block axis so both
    # TensorCores get work; with B >= 2 the leading parallel batch axis covers it.

    w1 = p["c1_w"].astype(jnp.bfloat16)
    w2 = p["c2_w"].astype(jnp.bfloat16)
    w3 = p["c3_w"].astype(jnp.bfloat16)
    w1_r = w1.astype(jnp.float32)   # bf16-rounded weights for the mean folds so the
    w2_r = w2.astype(jnp.float32)   # linearity-derived means match the kernel's z
    w3_r = w3.astype(jnp.float32)

    # ---- pass 1: conv1 / BN1 statistics (z1 never written to HBM) -----------
    ss1 = pl.pallas_call(
        partial(conv1_stats_kernel, nchunks=tile12 // LANE),
        grid=(B, nt12),
        in_specs=[
            pl.BlockSpec((None, k, tile12), lambda b, t: (b, 0, t)),
            pl.BlockSpec((C1, k), lambda b, t: (0, 0)),
        ],
        out_specs=pl.BlockSpec((None, C1, LANE), lambda b, t: (b, 0, 0)),
        out_shape=jax.ShapeDtypeStruct((B, C1, LANE), jnp.float32),
        compiler_params=pa,
    )(x_bf, w1)
    s1 = w1_r @ jnp.sum(x_bf.astype(jnp.float32), axis=(0, 2))   # sum_n z1 via linearity
    sc1, sh1 = _bn_fold(s1, ss1, p["c1_g"], p["c1_be"], count)

    # ---- pass 2: conv2 / BN2 statistics (conv1 recomputed from x) -----------
    ss2, a1s = pl.pallas_call(
        partial(conv2_stats_kernel, nchunks=tile12 // LANE, tile_n=tile12,
                n_true=N, has_pad=has_pad),
        grid=(B, nt12),
        in_specs=[
            pl.BlockSpec((None, k, tile12), lambda b, t: (b, 0, t)),
            pl.BlockSpec((C1, 1), lambda b, t: (0, 0)),
            pl.BlockSpec((C1, 1), lambda b, t: (0, 0)),
            pl.BlockSpec((C1, k), lambda b, t: (0, 0)),
            pl.BlockSpec((C2, C1), lambda b, t: (0, 0)),
        ],
        out_specs=(
            pl.BlockSpec((None, C2, LANE), lambda b, t: (b, 0, 0)),
            pl.BlockSpec((None, C1, LANE), lambda b, t: (b, 0, 0)),
        ),
        out_shape=(
            jax.ShapeDtypeStruct((B, C2, LANE), jnp.float32),
            jax.ShapeDtypeStruct((B, C1, LANE), jnp.float32),
        ),
        compiler_params=pa,
    )(x_bf, sc1, sh1, w1, w2)
    s2 = w2_r @ jnp.sum(a1s, axis=(0, 2))                        # sum_n z2 via linearity
    sc2, sh2 = _bn_fold(s2, ss2, p["c2_g"], p["c2_be"], count)

    # ---- pass 3: conv3 stats + running max/min (conv1+conv2 recomputed) -----
    ss3, a2s, zmx, zmn = pl.pallas_call(
        partial(conv3_stats_kernel, nchunks=tile3 // LANE, tile_n=tile3,
                n_true=N, has_pad=has_pad),
        grid=(B, nt3),
        in_specs=[
            pl.BlockSpec((None, k, tile3), lambda b, t: (b, 0, t)),
            pl.BlockSpec((C1, 1), lambda b, t: (0, 0)),
            pl.BlockSpec((C1, 1), lambda b, t: (0, 0)),
            pl.BlockSpec((C2, 1), lambda b, t: (0, 0)),
            pl.BlockSpec((C2, 1), lambda b, t: (0, 0)),
            pl.BlockSpec((C1, k), lambda b, t: (0, 0)),
            pl.BlockSpec((C2, C1), lambda b, t: (0, 0)),
            pl.BlockSpec((C3, C2), lambda b, t: (0, 0)),
        ],
        out_specs=(
            pl.BlockSpec((None, C3, LANE), lambda b, t: (b, 0, 0)),
            pl.BlockSpec((None, C2, LANE), lambda b, t: (b, 0, 0)),
            pl.BlockSpec((None, C3, LANE), lambda b, t: (b, 0, 0)),
            pl.BlockSpec((None, C3, LANE), lambda b, t: (b, 0, 0)),
        ),
        out_shape=(
            jax.ShapeDtypeStruct((B, C3, LANE), jnp.float32),
            jax.ShapeDtypeStruct((B, C2, LANE), jnp.float32),
            jax.ShapeDtypeStruct((B, C3, LANE), jnp.float32),
            jax.ShapeDtypeStruct((B, C3, LANE), jnp.float32),
        ),
        compiler_params=pa,
    )(x_bf, sc1, sh1, sc2, sh2, w1, w2, w3)
    s3 = w3_r @ jnp.sum(a2s, axis=(0, 2))                        # sum_n z3 via linearity
    sc3, sh3 = _bn_fold(s3, ss3, p["c3_g"], p["c3_be"], count)

    gmax = jnp.max(zmx, axis=2)   # (B, C3) per-(batch, channel) max of raw conv3 output
    gmin = jnp.min(zmn, axis=2)

    # ---- pass 4: BN3+ReLU+maxpool finish + FC head (tiny) -------------------
    fw1 = p["f1_w"].astype(jnp.bfloat16)
    fw2 = p["f2_w"].astype(jnp.bfloat16)
    fw3 = p["f3_w"].astype(jnp.bfloat16)
    fc_args = (gmax, gmin, sc3.reshape(1, C3), sh3.reshape(1, C3),
               fw1, p["f1_g"], p["f1_be"],
               fw2, p["f2_g"], p["f2_be"],
               fw3, p["f3_b"], p["iden"])
    out = pl.pallas_call(
        fc_head_kernel,
        grid=(1,),
        in_specs=[pl.BlockSpec(a.shape, lambda i: (0, 0)) for a in fc_args],
        out_specs=pl.BlockSpec((B, kk), lambda i: (0, 0)),
        out_shape=jax.ShapeDtypeStruct((B, kk), jnp.float32),
        compiler_params=pltpu.CompilerParams(dimension_semantics=("arbitrary",)),
    )(*fc_args)
    return out.reshape(B, k, k)


# ---------------------------------------------------------------------------
# synthetic parameters + pure-JAX reference (mirrors the PyTorch forward)
# ---------------------------------------------------------------------------
def init_params(key, k=K_DIM):
    keys = iter(jax.random.split(key, 32))

    def uni(shape, fan_in):
        b = 1.0 / (fan_in ** 0.5)
        return jax.random.uniform(next(keys), shape, jnp.float32, -b, b)

    p = {}
    for name, (cin, cout) in (("c1", (k, C1)), ("c2", (C1, C2)), ("c3", (C2, C3))):
        p[f"{name}_w"] = uni((cout, cin), cin)                   # Conv1d weight (out, in)
        p[f"{name}_b"] = uni((cout,), cin)                       # cancelled by BN in kernel
        p[f"{name}_g"] = 1.0 + 0.1 * jax.random.normal(next(keys), (cout,), jnp.float32)
        p[f"{name}_be"] = 0.1 * jax.random.normal(next(keys), (cout,), jnp.float32)
    for name, (cin, cout), bn in (("f1", (C3, 512), True),
                                  ("f2", (512, 256), True),
                                  ("f3", (256, k * k), False)):
        p[f"{name}_w"] = uni((cin, cout), cin)                   # Linear weight, (in, out)
        p[f"{name}_b"] = uni((1, cout), cin)
        if bn:
            p[f"{name}_g"] = 1.0 + 0.1 * jax.random.normal(next(keys), (1, cout), jnp.float32)
            p[f"{name}_be"] = 0.1 * jax.random.normal(next(keys), (1, cout), jnp.float32)
    p["iden"] = jnp.eye(k, dtype=jnp.float32).reshape(1, k * k)
    return p


def reference_forward(x, p, matmul_dtype=jnp.float32):
    """Pure-JAX mirror of the PyTorch forward (training-mode BatchNorm1d).

    matmul_dtype=jnp.bfloat16 models the kernel's MXU quantization (bf16 operands,
    f32 accumulation); jnp.float32 gives the exact PyTorch-semantics reference.
    """
    B, k, N = x.shape
    hi = lax.Precision.HIGHEST

    def q(a):
        return a.astype(matmul_dtype).astype(jnp.float32)

    def bn_relu(z, g, be, axes):
        mu = jnp.mean(z, axis=axes, keepdims=True)
        var = jnp.mean((z - mu) ** 2, axis=axes, keepdims=True)
        return jnp.maximum((z - mu) / jnp.sqrt(var + EPS) * g + be, 0.0)

    h = jnp.einsum('oc,bcn->bon', q(p["c1_w"]), q(x), precision=hi) + p["c1_b"][None, :, None]
    h = bn_relu(h, p["c1_g"][None, :, None], p["c1_be"][None, :, None], (0, 2))
    h = jnp.einsum('oc,bcn->bon', q(p["c2_w"]), q(h), precision=hi) + p["c2_b"][None, :, None]
    h = bn_relu(h, p["c2_g"][None, :, None], p["c2_be"][None, :, None], (0, 2))
    h = jnp.einsum('oc,bcn->bon', q(p["c3_w"]), q(h), precision=hi) + p["c3_b"][None, :, None]
    h = bn_relu(h, p["c3_g"][None, :, None], p["c3_be"][None, :, None], (0, 2))
    g = jnp.max(h, axis=2)                                       # (B, 1024)
    f = jnp.einsum('bi,io->bo', q(g), q(p["f1_w"]), precision=hi) + p["f1_b"]
    f = bn_relu(f, p["f1_g"], p["f1_be"], (0,))
    f = jnp.einsum('bi,io->bo', q(f), q(p["f2_w"]), precision=hi) + p["f2_b"]
    f = bn_relu(f, p["f2_g"], p["f2_be"], (0,))
    out = jnp.einsum('bi,io->bo', q(f), q(p["f3_w"]), precision=hi) + p["f3_b"] + p["iden"]
    return out.reshape(B, k, k)


if __name__ == "__main__":
    key = jax.random.PRNGKey(0)
    k_params, k_x = jax.random.split(key)
    params = init_params(k_params, K_DIM)

    B, N = 4, 300    # ragged N: exercises the pad-to-lane + masking path (pads to 384)
    x = jax.random.normal(k_x, (B, K_DIM, N), dtype=jnp.float32)  # PyTorch NCL layout

    fwd = jax.jit(stnkd_forward)
    out = jax.block_until_ready(fwd(x, params))
    assert out.shape == (B, K_DIM, K_DIM), out.shape
    assert bool(jnp.all(jnp.isfinite(out))), "non-finite output"

    # (a) tight check vs. a reference that quantizes matmul operands exactly like the
    #     kernel (bf16 in, f32 accumulate) -> validates kernel logic / tiling / masking.
    ref_q = reference_forward(x, params, matmul_dtype=jnp.bfloat16)
    err_q = float(jnp.max(jnp.abs(out - ref_q)))
    # (b) sanity check vs. the pure-f32 PyTorch-semantics reference; training-mode BN
    #     over a small batch amplifies bf16 rounding, so the mean is the robust metric.
    ref_f = reference_forward(x, params, matmul_dtype=jnp.float32)
    err_f = float(jnp.mean(jnp.abs(out - ref_f)))

    assert err_q < 5e-2, f"max |out - bf16-matched ref| = {err_q}"
    assert err_f < 5e-2, f"mean |out - f32 ref| = {err_f}"
    print("KERNEL_OK")
</pallas_src>

<mosaic_0001>
module attributes {stable_mosaic.version = 11 : i64} {
  func.func @conv1_stats_kernel(%arg0: i32, %arg1: i32, %arg2: memref<1x19x128xbf16, #tpu.memory_space<vmem>>, %arg3: memref<64x19xbf16, #tpu.memory_space<vmem>>, %arg4: memref<1x64x128xf32, #tpu.memory_space<vmem>>) attributes {dimension_semantics = [#tpu.dimension_semantics<parallel>, #tpu.dimension_semantics<arbitrary>], iteration_bounds = array<i64: 4, 3>, scalar_prefetch = 0 : i64, scratch_operands = 0 : i64, tpu.core_type = #tpu.core_type<tc>, window_params = [{transform_indices = @transform_0, window_bounds = array<i64: 1, 19, 128>}, {pipeline_mode = #tpu.pipeline_mode<synchronous>, transform_indices = @transform_1, window_bounds = array<i64: 64, 19>}, {transform_indices = @transform_2, window_bounds = array<i64: 1, 64, 128>}]} {
    %c0 = arith.constant 0 : index
    %c0_0 = arith.constant 0 : index
    %0 = vector.load %arg3[%c0, %c0_0] : memref<64x19xbf16, #tpu.memory_space<vmem>>, vector<64x19xbf16>
    %c0_1 = arith.constant 0 : index
    %c0_2 = arith.constant 0 : index
    %c0_3 = arith.constant 0 : index
    %1 = vector.load %arg2[%c0_1, %c0_2, %c0_3] : memref<1x19x128xbf16, #tpu.memory_space<vmem>>, vector<1x19x128xbf16>
    %2 = vector.shape_cast %1 : vector<1x19x128xbf16> to vector<19x128xbf16>
    %cst = arith.constant dense<0.000000e+00> : vector<64x128xf32>
    %3 = tpu.matmul %0, %2, %cst {dimension_numbers = #tpu.dot_dimension_numbers<[1], [0], [0], [1], [0, 0, 1, 1], [], []>} : vector<64x19xbf16>, vector<19x128xbf16>, vector<64x128xf32> -> vector<64x128xf32>
    %c0_i32 = arith.constant 0 : i32
    %4 = arith.cmpi eq, %arg1, %c0_i32 : i32
    %5 = arith.extui %4 : i1 to i32
    %c0_i32_4 = arith.constant 0 : i32
    %6 = arith.cmpi ne, %5, %c0_i32_4 : i32
    scf.if %6 {
      %cst_11 = arith.constant 0.000000e+00 : f32
      %14 = vector.broadcast %cst_11 : f32 to vector<64x128xf32>
      %c0_12 = arith.constant 0 : index
      %c0_13 = arith.constant 0 : index
      %c0_14 = arith.constant 0 : index
      %15 = vector.load %arg4[%c0_12, %c0_13, %c0_14] : memref<1x64x128xf32, #tpu.memory_space<vmem>>, vector<1x64x128xf32>
      %16 = vector.shape_cast %15 : vector<1x64x128xf32> to vector<64x128xf32>
      %17 = vector.shape_cast %14 : vector<64x128xf32> to vector<1x64x128xf32>
      tpu.vector_store %arg4[%c0_12, %c0_13, %c0_14], %17 {strides = array<i32>} : memref<1x64x128xf32, #tpu.memory_space<vmem>>, vector<1x64x128xf32>,
    } else {
    }
    %c0_5 = arith.constant 0 : index
    %c0_6 = arith.constant 0 : index
    %c0_7 = arith.constant 0 : index
    %7 = vector.load %arg4[%c0_5, %c0_6, %c0_7] : memref<1x64x128xf32, #tpu.memory_space<vmem>>, vector<1x64x128xf32>
    %8 = vector.shape_cast %7 : vector<1x64x128xf32> to vector<64x128xf32>
    %9 = arith.mulf %3, %3 : vector<64x128xf32>
    %10 = arith.addf %8, %9 : vector<64x128xf32>
    %c0_8 = arith.constant 0 : index
    %c0_9 = arith.constant 0 : index
    %c0_10 = arith.constant 0 : index
    %11 = vector.load %arg4[%c0_8, %c0_9, %c0_10] : memref<1x64x128xf32, #tpu.memory_space<vmem>>, vector<1x64x128xf32>
    %12 = vector.shape_cast %11 : vector<1x64x128xf32> to vector<64x128xf32>
    %13 = vector.shape_cast %10 : vector<64x128xf32> to vector<1x64x128xf32>
    tpu.vector_store %arg4[%c0_8, %c0_9, %c0_10], %13 {strides = array<i32>} : memref<1x64x128xf32, #tpu.memory_space<vmem>>, vector<1x64x128xf32>,
    return
  }
  func.func @transform_0(%arg0: i32, %arg1: i32) -> (i32, i32, i32) {
    %c0_i32 = arith.constant 0 : i32
    %c0_i32_0 = arith.constant 0 : i32
    return %arg0, %c0_i32, %arg1 : i32, i32, i32
  }
  func.func @transform_1(%arg0: i32, %arg1: i32) -> (i32, i32) {
    %c0_i32 = arith.constant 0 : i32
    %c0_i32_0 = arith.constant 0 : i32
    %c0_i32_1 = arith.constant 0 : i32
    return %c0_i32, %c0_i32_0 : i32, i32
  }
  func.func @transform_2(%arg0: i32, %arg1: i32) -> (i32, i32, i32) {
    %c0_i32 = arith.constant 0 : i32
    %c0_i32_0 = arith.constant 0 : i32
    %c0_i32_1 = arith.constant 0 : i32
    return %arg0, %c0_i32, %c0_i32_0 : i32, i32, i32
  }
}

module attributes {stable_mosaic.version = 11 : i64} {
  func.func @conv2_stats_kernel(%arg0: i32, %arg1: i32, %arg2: memref<1x19x128xbf16, #tpu.memory_space<vmem>>, %arg3: memref<64x1xf32, #tpu.memory_space<vmem>>, %arg4: memref<64x1xf32, #tpu.memory_space<vmem>>, %arg5: memref<64x19xbf16, #tpu.memory_space<vmem>>, %arg6: memref<128x64xbf16, #tpu.memory_space<vmem>>, %arg7: memref<1x128x128xf32, #tpu.memory_space<vmem>>, %arg8: memref<1x64x128xf32, #tpu.memory_space<vmem>>) attributes {dimension_semantics = [#tpu.dimension_semantics<parallel>, #tpu.dimension_semantics<arbitrary>], iteration_bounds = array<i64: 4, 3>, scalar_prefetch = 0 : i64, scratch_operands = 0 : i64, tpu.core_type = #tpu.core_type<tc>, window_params = [{transform_indices = @transform_0, window_bounds = array<i64: 1, 19, 128>}, {pipeline_mode = #tpu.pipeline_mode<synchronous>, transform_indices = @transform_1, window_bounds = array<i64: 64, 1>}, {pipeline_mode = #tpu.pipeline_mode<synchronous>, transform_indices = @transform_2, window_bounds = array<i64: 64, 1>}, {pipeline_mode = #tpu.pipeline_mode<synchronous>, transform_indices = @transform_3, window_bounds = array<i64: 64, 19>}, {pipeline_mode = #tpu.pipeline_mode<synchronous>, transform_indices = @transform_4, window_bounds = array<i64: 128, 64>}, {transform_indices = @transform_5, window_bounds = array<i64: 1, 128, 128>}, {transform_indices = @transform_6, window_bounds = array<i64: 1, 64, 128>}]} {
    %c0 = arith.constant 0 : index
    %c0_0 = arith.constant 0 : index
    %0 = vector.load %arg5[%c0, %c0_0] : memref<64x19xbf16, #tpu.memory_space<vmem>>, vector<64x19xbf16>
    %c0_1 = arith.constant 0 : index
    %c0_2 = arith.constant 0 : index
    %c0_3 = arith.constant 0 : index
    %1 = vector.load %arg2[%c0_1, %c0_2, %c0_3] : memref<1x19x128xbf16, #tpu.memory_space<vmem>>, vector<1x19x128xbf16>
    %2 = vector.shape_cast %1 : vector<1x19x128xbf16> to vector<19x128xbf16>
    %cst = arith.constant dense<0.000000e+00> : vector<64x128xf32>
    %3 = tpu.matmul %0, %2, %cst {dimension_numbers = #tpu.dot_dimension_numbers<[1], [0], [0], [1], [0, 0, 1, 1], [], []>} : vector<64x19xbf16>, vector<19x128xbf16>, vector<64x128xf32> -> vector<64x128xf32>
    %c0_4 = arith.constant 0 : index
    %c0_5 = arith.constant 0 : index
    %4 = vector.load %arg3[%c0_4, %c0_5] : memref<64x1xf32, #tpu.memory_space<vmem>>, vector<64x1xf32>
    %5 = vector.broadcast %4 : vector<64x1xf32> to vector<64x128xf32>
    %6 = arith.mulf %3, %5 : vector<64x128xf32>
    %c0_6 = arith.constant 0 : index
    %c0_7 = arith.constant 0 : index
    %7 = vector.load %arg4[%c0_6, %c0_7] : memref<64x1xf32, #tpu.memory_space<vmem>>, vector<64x1xf32>
    %8 = vector.broadcast %7 : vector<64x1xf32> to vector<64x128xf32>
    %9 = arith.addf %6, %8 : vector<64x128xf32>
    %cst_8 = arith.constant 0.000000e+00 : f32
    %10 = vector.broadcast %cst_8 : f32 to vector<64x128xf32>
    %11 = arith.maximumf %9, %10 : vector<64x128xf32>
    %c128_i32 = arith.constant 128 : i32
    %12 = arith.muli %arg1, %c128_i32 : i32
    %13 = tpu.iota {dimensions = array<i32: 1>} : vector<1x128xi32>
    %14 = vector.broadcast %12 : i32 to vector<1x128xi32>
    %15 = arith.addi %14, %13 : vector<1x128xi32>
    %c300_i32 = arith.constant 300 : i32
    %16 = vector.broadcast %c300_i32 : i32 to vector<1x128xi32>
    %17 = arith.cmpi slt, %15, %16 : vector<1x128xi32>
    %cst_9 = arith.constant 0.000000e+00 : f32
    %18 = vector.shape_cast %17 : vector<1x128xi1> to vector<1x128xi1>
    %19 = vector.broadcast %18 : vector<1x128xi1> to vector<64x128xi1>
    %20 = vector.broadcast %cst_9 : f32 to vector<64x128xf32>
    %21 = arith.select %19, %11, %20 : vector<64x128xi1>, vector<64x128xf32>
    %22 = arith.truncf %21 : vector<64x128xf32> to vector<64x128xbf16>
    %c0_10 = arith.constant 0 : index
    %c0_11 = arith.constant 0 : index
    %23 = vector.load %arg6[%c0_10, %c0_11] : memref<128x64xbf16, #tpu.memory_space<vmem>>, vector<128x64xbf16>
    %cst_12 = arith.constant dense<0.000000e+00> : vector<128x128xf32>
    %24 = tpu.matmul %23, %22, %cst_12 {dimension_numbers = #tpu.dot_dimension_numbers<[1], [0], [0], [1], [0, 0, 1, 1], [], []>} : vector<128x64xbf16>, vector<64x128xbf16>, vector<128x128xf32> -> vector<128x128xf32>
    %c0_i32 = arith.constant 0 : i32
    %25 = arith.cmpi eq, %arg1, %c0_i32 : i32
    %26 = arith.extui %25 : i1 to i32
    %c0_i32_13 = arith.constant 0 : i32
    %27 = arith.cmpi ne, %26, %c0_i32_13 : i32
    scf.if %27 {
      %cst_26 = arith.constant 0.000000e+00 : f32
      %42 = vector.broadcast %cst_26 : f32 to vector<128x128xf32>
      %c0_27 = arith.constant 0 : index
      %c0_28 = arith.constant 0 : index
      %c0_29 = arith.constant 0 : index
      %43 = vector.load %arg7[%c0_27, %c0_28, %c0_29] : memref<1x128x128xf32, #tpu.memory_space<vmem>>, vector<1x128x128xf32>
      %44 = vector.shape_cast %43 : vector<1x128x128xf32> to vector<128x128xf32>
      %45 = vector.shape_cast %42 : vector<128x128xf32> to vector<1x128x128xf32>
      tpu.vector_store %arg7[%c0_27, %c0_28, %c0_29], %45 {strides = array<i32>} : memref<1x128x128xf32, #tpu.memory_space<vmem>>, vector<1x128x128xf32>,
      %cst_30 = arith.constant 0.000000e+00 : f32
      %46 = vector.broadcast %cst_30 : f32 to vector<64x128xf32>
      %c0_31 = arith.constant 0 : index
      %c0_32 = arith.constant 0 : index
      %c0_33 = arith.constant 0 : index
      %47 = vector.load %arg8[%c0_31, %c0_32, %c0_33] : memref<1x64x128xf32, #tpu.memory_space<vmem>>, vector<1x64x128xf32>
      %48 = vector.shape_cast %47 : vector<1x64x128xf32> to vector<64x128xf32>
      %49 = vector.shape_cast %46 : vector<64x128xf32> to vector<1x64x128xf32>
      tpu.vector_store %arg8[%c0_31, %c0_32, %c0_33], %49 {strides = array<i32>} : memref<1x64x128xf32, #tpu.memory_space<vmem>>, vector<1x64x128xf32>,
    } else {
    }
    %c0_14 = arith.constant 0 : index
    %c0_15 = arith.constant 0 : index
    %c0_16 = arith.constant 0 : index
    %28 = vector.load %arg7[%c0_14, %c0_15, %c0_16] : memref<1x128x128xf32, #tpu.memory_space<vmem>>, vector<1x128x128xf32>
    %29 = vector.shape_cast %28 : vector<1x128x128xf32> to vector<128x128xf32>
    %c0_17 = arith.constant 0 : index
    %c0_18 = arith.constant 0 : index
    %c0_19 = arith.constant 0 : index
    %30 = vector.load %arg8[%c0_17, %c0_18, %c0_19] : memref<1x64x128xf32, #tpu.memory_space<vmem>>, vector<1x64x128xf32>
    %31 = vector.shape_cast %30 : vector<1x64x128xf32> to vector<64x128xf32>
    %32 = arith.extf %22 : vector<64x128xbf16> to vector<64x128xf32>
    %33 = arith.mulf %24, %24 : vector<128x128xf32>
    %34 = arith.addf %29, %33 : vector<128x128xf32>
    %35 = arith.addf %31, %32 : vector<64x128xf32>
    %c0_20 = arith.constant 0 : index
    %c0_21 = arith.constant 0 : index
    %c0_22 = arith.constant 0 : index
    %36 = vector.load %arg7[%c0_20, %c0_21, %c0_22] : memref<1x128x128xf32, #tpu.memory_space<vmem>>, vector<1x128x128xf32>
    %37 = vector.shape_cast %36 : vector<1x128x128xf32> to vector<128x128xf32>
    %38 = vector.shape_cast %34 : vector<128x128xf32> to vector<1x128x128xf32>
    tpu.vector_store %arg7[%c0_20, %c0_21, %c0_22], %38 {strides = array<i32>} : memref<1x128x128xf32, #tpu.memory_space<vmem>>, vector<1x128x128xf32>,
    %c0_23 = arith.constant 0 : index
    %c0_24 = arith.constant 0 : index
    %c0_25 = arith.constant 0 : index
    %39 = vector.load %arg8[%c0_23, %c0_24, %c0_25] : memref<1x64x128xf32, #tpu.memory_space<vmem>>, vector<1x64x128xf32>
    %40 = vector.shape_cast %39 : vector<1x64x128xf32> to vector<64x128xf32>
    %41 = vector.shape_cast %35 : vector<64x128xf32> to vector<1x64x128xf32>
    tpu.vector_store %arg8[%c0_23, %c0_24, %c0_25], %41 {strides = array<i32>} : memref<1x64x128xf32, #tpu.memory_space<vmem>>, vector<1x64x128xf32>,
    return
  }
  func.func @transform_0(%arg0: i32, %arg1: i32) -> (i32, i32, i32) {
    %c0_i32 = arith.constant 0 : i32
    %c0_i32_0 = arith.constant 0 : i32
    return %arg0, %c0_i32, %arg1 : i32, i32, i32
  }
  func.func @transform_1(%arg0: i32, %arg1: i32) -> (i32, i32) {
    %c0_i32 = arith.constant 0 : i32
    %c0_i32_0 = arith.constant 0 : i32
    %c0_i32_1 = arith.constant 0 : i32
    return %c0_i32, %c0_i32_0 : i32, i32
  }
  func.func @transform_2(%arg0: i32, %arg1: i32) -> (i32, i32) {
    %c0_i32 = arith.constant 0 : i32
    %c0_i32_0 = arith.constant 0 : i32
    %c0_i32_1 = arith.constant 0 : i32
    return %c0_i32, %c0_i32_0 : i32, i32
  }
  func.func @transform_3(%arg0: i32, %arg1: i32) -> (i32, i32) {
    %c0_i32 = arith.constant 0 : i32
    %c0_i32_0 = arith.constant 0 : i32
    %c0_i32_1 = arith.constant 0 : i32
    return %c0_i32, %c0_i32_0 : i32, i32
  }
  func.func @transform_4(%arg0: i32, %arg1: i32) -> (i32, i32) {
    %c0_i32 = arith.constant 0 : i32
    %c0_i32_0 = arith.constant 0 : i32
    %c0_i32_1 = arith.constant 0 : i32
    return %c0_i32, %c0_i32_0 : i32, i32
  }
  func.func @transform_5(%arg0: i32, %arg1: i32) -> (i32, i32, i32) {
    %c0_i32 = arith.constant 0 : i32
    %c0_i32_0 = arith.constant 0 : i32
    %c0_i32_1 = arith.constant 0 : i32
    return %arg0, %c0_i32, %c0_i32_0 : i32, i32, i32
  }
  func.func @transform_6(%arg0: i32, %arg1: i32) -> (i32, i32, i32) {
    %c0_i32 = arith.constant 0 : i32
    %c0_i32_0 = arith.constant 0 : i32
    %c0_i32_1 = arith.constant 0 : i32
    return %arg0, %c0_i32, %c0_i32_0 : i32, i32, i32
  }
}

module attributes {stable_mosaic.version = 11 : i64} {
  func.func @conv3_stats_kernel(%arg0: i32, %arg1: i32, %arg2: memref<1x19x128xbf16, #tpu.memory_space<vmem>>, %arg3: memref<64x1xf32, #tpu.memory_space<vmem>>, %arg4: memref<64x1xf32, #tpu.memory_space<vmem>>, %arg5: memref<128x1xf32, #tpu.memory_space<vmem>>, %arg6: memref<128x1xf32, #tpu.memory_space<vmem>>, %arg7: memref<64x19xbf16, #tpu.memory_space<vmem>>, %arg8: memref<128x64xbf16, #tpu.memory_space<vmem>>, %arg9: memref<1024x128xbf16, #tpu.memory_space<vmem>>, %arg10: memref<1x1024x128xf32, #tpu.memory_space<vmem>>, %arg11: memref<1x128x128xf32, #tpu.memory_space<vmem>>, %arg12: memref<1x1024x128xf32, #tpu.memory_space<vmem>>, %arg13: memref<1x1024x128xf32, #tpu.memory_space<vmem>>) attributes {dimension_semantics = [#tpu.dimension_semantics<parallel>, #tpu.dimension_semantics<arbitrary>], iteration_bounds = array<i64: 4, 3>, scalar_prefetch = 0 : i64, scratch_operands = 0 : i64, tpu.core_type = #tpu.core_type<tc>, window_params = [{transform_indices = @transform_0, window_bounds = array<i64: 1, 19, 128>}, {pipeline_mode = #tpu.pipeline_mode<synchronous>, transform_indices = @transform_1, window_bounds = array<i64: 64, 1>}, {pipeline_mode = #tpu.pipeline_mode<synchronous>, transform_indices = @transform_2, window_bounds = array<i64: 64, 1>}, {pipeline_mode = #tpu.pipeline_mode<synchronous>, transform_indices = @transform_3, window_bounds = array<i64: 128, 1>}, {pipeline_mode = #tpu.pipeline_mode<synchronous>, transform_indices = @transform_4, window_bounds = array<i64: 128, 1>}, {pipeline_mode = #tpu.pipeline_mode<synchronous>, transform_indices = @transform_5, window_bounds = array<i64: 64, 19>}, {pipeline_mode = #tpu.pipeline_mode<synchronous>, transform_indices = @transform_6, window_bounds = array<i64: 128, 64>}, {pipeline_mode = #tpu.pipeline_mode<synchronous>, transform_indices = @transform_7, window_bounds = array<i64: 1024, 128>}, {transform_indices = @transform_8, window_bounds = array<i64: 1, 1024, 128>}, {transform_indices = @transform_9, window_bounds = array<i64: 1, 128, 128>}, {transform_indices = @transform_10, window_bounds = array<i64: 1, 1024, 128>}, {transform_indices = @transform_11, window_bounds = array<i64: 1, 1024, 128>}]} {
    %c0 = arith.constant 0 : index
    %c0_0 = arith.constant 0 : index
    %0 = vector.load %arg7[%c0, %c0_0] : memref<64x19xbf16, #tpu.memory_space<vmem>>, vector<64x19xbf16>
    %c0_1 = arith.constant 0 : index
    %c0_2 = arith.constant 0 : index
    %c0_3 = arith.constant 0 : index
    %1 = vector.load %arg2[%c0_1, %c0_2, %c0_3] : memref<1x19x128xbf16, #tpu.memory_space<vmem>>, vector<1x19x128xbf16>
    %2 = vector.shape_cast %1 : vector<1x19x128xbf16> to vector<19x128xbf16>
    %cst = arith.constant dense<0.000000e+00> : vector<64x128xf32>
    %3 = tpu.matmul %0, %2, %cst {dimension_numbers = #tpu.dot_dimension_numbers<[1], [0], [0], [1], [0, 0, 1, 1], [], []>} : vector<64x19xbf16>, vector<19x128xbf16>, vector<64x128xf32> -> vector<64x128xf32>
    %c0_4 = arith.constant 0 : index
    %c0_5 = arith.constant 0 : index
    %4 = vector.load %arg3[%c0_4, %c0_5] : memref<64x1xf32, #tpu.memory_space<vmem>>, vector<64x1xf32>
    %5 = vector.broadcast %4 : vector<64x1xf32> to vector<64x128xf32>
    %6 = arith.mulf %3, %5 : vector<64x128xf32>
    %c0_6 = arith.constant 0 : index
    %c0_7 = arith.constant 0 : index
    %7 = vector.load %arg4[%c0_6, %c0_7] : memref<64x1xf32, #tpu.memory_space<vmem>>, vector<64x1xf32>
    %8 = vector.broadcast %7 : vector<64x1xf32> to vector<64x128xf32>
    %9 = arith.addf %6, %8 : vector<64x128xf32>
    %cst_8 = arith.constant 0.000000e+00 : f32
    %10 = vector.broadcast %cst_8 : f32 to vector<64x128xf32>
    %11 = arith.maximumf %9, %10 : vector<64x128xf32>
    %c0_9 = arith.constant 0 : index
    %c0_10 = arith.constant 0 : index
    %12 = vector.load %arg8[%c0_9, %c0_10] : memref<128x64xbf16, #tpu.memory_space<vmem>>, vector<128x64xbf16>
    %13 = arith.truncf %11 : vector<64x128xf32> to vector<64x128xbf16>
    %cst_11 = arith.constant dense<0.000000e+00> : vector<128x128xf32>
    %14 = tpu.matmul %12, %13, %cst_11 {dimension_numbers = #tpu.dot_dimension_numbers<[1], [0], [0], [1], [0, 0, 1, 1], [], []>} : vector<128x64xbf16>, vector<64x128xbf16>, vector<128x128xf32> -> vector<128x128xf32>
    %c0_12 = arith.constant 0 : index
    %c0_13 = arith.constant 0 : index
    %15 = vector.load %arg5[%c0_12, %c0_13] : memref<128x1xf32, #tpu.memory_space<vmem>>, vector<128x1xf32>
    %16 = vector.broadcast %15 : vector<128x1xf32> to vector<128x128xf32>
    %17 = arith.mulf %14, %16 : vector<128x128xf32>
    %c0_14 = arith.constant 0 : index
    %c0_15 = arith.constant 0 : index
    %18 = vector.load %arg6[%c0_14, %c0_15] : memref<128x1xf32, #tpu.memory_space<vmem>>, vector<128x1xf32>
    %19 = vector.broadcast %18 : vector<128x1xf32> to vector<128x128xf32>
    %20 = arith.addf %17, %19 : vector<128x128xf32>
    %cst_16 = arith.constant 0.000000e+00 : f32
    %21 = vector.broadcast %cst_16 : f32 to vector<128x128xf32>
    %22 = arith.maximumf %20, %21 : vector<128x128xf32>
    %c128_i32 = arith.constant 128 : i32
    %23 = arith.muli %arg1, %c128_i32 : i32
    %24 = tpu.iota {dimensions = array<i32: 1>} : vector<1x128xi32>
    %25 = vector.broadcast %23 : i32 to vector<1x128xi32>
    %26 = arith.addi %25, %24 : vector<1x128xi32>
    %c300_i32 = arith.constant 300 : i32
    %27 = vector.broadcast %c300_i32 : i32 to vector<1x128xi32>
    %28 = arith.cmpi slt, %26, %27 : vector<1x128xi32>
    %cst_17 = arith.constant 0.000000e+00 : f32
    %29 = vector.shape_cast %28 : vector<1x128xi1> to vector<1x128xi1>
    %30 = vector.broadcast %29 : vector<1x128xi1> to vector<128x128xi1>
    %31 = vector.broadcast %cst_17 : f32 to vector<128x128xf32>
    %32 = arith.select %30, %22, %31 : vector<128x128xi1>, vector<128x128xf32>
    %33 = arith.truncf %32 : vector<128x128xf32> to vector<128x128xbf16>
    %c0_18 = arith.constant 0 : index
    %c0_19 = arith.constant 0 : index
    %34 = vector.load %arg9[%c0_18, %c0_19] : memref<1024x128xbf16, #tpu.memory_space<vmem>>, vector<1024x128xbf16>
    %cst_20 = arith.constant dense<0.000000e+00> : vector<1024x128xf32>
    %35 = tpu.matmul %34, %33, %cst_20 {dimension_numbers = #tpu.dot_dimension_numbers<[1], [0], [0], [1], [0, 0, 1, 1], [], []>} : vector<1024x128xbf16>, vector<128x128xbf16>, vector<1024x128xf32> -> vector<1024x128xf32>
    %c0_i32 = arith.constant 0 : i32
    %36 = arith.cmpi eq, %arg1, %c0_i32 : i32
    %37 = arith.extui %36 : i1 to i32
    %c0_i32_21 = arith.constant 0 : i32
    %38 = arith.cmpi ne, %37, %c0_i32_21 : i32
    scf.if %38 {
      %cst_51 = arith.constant 0.000000e+00 : f32
      %80 = vector.broadcast %cst_51 : f32 to vector<1024x128xf32>
      %c0_52 = arith.constant 0 : index
      %c0_53 = arith.constant 0 : index
      %c0_54 = arith.constant 0 : index
      %81 = vector.load %arg10[%c0_52, %c0_53, %c0_54] : memref<1x1024x128xf32, #tpu.memory_space<vmem>>, vector<1x1024x128xf32>
      %82 = vector.shape_cast %81 : vector<1x1024x128xf32> to vector<1024x128xf32>
      %83 = vector.shape_cast %80 : vector<1024x128xf32> to vector<1x1024x128xf32>
      tpu.vector_store %arg10[%c0_52, %c0_53, %c0_54], %83 {strides = array<i32>} : memref<1x1024x128xf32, #tpu.memory_space<vmem>>, vector<1x1024x128xf32>,
      %cst_55 = arith.constant 0.000000e+00 : f32
      %84 = vector.broadcast %cst_55 : f32 to vector<128x128xf32>
      %c0_56 = arith.constant 0 : index
      %c0_57 = arith.constant 0 : index
      %c0_58 = arith.constant 0 : index
      %85 = vector.load %arg11[%c0_56, %c0_57, %c0_58] : memref<1x128x128xf32, #tpu.memory_space<vmem>>, vector<1x128x128xf32>
      %86 = vector.shape_cast %85 : vector<1x128x128xf32> to vector<128x128xf32>
      %87 = vector.shape_cast %84 : vector<128x128xf32> to vector<1x128x128xf32>
      tpu.vector_store %arg11[%c0_56, %c0_57, %c0_58], %87 {strides = array<i32>} : memref<1x128x128xf32, #tpu.memory_space<vmem>>, vector<1x128x128xf32>,
      %cst_59 = arith.constant 0xFF800000 : f32
      %88 = vector.broadcast %cst_59 : f32 to vector<1024x128xf32>
      %c0_60 = arith.constant 0 : index
      %c0_61 = arith.constant 0 : index
      %c0_62 = arith.constant 0 : index
      %89 = vector.load %arg12[%c0_60, %c0_61, %c0_62] : memref<1x1024x128xf32, #tpu.memory_space<vmem>>, vector<1x1024x128xf32>
      %90 = vector.shape_cast %89 : vector<1x1024x128xf32> to vector<1024x128xf32>
      %91 = vector.shape_cast %88 : vector<1024x128xf32> to vector<1x1024x128xf32>
      tpu.vector_store %arg12[%c0_60, %c0_61, %c0_62], %91 {strides = array<i32>} : memref<1x1024x128xf32, #tpu.memory_space<vmem>>, vector<1x1024x128xf32>,
      %cst_63 = arith.constant 0x7F800000 : f32
      %92 = vector.broadcast %cst_63 : f32 to vector<1024x128xf32>
      %c0_64 = arith.constant 0 : index
      %c0_65 = arith.constant 0 : index
      %c0_66 = arith.constant 0 : index
      %93 = vector.load %arg13[%c0_64, %c0_65, %c0_66] : memref<1x1024x128xf32, #tpu.memory_space<vmem>>, vector<1x1024x128xf32>
      %94 = vector.shape_cast %93 : vector<1x1024x128xf32> to vector<1024x128xf32>
      %95 = vector.shape_cast %92 : vector<1024x128xf32> to vector<1x1024x128xf32>
      tpu.vector_store %arg13[%c0_64, %c0_65, %c0_66], %95 {strides = array<i32>} : memref<1x1024x128xf32, #tpu.memory_space<vmem>>, vector<1x1024x128xf32>,
    } else {
    }
    %c0_22 = arith.constant 0 : index
    %c0_23 = arith.constant 0 : index
    %c0_24 = arith.constant 0 : index
    %39 = vector.load %arg10[%c0_22, %c0_23, %c0_24] : memref<1x1024x128xf32, #tpu.memory_space<vmem>>, vector<1x1024x128xf32>
    %40 = vector.shape_cast %39 : vector<1x1024x128xf32> to vector<1024x128xf32>
    %c0_25 = arith.constant 0 : index
    %c0_26 = arith.constant 0 : index
    %c0_27 = arith.constant 0 : index
    %41 = vector.load %arg11[%c0_25, %c0_26, %c0_27] : memref<1x128x128xf32, #tpu.memory_space<vmem>>, vector<1x128x128xf32>
    %42 = vector.shape_cast %41 : vector<1x128x128xf32> to vector<128x128xf32>
    %c0_28 = arith.constant 0 : index
    %c0_29 = arith.constant 0 : index
    %c0_30 = arith.constant 0 : index
    %43 = vector.load %arg12[%c0_28, %c0_29, %c0_30] : memref<1x1024x128xf32, #tpu.memory_space<vmem>>, vector<1x1024x128xf32>
    %44 = vector.shape_cast %43 : vector<1x1024x128xf32> to vector<1024x128xf32>
    %c0_31 = arith.constant 0 : index
    %c0_32 = arith.constant 0 : index
    %c0_33 = arith.constant 0 : index
    %45 = vector.load %arg13[%c0_31, %c0_32, %c0_33] : memref<1x1024x128xf32, #tpu.memory_space<vmem>>, vector<1x1024x128xf32>
    %46 = vector.shape_cast %45 : vector<1x1024x128xf32> to vector<1024x128xf32>
    %47 = arith.extf %33 : vector<128x128xbf16> to vector<128x128xf32>
    %48 = arith.mulf %35, %35 : vector<1024x128xf32>
    %49 = arith.addf %40, %48 : vector<1024x128xf32>
    %50 = arith.addf %42, %47 : vector<128x128xf32>
    %c128_i32_34 = arith.constant 128 : i32
    %51 = arith.muli %arg1, %c128_i32_34 : i32
    %c0_i32_35 = arith.constant 0 : i32
    %52 = arith.addi %51, %c0_i32_35 : i32
    %53 = tpu.iota {dimensions = array<i32: 1>} : vector<1x128xi32>
    %54 = vector.broadcast %52 : i32 to vector<1x128xi32>
    %55 = arith.addi %54, %53 : vector<1x128xi32>
    %c300_i32_36 = arith.constant 300 : i32
    %56 = vector.broadcast %c300_i32_36 : i32 to vector<1x128xi32>
    %57 = arith.cmpi slt, %55, %56 : vector<1x128xi32>
    %cst_37 = arith.constant 0xFF800000 : f32
    %58 = vector.shape_cast %57 : vector<1x128xi1> to vector<1x128xi1>
    %59 = vector.broadcast %58 : vector<1x128xi1> to vector<1024x128xi1>
    %60 = vector.broadcast %cst_37 : f32 to vector<1024x128xf32>
    %61 = arith.select %59, %35, %60 : vector<1024x128xi1>, vector<1024x128xf32>
    %62 = arith.maximumf %44, %61 : vector<1024x128xf32>
    %cst_38 = arith.constant 0x7F800000 : f32
    %63 = vector.shape_cast %57 : vector<1x128xi1> to vector<1x128xi1>
    %64 = vector.broadcast %63 : vector<1x128xi1> to vector<1024x128xi1>
    %65 = vector.broadcast %cst_38 : f32 to vector<1024x128xf32>
    %66 = arith.select %64, %35, %65 : vector<1024x128xi1>, vector<1024x128xf32>
    %67 = arith.minimumf %46, %66 : vector<1024x128xf32>
    %c0_39 = arith.constant 0 : index
    %c0_40 = arith.constant 0 : index
    %c0_41 = arith.constant 0 : index
    %68 = vector.load %arg10[%c0_39, %c0_40, %c0_41] : memref<1x1024x128xf32, #tpu.memory_space<vmem>>, vector<1x1024x128xf32>
    %69 = vector.shape_cast %68 : vector<1x1024x128xf32> to vector<1024x128xf32>
    %70 = vector.shape_cast %49 : vector<1024x128xf32> to vector<1x1024x128xf32>
    tpu.vector_store %arg10[%c0_39, %c0_40, %c0_41], %70 {strides = array<i32>} : memref<1x1024x128xf32, #tpu.memory_space<vmem>>, vector<1x1024x128xf32>,
    %c0_42 = arith.constant 0 : index
    %c0_43 = arith.constant 0 : index
    %c0_44 = arith.constant 0 : index
    %71 = vector.load %arg11[%c0_42, %c0_43, %c0_44] : memref<1x128x128xf32, #tpu.memory_space<vmem>>, vector<1x128x128xf32>
    %72 = vector.shape_cast %71 : vector<1x128x128xf32> to vector<128x128xf32>
    %73 = vector.shape_cast %50 : vector<128x128xf32> to vector<1x128x128xf32>
    tpu.vector_store %arg11[%c0_42, %c0_43, %c0_44], %73 {strides = array<i32>} : memref<1x128x128xf32, #tpu.memory_space<vmem>>, vector<1x128x128xf32>,
    %c0_45 = arith.constant 0 : index
    %c0_46 = arith.constant 0 : index
    %c0_47 = arith.constant 0 : index
    %74 = vector.load %arg12[%c0_45, %c0_46, %c0_47] : memref<1x1024x128xf32, #tpu.memory_space<vmem>>, vector<1x1024x128xf32>
    %75 = vector.shape_cast %74 : vector<1x1024x128xf32> to vector<1024x128xf32>
    %76 = vector.shape_cast %62 : vector<1024x128xf32> to vector<1x1024x128xf32>
    tpu.vector_store %arg12[%c0_45, %c0_46, %c0_47], %76 {strides = array<i32>} : memref<1x1024x128xf32, #tpu.memory_space<vmem>>, vector<1x1024x128xf32>,
    %c0_48 = arith.constant 0 : index
    %c0_49 = arith.constant 0 : index
    %c0_50 = arith.constant 0 : index
    %77 = vector.load %arg13[%c0_48, %c0_49, %c0_50] : memref<1x1024x128xf32, #tpu.memory_space<vmem>>, vector<1x1024x128xf32>
    %78 = vector.shape_cast %77 : vector<1x1024x128xf32> to vector<1024x128xf32>
    %79 = vector.shape_cast %67 : vector<1024x128xf32> to vector<1x1024x128xf32>
    tpu.vector_store %arg13[%c0_48, %c0_49, %c0_50], %79 {strides = array<i32>} : memref<1x1024x128xf32, #tpu.memory_space<vmem>>, vector<1x1024x128xf32>,
    return
  }
  func.func @transform_0(%arg0: i32, %arg1: i32) -> (i32, i32, i32) {
    %c0_i32 = arith.constant 0 : i32
    %c0_i32_0 = arith.constant 0 : i32
    return %arg0, %c0_i32, %arg1 : i32, i32, i32
  }
  func.func @transform_1(%arg0: i32, %arg1: i32) -> (i32, i32) {
    %c0_i32 = arith.constant 0 : i32
    %c0_i32_0 = arith.constant 0 : i32
    %c0_i32_1 = arith.constant 0 : i32
    return %c0_i32, %c0_i32_0 : i32, i32
  }
  func.func @transform_2(%arg0: i32, %arg1: i32) -> (i32, i32) {
    %c0_i32 = arith.constant 0 : i32
    %c0_i32_0 = arith.constant 0 : i32
    %c0_i32_1 = arith.constant 0 : i32
    return %c0_i32, %c0_i32_0 : i32, i32
  }
  func.func @transform_3(%arg0: i32, %arg1: i32) -> (i32, i32) {
    %c0_i32 = arith.constant 0 : i32
    %c0_i32_0 = arith.constant 0 : i32
    %c0_i32_1 = arith.constant 0 : i32
    return %c0_i32, %c0_i32_0 : i32, i32
  }
  func.func @transform_4(%arg0: i32, %arg1: i32) -> (i32, i32) {
    %c0_i32 = arith.constant 0 : i32
    %c0_i32_0 = arith.constant 0 : i32
    %c0_i32_1 = arith.constant 0 : i32
    return %c0_i32, %c0_i32_0 : i32, i32
  }
  func.func @transform_5(%arg0: i32, %arg1: i32) -> (i32, i32) {
    %c0_i32 = arith.constant 0 : i32
    %c0_i32_0 = arith.constant 0 : i32
    %c0_i32_1 = arith.constant 0 : i32
    return %c0_i32, %c0_i32_0 : i32, i32
  }
  func.func @transform_6(%arg0: i32, %arg1: i32) -> (i32, i32) {
    %c0_i32 = arith.constant 0 : i32
    %c0_i32_0 = arith.constant 0 : i32
    %c0_i32_1 = arith.constant 0 : i32
    return %c0_i32, %c0_i32_0 : i32, i32
  }
  func.func @transform_7(%arg0: i32, %arg1: i32) -> (i32, i32) {
    %c0_i32 = arith.constant 0 : i32
    %c0_i32_0 = arith.constant 0 : i32
    %c0_i32_1 = arith.constant 0 : i32
    return %c0_i32, %c0_i32_0 : i32, i32
  }
  func.func @transform_8(%arg0: i32, %arg1: i32) -> (i32, i32, i32) {
    %c0_i32 = arith.constant 0 : i32
    %c0_i32_0 = arith.constant 0 : i32
    %c0_i32_1 = arith.constant 0 : i32
    return %arg0, %c0_i32, %c0_i32_0 : i32, i32, i32
  }
  func.func @transform_9(%arg0: i32, %arg1: i32) -> (i32, i32, i32) {
    %c0_i32 = arith.constant 0 : i32
    %c0_i32_0 = arith.constant 0 : i32
    %c0_i32_1 = arith.constant 0 : i32
    return %arg0, %c0_i32, %c0_i32_0 : i32, i32, i32
  }
  func.func @transform_10(%arg0: i32, %arg1: i32) -> (i32, i32, i32) {
    %c0_i32 = arith.constant 0 : i32
    %c0_i32_0 = arith.constant 0 : i32
    %c0_i32_1 = arith.constant 0 : i32
    return %arg0, %c0_i32, %c0_i32_0 : i32, i32, i32
  }
  func.func @transform_11(%arg0: i32, %arg1: i32) -> (i32, i32, i32) {
    %c0_i32 = arith.constant 0 : i32
    %c0_i32_0 = arith.constant 0 : i32
    %c0_i32_1 = arith.constant 0 : i32
    return %arg0, %c0_i32, %c0_i32_0 : i32, i32, i32
  }
}

module attributes {stable_mosaic.version = 11 : i64} {
  func.func @fc_head_kernel(%arg0: i32, %arg1: memref<4x1024xf32, #tpu.memory_space<vmem>>, %arg2: memref<4x1024xf32, #tpu.memory_space<vmem>>, %arg3: memref<1x1024xf32, #tpu.memory_space<vmem>>, %arg4: memref<1x1024xf32, #tpu.memory_space<vmem>>, %arg5: memref<1024x512xbf16, #tpu.memory_space<vmem>>, %arg6: memref<1x512xf32, #tpu.memory_space<vmem>>, %arg7: memref<1x512xf32, #tpu.memory_space<vmem>>, %arg8: memref<512x256xbf16, #tpu.memory_space<vmem>>, %arg9: memref<1x256xf32, #tpu.memory_space<vmem>>, %arg10: memref<1x256xf32, #tpu.memory_space<vmem>>, %arg11: memref<256x361xbf16, #tpu.memory_space<vmem>>, %arg12: memref<1x361xf32, #tpu.memory_space<vmem>>, %arg13: memref<1x361xf32, #tpu.memory_space<vmem>>, %arg14: memref<4x361xf32, #tpu.memory_space<vmem>>) attributes {dimension_semantics = [#tpu.dimension_semantics<arbitrary>], iteration_bounds = array<i64: 1>, scalar_prefetch = 0 : i64, scratch_operands = 0 : i64, tpu.core_type = #tpu.core_type<tc>, window_params = [{pipeline_mode = #tpu.pipeline_mode<synchronous>, transform_indices = @transform_0, window_bounds = array<i64: 4, 1024>}, {pipeline_mode = #tpu.pipeline_mode<synchronous>, transform_indices = @transform_1, window_bounds = array<i64: 4, 1024>}, {pipeline_mode = #tpu.pipeline_mode<synchronous>, transform_indices = @transform_2, window_bounds = array<i64: 1, 1024>}, {pipeline_mode = #tpu.pipeline_mode<synchronous>, transform_indices = @transform_3, window_bounds = array<i64: 1, 1024>}, {pipeline_mode = #tpu.pipeline_mode<synchronous>, transform_indices = @transform_4, window_bounds = array<i64: 1024, 512>}, {pipeline_mode = #tpu.pipeline_mode<synchronous>, transform_indices = @transform_5, window_bounds = array<i64: 1, 512>}, {pipeline_mode = #tpu.pipeline_mode<synchronous>, transform_indices = @transform_6, window_bounds = array<i64: 1, 512>}, {pipeline_mode = #tpu.pipeline_mode<synchronous>, transform_indices = @transform_7, window_bounds = array<i64: 512, 256>}, {pipeline_mode = #tpu.pipeline_mode<synchronous>, transform_indices = @transform_8, window_bounds = array<i64: 1, 256>}, {pipeline_mode = #tpu.pipeline_mode<synchronous>, transform_indices = @transform_9, window_bounds = array<i64: 1, 256>}, {pipeline_mode = #tpu.pipeline_mode<synchronous>, transform_indices = @transform_10, window_bounds = array<i64: 256, 361>}, {pipeline_mode = #tpu.pipeline_mode<synchronous>, transform_indices = @transform_11, window_bounds = array<i64: 1, 361>}, {pipeline_mode = #tpu.pipeline_mode<synchronous>, transform_indices = @transform_12, window_bounds = array<i64: 1, 361>}, {pipeline_mode = #tpu.pipeline_mode<synchronous>, transform_indices = @transform_13, window_bounds = array<i64: 4, 361>}]} {
    %c0 = arith.constant 0 : index
    %c0_0 = arith.constant 0 : index
    %0 = vector.load %arg3[%c0, %c0_0] : memref<1x1024xf32, #tpu.memory_space<vmem>>, vector<1x1024xf32>
    %cst = arith.constant 0.000000e+00 : f32
    %1 = vector.broadcast %cst : f32 to vector<1x1024xf32>
    %2 = arith.cmpf oge, %0, %1 : vector<1x1024xf32>
    %c0_1 = arith.constant 0 : index
    %c0_2 = arith.constant 0 : index
    %3 = vector.load %arg1[%c0_1, %c0_2] : memref<4x1024xf32, #tpu.memory_space<vmem>>, vector<4x1024xf32>
    %c0_3 = arith.constant 0 : index
    %c0_4 = arith.constant 0 : index
    %4 = vector.load %arg2[%c0_3, %c0_4] : memref<4x1024xf32, #tpu.memory_space<vmem>>, vector<4x1024xf32>
    %5 = vector.shape_cast %2 : vector<1x1024xi1> to vector<1x1024xi1>
    %6 = vector.broadcast %5 : vector<1x1024xi1> to vector<4x1024xi1>
    %7 = arith.select %6, %3, %4 : vector<4x1024xi1>, vector<4x1024xf32>
    %8 = vector.broadcast %0 : vector<1x1024xf32> to vector<4x1024xf32>
    %9 = arith.mulf %7, %8 : vector<4x1024xf32>
    %c0_5 = arith.constant 0 : index
    %c0_6 = arith.constant 0 : index
    %10 = vector.load %arg4[%c0_5, %c0_6] : memref<1x1024xf32, #tpu.memory_space<vmem>>, vector<1x1024xf32>
    %11 = vector.broadcast %10 : vector<1x1024xf32> to vector<4x1024xf32>
    %12 = arith.addf %9, %11 : vector<4x1024xf32>
    %cst_7 = arith.constant 0.000000e+00 : f32
    %13 = vector.broadcast %cst_7 : f32 to vector<4x1024xf32>
    %14 = arith.maximumf %12, %13 : vector<4x1024xf32>
    %15 = arith.truncf %14 : vector<4x1024xf32> to vector<4x1024xbf16>
    %c0_8 = arith.constant 0 : index
    %c0_9 = arith.constant 0 : index
    %16 = vector.load %arg5[%c0_8, %c0_9] : memref<1024x512xbf16, #tpu.memory_space<vmem>>, vector<1024x512xbf16>
    %cst_10 = arith.constant dense<0.000000e+00> : vector<4x512xf32>
    %17 = tpu.matmul %15, %16, %cst_10 {dimension_numbers = #tpu.dot_dimension_numbers<[1], [0], [0], [1], [0, 0, 1, 1], [], []>} : vector<4x1024xbf16>, vector<1024x512xbf16>, vector<4x512xf32> -> vector<4x512xf32>
    %c0_11 = arith.constant 0 : index
    %c0_12 = arith.constant 0 : index
    %18 = vector.load %arg6[%c0_11, %c0_12] : memref<1x512xf32, #tpu.memory_space<vmem>>, vector<1x512xf32>
    %c0_13 = arith.constant 0 : index
    %c0_14 = arith.constant 0 : index
    %19 = vector.load %arg7[%c0_13, %c0_14] : memref<1x512xf32, #tpu.memory_space<vmem>>, vector<1x512xf32>
    %cst_15 = arith.constant dense<0.000000e+00> : vector<512xf32>
    %20 = vector.multi_reduction <add>, %17, %cst_15 [0] : vector<4x512xf32> to vector<512xf32>
    %21 = vector.shape_cast %20 : vector<512xf32> to vector<1x512xf32>
    %cst_16 = arith.constant 4.000000e+00 : f32
    %22 = vector.broadcast %cst_16 : f32 to vector<1x512xf32>
    %23 = arith.divf %21, %22 : vector<1x512xf32>
    %24 = vector.broadcast %23 : vector<1x512xf32> to vector<4x512xf32>
    %25 = arith.subf %17, %24 : vector<4x512xf32>
    %26 = arith.mulf %25, %25 : vector<4x512xf32>
    %cst_17 = arith.constant dense<0.000000e+00> : vector<512xf32>
    %27 = vector.multi_reduction <add>, %26, %cst_17 [0] : vector<4x512xf32> to vector<512xf32>
    %28 = vector.shape_cast %27 : vector<512xf32> to vector<1x512xf32>
    %cst_18 = arith.constant 4.000000e+00 : f32
    %29 = vector.broadcast %cst_18 : f32 to vector<1x512xf32>
    %30 = arith.divf %28, %29 : vector<1x512xf32>
    %cst_19 = arith.constant 9.99999974E-6 : f32
    %31 = vector.broadcast %cst_19 : f32 to vector<1x512xf32>
    %32 = arith.addf %30, %31 : vector<1x512xf32>
    %33 = math.rsqrt %32 : vector<1x512xf32>
    %34 = arith.mulf %18, %33 : vector<1x512xf32>
    %35 = arith.mulf %23, %34 : vector<1x512xf32>
    %36 = arith.subf %19, %35 : vector<1x512xf32>
    %37 = vector.broadcast %34 : vector<1x512xf32> to vector<4x512xf32>
    %38 = arith.mulf %17, %37 : vector<4x512xf32>
    %39 = vector.broadcast %36 : vector<1x512xf32> to vector<4x512xf32>
    %40 = arith.addf %38, %39 : vector<4x512xf32>
    %cst_20 = arith.constant 0.000000e+00 : f32
    %41 = vector.broadcast %cst_20 : f32 to vector<4x512xf32>
    %42 = arith.maximumf %40, %41 : vector<4x512xf32>
    %43 = arith.truncf %42 : vector<4x512xf32> to vector<4x512xbf16>
    %c0_21 = arith.constant 0 : index
    %c0_22 = arith.constant 0 : index
    %44 = vector.load %arg8[%c0_21, %c0_22] : memref<512x256xbf16, #tpu.memory_space<vmem>>, vector<512x256xbf16>
    %cst_23 = arith.constant dense<0.000000e+00> : vector<4x256xf32>
    %45 = tpu.matmul %43, %44, %cst_23 {dimension_numbers = #tpu.dot_dimension_numbers<[1], [0], [0], [1], [0, 0, 1, 1], [], []>} : vector<4x512xbf16>, vector<512x256xbf16>, vector<4x256xf32> -> vector<4x256xf32>
    %c0_24 = arith.constant 0 : index
    %c0_25 = arith.constant 0 : index
    %46 = vector.load %arg9[%c0_24, %c0_25] : memref<1x256xf32, #tpu.memory_space<vmem>>, vector<1x256xf32>
    %c0_26 = arith.constant 0 : index
    %c0_27 = arith.constant 0 : index
    %47 = vector.load %arg10[%c0_26, %c0_27] : memref<1x256xf32, #tpu.memory_space<vmem>>, vector<1x256xf32>
    %cst_28 = arith.constant dense<0.000000e+00> : vector<256xf32>
    %48 = vector.multi_reduction <add>, %45, %cst_28 [0] : vector<4x256xf32> to vector<256xf32>
    %49 = vector.shape_cast %48 : vector<256xf32> to vector<1x256xf32>
    %cst_29 = arith.constant 4.000000e+00 : f32
    %50 = vector.broadcast %cst_29 : f32 to vector<1x256xf32>
    %51 = arith.divf %49, %50 : vector<1x256xf32>
    %52 = vector.broadcast %51 : vector<1x256xf32> to vector<4x256xf32>
    %53 = arith.subf %45, %52 : vector<4x256xf32>
    %54 = arith.mulf %53, %53 : vector<4x256xf32>
    %cst_30 = arith.constant dense<0.000000e+00> : vector<256xf32>
    %55 = vector.multi_reduction <add>, %54, %cst_30 [0] : vector<4x256xf32> to vector<256xf32>
    %56 = vector.shape_cast %55 : vector<256xf32> to vector<1x256xf32>
    %cst_31 = arith.constant 4.000000e+00 : f32
    %57 = vector.broadcast %cst_31 : f32 to vector<1x256xf32>
    %58 = arith.divf %56, %57 : vector<1x256xf32>
    %cst_32 = arith.constant 9.99999974E-6 : f32
    %59 = vector.broadcast %cst_32 : f32 to vector<1x256xf32>
    %60 = arith.addf %58, %59 : vector<1x256xf32>
    %61 = math.rsqrt %60 : vector<1x256xf32>
    %62 = arith.mulf %46, %61 : vector<1x256xf32>
    %63 = arith.mulf %51, %62 : vector<1x256xf32>
    %64 = arith.subf %47, %63 : vector<1x256xf32>
    %65 = vector.broadcast %62 : vector<1x256xf32> to vector<4x256xf32>
    %66 = arith.mulf %45, %65 : vector<4x256xf32>
    %67 = vector.broadcast %64 : vector<1x256xf32> to vector<4x256xf32>
    %68 = arith.addf %66, %67 : vector<4x256xf32>
    %cst_33 = arith.constant 0.000000e+00 : f32
    %69 = vector.broadcast %cst_33 : f32 to vector<4x256xf32>
    %70 = arith.maximumf %68, %69 : vector<4x256xf32>
    %71 = arith.truncf %70 : vector<4x256xf32> to vector<4x256xbf16>
    %c0_34 = arith.constant 0 : index
    %c0_35 = arith.constant 0 : index
    %72 = vector.load %arg11[%c0_34, %c0_35] : memref<256x361xbf16, #tpu.memory_space<vmem>>, vector<256x361xbf16>
    %cst_36 = arith.constant dense<0.000000e+00> : vector<4x361xf32>
    %73 = tpu.matmul %71, %72, %cst_36 {dimension_numbers = #tpu.dot_dimension_numbers<[1], [0], [0], [1], [0, 0, 1, 1], [], []>} : vector<4x256xbf16>, vector<256x361xbf16>, vector<4x361xf32> -> vector<4x361xf32>
    %c0_37 = arith.constant 0 : index
    %c0_38 = arith.constant 0 : index
    %74 = vector.load %arg12[%c0_37, %c0_38] : memref<1x361xf32, #tpu.memory_space<vmem>>, vector<1x361xf32>
    %75 = vector.broadcast %74 : vector<1x361xf32> to vector<4x361xf32>
    %76 = arith.addf %73, %75 : vector<4x361xf32>
    %c0_39 = arith.constant 0 : index
    %c0_40 = arith.constant 0 : index
    %77 = vector.load %arg13[%c0_39, %c0_40] : memref<1x361xf32, #tpu.memory_space<vmem>>, vector<1x361xf32>
    %78 = vector.broadcast %77 : vector<1x361xf32> to vector<4x361xf32>
    %79 = arith.addf %76, %78 : vector<4x361xf32>
    %c0_41 = arith.constant 0 : index
    %c0_42 = arith.constant 0 : index
    %80 = vector.load %arg14[%c0_41, %c0_42] : memref<4x361xf32, #tpu.memory_space<vmem>>, vector<4x361xf32>
    tpu.vector_store %arg14[%c0_41, %c0_42], %79 {strides = array<i32>} : memref<4x361xf32, #tpu.memory_space<vmem>>, vector<4x361xf32>,
    return
  }
  func.func @transform_0(%arg0: i32) -> (i32, i32) {
    %c0_i32 = arith.constant 0 : i32
    %c0_i32_0 = arith.constant 0 : i32
    %c0_i32_1 = arith.constant 0 : i32
    return %c0_i32, %c0_i32_0 : i32, i32
  }
  func.func @transform_1(%arg0: i32) -> (i32, i32) {
    %c0_i32 = arith.constant 0 : i32
    %c0_i32_0 = arith.constant 0 : i32
    %c0_i32_1 = arith.constant 0 : i32
    return %c0_i32, %c0_i32_0 : i32, i32
  }
  func.func @transform_2(%arg0: i32) -> (i32, i32) {
    %c0_i32 = arith.constant 0 : i32
    %c0_i32_0 = arith.constant 0 : i32
    %c0_i32_1 = arith.constant 0 : i32
    return %c0_i32, %c0_i32_0 : i32, i32
  }
  func.func @transform_3(%arg0: i32) -> (i32, i32) {
    %c0_i32 = arith.constant 0 : i32
    %c0_i32_0 = arith.constant 0 : i32
    %c0_i32_1 = arith.constant 0 : i32
    return %c0_i32, %c0_i32_0 : i32, i32
  }
  func.func @transform_4(%arg0: i32) -> (i32, i32) {
    %c0_i32 = arith.constant 0 : i32
    %c0_i32_0 = arith.constant 0 : i32
    %c0_i32_1 = arith.constant 0 : i32
    return %c0_i32, %c0_i32_0 : i32, i32
  }
  func.func @transform_5(%arg0: i32) -> (i32, i32) {
    %c0_i32 = arith.constant 0 : i32
    %c0_i32_0 = arith.constant 0 : i32
    %c0_i32_1 = arith.constant 0 : i32
    return %c0_i32, %c0_i32_0 : i32, i32
  }
  func.func @transform_6(%arg0: i32) -> (i32, i32) {
    %c0_i32 = arith.constant 0 : i32
    %c0_i32_0 = arith.constant 0 : i32
    %c0_i32_1 = arith.constant 0 : i32
    return %c0_i32, %c0_i32_0 : i32, i32
  }
  func.func @transform_7(%arg0: i32) -> (i32, i32) {
    %c0_i32 = arith.constant 0 : i32
    %c0_i32_0 = arith.constant 0 : i32
    %c0_i32_1 = arith.constant 0 : i32
    return %c0_i32, %c0_i32_0 : i32, i32
  }
  func.func @transform_8(%arg0: i32) -> (i32, i32) {
    %c0_i32 = arith.constant 0 : i32
    %c0_i32_0 = arith.constant 0 : i32
    %c0_i32_1 = arith.constant 0 : i32
    return %c0_i32, %c0_i32_0 : i32, i32
  }
  func.func @transform_9(%arg0: i32) -> (i32, i32) {
    %c0_i32 = arith.constant 0 : i32
    %c0_i32_0 = arith.constant 0 : i32
    %c0_i32_1 = arith.constant 0 : i32
    return %c0_i32, %c0_i32_0 : i32, i32
  }
  func.func @transform_10(%arg0: i32) -> (i32, i32) {
    %c0_i32 = arith.constant 0 : i32
    %c0_i32_0 = arith.constant 0 : i32
    %c0_i32_1 = arith.constant 0 : i32
    return %c0_i32, %c0_i32_0 : i32, i32
  }
  func.func @transform_11(%arg0: i32) -> (i32, i32) {
    %c0_i32 = arith.constant 0 : i32
    %c0_i32_0 = arith.constant 0 : i32
    %c0_i32_1 = arith.constant 0 : i32
    return %c0_i32, %c0_i32_0 : i32, i32
  }
  func.func @transform_12(%arg0: i32) -> (i32, i32) {
    %c0_i32 = arith.constant 0 : i32
    %c0_i32_0 = arith.constant 0 : i32
    %c0_i32_1 = arith.constant 0 : i32
    return %c0_i32, %c0_i32_0 : i32, i32
  }
  func.func @transform_13(%arg0: i32) -> (i32, i32) {
    %c0_i32 = arith.constant 0 : i32
    %c0_i32_0 = arith.constant 0 : i32
    %c0_i32_1 = arith.constant 0 : i32
    return %c0_i32, %c0_i32_0 : i32, i32
  }
}

</mosaic_0001>

<bundles_post_ra>
// kernel: stnkd_forward.4
= control target key start
LH: loop header
LB: loop body
LE: loop exit
PB: predicated region body
PF: predicated region fallthrough
CT: control target
= control target key end

     0   :  { %s639_s9 = smov 0   ;;  %s641_s10 = smov 0   ;;  %s771_s0 = inlined_call_operand.vmem [shape: bf16[4,19,384], index: 0, kind: input, shape index: {}]   ;;  %s772_s1 = inlined_call_operand.vmem [shape: bf16[64,19], index: 1, kind: input, shape index: {}]   ;;  %s773_s2 = inlined_call_operand.vmem [shape: f32[4,64,128], index: 2, kind: output, shape index: {}]  }
   0x1   :  { %s643_s11 = smov 0   ;;  %s645_s12 = smov 0  }
   0x2   :  { %s647_s13 = smov 0   ;;  %s649_s14 = smov 0  }
   0x3   :  { %s651_s15 = smov 0  }
   0x4 LB: > { %s21_s16 = sadd.s32 1, %s612_s13  ;;  %s24_s17 = sadd.s32 1, %s616_s14  ;;  %s620_s15 = sphi %s651_s15, %s12_s15   ;;  %s616_s14 = sphi %s649_s14, %s779_s14   ;;  %s612_s13 = sphi %s647_s13, %s778_s13   ;;  %s608_s12 = sphi %s645_s12, %s777_s12   ;;  %s604_s11 = sphi %s643_s11, %s776_s11   ;;  %s600_s10 = sphi %s641_s10, %s775_s10   ;;  %s596_s9 = sphi %s639_s9, %s774_s9  }
   0x5   : > { %p22_p0 = scmp.ge.s32.totalorder %s21_s16, 3  ;;  %p40_p1 = scmp.ne.s32.totalorder %s600_s10, %s596_s9 }
   0x6   : > { %p41_p2 = scmp.eq.s32.totalorder %s620_s15, 0  ;;  %s33_s21 = sadd.s32 1, %s600_s10 }
   0x7   : > { %s781_s16 = smov (%p22_p0, %s21_s16), 0  ;;  %s783_s17 = smov (!%p22_p0, %s24_s17), %s616_s14 }
   0x8   : > { %p42_p3 = por %p41_p2, %p40_p1  ;;  %p26_p4 = scmp.ge.s32.totalorder %s783_s17, 4 }
   0x9   : > { %s29_s18 = ssub.s32 %s612_s13, %s781_s16  ;;  %p458_p6 = scmp.ge.s32.totalorder %s620_s15, 12 }
   0xa   : > { %s785_s17 = smov (%p26_p4, %s783_s17), 0 }
   0xb   : > { %s28_s19 = ssub.s32 %s616_s14, %s785_s17  ;;  %116 = sbr.rel (%p458_p6) target bundleno = 25 (0x19), region = 20 }
   0xc   : > { %s30_s20 = sor.u32 %s29_s18, %s28_s19 }
   0xd   : > { %p31_p5 = scmp.eq.s32.totalorder %s30_s20, 0 }
   0xf   : > { %s690_s22 = scalar_select %p31_p5, %s600_s10, %s33_s21  }
  0x10   : > { %119 = sbr.rel (!%p42_p3) target bundleno = 25 (0x19), region = 24  ;;  %s121_s23 = sand.u32 (%p42_p3), 1, %s600_s10  }
  0x11   : > { %s500_s24 = smul.u32 (%p42_p3), 9, %s616_s14 }
  0x12   : > { %s499_s25 = smul.u32 (%p42_p3), 12, %s121_s23 }
  0x13   : > { %s125_s26 = sadd.s32 (%p42_p3), %s612_s13, %s500_s24 }
  0x14   : > { %s459_s27 = sshll.u32 (%p42_p3), %s125_s26, 2  ;;  %s123_s3 = scalar_lea.vmem (%p42_p3), [#allocation2], %s499_s25 }
  0x15   : > { %s127_s30 = scalar_lea.vmem %s771_s0, %s459_s27 }
  0x16   : > { %v144_v0 = vld [vmem:[%s127_s30] sm:$0xf]  ;;  %v146_v1 = vld [vmem:[%s127_s30 + $0xc] sm:$0xf]  ;;  %v148_v2 = vld [vmem:[%s127_s30 + $0x18] sm:$0xf] }
  0x17   : > { %145 = vst [vmem:[%s123_s3] sm:$0xf] %v144_v0  ;;  %147 = vst [vmem:[%s123_s3 + $0x4] sm:$0xf] %v146_v1 }
  0x18   : > { %149 = vst [vmem:[%s123_s3 + $0x8] sm:$0xf] %v148_v2 }
  0x19 PF: > { %p460_p7 = scmp.ge.s32.totalorder %s620_s15, 1  ;;  %p178_p8 = scmp.lt.s32.totalorder %s620_s15, 13 }
  0x1b   : > { %p179_p9 = pnand %p460_p7, %p178_p8 }
  0x1c   : > { %s185_s4 = sand.u32 (!%p179_p9), 1, %s596_s9   ;;  %p206_p10 = scmp.lt.s32.totalorder (!%p179_p9), %s608_s12, 3 }
  0x1d   : > { %182 = sbr.rel (%p179_p9) target bundleno = 261 (0x105), region = 65  ;;  %p473_p11 = scmp.ne.s32.totalorder (!%p179_p9), %s604_s11, 0 }
  0x1e   : > { %s501_s7 = smul.u32 (!%p179_p9), 12, %s185_s4 }
  0x20   : > { %s187_s19 = scalar_lea.vmem (!%p179_p9), [#allocation2], %s501_s7 }
  0x22   : > { %vm265_vm0 = vcmask 1040384   ;;  %vm266_vm1 = vcmask 1041408   ;;  %v562_v3 = vld [vmem:[%s772_s1] sm:$0xff]   ;;  %v622_v4 = vmov 65535   ;;  %s787_s12 = smov (!%p206_p10, %s608_s12), 3  ;;  %vm252_vm2 = vcmask 154624  }
  0x23   : > { %v267_v5 = vsel %vm265_vm0, 4294967295, %v622_v4  ;;  %v563_v6 = vld [vmem:[%s772_s1 + $0x10] sm:$0xff]   ;;  %487 = vmatprep.mubr.msk.bf16.mxu0 %vm252_vm2, %v562_v3  ;;  %s476_s9 = sshll.u32 %s787_s12, 6  ;;  %v564_v11 = vld [vmem:[%s772_s1 + $0x8] sm:$0xff]   ;;  %v565_v12 = vld [vmem:[%s772_s1 + $0x18] sm:$0xff]  }
  0x24   : > { %v268_v7 = vsel %vm266_vm1, %v267_v5, 0  ;;  %v560_v8 = vld [vmem:[%s187_s19 + $0x8] ss:$0 sps:$4 sm:$0x33]   ;;  %491 = vmatprep.mubr.msk.bf16.mxu1 %vm252_vm2, %v563_v6  ;;  %s715_s23 = scalar_lea.vmem %s773_s2, %s476_s9  ;;  %v561_v9 = vld [vmem:[%s187_s19] sm:$0xff]  }
  0x25   : > { %v270_v10 = vand.u32 %v560_v8, %v268_v7 }
  0x27   : > { %483 = vmatprep.subr.bf16.mxu0 %v270_v10  ;;  %495 = vmatprep.subr.bf16.mxu1 %v270_v10 }
  0x28   : > { %484 = vmatpush3.bf16.msra.mxu0 %v270_v10  ;;  %497 = vmatpush3.bf16.msra.mxu1 %v270_v10 }
  0x29   : > { %485 = vmatprep.subr.bf16.mxu0 %v561_v9  ;;  %496 = vmatprep.subr.bf16.mxu1 %v561_v9 }
  0x2c   : > { %486 = vmatpush3.bf16.msra.mxu0 %v561_v9  ;;  %498 = vmatpush3.bf16.msra.mxu1 %v561_v9 }
  0x2f   : > { %488 = vmatmul.mubr.msk.bf16.vlgmr.msra.gmra.mxu0 %vm252_vm2, %v564_v11  ;;  %492 = vmatmul.mubr.msk.bf16.vlgmr.msra.gmra.mxu1 %vm252_vm2, %v565_v12 }
  0xef   : > { %v489_v13 = vpop.f32.mrf.mxu0  ;;  %v493_v14 = vpop.f32.mrf.mxu1 }
  0xf1   : > { %v306_v15 = vpop.f32.mrf.mxu0  ;;  %v322_v16 = vpop.f32.mrf.mxu1  ;;  %340 = sbr.rel (%p473_p11) target bundleno = 251 (0xfb), region = 73 }
  0xf3   : > { %v490_v17 = vpop.f32.mrf.mxu0  ;;  %v494_v18 = vpop.f32.mrf.mxu1 }
  0xf5   : > { %v309_v19 = vpop.f32.mrf.mxu0  ;;  %v325_v20 = vpop.f32.mrf.mxu1 }
  0xf6   : > { %v623_v21 = vmov 0.0  }
  0xf7   : > { %341 = vst [vmem:[%s715_s23] sm:$0xff] %v623_v21  ;;  %342 = vst [vmem:[%s715_s23 + $0x8] sm:$0xff] %v623_v21 }
  0xf8   : > { %343 = vst [vmem:[%s715_s23 + $0x10] sm:$0xff] %v623_v21  ;;  %344 = vst [vmem:[%s715_s23 + $0x18] sm:$0xff] %v623_v21 }
  0xf9   : > { %345 = vst [vmem:[%s715_s23 + $0x20] sm:$0xff] %v623_v21  ;;  %346 = vst [vmem:[%s715_s23 + $0x28] sm:$0xff] %v623_v21 }
  0xfa   : > { %347 = vst [vmem:[%s715_s23 + $0x30] sm:$0xff] %v623_v21  ;;  %348 = vst [vmem:[%s715_s23 + $0x38] sm:$0xff] %v623_v21 }
  0xfb PF: > { %v357_v23 = vmul.f32 %v306_v15, %v306_v15  ;;  %v358_v25 = vmul.f32 %v309_v19, %v309_v19  ;;  %v359_v27 = vmul.f32 %v489_v13, %v489_v13  ;;  %v360_v28 = vmul.f32 %v490_v17, %v490_v17 }
  0xfc   : > { %v361_v31 = vmul.f32 %v322_v16, %v322_v16  ;;  %v362_v33 = vmul.f32 %v325_v20, %v325_v20  ;;  %v363_v34 = vmul.f32 %v493_v14, %v493_v14  ;;  %v364_v35 = vmul.f32 %v494_v18, %v494_v18 }
  0xfe   : > { %v349_v22 = vld [vmem:[%s715_s23] sm:$0xff]  ;;  %v350_v24 = vld [vmem:[%s715_s23 + $0x8] sm:$0xff] }
  0xff   : > { %v351_v26 = vld [vmem:[%s715_s23 + $0x10] sm:$0xff]  ;;  %v352_v29 = vld [vmem:[%s715_s23 + $0x18] sm:$0xff]  ;;  %v365_v36 = vadd.f32 %v357_v23, %v349_v22  ;;  %v366_v37 = vadd.f32 %v358_v25, %v350_v24 }
 0x100   : > { %v353_v30 = vld [vmem:[%s715_s23 + $0x20] sm:$0xff]  ;;  %v354_v32 = vld [vmem:[%s715_s23 + $0x28] sm:$0xff]  ;;  %v367_v38 = vadd.f32 %v359_v27, %v351_v26  ;;  %v368_v39 = vadd.f32 %v360_v28, %v352_v29 }
 0x101   : > { %v355_v40 = vld [vmem:[%s715_s23 + $0x30] sm:$0xff]  ;;  %v356_v41 = vld [vmem:[%s715_s23 + $0x38] sm:$0xff]  ;;  %v369_v42 = vadd.f32 %v361_v31, %v353_v30  ;;  %v370_v43 = vadd.f32 %v362_v33, %v354_v32  ;;  %373 = vst [vmem:[%s715_s23] sm:$0xff] %v365_v36  ;;  %374 = vst [vmem:[%s715_s23 + $0x8] sm:$0xff] %v366_v37 }
 0x102   : > { %v371_v44 = vadd.f32 %v363_v34, %v355_v40  ;;  %v372_v45 = vadd.f32 %v364_v35, %v356_v41  ;;  %375 = vst [vmem:[%s715_s23 + $0x10] sm:$0xff] %v367_v38  ;;  %376 = vst [vmem:[%s715_s23 + $0x18] sm:$0xff] %v368_v39 }
 0x103   : > { %377 = vst [vmem:[%s715_s23 + $0x20] sm:$0xff] %v369_v42  ;;  %378 = vst [vmem:[%s715_s23 + $0x28] sm:$0xff] %v370_v43 }
 0x104   : > { %379 = vst [vmem:[%s715_s23 + $0x30] sm:$0xff] %v371_v44  ;;  %380 = vst [vmem:[%s715_s23 + $0x38] sm:$0xff] %v372_v45 }
 0x105 PF: > { %s12_s15 = sadd.s32 1, %s620_s15   ;;  %s774_s9 = smov %s600_s10 }
 0x106   : > { %p9_p12 = scmp.ge.s32.totalorder %s12_s15, 14   ;;  %s775_s10 = smov %s690_s22 }
 0x107   : > { %s776_s11 = smov %s612_s13  ;;  %s777_s12 = smov %s616_s14 }
 0x108   : > { %s778_s13 = smov %s781_s16  ;;  %s779_s14 = smov %s785_s17 }
 0x109   :  { %11 = sbr.rel (!%p9_p12) target bundleno = 4 (0x4), region = 108 }

// kernel: stnkd_forward.5
= control target key start
LH: loop header
LB: loop body
LE: loop exit
PB: predicated region body
PF: predicated region fallthrough
CT: control target
= control target key end

     0   :  { %s1295_s21 = smov 0   ;;  %s1297_s22 = smov 0   ;;  %s1655_s0 = inlined_call_operand.vmem [shape: bf16[4,19,384], index: 0, kind: input, shape index: {}]   ;;  %s1656_s1 = inlined_call_operand.vmem [shape: f32[64,1], index: 1, kind: input, shape index: {}]   ;;  %s1657_s2 = inlined_call_operand.vmem [shape: f32[64,1], index: 2, kind: input, shape index: {}]   ;;  %s1658_s3 = inlined_call_operand.vmem [shape: bf16[64,19], index: 3, kind: input, shape index: {}]   ;;  %s1659_s4 = inlined_call_operand.vmem [shape: bf16[128,64], index: 4, kind: input, shape index: {}]   ;;  %s1660_s5 = inlined_call_operand.vmem [shape: f32[4,128,128], index: 5, kind: output, shape index: {0}]   ;;  %s1661_s6 = inlined_call_operand.vmem [shape: f32[4,64,128], index: 6, kind: output, shape index: {1}]  }
   0x1   :  { %s1299_s23 = smov 0   ;;  %s1301_s24 = smov 0  }
   0x2   :  { %s1303_s25 = smov 0   ;;  %s1305_s26 = smov 0  }
   0x3   :  { %s1307_s27 = smov 0  }
   0x4 LB: > { %s26_s28 = sadd.s32 1, %s1247_s25  ;;  %s29_s29 = sadd.s32 1, %s1251_s26  ;;  %s1255_s27 = sphi %s1307_s27, %s17_s27   ;;  %s1251_s26 = sphi %s1305_s26, %s1669_s26   ;;  %s1247_s25 = sphi %s1303_s25, %s1668_s25   ;;  %s1243_s24 = sphi %s1301_s24, %s1667_s24   ;;  %s1239_s23 = sphi %s1299_s23, %s1666_s23   ;;  %s1235_s22 = sphi %s1297_s22, %s1665_s22   ;;  %s1231_s21 = sphi %s1295_s21, %s1664_s21  }
   0x5   : > { %p27_p0 = scmp.ge.s32.totalorder %s26_s28, 3  ;;  %p45_p1 = scmp.ne.s32.totalorder %s1235_s22, %s1231_s21 }
   0x6   : > { %p46_p2 = scmp.eq.s32.totalorder %s1255_s27, 0  ;;  %s38_s9 = sadd.s32 1, %s1235_s22 }
   0x7   : > { %s1671_s28 = smov (%p27_p0, %s26_s28), 0  ;;  %s1673_s29 = smov (!%p27_p0, %s29_s29), %s1251_s26 }
   0x8   : > { %p47_p3 = por %p46_p2, %p45_p1  ;;  %p31_p4 = scmp.ge.s32.totalorder %s1673_s29, 4 }
   0x9   : > { %s34_s30 = ssub.s32 %s1247_s25, %s1671_s28  ;;  %p1010_p6 = scmp.ge.s32.totalorder %s1255_s27, 12 }
   0xa   : > { %s1675_s29 = smov (%p31_p4, %s1673_s29), 0 }
   0xb   : > { %s33_s7 = ssub.s32 %s1251_s26, %s1675_s29  ;;  %219 = sbr.rel (%p1010_p6) target bundleno = 25 (0x19), region = 32 }
   0xc   : > { %s35_s8 = sor.u32 %s34_s30, %s33_s7 }
   0xd   : > { %p36_p5 = scmp.eq.s32.totalorder %s35_s8, 0 }
   0xf   : > { %s1346_s10 = scalar_select %p36_p5, %s1235_s22, %s38_s9  }
  0x10   : > { %222 = sbr.rel (!%p47_p3) target bundleno = 25 (0x19), region = 36  ;;  %s224_s11 = sand.u32 (%p47_p3), 1, %s1235_s22  }
  0x11   : > { %s1124_s12 = smul.u32 (%p47_p3), 9, %s1251_s26 }
  0x12   : > { %s1123_s13 = smul.u32 (%p47_p3), 12, %s224_s11 }
  0x13   : > { %s228_s14 = sadd.s32 (%p47_p3), %s1247_s25, %s1124_s12 }
  0x14   : > { %s1011_s15 = sshll.u32 (%p47_p3), %s228_s14, 2  ;;  %s226_s19 = scalar_lea.vmem (%p47_p3), [#allocation2], %s1123_s13 }
  0x15   : > { %s230_s18 = scalar_lea.vmem %s1655_s0, %s1011_s15 }
  0x16   : > { %v247_v0 = vld [vmem:[%s230_s18] sm:$0xf]  ;;  %v249_v1 = vld [vmem:[%s230_s18 + $0xc] sm:$0xf]  ;;  %v251_v2 = vld [vmem:[%s230_s18 + $0x18] sm:$0xf] }
  0x17   : > { %248 = vst [vmem:[%s226_s19] sm:$0xf] %v247_v0  ;;  %250 = vst [vmem:[%s226_s19 + $0x4] sm:$0xf] %v249_v1 }
  0x18   : > { %252 = vst [vmem:[%s226_s19 + $0x8] sm:$0xf] %v251_v2 }
  0x19 PF: > { %p1012_p7 = scmp.ge.s32.totalorder %s1255_s27, 1  ;;  %p281_p8 = scmp.lt.s32.totalorder %s1255_s27, 13 }
  0x1b   : > { %p282_p9 = pnand %p1012_p7, %p281_p8 }
  0x1c   : > { %s288_s20 = sand.u32 (!%p282_p9), 1, %s1231_s21   ;;  %p322_p10 = scmp.lt.s32.totalorder (!%p282_p9), %s1243_s24, 3 }
  0x1d   : > { %285 = sbr.rel (%p282_p9) target bundleno = 521 (0x209), region = 77  ;;  %s1027_s18 = sshll.u32 (!%p282_p9), %s1239_s23, 7 }
  0x1e   : > { %s1125_s8 = smul.u32 (!%p282_p9), 12, %s288_s20  ;;  %p1056_p11 = scmp.ne.s32.totalorder (!%p282_p9), %s1239_s23, 0 }
  0x20   : > { %s290_s12 = scalar_lea.vmem (!%p282_p9), [#allocation2], %s1125_s8 }
  0x22   : > { %vm386_vm0 = vcmask 1040384   ;;  %vm387_vm1 = vcmask 1041408   ;;  %v1189_v3 = vld [vmem:[%s1658_s3] sm:$0xff]   ;;  %v1257_v4 = vmov 65535   ;;  %s1677_s24 = smov (!%p322_p10, %s1243_s24), 3  ;;  %vm373_vm2 = vcmask 154624  }
  0x23   : > { %v388_v5 = vsel %vm386_vm0, 4294967295, %v1257_v4  ;;  %1083 = vmatprep.mubr.msk.bf16.mxu0 %vm373_vm2, %v1189_v3  ;;  %s1059_s9 = sshll.u32 %s1677_s24, 7  ;;  %s1060_s11 = sshll.u32 %s1677_s24, 6  ;;  %v1187_v7 = vld [vmem:[%s290_s12 + $0x8] ss:$0 sps:$4 sm:$0x33]   ;;  %v579_v44 = vlaneseq  ;;  %v581_v49 = vstv %s1027_s18 }
  0x24   : > { %v389_v6 = vsel %vm387_vm1, %v388_v5, 0  ;;  %s1367_s14 = scalar_lea.vmem %s1660_s5, %s1059_s9  ;;  %s1372_s17 = scalar_lea.vmem %s1661_s6, %s1060_s11  ;;  %v1188_v9 = vld [vmem:[%s290_s12] sm:$0xff]   ;;  %v1258_v12 = vmov 0   ;;  %v521_v13 = vld [vmem:[%s1657_s2 + $0x38] sm:$0xff]  ;;  %vm654_vm3 = vcmask 523264  }
  0x25   : > { %v391_v8 = vand.u32 %v1187_v7, %v389_v6  ;;  %v520_v10 = vld [vmem:[%s1657_s2 + $0x30] sm:$0xff]  ;;  %1186 = vset.pattern.permute.xlu1 %v1258_v12  ;;  %1185 = vset.pattern.permute.xlu0 %v1258_v12  ;;  %v1190_v14 = vld [vmem:[%s1658_s3 + $0x8] sm:$0xff]   ;;  %v465_v15 = vld [vmem:[%s1656_s1 + $0x38] sm:$0xff]  ;;  %v580_v47 = vand.u32 127, %v579_v44 }
  0x26   : > { %v464_v11 = vld [vmem:[%s1656_s1 + $0x30] sm:$0xff]  ;;  %554 = vperm.xlu1 %1186, %v520_v10   ;;  %v463_v17 = vld [vmem:[%s1656_s1 + $0x28] sm:$0xff]  ;;  %v462_v18 = vld [vmem:[%s1656_s1 + $0x20] sm:$0xff] }
  0x27   : > { %1079 = vmatprep.subr.bf16.mxu0 %v391_v8  ;;  %498 = vperm.xlu0 %1185, %v464_v11   ;;  %v1191_v16 = vld [vmem:[%s1658_s3 + $0x10] sm:$0xff]   ;;  %v519_v19 = vld [vmem:[%s1657_s2 + $0x28] sm:$0xff]  ;;  %v518_v20 = vld [vmem:[%s1657_s2 + $0x20] sm:$0xff]  ;;  %v582_v55 = vadd.s32 %v581_v49, %v580_v47 }
  0x28   : > { %1080 = vmatpush3.bf16.msra.mxu0 %v391_v8  ;;  %v1192_v21 = vld [vmem:[%s1658_s3 + $0x18] sm:$0xff]   ;;  %v460_v23 = vld [vmem:[%s1656_s1 + $0x10] sm:$0xff]  ;;  %v459_v26 = vld [vmem:[%s1656_s1 + $0x8] sm:$0xff] }
  0x29   : > { %1081 = vmatprep.subr.bf16.mxu0 %v1188_v9  ;;  %v461_v22 = vld [vmem:[%s1656_s1 + $0x18] sm:$0xff]  ;;  %v516_v25 = vld [vmem:[%s1657_s2 + $0x10] sm:$0xff]  ;;  %v458_v27 = vld [vmem:[%s1656_s1] sm:$0xff]  ;;  %vm583_vm4 = vcmp.lt.s32.totalorder %v582_v55, 300 }
  0x2a   : > { %559 = vperm.xlu1 %1186, %v521_v13   ;;  %v517_v24 = vld [vmem:[%s1657_s2 + $0x18] sm:$0xff]  ;;  %v515_v28 = vld [vmem:[%s1657_s2 + $0x8] sm:$0xff]  ;;  %v514_v29 = vld [vmem:[%s1657_s2] sm:$0xff] }
  0x2b   : > { %503 = vperm.xlu0 %1185, %v465_v15   ;;  %v1193_v30 = vld [vmem:[%s1659_s4 + $0x10] sm:$0xff]   ;;  %v1197_v31 = vld [vmem:[%s1659_s4] sm:$0xff]   ;;  %vm1453_vm5 = vmpackc.low %vm583_vm4, %vm583_vm4 }
  0x2c   : > { %1082 = vmatpush3.bf16.msra.mxu0 %v1188_v9  ;;  %1103 = vmatprep.mubr.msk.bf16.mxu1 %vm654_vm3, %v1193_v30 }
  0x2e   : > { %493 = vperm.xlu1 %1186, %v463_v17  }
  0x2f   : > { %1084 = vmatmul.mubr.msk.bf16.vlgmr.msra.gmra.mxu0 %vm373_vm2, %v1190_v14  ;;  %488 = vperm.xlu0 %1185, %v462_v18  }
  0x30   : > { %1087 = vmatprep.mubr.msk.bf16.mxu0 %vm373_vm2, %v1191_v16 }
  0x32   : > { %549 = vperm.xlu1 %1186, %v519_v19  }
  0x33   : > { %544 = vperm.xlu0 %1185, %v518_v20  }
  0x36   : > { %483 = vperm.xlu1 %1186, %v461_v22  }
  0x37   : > { %1088 = vmatmul.mubr.msk.bf16.gmra.mxu0 %vm373_vm2, %v1192_v21  ;;  %478 = vperm.xlu0 %1185, %v460_v23  }
  0x38   : > { %1099 = vmatprep.mubr.msk.bf16.mxu0 %vm654_vm3, %v1197_v31 }
  0x3a   : > { %539 = vperm.xlu1 %1186, %v517_v24  }
  0x3b   : > { %534 = vperm.xlu0 %1185, %v516_v25  }
  0x3e   : > { %473 = vperm.xlu1 %1186, %v459_v26  }
  0x3f   : > { %468 = vperm.xlu0 %1185, %v458_v27  }
  0x42   : > { %529 = vperm.xlu1 %1186, %v515_v28  }
  0x43   : > { %524 = vperm.xlu0 %1185, %v514_v29  }
  0xa1   : > { %v555_v33 = vpop.permute.xlu1 %554 }
  0xa2   : > { %v499_v32 = vpop.permute.xlu0 %498 }
  0xa5   : > { %v560_v35 = vpop.permute.xlu1 %559 }
  0xa6   : > { %v504_v34 = vpop.permute.xlu0 %503 }
  0xa9   : > { %v494_v37 = vpop.permute.xlu1 %493 }
  0xaa   : > { %v489_v36 = vpop.permute.xlu0 %488 }
  0xad   : > { %v550_v39 = vpop.permute.xlu1 %549 }
  0xae   : > { %v545_v38 = vpop.permute.xlu0 %544 }
  0xb1   : > { %v484_v41 = vpop.permute.xlu1 %483 }
  0xb2   : > { %v479_v40 = vpop.permute.xlu0 %478 }
  0xb5   : > { %v540_v43 = vpop.permute.xlu1 %539 }
  0xb6   : > { %v535_v42 = vpop.permute.xlu0 %534 }
  0xb9   : > { %v474_v50 = vpop.permute.xlu1 %473 }
  0xba   : > { %v469_v45 = vpop.permute.xlu0 %468 }
  0xbd   : > { %v530_v63 = vpop.permute.xlu1 %529 }
  0xbe   : > { %v525_v54 = vpop.permute.xlu0 %524 }
  0xef   : > { %v1085_v46 = vpop.f32.mrf.mxu0 }
  0xf0   : > { %v508_v48 = vmul.f32 %v1085_v46, %v479_v40  ;;  %v1196_v40 = vld [vmem:[%s1659_s4 + $0x28] sm:$0xff]  }
  0xf1   : > { %v427_v51 = vpop.f32.mrf.mxu0 }
  0xf2   : > { %v564_v52 = vadd.f32 %v535_v42, %v508_v48  ;;  %v506_v53 = vmul.f32 %v469_v45, %v427_v51  ;;  %v1200_v42 = vld [vmem:[%s1659_s4 + $0x38] sm:$0xff]  }
  0xf3   : > { %v1086_v56 = vpop.f32.mrf.mxu0 }
  0xf4   : > { %v562_v57 = vadd.f32 %v525_v54, %v506_v53  ;;  %v509_v58 = vmul.f32 %v1086_v56, %v484_v41  ;;  %v572_v60 = vmax.f32 %v564_v52, 0.0  ;;  %v1199_v41 = vld [vmem:[%s1659_s4 + $0x30] sm:$0xff]  }
  0xf5   : > { %v430_v59 = vpop.f32.mrf.mxu0 }
  0xf6   : > { %v565_v61 = vadd.f32 %v540_v43, %v509_v58  ;;  %v507_v62 = vmul.f32 %v474_v50, %v430_v59  ;;  %v570_v1 = vmax.f32 %v562_v57, 0.0  ;;  %v588_v6 = vsel %vm583_vm4, %v572_v60, 0.0 }
  0xf7   : > { %v1089_v0 = vpop.f32.mrf.mxu0 }
  0xf8   : > { %v573_v2 = vmax.f32 %v565_v61, 0.0  ;;  %v563_v3 = vadd.f32 %v530_v63, %v507_v62  ;;  %v512_v4 = vmul.f32 %v1089_v0, %v499_v32  ;;  %v586_v13 = vsel %vm583_vm4, %v570_v1, 0.0 }
  0xf9   : > { %v443_v5 = vpop.f32.mrf.mxu0 }
  0xfa   : > { %v589_v7 = vsel %vm583_vm4, %v573_v2, 0.0  ;;  %v571_v8 = vmax.f32 %v563_v3, 0.0  ;;  %v568_v9 = vadd.f32 %v555_v33, %v512_v4  ;;  %v510_v11 = vmul.f32 %v489_v36, %v443_v5 }
  0xfb   : > { %v1445_v10 = vpack.c.bf16 %v589_v7, %v588_v6  ;;  %v1090_v12 = vpop.f32.mrf.mxu0 }
  0xfc   : > { %v587_v14 = vsel %vm583_vm4, %v571_v8, 0.0  ;;  %v513_v15 = vmul.f32 %v1090_v12, %v504_v34  ;;  %v566_v17 = vadd.f32 %v545_v38, %v510_v11  ;;  %v576_v19 = vmax.f32 %v568_v9, 0.0  ;;  %v1198_v38 = vld [vmem:[%s1659_s4 + $0x8] sm:$0xff]  }
  0xfd   : > { %v1449_v16 = vpack.c.bf16 %v587_v14, %v586_v13  ;;  %v446_v18 = vpop.f32.mrf.mxu0  ;;  %v1046_v36 = vpack.c.bf16 %v571_v8, %v570_v1 }
  0xfe   : > { %v569_v20 = vadd.f32 %v560_v35, %v513_v15  ;;  %v511_v21 = vmul.f32 %v494_v37, %v446_v18  ;;  %v574_v22 = vmax.f32 %v566_v17, 0.0  ;;  %v592_v26 = vsel %vm583_vm4, %v576_v19, 0.0  ;;  %v1194_v37 = vld [vmem:[%s1659_s4 + $0x18] sm:$0xff]  }
  0xff   : > { %v1043_v35 = vpack.c.bf16 %v573_v2, %v572_v60 }
 0x100   : > { %v577_v23 = vmax.f32 %v569_v20, 0.0  ;;  %v567_v24 = vadd.f32 %v550_v39, %v511_v21  ;;  %v590_v31 = vsel %vm583_vm4, %v574_v22, 0.0  ;;  %v1195_v39 = vld [vmem:[%s1659_s4 + $0x20] sm:$0xff]  }
 0x102   : > { %v593_v27 = vsel %vm583_vm4, %v577_v23, 0.0  ;;  %v1037_v28 = vpack.c.bf16 %v577_v23, %v576_v19  ;;  %v575_v29 = vmax.f32 %v567_v24, 0.0 }
 0x103   : > { %v1459_v30 = vpack.c.bf16 %v593_v27, %v592_v26 }
 0x104   : > { %v591_v32 = vsel %vm583_vm4, %v575_v29, 0.0  ;;  %v1040_v33 = vpack.c.bf16 %v575_v29, %v574_v22  ;;  %1091 = vmatprep.subr.msk.bf16.mxu0 %vm1453_vm5, %v1037_v28  ;;  %1115 = vmatprep.subr.msk.bf16.mxu1 %vm1453_vm5, %v1037_v28 }
 0x105   : > { %v1467_v34 = vpack.c.bf16 %v591_v32, %v590_v31  ;;  %1092 = vmatpush3.bf16.msk.msra.mxu0 %vm1453_vm5, %v1037_v28  ;;  %1119 = vmatpush3.bf16.msk.msra.mxu1 %vm1453_vm5, %v1037_v28 }
 0x106   : > { %1093 = vmatprep.subr.msk.bf16.mxu0 %vm1453_vm5, %v1040_v33  ;;  %1116 = vmatprep.subr.msk.bf16.mxu1 %vm1453_vm5, %v1040_v33 }
 0x109   : > { %1094 = vmatpush3.bf16.msk.msra.mxu0 %vm1453_vm5, %v1040_v33  ;;  %1120 = vmatpush3.bf16.msk.msra.mxu1 %vm1453_vm5, %v1040_v33 }
 0x10a   : > { %1095 = vmatprep.subr.msk.bf16.mxu0 %vm1453_vm5, %v1043_v35  ;;  %1117 = vmatprep.subr.msk.bf16.mxu1 %vm1453_vm5, %v1043_v35 }
 0x10d   : > { %1096 = vmatpush3.bf16.msk.msra.mxu0 %vm1453_vm5, %v1043_v35  ;;  %1121 = vmatpush3.bf16.msk.msra.mxu1 %vm1453_vm5, %v1043_v35 }
 0x10e   : > { %1097 = vmatprep.subr.msk.bf16.mxu0 %vm1453_vm5, %v1046_v36  ;;  %1118 = vmatprep.subr.msk.bf16.mxu1 %vm1453_vm5, %v1046_v36 }
 0x111   : > { %1098 = vmatpush3.bf16.msk.msra.mxu0 %vm1453_vm5, %v1046_v36  ;;  %1122 = vmatpush3.bf16.msk.msra.mxu1 %vm1453_vm5, %v1046_v36 }
 0x114   : > { %1104 = vmatmul.mubr.msk.bf16.vlgmr.msra.gmra.mxu1 %vm654_vm3, %v1194_v37  ;;  %1100 = vmatmul.mubr.msk.bf16.vlgmr.msra.gmra.mxu0 %vm654_vm3, %v1198_v38 }
 0x115   : > { %1107 = vmatprep.mubr.msk.bf16.mxu1 %vm654_vm3, %v1195_v39 }
 0x11c   : > { %1108 = vmatmul.mubr.msk.bf16.gmra.mxu1 %vm654_vm3, %v1196_v40 }
 0x11d   : > { %1111 = vmatprep.mubr.msk.bf16.mxu1 %vm654_vm3, %v1199_v41 }
 0x124   : > { %1112 = vmatmul.mubr.msk.bf16.gmra.mxu1 %vm654_vm3, %v1200_v42 }
 0x1d4   : > { %v1105_v43 = vpop.f32.mrf.mxu1  ;;  %v1101_v44 = vpop.f32.mrf.mxu0 }
 0x1d6   : > { %v729_v45 = vpop.f32.mrf.mxu1  ;;  %v713_v46 = vpop.f32.mrf.mxu0 }
 0x1d8   : > { %v1106_v47 = vpop.f32.mrf.mxu1  ;;  %v1102_v48 = vpop.f32.mrf.mxu0 }
 0x1da   : > { %v732_v49 = vpop.f32.mrf.mxu1  ;;  %v716_v50 = vpop.f32.mrf.mxu0 }
 0x1dc   : > { %v1521_v51 = vpop.f32.mrf.mxu1 }
 0x1de   : > { %v1523_v52 = vpop.f32.mrf.mxu1 }
 0x1e0   : > { %v1525_v53 = vpop.f32.mrf.mxu1 }
 0x1e2   : > { %v1527_v54 = vpop.f32.mrf.mxu1 }
 0x1e4   : > { %v1529_v55 = vpop.f32.mrf.mxu1 }
 0x1e6   : > { %v1531_v56 = vpop.f32.mrf.mxu1  ;;  %779 = sbr.rel (%p1056_p11) target bundleno = 504 (0x1f8), region = 85 }
 0x1e8   : > { %v1533_v57 = vpop.f32.mrf.mxu1 }
 0x1ea   : > { %v1535_v58 = vpop.f32.mrf.mxu1 }
 0x1eb   : > { %v1259_v59 = vmov 0.0  }
 0x1ec   : > { %780 = vst [vmem:[%s1367_s14] sm:$0xff] %v1259_v59  ;;  %781 = vst [vmem:[%s1367_s14 + $0x8] sm:$0xff] %v1259_v59 }
 0x1ed   : > { %782 = vst [vmem:[%s1367_s14 + $0x10] sm:$0xff] %v1259_v59  ;;  %783 = vst [vmem:[%s1367_s14 + $0x18] sm:$0xff] %v1259_v59 }
 0x1ee   : > { %784 = vst [vmem:[%s1367_s14 + $0x20] sm:$0xff] %v1259_v59  ;;  %785 = vst [vmem:[%s1367_s14 + $0x28] sm:$0xff] %v1259_v59 }
 0x1ef   : > { %786 = vst [vmem:[%s1367_s14 + $0x30] sm:$0xff] %v1259_v59  ;;  %787 = vst [vmem:[%s1367_s14 + $0x38] sm:$0xff] %v1259_v59 }
 0x1f0   : > { %788 = vst [vmem:[%s1367_s14 + $0x40] sm:$0xff] %v1259_v59  ;;  %789 = vst [vmem:[%s1367_s14 + $0x48] sm:$0xff] %v1259_v59 }
 0x1f1   : > { %790 = vst [vmem:[%s1367_s14 + $0x50] sm:$0xff] %v1259_v59  ;;  %791 = vst [vmem:[%s1367_s14 + $0x58] sm:$0xff] %v1259_v59 }
 0x1f2   : > { %792 = vst [vmem:[%s1367_s14 + $0x60] sm:$0xff] %v1259_v59  ;;  %793 = vst [vmem:[%s1367_s14 + $0x68] sm:$0xff] %v1259_v59 }
 0x1f3   : > { %794 = vst [vmem:[%s1367_s14 + $0x70] sm:$0xff] %v1259_v59  ;;  %795 = vst [vmem:[%s1367_s14 + $0x78] sm:$0xff] %v1259_v59 }
 0x1f4   : > { %796 = vst [vmem:[%s1372_s17] sm:$0xff] %v1259_v59  ;;  %797 = vst [vmem:[%s1372_s17 + $0x8] sm:$0xff] %v1259_v59 }
 0x1f5   : > { %798 = vst [vmem:[%s1372_s17 + $0x10] sm:$0xff] %v1259_v59  ;;  %799 = vst [vmem:[%s1372_s17 + $0x18] sm:$0xff] %v1259_v59 }
 0x1f6   : > { %800 = vst [vmem:[%s1372_s17 + $0x20] sm:$0xff] %v1259_v59  ;;  %801 = vst [vmem:[%s1372_s17 + $0x28] sm:$0xff] %v1259_v59 }
 0x1f7   : > { %802 = vst [vmem:[%s1372_s17 + $0x30] sm:$0xff] %v1259_v59  ;;  %803 = vst [vmem:[%s1372_s17 + $0x38] sm:$0xff] %v1259_v59 }
 0x1f8 PF: > { %v804_v60 = vld [vmem:[%s1367_s14] sm:$0xff]  ;;  %v836_v61 = vmul.f32 %v713_v46, %v713_v46  ;;  %v805_v62 = vld [vmem:[%s1367_s14 + $0x8] sm:$0xff]  ;;  %v837_v63 = vmul.f32 %v716_v50, %v716_v50  ;;  %v806_v0 = vld [vmem:[%s1367_s14 + $0x10] sm:$0xff]  ;;  %v838_v1 = vmul.f32 %v1101_v44, %v1101_v44  ;;  %v839_v2 = vmul.f32 %v1102_v48, %v1102_v48 }
 0x1f9   : > { %v807_v3 = vld [vmem:[%s1367_s14 + $0x18] sm:$0xff]  ;;  %v808_v4 = vld [vmem:[%s1367_s14 + $0x20] sm:$0xff]  ;;  %v840_v5 = vmul.f32 %v729_v45, %v729_v45  ;;  %v809_v6 = vld [vmem:[%s1367_s14 + $0x28] sm:$0xff]  ;;  %v841_v7 = vmul.f32 %v732_v49, %v732_v49  ;;  %v842_v8 = vmul.f32 %v1105_v43, %v1105_v43  ;;  %v843_v9 = vmul.f32 %v1106_v47, %v1106_v47 }
 0x1fa   : > { %v852_v11 = vadd.f32 %v836_v61, %v804_v60  ;;  %v853_v12 = vadd.f32 %v837_v63, %v805_v62  ;;  %v854_v13 = vadd.f32 %v838_v1, %v806_v0  ;;  %v855_v14 = vadd.f32 %v839_v2, %v807_v3  ;;  %v810_v15 = vld [vmem:[%s1367_s14 + $0x30] sm:$0xff]  ;;  %v811_v17 = vld [vmem:[%s1367_s14 + $0x38] sm:$0xff]  ;;  %v812_v18 = vld [vmem:[%s1367_s14 + $0x40] sm:$0xff] }
 0x1fb   : > { %v856_v19 = vadd.f32 %v840_v5, %v808_v4  ;;  %v857_v20 = vadd.f32 %v841_v7, %v809_v6  ;;  %v858_v21 = vadd.f32 %v842_v8, %v810_v15  ;;  %v859_v22 = vadd.f32 %v843_v9, %v811_v17  ;;  %v813_v23 = vld [vmem:[%s1367_s14 + $0x48] sm:$0xff]  ;;  %v814_v24 = vld [vmem:[%s1367_s14 + $0x50] sm:$0xff]  ;;  %v815_v25 = vld [vmem:[%s1367_s14 + $0x58] sm:$0xff] }
 0x1fc   : > { %876 = vst [vmem:[%s1367_s14] sm:$0xff] %v852_v11  ;;  %877 = vst [vmem:[%s1367_s14 + $0x8] sm:$0xff] %v853_v12  ;;  %v844_v26 = vmul.f32 %v1523_v52, %v1523_v52  ;;  %v845_v27 = vmul.f32 %v1527_v54, %v1527_v54  ;;  %v846_v28 = vmul.f32 %v1521_v51, %v1521_v51  ;;  %v816_v31 = vld [vmem:[%s1367_s14 + $0x60] sm:$0xff]  ;;  %v817_v32 = vld [vmem:[%s1367_s14 + $0x68] sm:$0xff]  ;;  %v829_v54 = vunpack.c.h.bf16 %v1449_v16 }
 0x1fd   : > { %878 = vst [vmem:[%s1367_s14 + $0x10] sm:$0xff] %v854_v13  ;;  %879 = vst [vmem:[%s1367_s14 + $0x18] sm:$0xff] %v855_v14  ;;  %v847_v29 = vmul.f32 %v1525_v53, %v1525_v53  ;;  %v818_v33 = vld [vmem:[%s1367_s14 + $0x70] sm:$0xff]  ;;  %v848_v35 = vmul.f32 %v1531_v56, %v1531_v56  ;;  %v849_v36 = vmul.f32 %v1535_v58, %v1535_v58  ;;  %v819_v38 = vld [vmem:[%s1367_s14 + $0x78] sm:$0xff]  ;;  %v828_v53 = vunpack.c.l.bf16 %v1449_v16 }
 0x1fe   : > { %880 = vst [vmem:[%s1367_s14 + $0x20] sm:$0xff] %v856_v19  ;;  %881 = vst [vmem:[%s1367_s14 + $0x28] sm:$0xff] %v857_v20  ;;  %v850_v37 = vmul.f32 %v1529_v55, %v1529_v55  ;;  %v851_v39 = vmul.f32 %v1533_v57, %v1533_v57  ;;  %v860_v40 = vadd.f32 %v844_v26, %v812_v18  ;;  %v820_v44 = vld [vmem:[%s1372_s17] sm:$0xff]  ;;  %v821_v45 = vld [vmem:[%s1372_s17 + $0x8] sm:$0xff]  ;;  %v830_v55 = vunpack.c.l.bf16 %v1445_v10 }
 0x1ff   : > { %882 = vst [vmem:[%s1367_s14 + $0x30] sm:$0xff] %v858_v21  ;;  %883 = vst [vmem:[%s1367_s14 + $0x38] sm:$0xff] %v859_v22  ;;  %v861_v41 = vadd.f32 %v845_v27, %v813_v23  ;;  %v862_v42 = vadd.f32 %v846_v28, %v814_v24  ;;  %v863_v43 = vadd.f32 %v847_v29, %v815_v25  ;;  %v822_v50 = vld [vmem:[%s1372_s17 + $0x10] sm:$0xff]  ;;  %v823_v51 = vld [vmem:[%s1372_s17 + $0x18] sm:$0xff]  ;;  %v831_v56 = vunpack.c.h.bf16 %v1445_v10 }
 0x200   : > { %v864_v46 = vadd.f32 %v848_v35, %v816_v31  ;;  %v865_v47 = vadd.f32 %v849_v36, %v817_v32  ;;  %v866_v48 = vadd.f32 %v850_v37, %v818_v33  ;;  %v867_v49 = vadd.f32 %v851_v39, %v819_v38  ;;  %v824_v52 = vld [vmem:[%s1372_s17 + $0x20] sm:$0xff]  ;;  %884 = vst [vmem:[%s1367_s14 + $0x40] sm:$0xff] %v860_v40  ;;  %v825_v57 = vld [vmem:[%s1372_s17 + $0x28] sm:$0xff]  ;;  %v826_v58 = vld [vmem:[%s1372_s17 + $0x30] sm:$0xff] }
 0x201   : > { %885 = vst [vmem:[%s1367_s14 + $0x48] sm:$0xff] %v861_v41  ;;  %886 = vst [vmem:[%s1367_s14 + $0x50] sm:$0xff] %v862_v42  ;;  %v827_v59 = vld [vmem:[%s1372_s17 + $0x38] sm:$0xff]  ;;  %v832_v60 = vunpack.c.l.bf16 %v1467_v34  ;;  %v833_v16 = vunpack.c.h.bf16 %v1467_v34  ;;  %v834_v61 = vunpack.c.l.bf16 %v1459_v30  ;;  %v835_v10 = vunpack.c.h.bf16 %v1459_v30 }
 0x202   : > { %887 = vst [vmem:[%s1367_s14 + $0x58] sm:$0xff] %v863_v43  ;;  %888 = vst [vmem:[%s1367_s14 + $0x60] sm:$0xff] %v864_v46  ;;  %v868_v62 = vadd.f32 %v828_v53, %v820_v44  ;;  %v869_v63 = vadd.f32 %v829_v54, %v821_v45  ;;  %v870_v0 = vadd.f32 %v830_v55, %v822_v50 }
 0x203   : > { %889 = vst [vmem:[%s1367_s14 + $0x68] sm:$0xff] %v865_v47  ;;  %890 = vst [vmem:[%s1367_s14 + $0x70] sm:$0xff] %v866_v48  ;;  %v871_v1 = vadd.f32 %v831_v56, %v823_v51  ;;  %v872_v2 = vadd.f32 %v832_v60, %v824_v52  ;;  %v873_v3 = vadd.f32 %v833_v16, %v825_v57 }
 0x204   : > { %891 = vst [vmem:[%s1367_s14 + $0x78] sm:$0xff] %v867_v49  ;;  %v874_v4 = vadd.f32 %v834_v61, %v826_v58  ;;  %v875_v5 = vadd.f32 %v835_v10, %v827_v59  ;;  %892 = vst [vmem:[%s1372_s17] sm:$0xff] %v868_v62 }
 0x205   : > { %893 = vst [vmem:[%s1372_s17 + $0x8] sm:$0xff] %v869_v63  ;;  %894 = vst [vmem:[%s1372_s17 + $0x10] sm:$0xff] %v870_v0 }
 0x206   : > { %895 = vst [vmem:[%s1372_s17 + $0x18] sm:$0xff] %v871_v1  ;;  %896 = vst [vmem:[%s1372_s17 + $0x20] sm:$0xff] %v872_v2 }
 0x207   : > { %897 = vst [vmem:[%s1372_s17 + $0x28] sm:$0xff] %v873_v3  ;;  %898 = vst [vmem:[%s1372_s17 + $0x30] sm:$0xff] %v874_v4 }
 0x208   : > { %899 = vst [vmem:[%s1372_s17 + $0x38] sm:$0xff] %v875_v5 }
 0x209 PF: > { %s17_s27 = sadd.s32 1, %s1255_s27   ;;  %s1664_s21 = smov %s1235_s22 }
 0x20a   : > { %p14_p12 = scmp.ge.s32.totalorder %s17_s27, 14   ;;  %s1665_s22 = smov %s1346_s10 }
 0x20b   : > { %s1666_s23 = smov %s1247_s25  ;;  %s1667_s24 = smov %s1251_s26 }
 0x20c   : > { %s1668_s25 = smov %s1671_s28  ;;  %s1669_s26 = smov %s1675_s29 }
 0x20d   :  { %16 = sbr.rel (!%p14_p12) target bundleno = 4 (0x4), region = 132 }

// kernel: stnkd_forward.6
= control target key start
LH: loop header
LB: loop body
LE: loop exit
PB: predicated region body
PF: predicated region fallthrough
CT: control target
= control target key end

     0   :  { %s8726_s0 = inlined_call_operand.vmem [shape: bf16[4,19,384], index: 0, kind: input, shape index: {}]   ;;  %s8727_s1 = inlined_call_operand.vmem [shape: f32[64,1], index: 1, kind: input, shape index: {}]   ;;  %s8728_s2 = inlined_call_operand.vmem [shape: f32[64,1], index: 2, kind: input, shape index: {}]   ;;  %s8729_s3 = inlined_call_operand.vmem [shape: f32[128,1], index: 3, kind: input, shape index: {}]   ;;  %s8730_s4 = inlined_call_operand.vmem [shape: f32[128,1], index: 4, kind: input, shape index: {}]   ;;  %s8731_s5 = inlined_call_operand.vmem [shape: bf16[64,19], index: 5, kind: input, shape index: {}]   ;;  %s8732_s6 = inlined_call_operand.vmem [shape: bf16[128,64], index: 6, kind: input, shape index: {}]   ;;  %s8733_s7 = inlined_call_operand.vmem [shape: bf16[1024,128], index: 7, kind: input, shape index: {}]   ;;  %s8734_s8 = inlined_call_operand.vmem [shape: f32[4,1024,128], index: 8, kind: output, shape index: {0}]   ;;  %s8735_s9 = inlined_call_operand.vmem [shape: f32[4,128,128], index: 9, kind: output, shape index: {1}]   ;;  %s8736_s10 = inlined_call_operand.vmem [shape: f32[4,1024,128], index: 10, kind: output, shape index: {2}]   ;;  %s8737_s11 = inlined_call_operand.vmem [shape: f32[4,1024,128], index: 11, kind: output, shape index: {3}]  }
   0x1   :  { %8857 = sst [smem:[#allocation109_spill]] %s8726_s0 }
   0x2   :  { %8858 = sst [smem:[#allocation110_spill]] %s8734_s8 }
   0x3   :  { %8859 = sst [smem:[#allocation111_spill]] %s8735_s9 }
   0x4   :  { %s5112_s17 = smov 0   ;;  %s5114_s18 = smov 0  }
   0x5   :  { %s5116_s19 = smov 0   ;;  %s5118_s20 = smov 0  }
   0x6   :  { %s5120_s21 = smov 0   ;;  %s5122_s22 = smov 0  }
   0x7   :  { %s5124_s23 = smov 0  }
   0x8 LB: > { %8860 = sst [smem:[#allocation3_spill]] %s5029_s19  ;;  %s31_s24 = sadd.s32 1, %s5037_s21  ;;  %s5045_s23 = sphi %s5124_s23, %s22_s23   ;;  %s5041_s22 = sphi %s5122_s22, %s9251_s22   ;;  %s5037_s21 = sphi %s5120_s21, %s9250_s21   ;;  %s5033_s20 = sphi %s5118_s20, %s9249_s20   ;;  %s5029_s19 = sphi %s5116_s19, %s9248_s19   ;;  %s5025_s18 = sphi %s5114_s18, %s9247_s18   ;;  %s5021_s17 = sphi %s5112_s17, %s9246_s17  }
   0x9   : > { %p32_p0 = scmp.ge.s32.totalorder %s31_s24, 3  ;;  %s34_s25 = sadd.s32 1, %s5041_s22 }
   0xa   : > { %p50_p1 = scmp.ne.s32.totalorder %s5025_s18, %s5021_s17  ;;  %p51_p2 = scmp.eq.s32.totalorder %s5045_s23, 0 }
   0xb   : > { %s9253_s24 = smov (%p32_p0, %s31_s24), 0  ;;  %s9255_s25 = smov (!%p32_p0, %s34_s25), %s5041_s22 }
   0xc   : > { %8861 = sst [smem:[#allocation4_spill]] %s9253_s24  ;;  %p52_p3 = por %p51_p2, %p50_p1 }
   0xd   : > { %p36_p4 = scmp.ge.s32.totalorder %s9255_s25, 4  ;;  %s39_s26 = ssub.s32 %s5037_s21, %s9253_s24 }
   0xe   : > { %s43_s29 = sadd.s32 1, %s5025_s18  ;;  %p4428_p6 = scmp.ge.s32.totalorder %s5045_s23, 12 }
   0xf   : > { %s9257_s25 = smov (%p36_p4, %s9255_s25), 0 }
  0x10   : > { %s38_s27 = ssub.s32 %s5041_s22, %s9257_s25  ;;  %348 = sbr.rel (%p4428_p6) target bundleno = 32 (0x20), region = 44 }
  0x11   : > { %s40_s28 = sor.u32 %s39_s26, %s38_s27 }
  0x12   : > { %p41_p5 = scmp.eq.s32.totalorder %s40_s28, 0 }
  0x14   : > { %s5163_s30 = scalar_select %p41_p5, %s5025_s18, %s43_s29  }
  0x15   : > { %351 = sbr.rel (!%p52_p3) target bundleno = 32 (0x20), region = 48  ;;  %s353_s12 = sand.u32 (%p52_p3), 1, %s5025_s18  }
  0x16   : > { %s4848_s13 = smul.u32 (%p52_p3), 9, %s5041_s22  ;;  %s8862_s0 = sld [smem:[#allocation109_spill]] (%p52_p3) }
  0x17   : > { %s4847_s14 = smul.u32 (%p52_p3), 12, %s353_s12 }
  0x18   : > { %s357_s15 = sadd.s32 (%p52_p3), %s5037_s21, %s4848_s13 }
  0x19   : > { %s4429_s16 = sshll.u32 (%p52_p3), %s357_s15, 2  ;;  %s355_s27 = scalar_lea.vmem (%p52_p3), [#allocation2], %s4847_s14 }
  0x1c   : > { %s359_s26 = scalar_lea.vmem %s8862_s0, %s4429_s16 }
  0x1d   : > { %v376_v0 = vld [vmem:[%s359_s26] sm:$0xf]  ;;  %v378_v1 = vld [vmem:[%s359_s26 + $0xc] sm:$0xf]  ;;  %v380_v2 = vld [vmem:[%s359_s26 + $0x18] sm:$0xf] }
  0x1e   : > { %377 = vst [vmem:[%s355_s27] sm:$0xf] %v376_v0  ;;  %379 = vst [vmem:[%s355_s27 + $0x4] sm:$0xf] %v378_v1 }
  0x1f   : > { %381 = vst [vmem:[%s355_s27 + $0x8] sm:$0xf] %v380_v2 }
  0x20 PF: > { %p4430_p7 = scmp.ge.s32.totalorder %s5045_s23, 1  ;;  %p410_p8 = scmp.lt.s32.totalorder %s5045_s23, 13 }
  0x22   : > { %p411_p9 = pnand %p4430_p7, %p410_p8 }
  0x24   : > { %414 = sbr.rel (%p411_p9) target bundleno = 1356 (0x54c), region = 89 }
  0x29   : > { %v679_v3 = vld [vmem:[%s8728_s2 + $0x30] sm:$0xff]  ;;  %s417_s12 = sand.u32 1, %s5021_s17   ;;  %p471_p10 = scmp.lt.s32.totalorder %s5033_s20, 3  ;;  %v5047_v5 = vmov 0   ;;  %vm545_vm0 = vcmask 1040384   ;;  %vm546_vm1 = vcmask 1041408  }
  0x2a   : > { %v623_v4 = vld [vmem:[%s8727_s1 + $0x30] sm:$0xff]  ;;  %4912 = vset.pattern.permute.xlu1 %v5047_v5  ;;  %4911 = vset.pattern.permute.xlu0 %v5047_v5  ;;  %s4849_s13 = smul.u32 12, %s417_s12  ;;  %v680_v6 = vld [vmem:[%s8728_s2 + $0x38] sm:$0xff]  ;;  %v5048_v8 = vmov 65535   ;;  %s8863_s8 = sld [smem:[#allocation110_spill]]  ;;  %vm532_vm2 = vcmask 154624  }
  0x2b   : > { %713 = vperm.xlu1 %4912, %v679_v3   ;;  %657 = vperm.xlu0 %4911, %v623_v4   ;;  %v624_v7 = vld [vmem:[%s8727_s1 + $0x38] sm:$0xff]  ;;  %s9259_s20 = smov (!%p471_p10, %s5033_s20), 3  ;;  %v547_v9 = vsel %vm545_vm0, 4294967295, %v5048_v8  ;;  %s8864_s9 = sld [smem:[#allocation111_spill]]  ;;  %v4915_v12 = vld [vmem:[%s8731_s5] sm:$0xff]   ;;  %v622_v14 = vld [vmem:[%s8727_s1 + $0x28] sm:$0xff] }
  0x2c   : > { %v548_v10 = vsel %vm546_vm1, %v547_v9, 0  ;;  %s4557_s17 = sshll.u32 %s9259_s20, 10  ;;  %s4558_s27 = sshll.u32 %s9259_s20, 7  ;;  %v621_v15 = vld [vmem:[%s8727_s1 + $0x20] sm:$0xff]  ;;  %4655 = vmatprep.mubr.msk.bf16.mxu0 %vm532_vm2, %v4915_v12  ;;  %v678_v17 = vld [vmem:[%s8728_s2 + $0x28] sm:$0xff]  ;;  %v620_v20 = vld [vmem:[%s8727_s1 + $0x18] sm:$0xff] }
  0x2d   : > { %s419_s28 = scalar_lea.vmem [#allocation2], %s4849_s13  ;;  %s5202_s26 = scalar_lea.vmem %s8736_s10, %s4557_s17  ;;  %v677_v18 = vld [vmem:[%s8728_s2 + $0x20] sm:$0xff]  ;;  %v4916_v19 = vld [vmem:[%s8731_s5 + $0x8] sm:$0xff]   ;;  %v4917_v21 = vld [vmem:[%s8731_s5 + $0x10] sm:$0xff]   ;;  %vm797_vm3 = vcmask 523264  }
  0x2e   : > { %v4913_v11 = vld [vmem:[%s419_s28 + $0x8] ss:$0 sps:$4 sm:$0x33]   ;;  %s5207_s29 = scalar_lea.vmem %s8737_s11, %s4557_s17  ;;  %v4914_v16 = vld [vmem:[%s419_s28] sm:$0xff]   ;;  %v676_v23 = vld [vmem:[%s8728_s2 + $0x18] sm:$0xff] }
  0x2f   : > { %718 = vperm.xlu1 %4912, %v680_v6   ;;  %662 = vperm.xlu0 %4911, %v624_v7   ;;  %v550_v13 = vand.u32 %v4913_v11, %v548_v10  ;;  %v619_v22 = vld [vmem:[%s8727_s1 + $0x10] sm:$0xff]  ;;  %v4918_v25 = vld [vmem:[%s8731_s5 + $0x18] sm:$0xff]   ;;  %v618_v26 = vld [vmem:[%s8727_s1 + $0x8] sm:$0xff] }
  0x30   : > { %s5192_s24 = scalar_lea.vmem %s8863_s8, %s4557_s17  ;;  %v675_v24 = vld [vmem:[%s8728_s2 + $0x10] sm:$0xff]  ;;  %v617_v27 = vld [vmem:[%s8727_s1] sm:$0xff]  ;;  %v674_v28 = vld [vmem:[%s8728_s2 + $0x8] sm:$0xff]  ;;  %s8865_s8 = sld [smem:[#allocation3_spill]] }
  0x31   : > { %s5197_s14 = scalar_lea.vmem %s8864_s9, %s4558_s27  ;;  %4651 = vmatprep.subr.bf16.mxu0 %v550_v13  ;;  %v673_v29 = vld [vmem:[%s8728_s2] sm:$0xff]  ;;  %v934_v30 = vld [vmem:[%s8729_s3 + $0x78] sm:$0xff]  ;;  %v933_v31 = vld [vmem:[%s8729_s3 + $0x70] sm:$0xff] }
  0x32   : > { %4652 = vmatpush3.bf16.msra.mxu0 %v550_v13  ;;  %v1046_v32 = vld [vmem:[%s8730_s4 + $0x78] sm:$0xff]  ;;  %v1045_v33 = vld [vmem:[%s8730_s4 + $0x70] sm:$0xff]  ;;  %v932_v34 = vld [vmem:[%s8729_s3 + $0x68] sm:$0xff] }
  0x33   : > { %652 = vperm.xlu1 %4912, %v622_v14   ;;  %647 = vperm.xlu0 %4911, %v621_v15   ;;  %v931_v35 = vld [vmem:[%s8729_s3 + $0x60] sm:$0xff]  ;;  %v1044_v36 = vld [vmem:[%s8730_s4 + $0x68] sm:$0xff]  ;;  %v930_v38 = vld [vmem:[%s8729_s3 + $0x58] sm:$0xff] }
  0x34   : > { %4653 = vmatprep.subr.bf16.mxu0 %v4914_v16  ;;  %v1043_v37 = vld [vmem:[%s8730_s4 + $0x60] sm:$0xff]  ;;  %v929_v39 = vld [vmem:[%s8729_s3 + $0x50] sm:$0xff]  ;;  %v1042_v40 = vld [vmem:[%s8730_s4 + $0x58] sm:$0xff] }
  0x35   : > { %v1041_v41 = vld [vmem:[%s8730_s4 + $0x50] sm:$0xff]  ;;  %v928_v42 = vld [vmem:[%s8729_s3 + $0x48] sm:$0xff]  ;;  %v927_v43 = vld [vmem:[%s8729_s3 + $0x40] sm:$0xff] }
  0x36   : > { %4654 = vmatpush3.bf16.msra.mxu0 %v4914_v16  ;;  %v1040_v44 = vld [vmem:[%s8730_s4 + $0x48] sm:$0xff]  ;;  %v1039_v45 = vld [vmem:[%s8730_s4 + $0x40] sm:$0xff]  ;;  %v926_v46 = vld [vmem:[%s8729_s3 + $0x38] sm:$0xff]  ;;  %s4465_s16 = sshll.u32 %s8865_s8, 7  ;;  %p4554_p11 = scmp.ne.s32.totalorder %s8865_s8, 0 }
  0x37   : > { %708 = vperm.xlu1 %4912, %v678_v17   ;;  %703 = vperm.xlu0 %4911, %v677_v18   ;;  %v925_v47 = vld [vmem:[%s8729_s3 + $0x30] sm:$0xff]  ;;  %v1038_v48 = vld [vmem:[%s8730_s4 + $0x38] sm:$0xff]  ;;  %v924_v50 = vld [vmem:[%s8729_s3 + $0x28] sm:$0xff] }
  0x38   : > { %v1037_v49 = vld [vmem:[%s8730_s4 + $0x30] sm:$0xff]  ;;  %v923_v51 = vld [vmem:[%s8729_s3 + $0x20] sm:$0xff]  ;;  %v1036_v52 = vld [vmem:[%s8730_s4 + $0x28] sm:$0xff] }
  0x39   : > { %4656 = vmatmul.mubr.msk.bf16.vlgmr.msra.gmra.mxu0 %vm532_vm2, %v4916_v19  ;;  %v1035_v53 = vld [vmem:[%s8730_s4 + $0x20] sm:$0xff]  ;;  %v922_v54 = vld [vmem:[%s8729_s3 + $0x18] sm:$0xff]  ;;  %v921_v55 = vld [vmem:[%s8729_s3 + $0x10] sm:$0xff] }
  0x3a   : > { %4659 = vmatprep.mubr.msk.bf16.mxu0 %vm532_vm2, %v4917_v21  ;;  %v1034_v56 = vld [vmem:[%s8730_s4 + $0x18] sm:$0xff]  ;;  %v1033_v57 = vld [vmem:[%s8730_s4 + $0x10] sm:$0xff]  ;;  %v920_v58 = vld [vmem:[%s8729_s3 + $0x8] sm:$0xff] }
  0x3b   : > { %642 = vperm.xlu1 %4912, %v620_v20   ;;  %637 = vperm.xlu0 %4911, %v619_v22   ;;  %v919_v59 = vld [vmem:[%s8729_s3] sm:$0xff]  ;;  %v1032_v60 = vld [vmem:[%s8730_s4 + $0x8] sm:$0xff] }
  0x3c   : > { %v1031_v61 = vld [vmem:[%s8730_s4] sm:$0xff] }
  0x3d   : > { %v4919_v62 = vld [vmem:[%s8732_s6] sm:$0xff]  }
  0x3e   : > { %4671 = vmatprep.mubr.msk.bf16.mxu1 %vm797_vm3, %v4919_v62 }
  0x3f   : > { %698 = vperm.xlu1 %4912, %v676_v23   ;;  %693 = vperm.xlu0 %4911, %v675_v24  }
  0x41   : > { %4660 = vmatmul.mubr.msk.bf16.gmra.mxu0 %vm532_vm2, %v4918_v25 }
  0x43   : > { %632 = vperm.xlu1 %4912, %v618_v26   ;;  %627 = vperm.xlu0 %4911, %v617_v27  }
  0x47   : > { %688 = vperm.xlu1 %4912, %v674_v28   ;;  %683 = vperm.xlu0 %4911, %v673_v29  }
  0x4b   : > { %1012 = vperm.xlu1 %4912, %v934_v30   ;;  %1007 = vperm.xlu0 %4911, %v933_v31  }
  0x4f   : > { %1124 = vperm.xlu1 %4912, %v1046_v32   ;;  %1119 = vperm.xlu0 %4911, %v1045_v33  }
  0x53   : > { %1002 = vperm.xlu1 %4912, %v932_v34   ;;  %997 = vperm.xlu0 %4911, %v931_v35  }
  0x57   : > { %1114 = vperm.xlu1 %4912, %v1044_v36   ;;  %1109 = vperm.xlu0 %4911, %v1043_v37  }
  0x5b   : > { %992 = vperm.xlu1 %4912, %v930_v38   ;;  %987 = vperm.xlu0 %4911, %v929_v39  }
  0x5f   : > { %1104 = vperm.xlu1 %4912, %v1042_v40   ;;  %1099 = vperm.xlu0 %4911, %v1041_v41  }
  0x63   : > { %982 = vperm.xlu1 %4912, %v928_v42   ;;  %977 = vperm.xlu0 %4911, %v927_v43  }
  0x67   : > { %1094 = vperm.xlu1 %4912, %v1040_v44   ;;  %1089 = vperm.xlu0 %4911, %v1039_v45  }
  0x6b   : > { %972 = vperm.xlu1 %4912, %v926_v46   ;;  %967 = vperm.xlu0 %4911, %v925_v47  }
  0x6f   : > { %1084 = vperm.xlu1 %4912, %v1038_v48   ;;  %1079 = vperm.xlu0 %4911, %v1037_v49  }
  0x73   : > { %962 = vperm.xlu1 %4912, %v924_v50   ;;  %957 = vperm.xlu0 %4911, %v923_v51   ;;  %v4920_v51 = vld [vmem:[%s8732_s6 + $0x8] sm:$0xff]  }
  0x77   : > { %1074 = vperm.xlu1 %4912, %v1036_v52   ;;  %1069 = vperm.xlu0 %4911, %v1035_v53   ;;  %v4921_v52 = vld [vmem:[%s8732_s6 + $0x10] sm:$0xff]   ;;  %v4922_v53 = vld [vmem:[%s8732_s6 + $0x18] sm:$0xff]  }
  0x7b   : > { %952 = vperm.xlu1 %4912, %v922_v54   ;;  %947 = vperm.xlu0 %4911, %v921_v55   ;;  %v4923_v54 = vld [vmem:[%s8732_s6 + $0x20] sm:$0xff]   ;;  %v4924_v55 = vld [vmem:[%s8732_s6 + $0x28] sm:$0xff]  }
  0x7f   : > { %1064 = vperm.xlu1 %4912, %v1034_v56   ;;  %1059 = vperm.xlu0 %4911, %v1033_v57   ;;  %v4925_v56 = vld [vmem:[%s8732_s6 + $0x30] sm:$0xff]   ;;  %v4926_v57 = vld [vmem:[%s8732_s6 + $0x38] sm:$0xff]  }
  0x83   : > { %942 = vperm.xlu1 %4912, %v920_v58   ;;  %937 = vperm.xlu0 %4911, %v919_v59  }
  0x87   : > { %1054 = vperm.xlu1 %4912, %v1032_v60   ;;  %1049 = vperm.xlu0 %4911, %v1031_v61  }
  0xa6   : > { %v714_v63 = vpop.permute.xlu1 %713  ;;  %v658_v0 = vpop.permute.xlu0 %657 }
  0xaa   : > { %v719_v1 = vpop.permute.xlu1 %718  ;;  %v663_v2 = vpop.permute.xlu0 %662 }
  0xae   : > { %v653_v3 = vpop.permute.xlu1 %652  ;;  %v648_v4 = vpop.permute.xlu0 %647 }
  0xb2   : > { %v709_v5 = vpop.permute.xlu1 %708  ;;  %v704_v6 = vpop.permute.xlu0 %703 }
  0xb6   : > { %v643_v8 = vpop.permute.xlu1 %642  ;;  %v638_v10 = vpop.permute.xlu0 %637 }
  0xba   : > { %v699_v13 = vpop.permute.xlu1 %698  ;;  %v694_v16 = vpop.permute.xlu0 %693 }
  0xbe   : > { %v633_v23 = vpop.permute.xlu1 %632  ;;  %v628_v29 = vpop.permute.xlu0 %627 }
  0xc2   : > { %v689_v40 = vpop.permute.xlu1 %688  ;;  %v684_v44 = vpop.permute.xlu0 %683 }
  0xc6   : > { %v5389_v58 = vpop.permute.xlu0 %1007  ;;  %v5391_v59 = vpop.permute.xlu1 %1012 }
  0xca   : > { %v5393_v60 = vpop.permute.xlu0 %1119  ;;  %v5395_v61 = vpop.permute.xlu1 %1124 }
  0xce   : > { %v5397_v62 = vpop.permute.xlu0 %997 }
  0xf9   : > { %v4657_v7 = vpop.f32.mrf.mxu0 }
  0xfa   : > { %v667_v24 = vmul.f32 %v4657_v7, %v638_v10  ;;  %v4931_v7 = vld [vmem:[%s8733_s7 + $0x110] sm:$0xff]  }
  0xfb   : > { %v586_v9 = vpop.f32.mrf.mxu0 }
  0xfc   : > { %v723_v35 = vadd.f32 %v694_v16, %v667_v24  ;;  %v665_v36 = vmul.f32 %v628_v29, %v586_v9  ;;  %v1160_v24 = vlaneseq  ;;  %v1162_v29 = vstv %s4465_s16 }
  0xfd   : > { %v4658_v11 = vpop.f32.mrf.mxu0 }
  0xfe   : > { %v668_v19 = vmul.f32 %v4658_v11, %v643_v8  ;;  %v731_v45 = vmax.f32 %v723_v35, 0.0  ;;  %v721_v46 = vadd.f32 %v684_v44, %v665_v36 }
  0xff   : > { %v589_v12 = vpop.f32.mrf.mxu0 }
 0x100   : > { %v724_v30 = vadd.f32 %v699_v13, %v668_v19  ;;  %v666_v31 = vmul.f32 %v633_v23, %v589_v12  ;;  %v729_v49 = vmax.f32 %v721_v46, 0.0 }
 0x101   : > { %v4661_v14 = vpop.f32.mrf.mxu0 }
 0x102   : > { %v671_v15 = vmul.f32 %v4661_v14, %v658_v0  ;;  %v732_v41 = vmax.f32 %v724_v30, 0.0  ;;  %v722_v42 = vadd.f32 %v689_v40, %v666_v31  ;;  %v5401_v0 = vpop.permute.xlu0 %1109 }
 0x103   : > { %v602_v17 = vpop.f32.mrf.mxu0 }
 0x104   : > { %v669_v18 = vmul.f32 %v648_v4, %v602_v17  ;;  %v727_v21 = vadd.f32 %v714_v63, %v671_v15  ;;  %v730_v47 = vmax.f32 %v722_v42, 0.0  ;;  %v754_v48 = vpack.c.bf16 %v732_v41, %v731_v45  ;;  %v5399_v63 = vpop.permute.xlu1 %1002 }
 0x105   : > { %v4662_v20 = vpop.f32.mrf.mxu0 }
 0x106   : > { %v672_v22 = vmul.f32 %v4662_v20, %v663_v2  ;;  %v725_v26 = vadd.f32 %v704_v6, %v669_v18  ;;  %v735_v32 = vmax.f32 %v727_v21, 0.0  ;;  %v753_v50 = vpack.c.bf16 %v730_v47, %v729_v49  ;;  %v5405_v2 = vpop.permute.xlu0 %987 }
 0x107   : > { %v605_v25 = vpop.f32.mrf.mxu0 }
 0x108   : > { %v728_v27 = vadd.f32 %v719_v1, %v672_v22  ;;  %v670_v28 = vmul.f32 %v653_v3, %v605_v25  ;;  %v733_v37 = vmax.f32 %v725_v26, 0.0  ;;  %v5403_v1 = vpop.permute.xlu1 %1114  ;;  %v4927_v3 = vld [vmem:[%s8733_s7] sm:$0xff]  }
 0x109   : > { %4703 = vmatprep.mubr.bf16.mxu0 %v4927_v3 }
 0x10a   : > { %v736_v33 = vmax.f32 %v728_v27, 0.0  ;;  %v726_v34 = vadd.f32 %v709_v5, %v670_v28  ;;  %v5412_v5 = vpop.permute.xlu0 %1099  ;;  %v1161_v27 = vand.u32 127, %v1160_v24 }
 0x10c   : > { %v734_v38 = vmax.f32 %v726_v34, 0.0  ;;  %v756_v39 = vpack.c.bf16 %v736_v33, %v735_v32  ;;  %v5410_v4 = vpop.permute.xlu1 %992  ;;  %v5430_v35 = vadd.s32 %v1162_v29, %v1161_v27 }
 0x10e   : > { %4663 = vmatprep.subr.bf16.mxu1 %v756_v39  ;;  %v755_v43 = vpack.c.bf16 %v734_v38, %v733_v37  ;;  %v5419_v8 = vpop.permute.xlu0 %977  ;;  %8866 = vst [vmem:[#allocation5_spill] sm:$0xff] %v5430_v35  ;;  %vm1164_vm4 = vcmp.lt.s32.totalorder %v5430_v35, 300 }
 0x10f   : > { %4664 = vmatpush3.bf16.msra.mxu1 %v756_v39  ;;  %vm5526_vm5 = vmpackc.low %vm1164_vm4, %vm1164_vm4 }
 0x110   : > { %4665 = vmatprep.subr.bf16.mxu1 %v755_v43  ;;  %v5414_v6 = vpop.permute.xlu1 %1104 }
 0x112   : > { %v5423_v10 = vpop.permute.xlu0 %1089 }
 0x113   : > { %4666 = vmatpush3.bf16.msra.mxu1 %v755_v43 }
 0x114   : > { %4667 = vmatprep.subr.bf16.mxu1 %v754_v48  ;;  %v5421_v9 = vpop.permute.xlu1 %982 }
 0x116   : > { %v968_v12 = vpop.permute.xlu0 %967 }
 0x117   : > { %4668 = vmatpush3.bf16.msra.mxu1 %v754_v48 }
 0x118   : > { %4669 = vmatprep.subr.bf16.mxu1 %v753_v50  ;;  %v5425_v11 = vpop.permute.xlu1 %1094 }
 0x11a   : > { %v1080_v14 = vpop.permute.xlu0 %1079 }
 0x11b   : > { %4670 = vmatpush3.bf16.msra.mxu1 %v753_v50 }
 0x11c   : > { %v973_v13 = vpop.permute.xlu1 %972 }
 0x11e   : > { %4672 = vmatmul.mubr.msk.bf16.vlgmr.msra.gmra.mxu1 %vm797_vm3, %v4920_v51  ;;  %v958_v16 = vpop.permute.xlu0 %957 }
 0x11f   : > { %4675 = vmatprep.mubr.msk.bf16.mxu1 %vm797_vm3, %v4921_v52 }
 0x120   : > { %v1085_v15 = vpop.permute.xlu1 %1084 }
 0x122   : > { %v1070_v18 = vpop.permute.xlu0 %1069 }
 0x124   : > { %v963_v17 = vpop.permute.xlu1 %962 }
 0x126   : > { %4676 = vmatmul.mubr.msk.bf16.gmra.mxu1 %vm797_vm3, %v4922_v53  ;;  %v948_v20 = vpop.permute.xlu0 %947 }
 0x127   : > { %4679 = vmatprep.mubr.msk.bf16.mxu1 %vm797_vm3, %v4923_v54 }
 0x128   : > { %v1075_v19 = vpop.permute.xlu1 %1074 }
 0x12a   : > { %v1060_v22 = vpop.permute.xlu0 %1059 }
 0x12c   : > { %v953_v21 = vpop.permute.xlu1 %952 }
 0x12e   : > { %4680 = vmatmul.mubr.msk.bf16.gmra.mxu1 %vm797_vm3, %v4924_v55  ;;  %v938_v25 = vpop.permute.xlu0 %937 }
 0x12f   : > { %4683 = vmatprep.mubr.msk.bf16.mxu1 %vm797_vm3, %v4925_v56 }
 0x130   : > { %v1065_v23 = vpop.permute.xlu1 %1064 }
 0x132   : > { %v1050_v34 = vpop.permute.xlu0 %1049 }
 0x134   : > { %v943_v30 = vpop.permute.xlu1 %942 }
 0x136   : > { %4684 = vmatmul.mubr.msk.bf16.gmra.mxu1 %vm797_vm3, %v4926_v57 }
 0x137   : > { %4771 = vmatprep.mubr.bf16.mxu1 %v4931_v7 }
 0x138   : > { %v1055_v43 = vpop.permute.xlu1 %1054 }
 0x1de   : > { %v4673_v26 = vpop.f32.mrf.mxu1 }
 0x1df   : > { %v1017_v28 = vmul.f32 %v4673_v26, %v948_v20 }
 0x1e0   : > { %v856_v31 = vpop.f32.mrf.mxu1 }
 0x1e1   : > { %v5428_v32 = vadd.f32 %v1060_v22, %v1017_v28  ;;  %v1015_v33 = vmul.f32 %v938_v25, %v856_v31 }
 0x1e2   : > { %v4674_v36 = vpop.f32.mrf.mxu1 }
 0x1e3   : > { %v5432_v37 = vadd.f32 %v1050_v34, %v1015_v33  ;;  %v1018_v38 = vmul.f32 %v4674_v36, %v953_v21  ;;  %v1145_v40 = vmax.f32 %v5428_v32, 0.0 }
 0x1e4   : > { %v859_v39 = vpop.f32.mrf.mxu1 }
 0x1e5   : > { %v5435_v41 = vadd.f32 %v1065_v23, %v1018_v38  ;;  %v1016_v42 = vmul.f32 %v943_v30, %v859_v39  ;;  %v1143_v45 = vmax.f32 %v5432_v37, 0.0  ;;  %v1169_v50 = vsel %vm1164_vm4, %v1145_v40, 0.0  ;;  %v4932_v37 = vld [vmem:[%s8733_s7 + $0x118] sm:$0xff]  }
 0x1e6   : > { %v4677_v44 = vpop.f32.mrf.mxu1 }
 0x1e7   : > { %v1146_v46 = vmax.f32 %v5435_v41, 0.0  ;;  %v5440_v47 = vadd.f32 %v1055_v43, %v1016_v42  ;;  %v1021_v48 = vmul.f32 %v4677_v44, %v968_v12  ;;  %v1167_v57 = vsel %vm1164_vm4, %v1143_v45, 0.0  ;;  %v4929_v41 = vld [vmem:[%s8733_s7 + $0x10] sm:$0xff]  }
 0x1e8   : > { %v872_v49 = vpop.f32.mrf.mxu1 }
 0x1e9   : > { %v1170_v51 = vsel %vm1164_vm4, %v1146_v46, 0.0  ;;  %v1144_v52 = vmax.f32 %v5440_v47, 0.0  ;;  %v5451_v53 = vadd.f32 %v1080_v14, %v1021_v48  ;;  %v1019_v55 = vmul.f32 %v958_v16, %v872_v49  ;;  %v4936_v47 = vld [vmem:[%s8733_s7 + $0x128] sm:$0xff]  }
 0x1ea   : > { %v5453_v54 = vpack.c.bf16 %v1170_v51, %v1169_v50  ;;  %v4678_v56 = vpop.f32.mrf.mxu1 }
 0x1eb   : > { %v1168_v3 = vsel %vm1164_vm4, %v1144_v52, 0.0  ;;  %v1022_v7 = vmul.f32 %v4678_v56, %v973_v13  ;;  %v5465_v20 = vadd.f32 %v1070_v18, %v1019_v55  ;;  %v1149_v21 = vmax.f32 %v5451_v53, 0.0 }
 0x1ec   : > { %8867 = vst [vmem:[#allocation6_spill] sm:$0xff] %v5453_v54  ;;  %v5463_v12 = vpack.c.bf16 %v1168_v3, %v1167_v57  ;;  %v875_v14 = vpop.f32.mrf.mxu1  ;;  %v4552_v32 = vpack.c.bf16 %v1144_v52, %v1143_v45  ;;  %v4935_v45 = vld [vmem:[%s8733_s7 + $0x120] sm:$0xff]  }
 0x1ed   : > { %v5468_v16 = vadd.f32 %v1085_v15, %v1022_v7  ;;  %v1020_v22 = vmul.f32 %v963_v17, %v875_v14  ;;  %v1147_v24 = vmax.f32 %v5465_v20, 0.0  ;;  %v1173_v18 = vsel %vm1164_vm4, %v1149_v21, 0.0  ;;  %v4933_v52 = vld [vmem:[%s8733_s7 + $0x20] sm:$0xff]  }
 0x1ee   : > { %8868 = vst [vmem:[#allocation7_spill] sm:$0xff] %v5463_v12  ;;  %v4681_v23 = vpop.f32.mrf.mxu1  ;;  %v4549_v20 = vpack.c.bf16 %v1146_v46, %v1145_v40  ;;  %v4928_v40 = vld [vmem:[%s8733_s7 + $0x8] sm:$0xff]   ;;  %v4930_v46 = vld [vmem:[%s8733_s7 + $0x18] sm:$0xff]  }
 0x1ef   : > { %v1150_v25 = vmax.f32 %v5468_v16, 0.0  ;;  %v5472_v26 = vadd.f32 %v1075_v19, %v1020_v22  ;;  %v1025_v27 = vmul.f32 %v4681_v23, %v5405_v2  ;;  %v1171_v30 = vsel %vm1164_vm4, %v1147_v24, 0.0  ;;  %v4934_v16 = vld [vmem:[%s8733_s7 + $0x28] sm:$0xff]  }
 0x1f0   : > { %v888_v13 = vpop.f32.mrf.mxu1 }
 0x1f1   : > { %v1174_v15 = vsel %vm1164_vm4, %v1150_v25, 0.0  ;;  %v1148_v17 = vmax.f32 %v5472_v26, 0.0  ;;  %v1137_v28 = vadd.f32 %v5412_v5, %v1025_v27  ;;  %v1023_v19 = vmul.f32 %v5419_v8, %v888_v13  ;;  %v4943_v26 = vld [vmem:[%s8733_s7 + $0x140] sm:$0xff]  }
 0x1f2   : > { %v5485_v29 = vpack.c.bf16 %v1174_v15, %v1173_v18  ;;  %v4682_v2 = vpop.f32.mrf.mxu1  ;;  %v4972_v18 = vld [vmem:[%s8733_s7 + $0x1b8] sm:$0xff]  }
 0x1f3   : > { %v1172_v31 = vsel %vm1164_vm4, %v1148_v17, 0.0  ;;  %v1026_v33 = vmul.f32 %v4682_v2, %v5410_v4  ;;  %v1135_v5 = vadd.f32 %v5423_v10, %v1023_v19  ;;  %v1153_v38 = vmax.f32 %v1137_v28, 0.0 }
 0x1f4   : > { %8869 = vst [vmem:[#allocation8_spill] sm:$0xff] %v5485_v29  ;;  %v5497_v34 = vpack.c.bf16 %v1172_v31, %v1171_v30  ;;  %v891_v36 = vpop.f32.mrf.mxu1  ;;  %v4546_v53 = vpack.c.bf16 %v1148_v17, %v1147_v24  ;;  %v4940_v24 = vld [vmem:[%s8733_s7 + $0x138] sm:$0xff]  }
 0x1f5   : > { %v1138_v8 = vadd.f32 %v5414_v6, %v1026_v33  ;;  %v1024_v39 = vmul.f32 %v5421_v9, %v891_v36  ;;  %v1151_v43 = vmax.f32 %v1135_v5, 0.0  ;;  %v1177_v4 = vsel %vm1164_vm4, %v1153_v38, 0.0  ;;  %v4938_v17 = vld [vmem:[%s8733_s7 + $0x38] sm:$0xff]   ;;  %v4944_v5 = vld [vmem:[%s8733_s7 + $0x148] sm:$0xff]   ;;  %v4941_v36 = vld [vmem:[%s8733_s7 + $0x40] sm:$0xff]  }
 0x1f6   : > { %8870 = vst [vmem:[#allocation9_spill] sm:$0xff] %v5497_v34  ;;  %v4685_v42 = vpop.f32.mrf.mxu1  ;;  %v4543_v33 = vpack.c.bf16 %v1150_v25, %v1149_v21  ;;  %v4939_v21 = vld [vmem:[%s8733_s7 + $0x130] sm:$0xff]  }
 0x1f7   : > { %v1154_v44 = vmax.f32 %v1138_v8, 0.0  ;;  %v1136_v48 = vadd.f32 %v5425_v11, %v1024_v39  ;;  %v1029_v49 = vmul.f32 %v4685_v42, %v5389_v58  ;;  %v1175_v11 = vsel %vm1164_vm4, %v1151_v43, 0.0  ;;  %v4937_v25 = vld [vmem:[%s8733_s7 + $0x30] sm:$0xff]   ;;  %v4942_v8 = vld [vmem:[%s8733_s7 + $0x48] sm:$0xff]   ;;  %v4948_v39 = vld [vmem:[%s8733_s7 + $0x158] sm:$0xff]  }
 0x1f8   : > { %v904_v50 = vpop.f32.mrf.mxu1  ;;  %v4945_v42 = vld [vmem:[%s8733_s7 + $0x50] sm:$0xff]  }
 0x1f9   : > { %v1178_v10 = vsel %vm1164_vm4, %v1154_v44, 0.0  ;;  %v1152_v51 = vmax.f32 %v1136_v48, 0.0  ;;  %v1141_v55 = vadd.f32 %v5393_v60, %v1029_v49  ;;  %v1027_v9 = vmul.f32 %v5397_v62, %v904_v50  ;;  %v4952_v48 = vld [vmem:[%s8733_s7 + $0x168] sm:$0xff]   ;;  %v4949_v49 = vld [vmem:[%s8733_s7 + $0x60] sm:$0xff]   ;;  %v4955_v50 = vld [vmem:[%s8733_s7 + $0x170] sm:$0xff]  }
 0x1fa   : > { %v5509_v6 = vpack.c.bf16 %v1178_v10, %v1177_v4  ;;  %v4686_v56 = vpop.f32.mrf.mxu1  ;;  %v4537_v30 = vpack.c.bf16 %v1154_v44, %v1153_v38  ;;  %v4947_v38 = vld [vmem:[%s8733_s7 + $0x150] sm:$0xff]   ;;  %v4946_v44 = vld [vmem:[%s8733_s7 + $0x58] sm:$0xff]   ;;  %v4950_v4 = vld [vmem:[%s8733_s7 + $0x68] sm:$0xff]  }
 0x1fb   : > { %v1176_v58 = vsel %vm1164_vm4, %v1152_v51, 0.0  ;;  %v1030_v57 = vmul.f32 %v4686_v56, %v5391_v59  ;;  %v1139_v7 = vadd.f32 %v5401_v0, %v1027_v9  ;;  %v1157_v22 = vmax.f32 %v1141_v55, 0.0  ;;  %v4956_v10 = vld [vmem:[%s8733_s7 + $0x178] sm:$0xff]   ;;  %v4959_v55 = vld [vmem:[%s8733_s7 + $0x180] sm:$0xff]   ;;  %v4960_v56 = vld [vmem:[%s8733_s7 + $0x188] sm:$0xff]  }
 0x1fc   : > { %8871 = vst [vmem:[#allocation10_spill] sm:$0xff] %v5509_v6  ;;  %v5517_v3 = vpack.c.bf16 %v1176_v58, %v1175_v11  ;;  %v907_v14 = vpop.f32.mrf.mxu1  ;;  %v4540_v31 = vpack.c.bf16 %v1152_v51, %v1151_v43  ;;  %v4951_v43 = vld [vmem:[%s8733_s7 + $0x160] sm:$0xff]   ;;  %v4953_v51 = vld [vmem:[%s8733_s7 + $0x70] sm:$0xff]   ;;  %v4954_v9 = vld [vmem:[%s8733_s7 + $0x78] sm:$0xff]  }
 0x1fd   : > { %v1142_v60 = vadd.f32 %v5395_v61, %v1030_v57  ;;  %v1028_v23 = vmul.f32 %v5399_v63, %v907_v14  ;;  %v1155_v62 = vmax.f32 %v1139_v7, 0.0  ;;  %v1181_v59 = vsel %vm1164_vm4, %v1157_v22, 0.0  ;;  %v4957_v11 = vld [vmem:[%s8733_s7 + $0x80] sm:$0xff]   ;;  %v4963_v58 = vld [vmem:[%s8733_s7 + $0x190] sm:$0xff]   ;;  %v4958_v57 = vld [vmem:[%s8733_s7 + $0x88] sm:$0xff]  }
 0x1fe   : > { %8872 = vst [vmem:[#allocation11_spill] sm:$0xff] %v5517_v3  ;;  %v4964_v7 = vld [vmem:[%s8733_s7 + $0x198] sm:$0xff]   ;;  %v4961_v14 = vld [vmem:[%s8733_s7 + $0x90] sm:$0xff]  }
 0x1ff   : > { %v1158_v27 = vmax.f32 %v1142_v60, 0.0  ;;  %v1140_v13 = vadd.f32 %v5403_v1, %v1028_v23  ;;  %v1179_v1 = vsel %vm1164_vm4, %v1155_v62, 0.0  ;;  %v4962_v60 = vld [vmem:[%s8733_s7 + $0x98] sm:$0xff]   ;;  %v4968_v23 = vld [vmem:[%s8733_s7 + $0x1a8] sm:$0xff]  }
 0x201   : > { %v1182_v0 = vsel %vm1164_vm4, %v1158_v27, 0.0  ;;  %v4531_v61 = vpack.c.bf16 %v1158_v27, %v1157_v22  ;;  %v1156_v15 = vmax.f32 %v1140_v13, 0.0  ;;  %v4967_v22 = vld [vmem:[%s8733_s7 + $0x1a0] sm:$0xff]   ;;  %v4971_v27 = vld [vmem:[%s8733_s7 + $0x1b0] sm:$0xff]   ;;  %v4966_v13 = vld [vmem:[%s8733_s7 + $0xa8] sm:$0xff]  }
 0x202   : > { %v5534_v63 = vpack.c.bf16 %v1182_v0, %v1181_v59  ;;  %v4969_v59 = vld [vmem:[%s8733_s7 + $0xb0] sm:$0xff]   ;;  %v4975_v0 = vld [vmem:[%s8733_s7 + $0x1c0] sm:$0xff]  }
 0x203   : > { %v1180_v28 = vsel %vm1164_vm4, %v1156_v15, 0.0  ;;  %v4534_v19 = vpack.c.bf16 %v1156_v15, %v1155_v62  ;;  %4687 = vmatprep.subr.msk.bf16.mxu0 %vm5526_vm5, %v4531_v61  ;;  %4831 = vmatprep.subr.msk.bf16.mxu1 %vm5526_vm5, %v4531_v61  ;;  %v4965_v62 = vld [vmem:[%s8733_s7 + $0xa0] sm:$0xff]   ;;  %v4976_v15 = vld [vmem:[%s8733_s7 + $0x1c8] sm:$0xff]  }
 0x204   : > { %8875 = vst [vmem:[#allocation12_spill] sm:$0xff] %v5534_v63  ;;  %v5544_v2 = vpack.c.bf16 %v1180_v28, %v1179_v1  ;;  %4688 = vmatpush3.bf16.msk.msra.mxu0 %vm5526_vm5, %v4531_v61  ;;  %4839 = vmatpush3.bf16.msk.msra.mxu1 %vm5526_vm5, %v4531_v61  ;;  %v4970_v61 = vld [vmem:[%s8733_s7 + $0xb8] sm:$0xff]   ;;  %v4973_v1 = vld [vmem:[%s8733_s7 + $0xc0] sm:$0xff]   ;;  %v4979_v28 = vld [vmem:[%s8733_s7 + $0x1d0] sm:$0xff]  }
 0x205   : > { %4689 = vmatprep.subr.msk.bf16.mxu0 %vm5526_vm5, %v4534_v19  ;;  %4832 = vmatprep.subr.msk.bf16.mxu1 %vm5526_vm5, %v4534_v19 }
 0x206   : > { %8876 = vst [vmem:[#allocation13_spill] sm:$0xff] %v5544_v2 }
 0x208   : > { %4690 = vmatpush3.bf16.msk.msra.mxu0 %vm5526_vm5, %v4534_v19  ;;  %4840 = vmatpush3.bf16.msk.msra.mxu1 %vm5526_vm5, %v4534_v19  ;;  %v4974_v19 = vld [vmem:[%s8733_s7 + $0xc8] sm:$0xff]  }
 0x209   : > { %4691 = vmatprep.subr.msk.bf16.mxu0 %vm5526_vm5, %v4537_v30  ;;  %4833 = vmatprep.subr.msk.bf16.mxu1 %vm5526_vm5, %v4537_v30 }
 0x20c   : > { %4692 = vmatpush3.bf16.msk.msra.mxu0 %vm5526_vm5, %v4537_v30  ;;  %4841 = vmatpush3.bf16.msk.msra.mxu1 %vm5526_vm5, %v4537_v30  ;;  %v4980_v30 = vld [vmem:[%s8733_s7 + $0x1d8] sm:$0xff]  }
 0x20d   : > { %4693 = vmatprep.subr.msk.bf16.mxu0 %vm5526_vm5, %v4540_v31  ;;  %4834 = vmatprep.subr.msk.bf16.mxu1 %vm5526_vm5, %v4540_v31 }
 0x210   : > { %4694 = vmatpush3.bf16.msk.msra.mxu0 %vm5526_vm5, %v4540_v31  ;;  %4842 = vmatpush3.bf16.msk.msra.mxu1 %vm5526_vm5, %v4540_v31  ;;  %v4977_v31 = vld [vmem:[%s8733_s7 + $0xd0] sm:$0xff]  }
 0x211   : > { %4695 = vmatprep.subr.msk.bf16.mxu0 %vm5526_vm5, %v4543_v33  ;;  %4835 = vmatprep.subr.msk.bf16.mxu1 %vm5526_vm5, %v4543_v33 }
 0x214   : > { %4696 = vmatpush3.bf16.msk.msra.mxu0 %vm5526_vm5, %v4543_v33  ;;  %4843 = vmatpush3.bf16.msk.msra.mxu1 %vm5526_vm5, %v4543_v33  ;;  %v4983_v33 = vld [vmem:[%s8733_s7 + $0x1e0] sm:$0xff]  }
 0x215   : > { %4697 = vmatprep.subr.msk.bf16.mxu0 %vm5526_vm5, %v4546_v53  ;;  %4836 = vmatprep.subr.msk.bf16.mxu1 %vm5526_vm5, %v4546_v53 }
 0x218   : > { %4698 = vmatpush3.bf16.msk.msra.mxu0 %vm5526_vm5, %v4546_v53  ;;  %4844 = vmatpush3.bf16.msk.msra.mxu1 %vm5526_vm5, %v4546_v53  ;;  %v4978_v53 = vld [vmem:[%s8733_s7 + $0xd8] sm:$0xff]  }
 0x219   : > { %4699 = vmatprep.subr.msk.bf16.mxu0 %vm5526_vm5, %v4549_v20  ;;  %4837 = vmatprep.subr.msk.bf16.mxu1 %vm5526_vm5, %v4549_v20 }
 0x21c   : > { %4700 = vmatpush3.bf16.msk.msra.mxu0 %vm5526_vm5, %v4549_v20  ;;  %4845 = vmatpush3.bf16.msk.msra.mxu1 %vm5526_vm5, %v4549_v20  ;;  %v4984_v20 = vld [vmem:[%s8733_s7 + $0x1e8] sm:$0xff]  }
 0x21d   : > { %4701 = vmatprep.subr.msk.bf16.mxu0 %vm5526_vm5, %v4552_v32  ;;  %4838 = vmatprep.subr.msk.bf16.mxu1 %vm5526_vm5, %v4552_v32 }
 0x220   : > { %4702 = vmatpush3.bf16.msk.msra.mxu0 %vm5526_vm5, %v4552_v32  ;;  %4846 = vmatpush3.bf16.msk.msra.mxu1 %vm5526_vm5, %v4552_v32  ;;  %v4981_v32 = vld [vmem:[%s8733_s7 + $0xe0] sm:$0xff]  }
 0x223   : > { %4704 = vmatmul.mubr.bf16.vlgmr.msra.gmra.mxu0 %v4928_v40  ;;  %4772 = vmatmul.mubr.bf16.vlgmr.msra.gmra.mxu1 %v4932_v37  ;;  %v4987_v40 = vld [vmem:[%s8733_s7 + $0x1f0] sm:$0xff]   ;;  %v4982_v37 = vld [vmem:[%s8733_s7 + $0xe8] sm:$0xff]  }
 0x224   : > { %4707 = vmatprep.mubr.bf16.mxu0 %v4929_v41  ;;  %4775 = vmatprep.mubr.bf16.mxu1 %v4935_v45  ;;  %v4988_v41 = vld [vmem:[%s8733_s7 + $0x1f8] sm:$0xff]   ;;  %v4985_v45 = vld [vmem:[%s8733_s7 + $0xf0] sm:$0xff]  }
 0x22b   : > { %4708 = vmatmul.mubr.bf16.gmra.mxu0 %v4930_v46  ;;  %4776 = vmatmul.mubr.bf16.gmra.mxu1 %v4936_v47  ;;  %v4986_v46 = vld [vmem:[%s8733_s7 + $0xf8] sm:$0xff]   ;;  %v4989_v47 = vld [vmem:[%s8733_s7 + $0x100] sm:$0xff]  }
 0x22c   : > { %4711 = vmatprep.mubr.bf16.mxu0 %v4933_v52  ;;  %4779 = vmatprep.mubr.bf16.mxu1 %v4939_v21  ;;  %v4990_v52 = vld [vmem:[%s8733_s7 + $0x108] sm:$0xff]  }
 0x233   : > { %4712 = vmatmul.mubr.bf16.gmra.mxu0 %v4934_v16  ;;  %4780 = vmatmul.mubr.bf16.gmra.mxu1 %v4940_v24 }
 0x234   : > { %4715 = vmatprep.mubr.bf16.mxu0 %v4937_v25  ;;  %4783 = vmatprep.mubr.bf16.mxu1 %v4943_v26 }
 0x23b   : > { %4716 = vmatmul.mubr.bf16.gmra.mxu0 %v4938_v17  ;;  %4784 = vmatmul.mubr.bf16.gmra.mxu1 %v4944_v5 }
 0x23c   : > { %4719 = vmatprep.mubr.bf16.mxu0 %v4941_v36  ;;  %4787 = vmatprep.mubr.bf16.mxu1 %v4947_v38 }
 0x243   : > { %4720 = vmatmul.mubr.bf16.gmra.mxu0 %v4942_v8  ;;  %4788 = vmatmul.mubr.bf16.gmra.mxu1 %v4948_v39 }
 0x244   : > { %4723 = vmatprep.mubr.bf16.mxu0 %v4945_v42  ;;  %4791 = vmatprep.mubr.bf16.mxu1 %v4951_v43 }
 0x24b   : > { %4724 = vmatmul.mubr.bf16.gmra.mxu0 %v4946_v44  ;;  %4792 = vmatmul.mubr.bf16.gmra.mxu1 %v4952_v48 }
 0x24c   : > { %4727 = vmatprep.mubr.bf16.mxu0 %v4949_v49  ;;  %4795 = vmatprep.mubr.bf16.mxu1 %v4955_v50 }
 0x253   : > { %4728 = vmatmul.mubr.bf16.gmra.mxu0 %v4950_v4  ;;  %4796 = vmatmul.mubr.bf16.gmra.mxu1 %v4956_v10 }
 0x254   : > { %4731 = vmatprep.mubr.bf16.mxu0 %v4953_v51  ;;  %4799 = vmatprep.mubr.bf16.mxu1 %v4959_v55 }
 0x25b   : > { %4732 = vmatmul.mubr.bf16.gmra.mxu0 %v4954_v9  ;;  %4800 = vmatmul.mubr.bf16.gmra.mxu1 %v4960_v56 }
 0x25c   : > { %4735 = vmatprep.mubr.bf16.mxu0 %v4957_v11  ;;  %4803 = vmatprep.mubr.bf16.mxu1 %v4963_v58 }
 0x263   : > { %4736 = vmatmul.mubr.bf16.gmra.mxu0 %v4958_v57  ;;  %4804 = vmatmul.mubr.bf16.gmra.mxu1 %v4964_v7 }
 0x264   : > { %4739 = vmatprep.mubr.bf16.mxu0 %v4961_v14  ;;  %4807 = vmatprep.mubr.bf16.mxu1 %v4967_v22 }
 0x26b   : > { %4740 = vmatmul.mubr.bf16.gmra.mxu0 %v4962_v60  ;;  %4808 = vmatmul.mubr.bf16.gmra.mxu1 %v4968_v23 }
 0x26c   : > { %4743 = vmatprep.mubr.bf16.mxu0 %v4965_v62  ;;  %4811 = vmatprep.mubr.bf16.mxu1 %v4971_v27 }
 0x273   : > { %4744 = vmatmul.mubr.bf16.gmra.mxu0 %v4966_v13  ;;  %4812 = vmatmul.mubr.bf16.gmra.mxu1 %v4972_v18 }
 0x274   : > { %4747 = vmatprep.mubr.bf16.mxu0 %v4969_v59  ;;  %4815 = vmatprep.mubr.bf16.mxu1 %v4975_v0 }
 0x27b   : > { %4748 = vmatmul.mubr.bf16.gmra.mxu0 %v4970_v61  ;;  %4816 = vmatmul.mubr.bf16.gmra.mxu1 %v4976_v15 }
 0x27c   : > { %4751 = vmatprep.mubr.bf16.mxu0 %v4973_v1  ;;  %4819 = vmatprep.mubr.bf16.mxu1 %v4979_v28 }
 0x283   : > { %4752 = vmatmul.mubr.bf16.gmra.mxu0 %v4974_v19  ;;  %4820 = vmatmul.mubr.bf16.gmra.mxu1 %v4980_v30 }
 0x284   : > { %4755 = vmatprep.mubr.bf16.mxu0 %v4977_v31  ;;  %4823 = vmatprep.mubr.bf16.mxu1 %v4983_v33 }
 0x28b   : > { %4756 = vmatmul.mubr.bf16.gmra.mxu0 %v4978_v53  ;;  %4824 = vmatmul.mubr.bf16.gmra.mxu1 %v4984_v20 }
 0x28c   : > { %4759 = vmatprep.mubr.bf16.mxu0 %v4981_v32  ;;  %4827 = vmatprep.mubr.bf16.mxu1 %v4987_v40 }
 0x293   : > { %4760 = vmatmul.mubr.bf16.gmra.mxu0 %v4982_v37  ;;  %4828 = vmatmul.mubr.bf16.gmra.mxu1 %v4988_v41 }
 0x294   : > { %4763 = vmatprep.mubr.bf16.mxu0 %v4985_v45 }
 0x29b   : > { %4764 = vmatmul.mubr.bf16.gmra.mxu0 %v4986_v46 }
 0x29c   : > { %4767 = vmatprep.mubr.bf16.mxu0 %v4989_v47 }
 0x2a3   : > { %4768 = vmatmul.mubr.bf16.gmra.mxu0 %v4990_v52 }
 0x2e3   : > { %v5808_v21 = vpop.f32.mrf.mxu0  ;;  %v5810_v16 = vpop.f32.mrf.mxu1 }
 0x2e4   : > { %8877 = vst [vmem:[#allocation14_spill] sm:$0xff] %v5808_v21  ;;  %8878 = vst [vmem:[#allocation15_spill] sm:$0xff] %v5810_v16 }
 0x2e5   : > { %v5812_v24 = vpop.f32.mrf.mxu0  ;;  %v5814_v25 = vpop.f32.mrf.mxu1 }
 0x2e6   : > { %8879 = vst [vmem:[#allocation16_spill] sm:$0xff] %v5812_v24  ;;  %8880 = vst [vmem:[#allocation17_spill] sm:$0xff] %v5814_v25 }
 0x2e7   : > { %v5816_v26 = vpop.f32.mrf.mxu0  ;;  %v5818_v17 = vpop.f32.mrf.mxu1 }
 0x2e8   : > { %8881 = vst [vmem:[#allocation18_spill] sm:$0xff] %v5816_v26  ;;  %8882 = vst [vmem:[#allocation19_spill] sm:$0xff] %v5818_v17 }
 0x2e9   : > { %v5820_v5 = vpop.f32.mrf.mxu0  ;;  %v5822_v36 = vpop.f32.mrf.mxu1 }
 0x2ea   : > { %8883 = vst [vmem:[#allocation20_spill] sm:$0xff] %v5820_v5  ;;  %8884 = vst [vmem:[#allocation21_spill] sm:$0xff] %v5822_v36 }
 0x2eb   : > { %v5824_v38 = vpop.f32.mrf.mxu0  ;;  %v5826_v8 = vpop.f32.mrf.mxu1 }
 0x2ec   : > { %8885 = vst [vmem:[#allocation22_spill] sm:$0xff] %v5824_v38  ;;  %8886 = vst [vmem:[#allocation23_spill] sm:$0xff] %v5826_v8 }
 0x2ed   : > { %v5828_v39 = vpop.f32.mrf.mxu0  ;;  %v5830_v42 = vpop.f32.mrf.mxu1 }
 0x2ee   : > { %8887 = vst [vmem:[#allocation24_spill] sm:$0xff] %v5828_v39  ;;  %8888 = vst [vmem:[#allocation25_spill] sm:$0xff] %v5830_v42 }
 0x2ef   : > { %v5832_v43 = vpop.f32.mrf.mxu0  ;;  %v5834_v44 = vpop.f32.mrf.mxu1 }
 0x2f0   : > { %8889 = vst [vmem:[#allocation26_spill] sm:$0xff] %v5832_v43  ;;  %8890 = vst [vmem:[#allocation27_spill] sm:$0xff] %v5834_v44 }
 0x2f1   : > { %v5836_v48 = vpop.f32.mrf.mxu0  ;;  %v5838_v49 = vpop.f32.mrf.mxu1 }
 0x2f2   : > { %8891 = vst [vmem:[#allocation28_spill] sm:$0xff] %v5836_v48  ;;  %8892 = vst [vmem:[#allocation29_spill] sm:$0xff] %v5838_v49 }
 0x2f3   : > { %v5840_v50 = vpop.f32.mrf.mxu0  ;;  %v5842_v4 = vpop.f32.mrf.mxu1 }
 0x2f4   : > { %8893 = vst [vmem:[#allocation30_spill] sm:$0xff] %v5842_v4 }
 0x2f5   : > { %v5844_v10 = vpop.f32.mrf.mxu0  ;;  %v5846_v51 = vpop.f32.mrf.mxu1 }
 0x2f6   : > { %8894 = vst [vmem:[#allocation31_spill] sm:$0xff] %v5846_v51 }
 0x2f7   : > { %v5848_v55 = vpop.f32.mrf.mxu0  ;;  %v5850_v9 = vpop.f32.mrf.mxu1 }
 0x2f8   : > { %8895 = vst [vmem:[#allocation32_spill] sm:$0xff] %v5850_v9 }
 0x2f9   : > { %v5852_v56 = vpop.f32.mrf.mxu0  ;;  %v5854_v11 = vpop.f32.mrf.mxu1 }
 0x2fa   : > { %8896 = vst [vmem:[#allocation33_spill] sm:$0xff] %v5854_v11 }
 0x2fb   : > { %v5856_v58 = vpop.f32.mrf.mxu0  ;;  %v5858_v57 = vpop.f32.mrf.mxu1 }
 0x2fc   : > { %8897 = vst [vmem:[#allocation34_spill] sm:$0xff] %v5856_v58  ;;  %8898 = vst [vmem:[#allocation35_spill] sm:$0xff] %v5858_v57 }
 0x2fd   : > { %v5860_v7 = vpop.f32.mrf.mxu0  ;;  %v5862_v14 = vpop.f32.mrf.mxu1 }
 0x2fe   : > { %8899 = vst [vmem:[#allocation36_spill] sm:$0xff] %v5862_v14 }
 0x2ff   : > { %v5864_v22 = vpop.f32.mrf.mxu0  ;;  %v5866_v60 = vpop.f32.mrf.mxu1 }
 0x300   : > { %8900 = vst [vmem:[#allocation37_spill] sm:$0xff] %v5864_v22  ;;  %8901 = vst [vmem:[#allocation38_spill] sm:$0xff] %v5866_v60 }
 0x301   : > { %v5868_v23 = vpop.f32.mrf.mxu0  ;;  %v5870_v62 = vpop.f32.mrf.mxu1 }
 0x302   : > { %8902 = vst [vmem:[#allocation39_spill] sm:$0xff] %v5870_v62 }
 0x303   : > { %v5872_v27 = vpop.f32.mrf.mxu0  ;;  %v5874_v13 = vpop.f32.mrf.mxu1 }
 0x304   : > { %8903 = vst [vmem:[#allocation40_spill] sm:$0xff] %v5874_v13 }
 0x305   : > { %v5876_v18 = vpop.f32.mrf.mxu0  ;;  %v5878_v59 = vpop.f32.mrf.mxu1 }
 0x306   : > { %8904 = vst [vmem:[#allocation41_spill] sm:$0xff] %v5878_v59 }
 0x307   : > { %v5880_v0 = vpop.f32.mrf.mxu0  ;;  %v5882_v61 = vpop.f32.mrf.mxu1 }
 0x308   : > { %8905 = vst [vmem:[#allocation42_spill] sm:$0xff] %v5882_v61 }
 0x309   : > { %v5884_v15 = vpop.f32.mrf.mxu0  ;;  %v5886_v1 = vpop.f32.mrf.mxu1 }
 0x30a   : > { %8906 = vst [vmem:[#allocation43_spill] sm:$0xff] %v5886_v1 }
 0x30b   : > { %v5888_v28 = vpop.f32.mrf.mxu0  ;;  %v5890_v19 = vpop.f32.mrf.mxu1 }
 0x30c   : > { %8907 = vst [vmem:[#allocation44_spill] sm:$0xff] %v5890_v19 }
 0x30d   : > { %v5892_v30 = vpop.f32.mrf.mxu0  ;;  %v5894_v31 = vpop.f32.mrf.mxu1 }
 0x30e   : > { %8908 = vst [vmem:[#allocation45_spill] sm:$0xff] %v5894_v31 }
 0x30f   : > { %v5896_v33 = vpop.f32.mrf.mxu0  ;;  %v5898_v53 = vpop.f32.mrf.mxu1 }
 0x310   : > { %8909 = vst [vmem:[#allocation46_spill] sm:$0xff] %v5898_v53 }
 0x311   : > { %v5900_v20 = vpop.f32.mrf.mxu0  ;;  %v5902_v32 = vpop.f32.mrf.mxu1 }
 0x312   : > { %8910 = vst [vmem:[#allocation47_spill] sm:$0xff] %v5902_v32 }
 0x313   : > { %v5904_v40 = vpop.f32.mrf.mxu0  ;;  %v5906_v37 = vpop.f32.mrf.mxu1 }
 0x314   : > { %8911 = vst [vmem:[#allocation48_spill] sm:$0xff] %v5906_v37 }
 0x315   : > { %v5908_v41 = vpop.f32.mrf.mxu0  ;;  %v5910_v45 = vpop.f32.mrf.mxu1 }
 0x316   : > { %8912 = vst [vmem:[#allocation49_spill] sm:$0xff] %v5910_v45 }
 0x317   : > { %v5912_v46 = vpop.f32.mrf.mxu0  ;;  %v5914_v47 = vpop.f32.mrf.mxu1 }
 0x318   : > { %8913 = vst [vmem:[#allocation50_spill] sm:$0xff] %v5914_v47 }
 0x319   : > { %v5916_v52 = vpop.f32.mrf.mxu0  ;;  %v5918_v35 = vpop.f32.mrf.mxu1 }
 0x31a   : > { %8914 = vst [vmem:[#allocation51_spill] sm:$0xff] %v5918_v35 }
 0x31b   : > { %v5920_v63 = vpop.f32.mrf.mxu0  ;;  %v5922_v2 = vpop.f32.mrf.mxu1 }
 0x31c   : > { %8915 = vst [vmem:[#allocation52_spill] sm:$0xff] %v5922_v2 }
 0x31d   : > { %v5924_v6 = vpop.f32.mrf.mxu0  ;;  %v5926_v3 = vpop.f32.mrf.mxu1 }
 0x31e   : > { %8916 = vst [vmem:[#allocation53_spill] sm:$0xff] %v5926_v3 }
 0x31f   : > { %v5928_v29 = vpop.f32.mrf.mxu0  ;;  %v5930_v34 = vpop.f32.mrf.mxu1 }
 0x320   : > { %8917 = vst [vmem:[#allocation54_spill] sm:$0xff] %v5930_v34 }
 0x321   : > { %v5932_v54 = vpop.f32.mrf.mxu0  ;;  %v5934_v12 = vpop.f32.mrf.mxu1 }
 0x322   : > { %8918 = vst [vmem:[#allocation55_spill] sm:$0xff] %v5934_v12 }
 0x323   : > { %v5936_v47 = vpop.f32.mrf.mxu0  ;;  %v5938_v37 = vpop.f32.mrf.mxu1 }
 0x324   : > { %8919 = vst [vmem:[#allocation56_spill] sm:$0xff] %v5938_v37 }
 0x325   : > { %v5940_v35 = vpop.f32.mrf.mxu0  ;;  %v5942_v45 = vpop.f32.mrf.mxu1 }
 0x326   : > { %8920 = vst [vmem:[#allocation57_spill] sm:$0xff] %v5942_v45 }
 0x327   : > { %v5944_v2 = vpop.f32.mrf.mxu0  ;;  %v5946_v53 = vpop.f32.mrf.mxu1 }
 0x328   : > { %8921 = vst [vmem:[#allocation58_spill] sm:$0xff] %v5946_v53 }
 0x329   : > { %v5948_v3 = vpop.f32.mrf.mxu0  ;;  %v5950_v19 = vpop.f32.mrf.mxu1 }
 0x32a   : > { %8922 = vst [vmem:[#allocation59_spill] sm:$0xff] %v5950_v19 }
 0x32b   : > { %v5952_v34 = vpop.f32.mrf.mxu0  ;;  %v5954_v32 = vpop.f32.mrf.mxu1 }
 0x32c   : > { %8923 = vst [vmem:[#allocation60_spill] sm:$0xff] %v5954_v32 }
 0x32d   : > { %v5956_v12 = vpop.f32.mrf.mxu0  ;;  %v5958_v31 = vpop.f32.mrf.mxu1 }
 0x32e   : > { %8924 = vst [vmem:[#allocation61_spill] sm:$0xff] %v5958_v31 }
 0x32f   : > { %v5960_v37 = vpop.f32.mrf.mxu0  ;;  %v5962_v61 = vpop.f32.mrf.mxu1 }
 0x330   : > { %8925 = vst [vmem:[#allocation62_spill] sm:$0xff] %v5962_v61 }
 0x331   : > { %v5964_v45 = vpop.f32.mrf.mxu0  ;;  %v5966_v13 = vpop.f32.mrf.mxu1 }
 0x332   : > { %8926 = vst [vmem:[#allocation63_spill] sm:$0xff] %v5966_v13 }
 0x333   : > { %v5968_v53 = vpop.f32.mrf.mxu0  ;;  %v5970_v1 = vpop.f32.mrf.mxu1 }
 0x334   : > { %8927 = vst [vmem:[#allocation64_spill] sm:$0xff] %v5970_v1 }
 0x335   : > { %v5972_v19 = vpop.f32.mrf.mxu0  ;;  %v5974_v59 = vpop.f32.mrf.mxu1 }
 0x336   : > { %8928 = vst [vmem:[#allocation65_spill] sm:$0xff] %v5974_v59 }
 0x337   : > { %v5976_v32 = vpop.f32.mrf.mxu0  ;;  %v5978_v60 = vpop.f32.mrf.mxu1 }
 0x338   : > { %8929 = vst [vmem:[#allocation66_spill] sm:$0xff] %v5976_v32  ;;  %8930 = vst [vmem:[#allocation67_spill] sm:$0xff] %v5978_v60 }
 0x339   : > { %v5980_v31 = vpop.f32.mrf.mxu0  ;;  %v5982_v57 = vpop.f32.mrf.mxu1 }
 0x33a   : > { %8931 = vst [vmem:[#allocation68_spill] sm:$0xff] %v5982_v57 }
 0x33b   : > { %v5984_v61 = vpop.f32.mrf.mxu0  ;;  %v5986_v62 = vpop.f32.mrf.mxu1 }
 0x33c   : > { %8932 = vst [vmem:[#allocation69_spill] sm:$0xff] %v5984_v61  ;;  %8933 = vst [vmem:[#allocation70_spill] sm:$0xff] %v5986_v62 }
 0x33d   : > { %v5988_v13 = vpop.f32.mrf.mxu0  ;;  %v5990_v14 = vpop.f32.mrf.mxu1 }
 0x33e   : > { %8934 = vst [vmem:[#allocation71_spill] sm:$0xff] %v5988_v13  ;;  %8935 = vst [vmem:[#allocation72_spill] sm:$0xff] %v5990_v14 }
 0x33f   : > { %v5992_v1 = vpop.f32.mrf.mxu0  ;;  %v5994_v9 = vpop.f32.mrf.mxu1 }
 0x340   : > { %8936 = vst [vmem:[#allocation73_spill] sm:$0xff] %v5992_v1  ;;  %8937 = vst [vmem:[#allocation74_spill] sm:$0xff] %v5994_v9 }
 0x341   : > { %v5996_v59 = vpop.f32.mrf.mxu0  ;;  %v5998_v4 = vpop.f32.mrf.mxu1 }
 0x342   : > { %8938 = vst [vmem:[#allocation75_spill] sm:$0xff] %v5996_v59  ;;  %8939 = vst [vmem:[#allocation76_spill] sm:$0xff] %v5998_v4 }
 0x343   : > { %v6000_v60 = vpop.f32.mrf.mxu0  ;;  %v6002_v11 = vpop.f32.mrf.mxu1 }
 0x344   : > { %8940 = vst [vmem:[#allocation77_spill] sm:$0xff] %v6000_v60  ;;  %8941 = vst [vmem:[#allocation78_spill] sm:$0xff] %v6002_v11 }
 0x345   : > { %v6004_v57 = vpop.f32.mrf.mxu0  ;;  %v6006_v51 = vpop.f32.mrf.mxu1 }
 0x346   : > { %8942 = vst [vmem:[#allocation79_spill] sm:$0xff] %v6004_v57  ;;  %8943 = vst [vmem:[#allocation80_spill] sm:$0xff] %v6006_v51 }
 0x347   : > { %v6008_v62 = vpop.f32.mrf.mxu0  ;;  %v6010_v44 = vpop.f32.mrf.mxu1 }
 0x348   : > { %8944 = vst [vmem:[#allocation81_spill] sm:$0xff] %v6008_v62  ;;  %8945 = vst [vmem:[#allocation82_spill] sm:$0xff] %v6010_v44 }
 0x349   : > { %v6012_v14 = vpop.f32.mrf.mxu0  ;;  %v6014_v8 = vpop.f32.mrf.mxu1 }
 0x34a   : > { %8946 = vst [vmem:[#allocation83_spill] sm:$0xff] %v6012_v14  ;;  %8947 = vst [vmem:[#allocation84_spill] sm:$0xff] %v6014_v8 }
 0x34b   : > { %v6016_v9 = vpop.f32.mrf.mxu0  ;;  %v6018_v49 = vpop.f32.mrf.mxu1 }
 0x34c   : > { %8948 = vst [vmem:[#allocation85_spill] sm:$0xff] %v6016_v9  ;;  %8949 = vst [vmem:[#allocation86_spill] sm:$0xff] %v6018_v49 }
 0x34d   : > { %v6020_v4 = vpop.f32.mrf.mxu0  ;;  %v6022_v42 = vpop.f32.mrf.mxu1 }
 0x34e   : > { %8950 = vst [vmem:[#allocation87_spill] sm:$0xff] %v6020_v4  ;;  %8951 = vst [vmem:[#allocation88_spill] sm:$0xff] %v6022_v42 }
 0x34f   : > { %v6024_v11 = vpop.f32.mrf.mxu0  ;;  %v6026_v17 = vpop.f32.mrf.mxu1 }
 0x350   : > { %8952 = vst [vmem:[#allocation89_spill] sm:$0xff] %v6024_v11  ;;  %8953 = vst [vmem:[#allocation90_spill] sm:$0xff] %v6026_v17 }
 0x351   : > { %v6028_v51 = vpop.f32.mrf.mxu0  ;;  %v6030_v16 = vpop.f32.mrf.mxu1 }
 0x352   : > { %8954 = vst [vmem:[#allocation91_spill] sm:$0xff] %v6028_v51  ;;  %8955 = vst [vmem:[#allocation92_spill] sm:$0xff] %v6030_v16 }
 0x353   : > { %v6032_v44 = vpop.f32.mrf.mxu0  ;;  %v6034_v36 = vpop.f32.mrf.mxu1 }
 0x354   : > { %8956 = vst [vmem:[#allocation93_spill] sm:$0xff] %v6032_v44  ;;  %8957 = vst [vmem:[#allocation94_spill] sm:$0xff] %v6034_v36 }
 0x355   : > { %v6036_v8 = vpop.f32.mrf.mxu0  ;;  %v6038_v25 = vpop.f32.mrf.mxu1 }
 0x356   : > { %8958 = vst [vmem:[#allocation95_spill] sm:$0xff] %v6036_v8  ;;  %8959 = vst [vmem:[#allocation96_spill] sm:$0xff] %v6038_v25 }
 0x357   : > { %v6040_v49 = vpop.f32.mrf.mxu0  ;;  %v6042_v9 = vpop.f32.mrf.mxu1 }
 0x358   : > { %8960 = vst [vmem:[#allocation97_spill] sm:$0xff] %v6040_v49  ;;  %8961 = vst [vmem:[#allocation98_spill] sm:$0xff] %v6042_v9 }
 0x359   : > { %v6044_v42 = vpop.f32.mrf.mxu0  ;;  %v6046_v11 = vpop.f32.mrf.mxu1 }
 0x35a   : > { %8962 = vst [vmem:[#allocation99_spill] sm:$0xff] %v6044_v42  ;;  %8963 = vst [vmem:[#allocation100_spill] sm:$0xff] %v6046_v11 }
 0x35b   : > { %v6048_v17 = vpop.f32.mrf.mxu0 }
 0x35c   : > { %8964 = vst [vmem:[#allocation101_spill] sm:$0xff] %v6048_v17 }
 0x35d   : > { %v6050_v51 = vpop.f32.mrf.mxu0 }
 0x35e   : > { %8965 = vst [vmem:[#allocation102_spill] sm:$0xff] %v6050_v51 }
 0x35f   : > { %v6052_v16 = vpop.f32.mrf.mxu0 }
 0x360   : > { %8966 = vst [vmem:[#allocation103_spill] sm:$0xff] %v6052_v16 }
 0x361   : > { %v6054_v44 = vpop.f32.mrf.mxu0 }
 0x362   : > { %8967 = vst [vmem:[#allocation104_spill] sm:$0xff] %v6054_v44 }
 0x363   : > { %v6056_v36 = vpop.f32.mrf.mxu0 }
 0x364   : > { %8968 = vst [vmem:[#allocation105_spill] sm:$0xff] %v6056_v36 }
 0x365   : > { %v6058_v8 = vpop.f32.mrf.mxu0 }
 0x366   : > { %8969 = vst [vmem:[#allocation106_spill] sm:$0xff] %v6058_v8  ;;  %2251 = sbr.rel (%p4554_p11) target bundleno = 1076 (0x434), region = 97 }
 0x367   : > { %v6060_v25 = vpop.f32.mrf.mxu0 }
 0x368   : > { %8970 = vst [vmem:[#allocation107_spill] sm:$0xff] %v6060_v25 }
 0x369   : > { %v6062_v49 = vpop.f32.mrf.mxu0 }
 0x36a   : > { %8971 = vst [vmem:[#allocation108_spill] sm:$0xff] %v6062_v49 }
 0x36b   : > { %v5049_v9 = vmov 0.0   ;;  %v5050_v11 = vmov -inf  }
 0x36c   : > { %2252 = vst [vmem:[%s5192_s24] sm:$0xff] %v5049_v9  ;;  %2253 = vst [vmem:[%s5192_s24 + $0x8] sm:$0xff] %v5049_v9 }
 0x36d   : > { %2254 = vst [vmem:[%s5192_s24 + $0x10] sm:$0xff] %v5049_v9  ;;  %2255 = vst [vmem:[%s5192_s24 + $0x18] sm:$0xff] %v5049_v9 }
 0x36e   : > { %2256 = vst [vmem:[%s5192_s24 + $0x20] sm:$0xff] %v5049_v9  ;;  %2257 = vst [vmem:[%s5192_s24 + $0x28] sm:$0xff] %v5049_v9 }
 0x36f   : > { %2258 = vst [vmem:[%s5192_s24 + $0x30] sm:$0xff] %v5049_v9  ;;  %2259 = vst [vmem:[%s5192_s24 + $0x38] sm:$0xff] %v5049_v9 }
 0x370   : > { %2260 = vst [vmem:[%s5192_s24 + $0x40] sm:$0xff] %v5049_v9  ;;  %2261 = vst [vmem:[%s5192_s24 + $0x48] sm:$0xff] %v5049_v9 }
 0x371   : > { %2262 = vst [vmem:[%s5192_s24 + $0x50] sm:$0xff] %v5049_v9  ;;  %2263 = vst [vmem:[%s5192_s24 + $0x58] sm:$0xff] %v5049_v9 }
 0x372   : > { %2264 = vst [vmem:[%s5192_s24 + $0x60] sm:$0xff] %v5049_v9  ;;  %2265 = vst [vmem:[%s5192_s24 + $0x68] sm:$0xff] %v5049_v9 }
 0x373   : > { %2266 = vst [vmem:[%s5192_s24 + $0x70] sm:$0xff] %v5049_v9  ;;  %2267 = vst [vmem:[%s5192_s24 + $0x78] sm:$0xff] %v5049_v9 }
 0x374   : > { %2268 = vst [vmem:[%s5192_s24 + $0x80] sm:$0xff] %v5049_v9  ;;  %2269 = vst [vmem:[%s5192_s24 + $0x88] sm:$0xff] %v5049_v9 }
 0x375   : > { %2270 = vst [vmem:[%s5192_s24 + $0x90] sm:$0xff] %v5049_v9  ;;  %2271 = vst [vmem:[%s5192_s24 + $0x98] sm:$0xff] %v5049_v9 }
 0x376   : > { %2272 = vst [vmem:[%s5192_s24 + $0xa0] sm:$0xff] %v5049_v9  ;;  %2273 = vst [vmem:[%s5192_s24 + $0xa8] sm:$0xff] %v5049_v9 }
 0x377   : > { %2274 = vst [vmem:[%s5192_s24 + $0xb0] sm:$0xff] %v5049_v9  ;;  %2275 = vst [vmem:[%s5192_s24 + $0xb8] sm:$0xff] %v5049_v9 }
 0x378   : > { %2276 = vst [vmem:[%s5192_s24 + $0xc0] sm:$0xff] %v5049_v9  ;;  %2277 = vst [vmem:[%s5192_s24 + $0xc8] sm:$0xff] %v5049_v9 }
 0x379   : > { %2278 = vst [vmem:[%s5192_s24 + $0xd0] sm:$0xff] %v5049_v9  ;;  %2279 = vst [vmem:[%s5192_s24 + $0xd8] sm:$0xff] %v5049_v9 }
 0x37a   : > { %2280 = vst [vmem:[%s5192_s24 + $0xe0] sm:$0xff] %v5049_v9  ;;  %2281 = vst [vmem:[%s5192_s24 + $0xe8] sm:$0xff] %v5049_v9 }
 0x37b   : > { %2282 = vst [vmem:[%s5192_s24 + $0xf0] sm:$0xff] %v5049_v9  ;;  %2283 = vst [vmem:[%s5192_s24 + $0xf8] sm:$0xff] %v5049_v9 }
 0x37c   : > { %2284 = vst [vmem:[%s5192_s24 + $0x100] sm:$0xff] %v5049_v9  ;;  %2285 = vst [vmem:[%s5192_s24 + $0x108] sm:$0xff] %v5049_v9 }
 0x37d   : > { %2286 = vst [vmem:[%s5192_s24 + $0x110] sm:$0xff] %v5049_v9  ;;  %2287 = vst [vmem:[%s5192_s24 + $0x118] sm:$0xff] %v5049_v9 }
 0x37e   : > { %2288 = vst [vmem:[%s5192_s24 + $0x120] sm:$0xff] %v5049_v9  ;;  %2289 = vst [vmem:[%s5192_s24 + $0x128] sm:$0xff] %v5049_v9 }
 0x37f   : > { %2290 = vst [vmem:[%s5192_s24 + $0x130] sm:$0xff] %v5049_v9  ;;  %2291 = vst [vmem:[%s5192_s24 + $0x138] sm:$0xff] %v5049_v9 }
 0x380   : > { %2292 = vst [vmem:[%s5192_s24 + $0x140] sm:$0xff] %v5049_v9  ;;  %2293 = vst [vmem:[%s5192_s24 + $0x148] sm:$0xff] %v5049_v9 }
 0x381   : > { %2294 = vst [vmem:[%s5192_s24 + $0x150] sm:$0xff] %v5049_v9  ;;  %2295 = vst [vmem:[%s5192_s24 + $0x158] sm:$0xff] %v5049_v9 }
 0x382   : > { %2296 = vst [vmem:[%s5192_s24 + $0x160] sm:$0xff] %v5049_v9  ;;  %2297 = vst [vmem:[%s5192_s24 + $0x168] sm:$0xff] %v5049_v9 }
 0x383   : > { %2298 = vst [vmem:[%s5192_s24 + $0x170] sm:$0xff] %v5049_v9  ;;  %2299 = vst [vmem:[%s5192_s24 + $0x178] sm:$0xff] %v5049_v9 }
 0x384   : > { %2300 = vst [vmem:[%s5192_s24 + $0x180] sm:$0xff] %v5049_v9  ;;  %2301 = vst [vmem:[%s5192_s24 + $0x188] sm:$0xff] %v5049_v9 }
 0x385   : > { %2302 = vst [vmem:[%s5192_s24 + $0x190] sm:$0xff] %v5049_v9  ;;  %2303 = vst [vmem:[%s5192_s24 + $0x198] sm:$0xff] %v5049_v9 }
 0x386   : > { %2304 = vst [vmem:[%s5192_s24 + $0x1a0] sm:$0xff] %v5049_v9  ;;  %2305 = vst [vmem:[%s5192_s24 + $0x1a8] sm:$0xff] %v5049_v9 }
 0x387   : > { %2306 = vst [vmem:[%s5192_s24 + $0x1b0] sm:$0xff] %v5049_v9  ;;  %2307 = vst [vmem:[%s5192_s24 + $0x1b8] sm:$0xff] %v5049_v9 }
 0x388   : > { %2308 = vst [vmem:[%s5192_s24 + $0x1c0] sm:$0xff] %v5049_v9  ;;  %2309 = vst [vmem:[%s5192_s24 + $0x1c8] sm:$0xff] %v5049_v9 }
 0x389   : > { %2310 = vst [vmem:[%s5192_s24 + $0x1d0] sm:$0xff] %v5049_v9  ;;  %2311 = vst [vmem:[%s5192_s24 + $0x1d8] sm:$0xff] %v5049_v9 }
 0x38a   : > { %2312 = vst [vmem:[%s5192_s24 + $0x1e0] sm:$0xff] %v5049_v9  ;;  %2313 = vst [vmem:[%s5192_s24 + $0x1e8] sm:$0xff] %v5049_v9 }
 0x38b   : > { %2314 = vst [vmem:[%s5192_s24 + $0x1f0] sm:$0xff] %v5049_v9  ;;  %2315 = vst [vmem:[%s5192_s24 + $0x1f8] sm:$0xff] %v5049_v9 }
 0x38c   : > { %2316 = vst [vmem:[%s5192_s24 + $0x200] sm:$0xff] %v5049_v9  ;;  %2317 = vst [vmem:[%s5192_s24 + $0x208] sm:$0xff] %v5049_v9 }
 0x38d   : > { %2318 = vst [vmem:[%s5192_s24 + $0x210] sm:$0xff] %v5049_v9  ;;  %2319 = vst [vmem:[%s5192_s24 + $0x218] sm:$0xff] %v5049_v9 }
 0x38e   : > { %2320 = vst [vmem:[%s5192_s24 + $0x220] sm:$0xff] %v5049_v9  ;;  %2321 = vst [vmem:[%s5192_s24 + $0x228] sm:$0xff] %v5049_v9 }
 0x38f   : > { %2322 = vst [vmem:[%s5192_s24 + $0x230] sm:$0xff] %v5049_v9  ;;  %2323 = vst [vmem:[%s5192_s24 + $0x238] sm:$0xff] %v5049_v9 }
 0x390   : > { %2324 = vst [vmem:[%s5192_s24 + $0x240] sm:$0xff] %v5049_v9  ;;  %2325 = vst [vmem:[%s5192_s24 + $0x248] sm:$0xff] %v5049_v9 }
 0x391   : > { %2326 = vst [vmem:[%s5192_s24 + $0x250] sm:$0xff] %v5049_v9  ;;  %2327 = vst [vmem:[%s5192_s24 + $0x258] sm:$0xff] %v5049_v9 }
 0x392   : > { %2328 = vst [vmem:[%s5192_s24 + $0x260] sm:$0xff] %v5049_v9  ;;  %2329 = vst [vmem:[%s5192_s24 + $0x268] sm:$0xff] %v5049_v9 }
 0x393   : > { %2330 = vst [vmem:[%s5192_s24 + $0x270] sm:$0xff] %v5049_v9  ;;  %2331 = vst [vmem:[%s5192_s24 + $0x278] sm:$0xff] %v5049_v9 }
 0x394   : > { %2332 = vst [vmem:[%s5192_s24 + $0x280] sm:$0xff] %v5049_v9  ;;  %2333 = vst [vmem:[%s5192_s24 + $0x288] sm:$0xff] %v5049_v9 }
 0x395   : > { %2334 = vst [vmem:[%s5192_s24 + $0x290] sm:$0xff] %v5049_v9  ;;  %2335 = vst [vmem:[%s5192_s24 + $0x298] sm:$0xff] %v5049_v9 }
 0x396   : > { %2336 = vst [vmem:[%s5192_s24 + $0x2a0] sm:$0xff] %v5049_v9  ;;  %2337 = vst [vmem:[%s5192_s24 + $0x2a8] sm:$0xff] %v5049_v9 }
 0x397   : > { %2338 = vst [vmem:[%s5192_s24 + $0x2b0] sm:$0xff] %v5049_v9  ;;  %2339 = vst [vmem:[%s5192_s24 + $0x2b8] sm:$0xff] %v5049_v9 }
 0x398   : > { %2340 = vst [vmem:[%s5192_s24 + $0x2c0] sm:$0xff] %v5049_v9  ;;  %2341 = vst [vmem:[%s5192_s24 + $0x2c8] sm:$0xff] %v5049_v9 }
 0x399   : > { %2342 = vst [vmem:[%s5192_s24 + $0x2d0] sm:$0xff] %v5049_v9  ;;  %2343 = vst [vmem:[%s5192_s24 + $0x2d8] sm:$0xff] %v5049_v9 }
 0x39a   : > { %2344 = vst [vmem:[%s5192_s24 + $0x2e0] sm:$0xff] %v5049_v9  ;;  %2345 = vst [vmem:[%s5192_s24 + $0x2e8] sm:$0xff] %v5049_v9 }
 0x39b   : > { %2346 = vst [vmem:[%s5192_s24 + $0x2f0] sm:$0xff] %v5049_v9  ;;  %2347 = vst [vmem:[%s5192_s24 + $0x2f8] sm:$0xff] %v5049_v9 }
 0x39c   : > { %2348 = vst [vmem:[%s5192_s24 + $0x300] sm:$0xff] %v5049_v9  ;;  %2349 = vst [vmem:[%s5192_s24 + $0x308] sm:$0xff] %v5049_v9 }
 0x39d   : > { %2350 = vst [vmem:[%s5192_s24 + $0x310] sm:$0xff] %v5049_v9  ;;  %2351 = vst [vmem:[%s5192_s24 + $0x318] sm:$0xff] %v5049_v9 }
 0x39e   : > { %2352 = vst [vmem:[%s5192_s24 + $0x320] sm:$0xff] %v5049_v9  ;;  %2353 = vst [vmem:[%s5192_s24 + $0x328] sm:$0xff] %v5049_v9 }
 0x39f   : > { %2354 = vst [vmem:[%s5192_s24 + $0x330] sm:$0xff] %v5049_v9  ;;  %2355 = vst [vmem:[%s5192_s24 + $0x338] sm:$0xff] %v5049_v9 }
 0x3a0   : > { %2356 = vst [vmem:[%s5192_s24 + $0x340] sm:$0xff] %v5049_v9  ;;  %2357 = vst [vmem:[%s5192_s24 + $0x348] sm:$0xff] %v5049_v9 }
 0x3a1   : > { %2358 = vst [vmem:[%s5192_s24 + $0x350] sm:$0xff] %v5049_v9  ;;  %2359 = vst [vmem:[%s5192_s24 + $0x358] sm:$0xff] %v5049_v9 }
 0x3a2   : > { %2360 = vst [vmem:[%s5192_s24 + $0x360] sm:$0xff] %v5049_v9  ;;  %2361 = vst [vmem:[%s5192_s24 + $0x368] sm:$0xff] %v5049_v9 }
 0x3a3   : > { %2362 = vst [vmem:[%s5192_s24 + $0x370] sm:$0xff] %v5049_v9  ;;  %2363 = vst [vmem:[%s5192_s24 + $0x378] sm:$0xff] %v5049_v9 }
 0x3a4   : > { %2364 = vst [vmem:[%s5192_s24 + $0x380] sm:$0xff] %v5049_v9  ;;  %2365 = vst [vmem:[%s5192_s24 + $0x388] sm:$0xff] %v5049_v9 }
 0x3a5   : > { %2366 = vst [vmem:[%s5192_s24 + $0x390] sm:$0xff] %v5049_v9  ;;  %2367 = vst [vmem:[%s5192_s24 + $0x398] sm:$0xff] %v5049_v9 }
 0x3a6   : > { %2368 = vst [vmem:[%s5192_s24 + $0x3a0] sm:$0xff] %v5049_v9  ;;  %2369 = vst [vmem:[%s5192_s24 + $0x3a8] sm:$0xff] %v5049_v9 }
 0x3a7   : > { %2370 = vst [vmem:[%s5192_s24 + $0x3b0] sm:$0xff] %v5049_v9  ;;  %2371 = vst [vmem:[%s5192_s24 + $0x3b8] sm:$0xff] %v5049_v9 }
 0x3a8   : > { %2372 = vst [vmem:[%s5192_s24 + $0x3c0] sm:$0xff] %v5049_v9  ;;  %2373 = vst [vmem:[%s5192_s24 + $0x3c8] sm:$0xff] %v5049_v9 }
 0x3a9   : > { %2374 = vst [vmem:[%s5192_s24 + $0x3d0] sm:$0xff] %v5049_v9  ;;  %2375 = vst [vmem:[%s5192_s24 + $0x3d8] sm:$0xff] %v5049_v9 }
 0x3aa   : > { %2376 = vst [vmem:[%s5192_s24 + $0x3e0] sm:$0xff] %v5049_v9  ;;  %2377 = vst [vmem:[%s5192_s24 + $0x3e8] sm:$0xff] %v5049_v9 }
 0x3ab   : > { %2378 = vst [vmem:[%s5192_s24 + $0x3f0] sm:$0xff] %v5049_v9  ;;  %2379 = vst [vmem:[%s5192_s24 + $0x3f8] sm:$0xff] %v5049_v9 }
 0x3ac   : > { %2380 = vst [vmem:[%s5197_s14] sm:$0xff] %v5049_v9  ;;  %2381 = vst [vmem:[%s5197_s14 + $0x8] sm:$0xff] %v5049_v9 }
 0x3ad   : > { %2382 = vst [vmem:[%s5197_s14 + $0x10] sm:$0xff] %v5049_v9  ;;  %2383 = vst [vmem:[%s5197_s14 + $0x18] sm:$0xff] %v5049_v9 }
 0x3ae   : > { %2384 = vst [vmem:[%s5197_s14 + $0x20] sm:$0xff] %v5049_v9  ;;  %2385 = vst [vmem:[%s5197_s14 + $0x28] sm:$0xff] %v5049_v9 }
 0x3af   : > { %2386 = vst [vmem:[%s5197_s14 + $0x30] sm:$0xff] %v5049_v9  ;;  %2387 = vst [vmem:[%s5197_s14 + $0x38] sm:$0xff] %v5049_v9 }
 0x3b0   : > { %2388 = vst [vmem:[%s5197_s14 + $0x40] sm:$0xff] %v5049_v9  ;;  %2389 = vst [vmem:[%s5197_s14 + $0x48] sm:$0xff] %v5049_v9 }
 0x3b1   : > { %2390 = vst [vmem:[%s5197_s14 + $0x50] sm:$0xff] %v5049_v9  ;;  %2391 = vst [vmem:[%s5197_s14 + $0x58] sm:$0xff] %v5049_v9 }
 0x3b2   : > { %2392 = vst [vmem:[%s5197_s14 + $0x60] sm:$0xff] %v5049_v9  ;;  %2393 = vst [vmem:[%s5197_s14 + $0x68] sm:$0xff] %v5049_v9 }
 0x3b3   : > { %2394 = vst [vmem:[%s5197_s14 + $0x70] sm:$0xff] %v5049_v9  ;;  %2395 = vst [vmem:[%s5197_s14 + $0x78] sm:$0xff] %v5049_v9  ;;  %v5051_v9 = vmov inf  }
 0x3b4   : > { %2396 = vst [vmem:[%s5202_s26] sm:$0xff] %v5050_v11  ;;  %2397 = vst [vmem:[%s5202_s26 + $0x8] sm:$0xff] %v5050_v11 }
 0x3b5   : > { %2398 = vst [vmem:[%s5202_s26 + $0x10] sm:$0xff] %v5050_v11  ;;  %2399 = vst [vmem:[%s5202_s26 + $0x18] sm:$0xff] %v5050_v11 }
 0x3b6   : > { %2400 = vst [vmem:[%s5202_s26 + $0x20] sm:$0xff] %v5050_v11  ;;  %2401 = vst [vmem:[%s5202_s26 + $0x28] sm:$0xff] %v5050_v11 }
 0x3b7   : > { %2402 = vst [vmem:[%s5202_s26 + $0x30] sm:$0xff] %v5050_v11  ;;  %2403 = vst [vmem:[%s5202_s26 + $0x38] sm:$0xff] %v5050_v11 }
 0x3b8   : > { %2404 = vst [vmem:[%s5202_s26 + $0x40] sm:$0xff] %v5050_v11  ;;  %2405 = vst [vmem:[%s5202_s26 + $0x48] sm:$0xff] %v5050_v11 }
 0x3b9   : > { %2406 = vst [vmem:[%s5202_s26 + $0x50] sm:$0xff] %v5050_v11  ;;  %2407 = vst [vmem:[%s5202_s26 + $0x58] sm:$0xff] %v5050_v11 }
 0x3ba   : > { %2408 = vst [vmem:[%s5202_s26 + $0x60] sm:$0xff] %v5050_v11  ;;  %2409 = vst [vmem:[%s5202_s26 + $0x68] sm:$0xff] %v5050_v11 }
 0x3bb   : > { %2410 = vst [vmem:[%s5202_s26 + $0x70] sm:$0xff] %v5050_v11  ;;  %2411 = vst [vmem:[%s5202_s26 + $0x78] sm:$0xff] %v5050_v11 }
 0x3bc   : > { %2412 = vst [vmem:[%s5202_s26 + $0x80] sm:$0xff] %v5050_v11  ;;  %2413 = vst [vmem:[%s5202_s26 + $0x88] sm:$0xff] %v5050_v11 }
 0x3bd   : > { %2414 = vst [vmem:[%s5202_s26 + $0x90] sm:$0xff] %v5050_v11  ;;  %2415 = vst [vmem:[%s5202_s26 + $0x98] sm:$0xff] %v5050_v11 }
 0x3be   : > { %2416 = vst [vmem:[%s5202_s26 + $0xa0] sm:$0xff] %v5050_v11  ;;  %2417 = vst [vmem:[%s5202_s26 + $0xa8] sm:$0xff] %v5050_v11 }
 0x3bf   : > { %2418 = vst [vmem:[%s5202_s26 + $0xb0] sm:$0xff] %v5050_v11  ;;  %2419 = vst [vmem:[%s5202_s26 + $0xb8] sm:$0xff] %v5050_v11 }
 0x3c0   : > { %2420 = vst [vmem:[%s5202_s26 + $0xc0] sm:$0xff] %v5050_v11  ;;  %2421 = vst [vmem:[%s5202_s26 + $0xc8] sm:$0xff] %v5050_v11 }
 0x3c1   : > { %2422 = vst [vmem:[%s5202_s26 + $0xd0] sm:$0xff] %v5050_v11  ;;  %2423 = vst [vmem:[%s5202_s26 + $0xd8] sm:$0xff] %v5050_v11 }
 0x3c2   : > { %2424 = vst [vmem:[%s5202_s26 + $0xe0] sm:$0xff] %v5050_v11  ;;  %2425 = vst [vmem:[%s5202_s26 + $0xe8] sm:$0xff] %v5050_v11 }
 0x3c3   : > { %2426 = vst [vmem:[%s5202_s26 + $0xf0] sm:$0xff] %v5050_v11  ;;  %2427 = vst [vmem:[%s5202_s26 + $0xf8] sm:$0xff] %v5050_v11 }
 0x3c4   : > { %2428 = vst [vmem:[%s5202_s26 + $0x100] sm:$0xff] %v5050_v11  ;;  %2429 = vst [vmem:[%s5202_s26 + $0x108] sm:$0xff] %v5050_v11 }
 0x3c5   : > { %2430 = vst [vmem:[%s5202_s26 + $0x110] sm:$0xff] %v5050_v11  ;;  %2431 = vst [vmem:[%s5202_s26 + $0x118] sm:$0xff] %v5050_v11 }
 0x3c6   : > { %2432 = vst [vmem:[%s5202_s26 + $0x120] sm:$0xff] %v5050_v11  ;;  %2433 = vst [vmem:[%s5202_s26 + $0x128] sm:$0xff] %v5050_v11 }
 0x3c7   : > { %2434 = vst [vmem:[%s5202_s26 + $0x130] sm:$0xff] %v5050_v11  ;;  %2435 = vst [vmem:[%s5202_s26 + $0x138] sm:$0xff] %v5050_v11 }
 0x3c8   : > { %2436 = vst [vmem:[%s5202_s26 + $0x140] sm:$0xff] %v5050_v11  ;;  %2437 = vst [vmem:[%s5202_s26 + $0x148] sm:$0xff] %v5050_v11 }
 0x3c9   : > { %2438 = vst [vmem:[%s5202_s26 + $0x150] sm:$0xff] %v5050_v11  ;;  %2439 = vst [vmem:[%s5202_s26 + $0x158] sm:$0xff] %v5050_v11 }
 0x3ca   : > { %2440 = vst [vmem:[%s5202_s26 + $0x160] sm:$0xff] %v5050_v11  ;;  %2441 = vst [vmem:[%s5202_s26 + $0x168] sm:$0xff] %v5050_v11 }
 0x3cb   : > { %2442 = vst [vmem:[%s5202_s26 + $0x170] sm:$0xff] %v5050_v11  ;;  %2443 = vst [vmem:[%s5202_s26 + $0x178] sm:$0xff] %v5050_v11 }
 0x3cc   : > { %2444 = vst [vmem:[%s5202_s26 + $0x180] sm:$0xff] %v5050_v11  ;;  %2445 = vst [vmem:[%s5202_s26 + $0x188] sm:$0xff] %v5050_v11 }
 0x3cd   : > { %2446 = vst [vmem:[%s5202_s26 + $0x190] sm:$0xff] %v5050_v11  ;;  %2447 = vst [vmem:[%s5202_s26 + $0x198] sm:$0xff] %v5050_v11 }
 0x3ce   : > { %2448 = vst [vmem:[%s5202_s26 + $0x1a0] sm:$0xff] %v5050_v11  ;;  %2449 = vst [vmem:[%s5202_s26 + $0x1a8] sm:$0xff] %v5050_v11 }
 0x3cf   : > { %2450 = vst [vmem:[%s5202_s26 + $0x1b0] sm:$0xff] %v5050_v11  ;;  %2451 = vst [vmem:[%s5202_s26 + $0x1b8] sm:$0xff] %v5050_v11 }
 0x3d0   : > { %2452 = vst [vmem:[%s5202_s26 + $0x1c0] sm:$0xff] %v5050_v11  ;;  %2453 = vst [vmem:[%s5202_s26 + $0x1c8] sm:$0xff] %v5050_v11 }
 0x3d1   : > { %2454 = vst [vmem:[%s5202_s26 + $0x1d0] sm:$0xff] %v5050_v11  ;;  %2455 = vst [vmem:[%s5202_s26 + $0x1d8] sm:$0xff] %v5050_v11 }
 0x3d2   : > { %2456 = vst [vmem:[%s5202_s26 + $0x1e0] sm:$0xff] %v5050_v11  ;;  %2457 = vst [vmem:[%s5202_s26 + $0x1e8] sm:$0xff] %v5050_v11 }
 0x3d3   : > { %2458 = vst [vmem:[%s5202_s26 + $0x1f0] sm:$0xff] %v5050_v11  ;;  %2459 = vst [vmem:[%s5202_s26 + $0x1f8] sm:$0xff] %v5050_v11 }
 0x3d4   : > { %2460 = vst [vmem:[%s5202_s26 + $0x200] sm:$0xff] %v5050_v11  ;;  %2461 = vst [vmem:[%s5202_s26 + $0x208] sm:$0xff] %v5050_v11 }
 0x3d5   : > { %2462 = vst [vmem:[%s5202_s26 + $0x210] sm:$0xff] %v5050_v11  ;;  %2463 = vst [vmem:[%s5202_s26 + $0x218] sm:$0xff] %v5050_v11 }
 0x3d6   : > { %2464 = vst [vmem:[%s5202_s26 + $0x220] sm:$0xff] %v5050_v11  ;;  %2465 = vst [vmem:[%s5202_s26 + $0x228] sm:$0xff] %v5050_v11 }
 0x3d7   : > { %2466 = vst [vmem:[%s5202_s26 + $0x230] sm:$0xff] %v5050_v11  ;;  %2467 = vst [vmem:[%s5202_s26 + $0x238] sm:$0xff] %v5050_v11 }
 0x3d8   : > { %2468 = vst [vmem:[%s5202_s26 + $0x240] sm:$0xff] %v5050_v11  ;;  %2469 = vst [vmem:[%s5202_s26 + $0x248] sm:$0xff] %v5050_v11 }
 0x3d9   : > { %2470 = vst [vmem:[%s5202_s26 + $0x250] sm:$0xff] %v5050_v11  ;;  %2471 = vst [vmem:[%s5202_s26 + $0x258] sm:$0xff] %v5050_v11 }
 0x3da   : > { %2472 = vst [vmem:[%s5202_s26 + $0x260] sm:$0xff] %v5050_v11  ;;  %2473 = vst [vmem:[%s5202_s26 + $0x268] sm:$0xff] %v5050_v11 }
 0x3db   : > { %2474 = vst [vmem:[%s5202_s26 + $0x270] sm:$0xff] %v5050_v11  ;;  %2475 = vst [vmem:[%s5202_s26 + $0x278] sm:$0xff] %v5050_v11 }
 0x3dc   : > { %2476 = vst [vmem:[%s5202_s26 + $0x280] sm:$0xff] %v5050_v11  ;;  %2477 = vst [vmem:[%s5202_s26 + $0x288] sm:$0xff] %v5050_v11 }
 0x3dd   : > { %2478 = vst [vmem:[%s5202_s26 + $0x290] sm:$0xff] %v5050_v11  ;;  %2479 = vst [vmem:[%s5202_s26 + $0x298] sm:$0xff] %v5050_v11 }
 0x3de   : > { %2480 = vst [vmem:[%s5202_s26 + $0x2a0] sm:$0xff] %v5050_v11  ;;  %2481 = vst [vmem:[%s5202_s26 + $0x2a8] sm:$0xff] %v5050_v11 }
 0x3df   : > { %2482 = vst [vmem:[%s5202_s26 + $0x2b0] sm:$0xff] %v5050_v11  ;;  %2483 = vst [vmem:[%s5202_s26 + $0x2b8] sm:$0xff] %v5050_v11 }
 0x3e0   : > { %2484 = vst [vmem:[%s5202_s26 + $0x2c0] sm:$0xff] %v5050_v11  ;;  %2485 = vst [vmem:[%s5202_s26 + $0x2c8] sm:$0xff] %v5050_v11 }
 0x3e1   : > { %2486 = vst [vmem:[%s5202_s26 + $0x2d0] sm:$0xff] %v5050_v11  ;;  %2487 = vst [vmem:[%s5202_s26 + $0x2d8] sm:$0xff] %v5050_v11 }
 0x3e2   : > { %2488 = vst [vmem:[%s5202_s26 + $0x2e0] sm:$0xff] %v5050_v11  ;;  %2489 = vst [vmem:[%s5202_s26 + $0x2e8] sm:$0xff] %v5050_v11 }
 0x3e3   : > { %2490 = vst [vmem:[%s5202_s26 + $0x2f0] sm:$0xff] %v5050_v11  ;;  %2491 = vst [vmem:[%s5202_s26 + $0x2f8] sm:$0xff] %v5050_v11 }
 0x3e4   : > { %2492 = vst [vmem:[%s5202_s26 + $0x300] sm:$0xff] %v5050_v11  ;;  %2493 = vst [vmem:[%s5202_s26 + $0x308] sm:$0xff] %v5050_v11 }
 0x3e5   : > { %2494 = vst [vmem:[%s5202_s26 + $0x310] sm:$0xff] %v5050_v11  ;;  %2495 = vst [vmem:[%s5202_s26 + $0x318] sm:$0xff] %v5050_v11 }
 0x3e6   : > { %2496 = vst [vmem:[%s5202_s26 + $0x320] sm:$0xff] %v5050_v11  ;;  %2497 = vst [vmem:[%s5202_s26 + $0x328] sm:$0xff] %v5050_v11 }
 0x3e7   : > { %2498 = vst [vmem:[%s5202_s26 + $0x330] sm:$0xff] %v5050_v11  ;;  %2499 = vst [vmem:[%s5202_s26 + $0x338] sm:$0xff] %v5050_v11 }
 0x3e8   : > { %2500 = vst [vmem:[%s5202_s26 + $0x340] sm:$0xff] %v5050_v11  ;;  %2501 = vst [vmem:[%s5202_s26 + $0x348] sm:$0xff] %v5050_v11 }
 0x3e9   : > { %2502 = vst [vmem:[%s5202_s26 + $0x350] sm:$0xff] %v5050_v11  ;;  %2503 = vst [vmem:[%s5202_s26 + $0x358] sm:$0xff] %v5050_v11 }
 0x3ea   : > { %2504 = vst [vmem:[%s5202_s26 + $0x360] sm:$0xff] %v5050_v11  ;;  %2505 = vst [vmem:[%s5202_s26 + $0x368] sm:$0xff] %v5050_v11 }
 0x3eb   : > { %2506 = vst [vmem:[%s5202_s26 + $0x370] sm:$0xff] %v5050_v11  ;;  %2507 = vst [vmem:[%s5202_s26 + $0x378] sm:$0xff] %v5050_v11 }
 0x3ec   : > { %2508 = vst [vmem:[%s5202_s26 + $0x380] sm:$0xff] %v5050_v11  ;;  %2509 = vst [vmem:[%s5202_s26 + $0x388] sm:$0xff] %v5050_v11 }
 0x3ed   : > { %2510 = vst [vmem:[%s5202_s26 + $0x390] sm:$0xff] %v5050_v11  ;;  %2511 = vst [vmem:[%s5202_s26 + $0x398] sm:$0xff] %v5050_v11 }
 0x3ee   : > { %2512 = vst [vmem:[%s5202_s26 + $0x3a0] sm:$0xff] %v5050_v11  ;;  %2513 = vst [vmem:[%s5202_s26 + $0x3a8] sm:$0xff] %v5050_v11 }
 0x3ef   : > { %2514 = vst [vmem:[%s5202_s26 + $0x3b0] sm:$0xff] %v5050_v11  ;;  %2515 = vst [vmem:[%s5202_s26 + $0x3b8] sm:$0xff] %v5050_v11 }
 0x3f0   : > { %2516 = vst [vmem:[%s5202_s26 + $0x3c0] sm:$0xff] %v5050_v11  ;;  %2517 = vst [vmem:[%s5202_s26 + $0x3c8] sm:$0xff] %v5050_v11 }
 0x3f1   : > { %2518 = vst [vmem:[%s5202_s26 + $0x3d0] sm:$0xff] %v5050_v11  ;;  %2519 = vst [vmem:[%s5202_s26 + $0x3d8] sm:$0xff] %v5050_v11 }
 0x3f2   : > { %2520 = vst [vmem:[%s5202_s26 + $0x3e0] sm:$0xff] %v5050_v11  ;;  %2521 = vst [vmem:[%s5202_s26 + $0x3e8] sm:$0xff] %v5050_v11 }
 0x3f3   : > { %2522 = vst [vmem:[%s5202_s26 + $0x3f0] sm:$0xff] %v5050_v11  ;;  %2523 = vst [vmem:[%s5202_s26 + $0x3f8] sm:$0xff] %v5050_v11 }
 0x3f4   : > { %2524 = vst [vmem:[%s5207_s29] sm:$0xff] %v5051_v9  ;;  %2525 = vst [vmem:[%s5207_s29 + $0x8] sm:$0xff] %v5051_v9 }
 0x3f5   : > { %2526 = vst [vmem:[%s5207_s29 + $0x10] sm:$0xff] %v5051_v9  ;;  %2527 = vst [vmem:[%s5207_s29 + $0x18] sm:$0xff] %v5051_v9 }
 0x3f6   : > { %2528 = vst [vmem:[%s5207_s29 + $0x20] sm:$0xff] %v5051_v9  ;;  %2529 = vst [vmem:[%s5207_s29 + $0x28] sm:$0xff] %v5051_v9 }
 0x3f7   : > { %2530 = vst [vmem:[%s5207_s29 + $0x30] sm:$0xff] %v5051_v9  ;;  %2531 = vst [vmem:[%s5207_s29 + $0x38] sm:$0xff] %v5051_v9 }
 0x3f8   : > { %2532 = vst [vmem:[%s5207_s29 + $0x40] sm:$0xff] %v5051_v9  ;;  %2533 = vst [vmem:[%s5207_s29 + $0x48] sm:$0xff] %v5051_v9 }
 0x3f9   : > { %2534 = vst [vmem:[%s5207_s29 + $0x50] sm:$0xff] %v5051_v9  ;;  %2535 = vst [vmem:[%s5207_s29 + $0x58] sm:$0xff] %v5051_v9 }
 0x3fa   : > { %2536 = vst [vmem:[%s5207_s29 + $0x60] sm:$0xff] %v5051_v9  ;;  %2537 = vst [vmem:[%s5207_s29 + $0x68] sm:$0xff] %v5051_v9 }
 0x3fb   : > { %2538 = vst [vmem:[%s5207_s29 + $0x70] sm:$0xff] %v5051_v9  ;;  %2539 = vst [vmem:[%s5207_s29 + $0x78] sm:$0xff] %v5051_v9 }
 0x3fc   : > { %2540 = vst [vmem:[%s5207_s29 + $0x80] sm:$0xff] %v5051_v9  ;;  %2541 = vst [vmem:[%s5207_s29 + $0x88] sm:$0xff] %v5051_v9 }
 0x3fd   : > { %2542 = vst [vmem:[%s5207_s29 + $0x90] sm:$0xff] %v5051_v9  ;;  %2543 = vst [vmem:[%s5207_s29 + $0x98] sm:$0xff] %v5051_v9 }
 0x3fe   : > { %2544 = vst [vmem:[%s5207_s29 + $0xa0] sm:$0xff] %v5051_v9  ;;  %2545 = vst [vmem:[%s5207_s29 + $0xa8] sm:$0xff] %v5051_v9 }
 0x3ff   : > { %2546 = vst [vmem:[%s5207_s29 + $0xb0] sm:$0xff] %v5051_v9  ;;  %2547 = vst [vmem:[%s5207_s29 + $0xb8] sm:$0xff] %v5051_v9 }
 0x400   : > { %2548 = vst [vmem:[%s5207_s29 + $0xc0] sm:$0xff] %v5051_v9  ;;  %2549 = vst [vmem:[%s5207_s29 + $0xc8] sm:$0xff] %v5051_v9 }
 0x401   : > { %2550 = vst [vmem:[%s5207_s29 + $0xd0] sm:$0xff] %v5051_v9  ;;  %2551 = vst [vmem:[%s5207_s29 + $0xd8] sm:$0xff] %v5051_v9 }
 0x402   : > { %2552 = vst [vmem:[%s5207_s29 + $0xe0] sm:$0xff] %v5051_v9  ;;  %2553 = vst [vmem:[%s5207_s29 + $0xe8] sm:$0xff] %v5051_v9 }
 0x403   : > { %2554 = vst [vmem:[%s5207_s29 + $0xf0] sm:$0xff] %v5051_v9  ;;  %2555 = vst [vmem:[%s5207_s29 + $0xf8] sm:$0xff] %v5051_v9 }
 0x404   : > { %2556 = vst [vmem:[%s5207_s29 + $0x100] sm:$0xff] %v5051_v9  ;;  %2557 = vst [vmem:[%s5207_s29 + $0x108] sm:$0xff] %v5051_v9 }
 0x405   : > { %2558 = vst [vmem:[%s5207_s29 + $0x110] sm:$0xff] %v5051_v9  ;;  %2559 = vst [vmem:[%s5207_s29 + $0x118] sm:$0xff] %v5051_v9 }
 0x406   : > { %2560 = vst [vmem:[%s5207_s29 + $0x120] sm:$0xff] %v5051_v9  ;;  %2561 = vst [vmem:[%s5207_s29 + $0x128] sm:$0xff] %v5051_v9 }
 0x407   : > { %2562 = vst [vmem:[%s5207_s29 + $0x130] sm:$0xff] %v5051_v9  ;;  %2563 = vst [vmem:[%s5207_s29 + $0x138] sm:$0xff] %v5051_v9 }
 0x408   : > { %2564 = vst [vmem:[%s5207_s29 + $0x140] sm:$0xff] %v5051_v9  ;;  %2565 = vst [vmem:[%s5207_s29 + $0x148] sm:$0xff] %v5051_v9 }
 0x409   : > { %2566 = vst [vmem:[%s5207_s29 + $0x150] sm:$0xff] %v5051_v9  ;;  %2567 = vst [vmem:[%s5207_s29 + $0x158] sm:$0xff] %v5051_v9 }
 0x40a   : > { %2568 = vst [vmem:[%s5207_s29 + $0x160] sm:$0xff] %v5051_v9  ;;  %2569 = vst [vmem:[%s5207_s29 + $0x168] sm:$0xff] %v5051_v9 }
 0x40b   : > { %2570 = vst [vmem:[%s5207_s29 + $0x170] sm:$0xff] %v5051_v9  ;;  %2571 = vst [vmem:[%s5207_s29 + $0x178] sm:$0xff] %v5051_v9 }
 0x40c   : > { %2572 = vst [vmem:[%s5207_s29 + $0x180] sm:$0xff] %v5051_v9  ;;  %2573 = vst [vmem:[%s5207_s29 + $0x188] sm:$0xff] %v5051_v9 }
 0x40d   : > { %2574 = vst [vmem:[%s5207_s29 + $0x190] sm:$0xff] %v5051_v9  ;;  %2575 = vst [vmem:[%s5207_s29 + $0x198] sm:$0xff] %v5051_v9 }
 0x40e   : > { %2576 = vst [vmem:[%s5207_s29 + $0x1a0] sm:$0xff] %v5051_v9  ;;  %2577 = vst [vmem:[%s5207_s29 + $0x1a8] sm:$0xff] %v5051_v9 }
 0x40f   : > { %2578 = vst [vmem:[%s5207_s29 + $0x1b0] sm:$0xff] %v5051_v9  ;;  %2579 = vst [vmem:[%s5207_s29 + $0x1b8] sm:$0xff] %v5051_v9 }
 0x410   : > { %2580 = vst [vmem:[%s5207_s29 + $0x1c0] sm:$0xff] %v5051_v9  ;;  %2581 = vst [vmem:[%s5207_s29 + $0x1c8] sm:$0xff] %v5051_v9 }
 0x411   : > { %2582 = vst [vmem:[%s5207_s29 + $0x1d0] sm:$0xff] %v5051_v9  ;;  %2583 = vst [vmem:[%s5207_s29 + $0x1d8] sm:$0xff] %v5051_v9 }
 0x412   : > { %2584 = vst [vmem:[%s5207_s29 + $0x1e0] sm:$0xff] %v5051_v9  ;;  %2585 = vst [vmem:[%s5207_s29 + $0x1e8] sm:$0xff] %v5051_v9 }
 0x413   : > { %2586 = vst [vmem:[%s5207_s29 + $0x1f0] sm:$0xff] %v5051_v9  ;;  %2587 = vst [vmem:[%s5207_s29 + $0x1f8] sm:$0xff] %v5051_v9 }
 0x414   : > { %2588 = vst [vmem:[%s5207_s29 + $0x200] sm:$0xff] %v5051_v9  ;;  %2589 = vst [vmem:[%s5207_s29 + $0x208] sm:$0xff] %v5051_v9 }
 0x415   : > { %2590 = vst [vmem:[%s5207_s29 + $0x210] sm:$0xff] %v5051_v9  ;;  %2591 = vst [vmem:[%s5207_s29 + $0x218] sm:$0xff] %v5051_v9 }
 0x416   : > { %2592 = vst [vmem:[%s5207_s29 + $0x220] sm:$0xff] %v5051_v9  ;;  %2593 = vst [vmem:[%s5207_s29 + $0x228] sm:$0xff] %v5051_v9 }
 0x417   : > { %2594 = vst [vmem:[%s5207_s29 + $0x230] sm:$0xff] %v5051_v9  ;;  %2595 = vst [vmem:[%s5207_s29 + $0x238] sm:$0xff] %v5051_v9 }
 0x418   : > { %2596 = vst [vmem:[%s5207_s29 + $0x240] sm:$0xff] %v5051_v9  ;;  %2597 = vst [vmem:[%s5207_s29 + $0x248] sm:$0xff] %v5051_v9 }
 0x419   : > { %2598 = vst [vmem:[%s5207_s29 + $0x250] sm:$0xff] %v5051_v9  ;;  %2599 = vst [vmem:[%s5207_s29 + $0x258] sm:$0xff] %v5051_v9 }
 0x41a   : > { %2600 = vst [vmem:[%s5207_s29 + $0x260] sm:$0xff] %v5051_v9  ;;  %2601 = vst [vmem:[%s5207_s29 + $0x268] sm:$0xff] %v5051_v9 }
 0x41b   : > { %2602 = vst [vmem:[%s5207_s29 + $0x270] sm:$0xff] %v5051_v9  ;;  %2603 = vst [vmem:[%s5207_s29 + $0x278] sm:$0xff] %v5051_v9 }
 0x41c   : > { %2604 = vst [vmem:[%s5207_s29 + $0x280] sm:$0xff] %v5051_v9  ;;  %2605 = vst [vmem:[%s5207_s29 + $0x288] sm:$0xff] %v5051_v9 }
 0x41d   : > { %2606 = vst [vmem:[%s5207_s29 + $0x290] sm:$0xff] %v5051_v9  ;;  %2607 = vst [vmem:[%s5207_s29 + $0x298] sm:$0xff] %v5051_v9 }
 0x41e   : > { %2608 = vst [vmem:[%s5207_s29 + $0x2a0] sm:$0xff] %v5051_v9  ;;  %2609 = vst [vmem:[%s5207_s29 + $0x2a8] sm:$0xff] %v5051_v9 }
 0x41f   : > { %2610 = vst [vmem:[%s5207_s29 + $0x2b0] sm:$0xff] %v5051_v9  ;;  %2611 = vst [vmem:[%s5207_s29 + $0x2b8] sm:$0xff] %v5051_v9 }
 0x420   : > { %2612 = vst [vmem:[%s5207_s29 + $0x2c0] sm:$0xff] %v5051_v9  ;;  %2613 = vst [vmem:[%s5207_s29 + $0x2c8] sm:$0xff] %v5051_v9 }
 0x421   : > { %2614 = vst [vmem:[%s5207_s29 + $0x2d0] sm:$0xff] %v5051_v9  ;;  %2615 = vst [vmem:[%s5207_s29 + $0x2d8] sm:$0xff] %v5051_v9 }
 0x422   : > { %2616 = vst [vmem:[%s5207_s29 + $0x2e0] sm:$0xff] %v5051_v9  ;;  %2617 = vst [vmem:[%s5207_s29 + $0x2e8] sm:$0xff] %v5051_v9 }
 0x423   : > { %2618 = vst [vmem:[%s5207_s29 + $0x2f0] sm:$0xff] %v5051_v9  ;;  %2619 = vst [vmem:[%s5207_s29 + $0x2f8] sm:$0xff] %v5051_v9 }
 0x424   : > { %2620 = vst [vmem:[%s5207_s29 + $0x300] sm:$0xff] %v5051_v9  ;;  %2621 = vst [vmem:[%s5207_s29 + $0x308] sm:$0xff] %v5051_v9 }
 0x425   : > { %2622 = vst [vmem:[%s5207_s29 + $0x310] sm:$0xff] %v5051_v9  ;;  %2623 = vst [vmem:[%s5207_s29 + $0x318] sm:$0xff] %v5051_v9 }
 0x426   : > { %2624 = vst [vmem:[%s5207_s29 + $0x320] sm:$0xff] %v5051_v9  ;;  %2625 = vst [vmem:[%s5207_s29 + $0x328] sm:$0xff] %v5051_v9 }
 0x427   : > { %2626 = vst [vmem:[%s5207_s29 + $0x330] sm:$0xff] %v5051_v9  ;;  %2627 = vst [vmem:[%s5207_s29 + $0x338] sm:$0xff] %v5051_v9 }
 0x428   : > { %2628 = vst [vmem:[%s5207_s29 + $0x340] sm:$0xff] %v5051_v9  ;;  %2629 = vst [vmem:[%s5207_s29 + $0x348] sm:$0xff] %v5051_v9 }
 0x429   : > { %2630 = vst [vmem:[%s5207_s29 + $0x350] sm:$0xff] %v5051_v9  ;;  %2631 = vst [vmem:[%s5207_s29 + $0x358] sm:$0xff] %v5051_v9 }
 0x42a   : > { %2632 = vst [vmem:[%s5207_s29 + $0x360] sm:$0xff] %v5051_v9  ;;  %2633 = vst [vmem:[%s5207_s29 + $0x368] sm:$0xff] %v5051_v9 }
 0x42b   : > { %2634 = vst [vmem:[%s5207_s29 + $0x370] sm:$0xff] %v5051_v9  ;;  %2635 = vst [vmem:[%s5207_s29 + $0x378] sm:$0xff] %v5051_v9 }
 0x42c   : > { %2636 = vst [vmem:[%s5207_s29 + $0x380] sm:$0xff] %v5051_v9  ;;  %2637 = vst [vmem:[%s5207_s29 + $0x388] sm:$0xff] %v5051_v9 }
 0x42d   : > { %2638 = vst [vmem:[%s5207_s29 + $0x390] sm:$0xff] %v5051_v9  ;;  %2639 = vst [vmem:[%s5207_s29 + $0x398] sm:$0xff] %v5051_v9 }
 0x42e   : > { %2640 = vst [vmem:[%s5207_s29 + $0x3a0] sm:$0xff] %v5051_v9  ;;  %2641 = vst [vmem:[%s5207_s29 + $0x3a8] sm:$0xff] %v5051_v9 }
 0x42f   : > { %2642 = vst [vmem:[%s5207_s29 + $0x3b0] sm:$0xff] %v5051_v9  ;;  %2643 = vst [vmem:[%s5207_s29 + $0x3b8] sm:$0xff] %v5051_v9 }
 0x430   : > { %2644 = vst [vmem:[%s5207_s29 + $0x3c0] sm:$0xff] %v5051_v9  ;;  %2645 = vst [vmem:[%s5207_s29 + $0x3c8] sm:$0xff] %v5051_v9 }
 0x431   : > { %2646 = vst [vmem:[%s5207_s29 + $0x3d0] sm:$0xff] %v5051_v9  ;;  %2647 = vst [vmem:[%s5207_s29 + $0x3d8] sm:$0xff] %v5051_v9 }
 0x432   : > { %2648 = vst [vmem:[%s5207_s29 + $0x3e0] sm:$0xff] %v5051_v9  ;;  %2649 = vst [vmem:[%s5207_s29 + $0x3e8] sm:$0xff] %v5051_v9 }
 0x433   : > { %2650 = vst [vmem:[%s5207_s29 + $0x3f0] sm:$0xff] %v5051_v9  ;;  %2651 = vst [vmem:[%s5207_s29 + $0x3f8] sm:$0xff] %v5051_v9 }
 0x434 PF: > { %v2652_v11 = vld [vmem:[%s5192_s24] sm:$0xff]  ;;  %v3068_v25 = vmul.f32 %v5812_v24, %v5812_v24  ;;  %v2653_v36 = vld [vmem:[%s5192_s24 + $0x8] sm:$0xff]  ;;  %v3069_v49 = vmul.f32 %v5820_v5, %v5820_v5  ;;  %v2654_v8 = vld [vmem:[%s5192_s24 + $0x10] sm:$0xff]  ;;  %v3070_v9 = vmul.f32 %v5808_v21, %v5808_v21  ;;  %v3071_v16 = vmul.f32 %v5816_v26, %v5816_v26 }
 0x435   : > { %v2655_v17 = vld [vmem:[%s5192_s24 + $0x18] sm:$0xff]  ;;  %v2656_v44 = vld [vmem:[%s5192_s24 + $0x20] sm:$0xff]  ;;  %v3072_v51 = vmul.f32 %v5828_v39, %v5828_v39  ;;  %v2657_v24 = vld [vmem:[%s5192_s24 + $0x28] sm:$0xff]  ;;  %v3073_v5 = vmul.f32 %v5836_v48, %v5836_v48  ;;  %v3074_v42 = vmul.f32 %v5824_v38, %v5824_v38  ;;  %v3075_v21 = vmul.f32 %v5832_v43, %v5832_v43 }
 0x436   : > { %v3196_v26 = vadd.f32 %v3068_v25, %v2652_v11  ;;  %v3197_v4 = vadd.f32 %v3069_v49, %v2653_v36  ;;  %v3198_v39 = vadd.f32 %v3070_v9, %v2654_v8  ;;  %v3199_v62 = vadd.f32 %v3071_v16, %v2655_v17  ;;  %v2658_v60 = vld [vmem:[%s5192_s24 + $0x30] sm:$0xff]  ;;  %v2659_v14 = vld [vmem:[%s5192_s24 + $0x38] sm:$0xff]  ;;  %v2660_v57 = vld [vmem:[%s5192_s24 + $0x40] sm:$0xff] }
 0x437   : > { %v3200_v48 = vadd.f32 %v3072_v51, %v2656_v44  ;;  %v3201_v1 = vadd.f32 %v3073_v5, %v2657_v24  ;;  %v3202_v38 = vadd.f32 %v3074_v42, %v2658_v60  ;;  %v3203_v61 = vadd.f32 %v3075_v21, %v2659_v14  ;;  %v2661_v43 = vld [vmem:[%s5192_s24 + $0x48] sm:$0xff]  ;;  %v2662_v25 = vld [vmem:[%s5192_s24 + $0x50] sm:$0xff]  ;;  %v2663_v36 = vld [vmem:[%s5192_s24 + $0x58] sm:$0xff] }
 0x438   : > { %3852 = vst [vmem:[%s5192_s24] sm:$0xff] %v3196_v26  ;;  %3853 = vst [vmem:[%s5192_s24 + $0x8] sm:$0xff] %v3197_v4  ;;  %v3076_v16 = vmul.f32 %v5844_v10, %v5844_v10  ;;  %v3077_v24 = vmul.f32 %v5852_v56, %v5852_v56  ;;  %v3078_v21 = vmul.f32 %v5840_v50, %v5840_v50  ;;  %v2664_v5 = vld [vmem:[%s5192_s24 + $0x60] sm:$0xff]  ;;  %v2665_v8 = vld [vmem:[%s5192_s24 + $0x68] sm:$0xff] }
 0x439   : > { %3854 = vst [vmem:[%s5192_s24 + $0x10] sm:$0xff] %v3198_v39  ;;  %3855 = vst [vmem:[%s5192_s24 + $0x18] sm:$0xff] %v3199_v62  ;;  %v3079_v17 = vmul.f32 %v5848_v55, %v5848_v55  ;;  %v2666_v26 = vld [vmem:[%s5192_s24 + $0x70] sm:$0xff]  ;;  %v3080_v39 = vmul.f32 %v5860_v7, %v5860_v7  ;;  %v3081_v42 = vmul.f32 %v5868_v23, %v5868_v23  ;;  %v2667_v49 = vld [vmem:[%s5192_s24 + $0x78] sm:$0xff] }
 0x43a   : > { %3856 = vst [vmem:[%s5192_s24 + $0x20] sm:$0xff] %v3200_v48  ;;  %3857 = vst [vmem:[%s5192_s24 + $0x28] sm:$0xff] %v3201_v1  ;;  %v3082_v44 = vmul.f32 %v5856_v58, %v5856_v58  ;;  %v3083_v48 = vmul.f32 %v5864_v22, %v5864_v22  ;;  %v3205_v4 = vadd.f32 %v3077_v24, %v2661_v43  ;;  %v2668_v60 = vld [vmem:[%s5192_s24 + $0x80] sm:$0xff]  ;;  %v2669_v62 = vld [vmem:[%s5192_s24 + $0x88] sm:$0xff] }
 0x43b   : > { %3858 = vst [vmem:[%s5192_s24 + $0x30] sm:$0xff] %v3202_v38  ;;  %3859 = vst [vmem:[%s5192_s24 + $0x38] sm:$0xff] %v3203_v61  ;;  %v3204_v38 = vadd.f32 %v3076_v16, %v2660_v57  ;;  %v3206_v51 = vadd.f32 %v3078_v21, %v2662_v25  ;;  %v3207_v14 = vadd.f32 %v3079_v17, %v2663_v36  ;;  %v2670_v58 = vld [vmem:[%s5192_s24 + $0x90] sm:$0xff]  ;;  %v2671_v22 = vld [vmem:[%s5192_s24 + $0x98] sm:$0xff] }
 0x43c   : > { %v3208_v61 = vadd.f32 %v3080_v39, %v2664_v5  ;;  %v3209_v1 = vadd.f32 %v3081_v42, %v2665_v8  ;;  %v3210_v11 = vadd.f32 %v3082_v44, %v2666_v26  ;;  %v3211_v9 = vadd.f32 %v3083_v48, %v2667_v49  ;;  %v2672_v57 = vld [vmem:[%s5192_s24 + $0xa0] sm:$0xff]  ;;  %3861 = vst [vmem:[%s5192_s24 + $0x48] sm:$0xff] %v3205_v4  ;;  %v2673_v24 = vld [vmem:[%s5192_s24 + $0xa8] sm:$0xff]  ;;  %v2674_v21 = vld [vmem:[%s5192_s24 + $0xb0] sm:$0xff] }
 0x43d   : > { %3860 = vst [vmem:[%s5192_s24 + $0x40] sm:$0xff] %v3204_v38  ;;  %3862 = vst [vmem:[%s5192_s24 + $0x50] sm:$0xff] %v3206_v51  ;;  %v3084_v43 = vmul.f32 %v5876_v18, %v5876_v18  ;;  %v3085_v25 = vmul.f32 %v5884_v15, %v5884_v15  ;;  %v3086_v36 = vmul.f32 %v5872_v27, %v5872_v27  ;;  %v2675_v17 = vld [vmem:[%s5192_s24 + $0xb8] sm:$0xff]  ;;  %v2676_v38 = vld [vmem:[%s5192_s24 + $0xc0] sm:$0xff] }
 0x43e   : > { %3863 = vst [vmem:[%s5192_s24 + $0x58] sm:$0xff] %v3207_v14  ;;  %v3087_v16 = vmul.f32 %v5880_v0, %v5880_v0  ;;  %3864 = vst [vmem:[%s5192_s24 + $0x60] sm:$0xff] %v3208_v61  ;;  %v3088_v5 = vmul.f32 %v5892_v30, %v5892_v30  ;;  %v3089_v8 = vmul.f32 %v5900_v20, %v5900_v20  ;;  %v2677_v4 = vld [vmem:[%s5192_s24 + $0xc8] sm:$0xff] }
 0x43f   : > { %3865 = vst [vmem:[%s5192_s24 + $0x68] sm:$0xff] %v3209_v1  ;;  %3866 = vst [vmem:[%s5192_s24 + $0x70] sm:$0xff] %v3210_v11  ;;  %v3090_v26 = vmul.f32 %v5888_v28, %v5888_v28  ;;  %v3091_v39 = vmul.f32 %v5896_v33, %v5896_v33  ;;  %v3212_v42 = vadd.f32 %v3084_v43, %v2668_v60  ;;  %v2678_v11 = vld [vmem:[%s5192_s24 + $0xd0] sm:$0xff]  ;;  %v2680_v60 = vld [vmem:[%s5192_s24 + $0xe0] sm:$0xff] }
 0x440   : > { %3867 = vst [vmem:[%s5192_s24 + $0x78] sm:$0xff] %v3211_v9  ;;  %v3213_v44 = vadd.f32 %v3085_v25, %v2669_v62  ;;  %v3214_v49 = vadd.f32 %v3086_v36, %v2670_v58  ;;  %v3215_v48 = vadd.f32 %v3087_v16, %v2671_v22  ;;  %v3216_v51 = vadd.f32 %v3088_v5, %v2672_v57  ;;  %v2679_v9 = vld [vmem:[%s5192_s24 + $0xd8] sm:$0xff]  ;;  %v2681_v43 = vld [vmem:[%s5192_s24 + $0xe8] sm:$0xff]  ;;  %v2682_v25 = vld [vmem:[%s5192_s24 + $0xf0] sm:$0xff] }
 0x441   : > { %v3217_v14 = vadd.f32 %v3089_v8, %v2673_v24  ;;  %v3218_v61 = vadd.f32 %v3090_v26, %v2674_v21  ;;  %v3219_v1 = vadd.f32 %v3091_v39, %v2675_v17  ;;  %3868 = vst [vmem:[%s5192_s24 + $0x80] sm:$0xff] %v3212_v42  ;;  %v3092_v58 = vmul.f32 %v5908_v41, %v5908_v41  ;;  %v2683_v36 = vld [vmem:[%s5192_s24 + $0xf8] sm:$0xff]  ;;  %v2684_v42 = vld [vmem:[%s5192_s24 + $0x100] sm:$0xff] }
 0x442   : > { %3869 = vst [vmem:[%s5192_s24 + $0x88] sm:$0xff] %v3213_v44  ;;  %3870 = vst [vmem:[%s5192_s24 + $0x90] sm:$0xff] %v3214_v49  ;;  %v3093_v22 = vmul.f32 %v5916_v52, %v5916_v52  ;;  %v3094_v62 = vmul.f32 %v5904_v40, %v5904_v40  ;;  %v3095_v57 = vmul.f32 %v5912_v46, %v5912_v46  ;;  %v2685_v44 = vld [vmem:[%s5192_s24 + $0x108] sm:$0xff] }
 0x443   : > { %3871 = vst [vmem:[%s5192_s24 + $0x98] sm:$0xff] %v3215_v48  ;;  %3872 = vst [vmem:[%s5192_s24 + $0xa0] sm:$0xff] %v3216_v51  ;;  %v3096_v16 = vmul.f32 %v5924_v6, %v5924_v6  ;;  %v3097_v24 = vmul.f32 %v5932_v54, %v5932_v54  ;;  %v3098_v21 = vmul.f32 %v5920_v63, %v5920_v63 }
 0x444   : > { %3873 = vst [vmem:[%s5192_s24 + $0xa8] sm:$0xff] %v3217_v14  ;;  %3874 = vst [vmem:[%s5192_s24 + $0xb0] sm:$0xff] %v3218_v61  ;;  %v3099_v17 = vmul.f32 %v5928_v29, %v5928_v29  ;;  %v3220_v5 = vadd.f32 %v3092_v58, %v2676_v38  ;;  %v3221_v8 = vadd.f32 %v3093_v22, %v2677_v4  ;;  %v2686_v61 = vld [vmem:[%s5192_s24 + $0x110] sm:$0xff]  ;;  %v2688_v38 = vld [vmem:[%s5192_s24 + $0x120] sm:$0xff] }
 0x445   : > { %3875 = vst [vmem:[%s5192_s24 + $0xb8] sm:$0xff] %v3219_v1  ;;  %v3222_v26 = vadd.f32 %v3094_v62, %v2678_v11  ;;  %v3223_v39 = vadd.f32 %v3095_v57, %v2679_v9  ;;  %v3224_v49 = vadd.f32 %v3096_v16, %v2680_v60  ;;  %v3225_v48 = vadd.f32 %v3097_v24, %v2681_v43  ;;  %v2687_v1 = vld [vmem:[%s5192_s24 + $0x118] sm:$0xff]  ;;  %v2689_v58 = vld [vmem:[%s5192_s24 + $0x128] sm:$0xff]  ;;  %v2690_v22 = vld [vmem:[%s5192_s24 + $0x130] sm:$0xff] }
 0x446   : > { %v3226_v51 = vadd.f32 %v3098_v21, %v2682_v25  ;;  %v3227_v14 = vadd.f32 %v3099_v17, %v2683_v36  ;;  %3876 = vst [vmem:[%s5192_s24 + $0xc0] sm:$0xff] %v3220_v5  ;;  %3877 = vst [vmem:[%s5192_s24 + $0xc8] sm:$0xff] %v3221_v8  ;;  %v3100_v4 = vmul.f32 %v5940_v35, %v5940_v35  ;;  %v2691_v62 = vld [vmem:[%s5192_s24 + $0x138] sm:$0xff]  ;;  %v2692_v5 = vld [vmem:[%s5192_s24 + $0x140] sm:$0xff] }
 0x447   : > { %3878 = vst [vmem:[%s5192_s24 + $0xd0] sm:$0xff] %v3222_v26  ;;  %3879 = vst [vmem:[%s5192_s24 + $0xd8] sm:$0xff] %v3223_v39  ;;  %v3101_v11 = vmul.f32 %v5948_v3, %v5948_v3  ;;  %v3102_v9 = vmul.f32 %v5936_v47, %v5936_v47  ;;  %v3103_v60 = vmul.f32 %v5944_v2, %v5944_v2  ;;  %v2693_v8 = vld [vmem:[%s5192_s24 + $0x148] sm:$0xff] }
 0x448   : > { %3880 = vst [vmem:[%s5192_s24 + $0xe0] sm:$0xff] %v3224_v49  ;;  %3881 = vst [vmem:[%s5192_s24 + $0xe8] sm:$0xff] %v3225_v48  ;;  %v3104_v57 = vmul.f32 %v5956_v12, %v5956_v12  ;;  %v3105_v43 = vmul.f32 %v5964_v45, %v5964_v45  ;;  %v3106_v25 = vmul.f32 %v5952_v34, %v5952_v34 }
 0x449   : > { %3882 = vst [vmem:[%s5192_s24 + $0xf0] sm:$0xff] %v3226_v51  ;;  %3883 = vst [vmem:[%s5192_s24 + $0xf8] sm:$0xff] %v3227_v14  ;;  %v3107_v36 = vmul.f32 %v5960_v37, %v5960_v37  ;;  %v3228_v16 = vadd.f32 %v3100_v4, %v2684_v42  ;;  %v3229_v24 = vadd.f32 %v3101_v11, %v2685_v44  ;;  %v2694_v51 = vld [vmem:[%s5192_s24 + $0x150] sm:$0xff]  ;;  %v2695_v14 = vld [vmem:[%s5192_s24 + $0x158] sm:$0xff] }
 0x44a   : > { %v3230_v21 = vadd.f32 %v3102_v9, %v2686_v61  ;;  %v3231_v17 = vadd.f32 %v3103_v60, %v2687_v1  ;;  %v3232_v26 = vadd.f32 %v3104_v57, %v2688_v38  ;;  %v3233_v39 = vadd.f32 %v3105_v43, %v2689_v58  ;;  %v2696_v42 = vld [vmem:[%s5192_s24 + $0x160] sm:$0xff]  ;;  %v2697_v4 = vld [vmem:[%s5192_s24 + $0x168] sm:$0xff]  ;;  %v2698_v11 = vld [vmem:[%s5192_s24 + $0x170] sm:$0xff] }
 0x44b   : > { %v3234_v49 = vadd.f32 %v3106_v25, %v2690_v22  ;;  %v3235_v48 = vadd.f32 %v3107_v36, %v2691_v62  ;;  %3884 = vst [vmem:[%s5192_s24 + $0x100] sm:$0xff] %v3228_v16  ;;  %3885 = vst [vmem:[%s5192_s24 + $0x108] sm:$0xff] %v3229_v24  ;;  %v3108_v44 = vmul.f32 %v5972_v19, %v5972_v19  ;;  %v2699_v9 = vld [vmem:[%s5192_s24 + $0x178] sm:$0xff] }
 0x44c   : > { %3886 = vst [vmem:[%s5192_s24 + $0x110] sm:$0xff] %v3230_v21  ;;  %3887 = vst [vmem:[%s5192_s24 + $0x118] sm:$0xff] %v3231_v17  ;;  %v3109_v61 = vmul.f32 %v5980_v31, %v5980_v31  ;;  %v3110_v1 = vmul.f32 %v5968_v53, %v5968_v53  ;;  %v3111_v38 = vmul.f32 %v5976_v32, %v5976_v32  ;;  %v8972_v22 = vld [vmem:[#allocation69_spill] sm:$0xff]  ;;  %v2700_v21 = vld [vmem:[%s5192_s24 + $0x180] sm:$0xff] }
 0x44d   : > { %3888 = vst [vmem:[%s5192_s24 + $0x120] sm:$0xff] %v3232_v26  ;;  %3889 = vst [vmem:[%s5192_s24 + $0x128] sm:$0xff] %v3233_v39  ;;  %v3112_v60 = vmul.f32 %v5988_v13, %v5988_v13  ;;  %v3113_v58 = vmul.f32 %v5996_v59, %v5996_v59  ;;  %v3114_v62 = vmul.f32 %v8972_v22, %v8972_v22  ;;  %v8973_v57 = vld [vmem:[#allocation73_spill] sm:$0xff]  ;;  %v2701_v17 = vld [vmem:[%s5192_s24 + $0x188] sm:$0xff] }
 0x44e   : > { %3890 = vst [vmem:[%s5192_s24 + $0x130] sm:$0xff] %v3234_v49  ;;  %3891 = vst [vmem:[%s5192_s24 + $0x138] sm:$0xff] %v3235_v48  ;;  %v3115_v43 = vmul.f32 %v8973_v57, %v8973_v57  ;;  %v3236_v25 = vadd.f32 %v3108_v44, %v2692_v5  ;;  %v3237_v36 = vadd.f32 %v3109_v61, %v2693_v8  ;;  %v2702_v22 = vld [vmem:[%s5192_s24 + $0x190] sm:$0xff]  ;;  %v2703_v57 = vld [vmem:[%s5192_s24 + $0x198] sm:$0xff] }
 0x44f   : > { %v3238_v16 = vadd.f32 %v3110_v1, %v2694_v51  ;;  %v3239_v24 = vadd.f32 %v3111_v38, %v2695_v14  ;;  %v3240_v26 = vadd.f32 %v3112_v60, %v2696_v42  ;;  %v3241_v39 = vadd.f32 %v3113_v58, %v2697_v4  ;;  %v2704_v5 = vld [vmem:[%s5192_s24 + $0x1a0] sm:$0xff]  ;;  %v8974_v8 = vld [vmem:[#allocation79_spill] sm:$0xff]  ;;  %v8976_v44 = vld [vmem:[#allocation77_spill] sm:$0xff] }
 0x450   : > { %v3242_v49 = vadd.f32 %v3114_v62, %v2698_v11  ;;  %v3243_v48 = vadd.f32 %v3115_v43, %v2699_v9  ;;  %3892 = vst [vmem:[%s5192_s24 + $0x140] sm:$0xff] %v3236_v25  ;;  %3893 = vst [vmem:[%s5192_s24 + $0x148] sm:$0xff] %v3237_v36  ;;  %v3116_v51 = vmul.f32 %v8974_v8, %v8974_v8  ;;  %v8975_v14 = vld [vmem:[#allocation83_spill] sm:$0xff]  ;;  %v8977_v1 = vld [vmem:[#allocation81_spill] sm:$0xff] }
 0x451   : > { %3894 = vst [vmem:[%s5192_s24 + $0x150] sm:$0xff] %v3238_v16  ;;  %3895 = vst [vmem:[%s5192_s24 + $0x158] sm:$0xff] %v3239_v24  ;;  %v3117_v42 = vmul.f32 %v8975_v14, %v8975_v14  ;;  %v3118_v61 = vmul.f32 %v8976_v44, %v8976_v44  ;;  %v3119_v38 = vmul.f32 %v8977_v1, %v8977_v1  ;;  %v2705_v4 = vld [vmem:[%s5192_s24 + $0x1a8] sm:$0xff]  ;;  %v2706_v11 = vld [vmem:[%s5192_s24 + $0x1b0] sm:$0xff] }
 0x452   : > { %v2707_v9 = vld [vmem:[%s5192_s24 + $0x1b8] sm:$0xff]  ;;  %3896 = vst [vmem:[%s5192_s24 + $0x160] sm:$0xff] %v3240_v26  ;;  %3897 = vst [vmem:[%s5192_s24 + $0x168] sm:$0xff] %v3241_v39  ;;  %v8978_v60 = vld [vmem:[#allocation87_spill] sm:$0xff]  ;;  %v3244_v26 = vadd.f32 %v3116_v51, %v2700_v21 }
 0x453   : > { %3898 = vst [vmem:[%s5192_s24 + $0x170] sm:$0xff] %v3242_v49  ;;  %3899 = vst [vmem:[%s5192_s24 + $0x178] sm:$0xff] %v3243_v48  ;;  %v3120_v58 = vmul.f32 %v8978_v60, %v8978_v60  ;;  %v8979_v62 = vld [vmem:[#allocation91_spill] sm:$0xff]  ;;  %v8980_v25 = vld [vmem:[#allocation85_spill] sm:$0xff]  ;;  %v3245_v39 = vadd.f32 %v3117_v42, %v2701_v17  ;;  %v3246_v49 = vadd.f32 %v3118_v61, %v2702_v22 }
 0x454   : > { %v3121_v43 = vmul.f32 %v8979_v62, %v8979_v62  ;;  %v3122_v36 = vmul.f32 %v8980_v25, %v8980_v25  ;;  %v8981_v16 = vld [vmem:[#allocation89_spill] sm:$0xff]  ;;  %v3247_v48 = vadd.f32 %v3119_v38, %v2703_v57  ;;  %v2708_v1 = vld [vmem:[%s5192_s24 + $0x1c0] sm:$0xff]  ;;  %v2709_v60 = vld [vmem:[%s5192_s24 + $0x1c8] sm:$0xff]  ;;  %3900 = vst [vmem:[%s5192_s24 + $0x180] sm:$0xff] %v3244_v26 }
 0x455   : > { %v3123_v24 = vmul.f32 %v8981_v16, %v8981_v16  ;;  %v3248_v44 = vadd.f32 %v3120_v58, %v2704_v5  ;;  %v2710_v8 = vld [vmem:[%s5192_s24 + $0x1d0] sm:$0xff]  ;;  %v2711_v16 = vld [vmem:[%s5192_s24 + $0x1d8] sm:$0xff]  ;;  %v2712_v21 = vld [vmem:[%s5192_s24 + $0x1e0] sm:$0xff]  ;;  %3901 = vst [vmem:[%s5192_s24 + $0x188] sm:$0xff] %v3245_v39 }
 0x456   : > { %v3249_v62 = vadd.f32 %v3121_v43, %v2705_v4  ;;  %v3250_v14 = vadd.f32 %v3122_v36, %v2706_v11  ;;  %3902 = vst [vmem:[%s5192_s24 + $0x190] sm:$0xff] %v3246_v49  ;;  %3903 = vst [vmem:[%s5192_s24 + $0x198] sm:$0xff] %v3247_v48  ;;  %v8982_v22 = vld [vmem:[#allocation95_spill] sm:$0xff]  ;;  %v8984_v51 = vld [vmem:[#allocation93_spill] sm:$0xff] }
 0x457   : > { %v3251_v25 = vadd.f32 %v3123_v24, %v2707_v9  ;;  %v3124_v57 = vmul.f32 %v8982_v22, %v8982_v22  ;;  %v8983_v17 = vld [vmem:[#allocation99_spill] sm:$0xff]  ;;  %v3126_v42 = vmul.f32 %v8984_v51, %v8984_v51  ;;  %v8985_v61 = vld [vmem:[#allocation97_spill] sm:$0xff]  ;;  %v2714_v11 = vld [vmem:[%s5192_s24 + $0x1f0] sm:$0xff]  ;;  %3904 = vst [vmem:[%s5192_s24 + $0x1a0] sm:$0xff] %v3248_v44 }
 0x458   : > { %v3125_v5 = vmul.f32 %v8983_v17, %v8983_v17  ;;  %v3127_v38 = vmul.f32 %v8985_v61, %v8985_v61  ;;  %v2713_v4 = vld [vmem:[%s5192_s24 + $0x1e8] sm:$0xff]  ;;  %v2715_v9 = vld [vmem:[%s5192_s24 + $0x1f8] sm:$0xff]  ;;  %3905 = vst [vmem:[%s5192_s24 + $0x1a8] sm:$0xff] %v3249_v62  ;;  %3906 = vst [vmem:[%s5192_s24 + $0x1b0] sm:$0xff] %v3250_v14 }
 0x459   : > { %3907 = vst [vmem:[%s5192_s24 + $0x1b8] sm:$0xff] %v3251_v25  ;;  %v8986_v58 = vld [vmem:[#allocation102_spill] sm:$0xff]  ;;  %v8987_v36 = vld [vmem:[#allocation104_spill] sm:$0xff]  ;;  %v8988_v26 = vld [vmem:[#allocation101_spill] sm:$0xff]  ;;  %v3252_v14 = vadd.f32 %v3124_v57, %v2708_v1  ;;  %v3254_v25 = vadd.f32 %v3126_v42, %v2710_v8 }
 0x45a   : > { %v3128_v43 = vmul.f32 %v8986_v58, %v8986_v58  ;;  %v3129_v24 = vmul.f32 %v8987_v36, %v8987_v36  ;;  %v3130_v39 = vmul.f32 %v8988_v26, %v8988_v26  ;;  %v8989_v49 = vld [vmem:[#allocation103_spill] sm:$0xff]  ;;  %v3253_v62 = vadd.f32 %v3125_v5, %v2709_v60  ;;  %v2716_v61 = vld [vmem:[%s5192_s24 + $0x200] sm:$0xff]  ;;  %v2718_v22 = vld [vmem:[%s5192_s24 + $0x210] sm:$0xff] }
 0x45b   : > { %v3131_v44 = vmul.f32 %v8989_v49, %v8989_v49  ;;  %v3255_v48 = vadd.f32 %v3127_v38, %v2711_v16  ;;  %v2717_v58 = vld [vmem:[%s5192_s24 + $0x208] sm:$0xff]  ;;  %v2719_v49 = vld [vmem:[%s5192_s24 + $0x218] sm:$0xff]  ;;  %v2720_v1 = vld [vmem:[%s5192_s24 + $0x220] sm:$0xff]  ;;  %3908 = vst [vmem:[%s5192_s24 + $0x1c0] sm:$0xff] %v3252_v14 }
 0x45c   : > { %v3256_v51 = vadd.f32 %v3128_v43, %v2712_v21  ;;  %v3257_v36 = vadd.f32 %v3129_v24, %v2713_v4  ;;  %v3258_v17 = vadd.f32 %v3130_v39, %v2714_v11  ;;  %3909 = vst [vmem:[%s5192_s24 + $0x1c8] sm:$0xff] %v3253_v62  ;;  %3910 = vst [vmem:[%s5192_s24 + $0x1d0] sm:$0xff] %v3254_v25  ;;  %v8990_v8 = vld [vmem:[#allocation106_spill] sm:$0xff]  ;;  %v8991_v16 = vld [vmem:[#allocation108_spill] sm:$0xff] }
 0x45d   : > { %v3259_v26 = vadd.f32 %v3131_v44, %v2715_v9  ;;  %3911 = vst [vmem:[%s5192_s24 + $0x1d8] sm:$0xff] %v3255_v48  ;;  %v3132_v60 = vmul.f32 %v8990_v8, %v8990_v8  ;;  %v3133_v21 = vmul.f32 %v8991_v16, %v8991_v16  ;;  %v8992_v57 = vld [vmem:[#allocation105_spill] sm:$0xff]  ;;  %v8993_v42 = vld [vmem:[#allocation107_spill] sm:$0xff]  ;;  %v2722_v11 = vld [vmem:[%s5192_s24 + $0x230] sm:$0xff] }
 0x45e   : > { %v3134_v5 = vmul.f32 %v8992_v57, %v8992_v57  ;;  %v3135_v38 = vmul.f32 %v8993_v42, %v8993_v42  ;;  %v2721_v4 = vld [vmem:[%s5192_s24 + $0x228] sm:$0xff]  ;;  %v2723_v9 = vld [vmem:[%s5192_s24 + $0x238] sm:$0xff]  ;;  %3912 = vst [vmem:[%s5192_s24 + $0x1e0] sm:$0xff] %v3256_v51  ;;  %3913 = vst [vmem:[%s5192_s24 + $0x1e8] sm:$0xff] %v3257_v36 }
 0x45f   : > { %3914 = vst [vmem:[%s5192_s24 + $0x1f0] sm:$0xff] %v3258_v17  ;;  %3915 = vst [vmem:[%s5192_s24 + $0x1f8] sm:$0xff] %v3259_v26  ;;  %v8994_v43 = vld [vmem:[#allocation17_spill] sm:$0xff]  ;;  %v8996_v14 = vld [vmem:[#allocation15_spill] sm:$0xff]  ;;  %v3260_v17 = vadd.f32 %v3132_v60, %v2716_v61  ;;  %v3261_v36 = vadd.f32 %v3133_v21, %v2717_v58 }
 0x460   : > { %v3136_v24 = vmul.f32 %v8994_v43, %v8994_v43  ;;  %v8995_v39 = vld [vmem:[#allocation21_spill] sm:$0xff]  ;;  %v3138_v62 = vmul.f32 %v8996_v14, %v8996_v14  ;;  %v8997_v25 = vld [vmem:[#allocation19_spill] sm:$0xff]  ;;  %v3262_v26 = vadd.f32 %v3134_v5, %v2718_v22  ;;  %v3263_v48 = vadd.f32 %v3135_v38, %v2719_v49  ;;  %v2724_v42 = vld [vmem:[%s5192_s24 + $0x240] sm:$0xff] }
 0x461   : > { %v3137_v44 = vmul.f32 %v8995_v39, %v8995_v39  ;;  %v3139_v51 = vmul.f32 %v8997_v25, %v8997_v25  ;;  %v2725_v43 = vld [vmem:[%s5192_s24 + $0x248] sm:$0xff]  ;;  %v2726_v8 = vld [vmem:[%s5192_s24 + $0x250] sm:$0xff]  ;;  %v2727_v25 = vld [vmem:[%s5192_s24 + $0x258] sm:$0xff]  ;;  %3916 = vst [vmem:[%s5192_s24 + $0x200] sm:$0xff] %v3260_v17 }
 0x462   : > { %v3264_v57 = vadd.f32 %v3136_v24, %v2720_v1  ;;  %v3266_v16 = vadd.f32 %v3138_v62, %v2722_v11  ;;  %v2728_v61 = vld [vmem:[%s5192_s24 + $0x260] sm:$0xff]  ;;  %3917 = vst [vmem:[%s5192_s24 + $0x208] sm:$0xff] %v3261_v36  ;;  %3918 = vst [vmem:[%s5192_s24 + $0x210] sm:$0xff] %v3262_v26  ;;  %v8998_v22 = vld [vmem:[#allocation25_spill] sm:$0xff] }
 0x463   : > { %v3265_v39 = vadd.f32 %v3137_v44, %v2721_v4  ;;  %v3267_v14 = vadd.f32 %v3139_v51, %v2723_v9  ;;  %3919 = vst [vmem:[%s5192_s24 + $0x218] sm:$0xff] %v3263_v48  ;;  %v3140_v58 = vmul.f32 %v8998_v22, %v8998_v22  ;;  %v8999_v49 = vld [vmem:[#allocation29_spill] sm:$0xff]  ;;  %v9000_v60 = vld [vmem:[#allocation23_spill] sm:$0xff]  ;;  %v2730_v11 = vld [vmem:[%s5192_s24 + $0x270] sm:$0xff] }
 0x464   : > { %v3141_v1 = vmul.f32 %v8999_v49, %v8999_v49  ;;  %v3142_v21 = vmul.f32 %v9000_v60, %v9000_v60  ;;  %v9001_v5 = vld [vmem:[#allocation27_spill] sm:$0xff]  ;;  %v2731_v9 = vld [vmem:[%s5192_s24 + $0x278] sm:$0xff]  ;;  %3920 = vst [vmem:[%s5192_s24 + $0x220] sm:$0xff] %v3264_v57  ;;  %3922 = vst [vmem:[%s5192_s24 + $0x230] sm:$0xff] %v3266_v16 }
 0x465   : > { %v3143_v38 = vmul.f32 %v9001_v5, %v9001_v5  ;;  %v2729_v4 = vld [vmem:[%s5192_s24 + $0x268] sm:$0xff]  ;;  %3921 = vst [vmem:[%s5192_s24 + $0x228] sm:$0xff] %v3265_v39  ;;  %3923 = vst [vmem:[%s5192_s24 + $0x238] sm:$0xff] %v3267_v14  ;;  %v9003_v62 = vld [vmem:[#allocation33_spill] sm:$0xff]  ;;  %v3268_v16 = vadd.f32 %v3140_v58, %v2724_v42 }
 0x466   : > { %v9002_v24 = vld [vmem:[#allocation31_spill] sm:$0xff]  ;;  %v3145_v51 = vmul.f32 %v9003_v62, %v9003_v62  ;;  %v9004_v17 = vld [vmem:[#allocation30_spill] sm:$0xff]  ;;  %v9005_v26 = vld [vmem:[#allocation32_spill] sm:$0xff]  ;;  %v3269_v39 = vadd.f32 %v3141_v1, %v2725_v43  ;;  %v3270_v14 = vadd.f32 %v3142_v21, %v2726_v8 }
 0x467   : > { %v3144_v44 = vmul.f32 %v9002_v24, %v9002_v24  ;;  %v3146_v36 = vmul.f32 %v9004_v17, %v9004_v17  ;;  %v3147_v57 = vmul.f32 %v9005_v26, %v9005_v26  ;;  %v3271_v48 = vadd.f32 %v3143_v38, %v2727_v25  ;;  %v2732_v5 = vld [vmem:[%s5192_s24 + $0x280] sm:$0xff]  ;;  %v2733_v24 = vld [vmem:[%s5192_s24 + $0x288] sm:$0xff]  ;;  %v2734_v22 = vld [vmem:[%s5192_s24 + $0x290] sm:$0xff]  ;;  %3924 = vst [vmem:[%s5192_s24 + $0x240] sm:$0xff] %v3268_v16 }
 0x468   : > { %v3273_v62 = vadd.f32 %v3145_v51, %v2729_v4  ;;  %v2735_v26 = vld [vmem:[%s5192_s24 + $0x298] sm:$0xff]  ;;  %v2736_v42 = vld [vmem:[%s5192_s24 + $0x2a0] sm:$0xff]  ;;  %3925 = vst [vmem:[%s5192_s24 + $0x248] sm:$0xff] %v3269_v39  ;;  %3926 = vst [vmem:[%s5192_s24 + $0x250] sm:$0xff] %v3270_v14 }
 0x469   : > { %v3272_v60 = vadd.f32 %v3144_v44, %v2728_v61  ;;  %v3274_v49 = vadd.f32 %v3146_v36, %v2730_v11  ;;  %v3275_v17 = vadd.f32 %v3147_v57, %v2731_v9  ;;  %3927 = vst [vmem:[%s5192_s24 + $0x258] sm:$0xff] %v3271_v48  ;;  %v9006_v8 = vld [vmem:[#allocation36_spill] sm:$0xff]  ;;  %v9007_v25 = vld [vmem:[#allocation39_spill] sm:$0xff]  ;;  %v9009_v21 = vld [vmem:[#allocation38_spill] sm:$0xff] }
 0x46a   : > { %v3148_v43 = vmul.f32 %v9006_v8, %v9006_v8  ;;  %v3149_v61 = vmul.f32 %v9007_v25, %v9007_v25  ;;  %v9008_v58 = vld [vmem:[#allocation35_spill] sm:$0xff]  ;;  %v3151_v38 = vmul.f32 %v9009_v21, %v9009_v21  ;;  %v2738_v11 = vld [vmem:[%s5192_s24 + $0x2b0] sm:$0xff]  ;;  %v2739_v9 = vld [vmem:[%s5192_s24 + $0x2b8] sm:$0xff]  ;;  %3929 = vst [vmem:[%s5192_s24 + $0x268] sm:$0xff] %v3273_v62 }
 0x46b   : > { %v3150_v1 = vmul.f32 %v9008_v58, %v9008_v58  ;;  %v2737_v4 = vld [vmem:[%s5192_s24 + $0x2a8] sm:$0xff]  ;;  %3928 = vst [vmem:[%s5192_s24 + $0x260] sm:$0xff] %v3272_v60  ;;  %3930 = vst [vmem:[%s5192_s24 + $0x270] sm:$0xff] %v3274_v49  ;;  %v9010_v44 = vld [vmem:[#allocation41_spill] sm:$0xff] }
 0x46c   : > { %3931 = vst [vmem:[%s5192_s24 + $0x278] sm:$0xff] %v3275_v17  ;;  %v3152_v51 = vmul.f32 %v9010_v44, %v9010_v44  ;;  %v9011_v36 = vld [vmem:[#allocation43_spill] sm:$0xff]  ;;  %v9012_v16 = vld [vmem:[#allocation40_spill] sm:$0xff]  ;;  %v9013_v14 = vld [vmem:[#allocation42_spill] sm:$0xff]  ;;  %v3276_v49 = vadd.f32 %v3148_v43, %v2732_v5  ;;  %v3277_v62 = vadd.f32 %v3149_v61, %v2733_v24  ;;  %v3279_v48 = vadd.f32 %v3151_v38, %v2735_v26 }
 0x46d   : > { %v3153_v57 = vmul.f32 %v9011_v36, %v9011_v36  ;;  %v3154_v39 = vmul.f32 %v9012_v16, %v9012_v16  ;;  %v3155_v60 = vmul.f32 %v9013_v14, %v9013_v14  ;;  %v3278_v17 = vadd.f32 %v3150_v1, %v2734_v22  ;;  %v2740_v21 = vld [vmem:[%s5192_s24 + $0x2c0] sm:$0xff]  ;;  %v2741_v44 = vld [vmem:[%s5192_s24 + $0x2c8] sm:$0xff]  ;;  %v2742_v8 = vld [vmem:[%s5192_s24 + $0x2d0] sm:$0xff] }
 0x46e   : > { %v3280_v58 = vadd.f32 %v3152_v51, %v2736_v42  ;;  %v2743_v14 = vld [vmem:[%s5192_s24 + $0x2d8] sm:$0xff]  ;;  %v2744_v5 = vld [vmem:[%s5192_s24 + $0x2e0] sm:$0xff]  ;;  %3932 = vst [vmem:[%s5192_s24 + $0x280] sm:$0xff] %v3276_v49  ;;  %3933 = vst [vmem:[%s5192_s24 + $0x288] sm:$0xff] %v3277_v62 }
 0x46f   : > { %v3281_v36 = vadd.f32 %v3153_v57, %v2737_v4  ;;  %v3282_v25 = vadd.f32 %v3154_v39, %v2738_v11  ;;  %v3283_v16 = vadd.f32 %v3155_v60, %v2739_v9  ;;  %3934 = vst [vmem:[%s5192_s24 + $0x290] sm:$0xff] %v3278_v17  ;;  %3935 = vst [vmem:[%s5192_s24 + $0x298] sm:$0xff] %v3279_v48  ;;  %v9014_v22 = vld [vmem:[#allocation45_spill] sm:$0xff]  ;;  %v9015_v26 = vld [vmem:[#allocation47_spill] sm:$0xff] }
 0x470   : > { %v3156_v24 = vmul.f32 %v9014_v22, %v9014_v22  ;;  %v3157_v42 = vmul.f32 %v9015_v26, %v9015_v26  ;;  %v9016_v43 = vld [vmem:[#allocation44_spill] sm:$0xff]  ;;  %v9017_v1 = vld [vmem:[#allocation46_spill] sm:$0xff]  ;;  %v2745_v4 = vld [vmem:[%s5192_s24 + $0x2e8] sm:$0xff]  ;;  %3936 = vst [vmem:[%s5192_s24 + $0x2a0] sm:$0xff] %v3280_v58 }
 0x471   : > { %v3158_v61 = vmul.f32 %v9016_v43, %v9016_v43  ;;  %v3159_v38 = vmul.f32 %v9017_v1, %v9017_v1  ;;  %v2746_v11 = vld [vmem:[%s5192_s24 + $0x2f0] sm:$0xff]  ;;  %v2747_v9 = vld [vmem:[%s5192_s24 + $0x2f8] sm:$0xff]  ;;  %3937 = vst [vmem:[%s5192_s24 + $0x2a8] sm:$0xff] %v3281_v36  ;;  %3938 = vst [vmem:[%s5192_s24 + $0x2b0] sm:$0xff] %v3282_v25 }
 0x472   : > { %3939 = vst [vmem:[%s5192_s24 + $0x2b8] sm:$0xff] %v3283_v16  ;;  %v9018_v51 = vld [vmem:[#allocation49_spill] sm:$0xff]  ;;  %v9019_v39 = vld [vmem:[#allocation51_spill] sm:$0xff]  ;;  %v9020_v49 = vld [vmem:[#allocation48_spill] sm:$0xff]  ;;  %v3284_v25 = vadd.f32 %v3156_v24, %v2740_v21  ;;  %v3285_v36 = vadd.f32 %v3157_v42, %v2741_v44 }
 0x473   : > { %v3160_v57 = vmul.f32 %v9018_v51, %v9018_v51  ;;  %v3161_v60 = vmul.f32 %v9019_v39, %v9019_v39  ;;  %v3162_v62 = vmul.f32 %v9020_v49, %v9020_v49  ;;  %v9021_v17 = vld [vmem:[#allocation50_spill] sm:$0xff]  ;;  %v3286_v16 = vadd.f32 %v3158_v61, %v2742_v8  ;;  %v2749_v51 = vld [vmem:[%s5192_s24 + $0x308] sm:$0xff]  ;;  %v2750_v22 = vld [vmem:[%s5192_s24 + $0x310] sm:$0xff] }
 0x474   : > { %v3163_v58 = vmul.f32 %v9021_v17, %v9021_v17  ;;  %v3287_v48 = vadd.f32 %v3159_v38, %v2743_v14  ;;  %v2748_v1 = vld [vmem:[%s5192_s24 + $0x300] sm:$0xff]  ;;  %v2751_v17 = vld [vmem:[%s5192_s24 + $0x318] sm:$0xff]  ;;  %3940 = vst [vmem:[%s5192_s24 + $0x2c0] sm:$0xff] %v3284_v25  ;;  %3941 = vst [vmem:[%s5192_s24 + $0x2c8] sm:$0xff] %v3285_v36 }
 0x475   : > { %v3288_v43 = vadd.f32 %v3160_v57, %v2744_v5  ;;  %v3289_v39 = vadd.f32 %v3161_v60, %v2745_v4  ;;  %v3290_v26 = vadd.f32 %v3162_v62, %v2746_v11  ;;  %v2752_v21 = vld [vmem:[%s5192_s24 + $0x320] sm:$0xff]  ;;  %3942 = vst [vmem:[%s5192_s24 + $0x2d0] sm:$0xff] %v3286_v16  ;;  %v9022_v8 = vld [vmem:[#allocation53_spill] sm:$0xff]  ;;  %v9023_v14 = vld [vmem:[#allocation55_spill] sm:$0xff] }
 0x476   : > { %v3291_v49 = vadd.f32 %v3163_v58, %v2747_v9  ;;  %3943 = vst [vmem:[%s5192_s24 + $0x2d8] sm:$0xff] %v3287_v48  ;;  %v3164_v44 = vmul.f32 %v9022_v8, %v9022_v8  ;;  %v3165_v5 = vmul.f32 %v9023_v14, %v9023_v14  ;;  %v9024_v24 = vld [vmem:[#allocation52_spill] sm:$0xff]  ;;  %v9025_v61 = vld [vmem:[#allocation54_spill] sm:$0xff]  ;;  %v2753_v4 = vld [vmem:[%s5192_s24 + $0x328] sm:$0xff] }
 0x477   : > { %v3166_v42 = vmul.f32 %v9024_v24, %v9024_v24  ;;  %v3167_v38 = vmul.f32 %v9025_v61, %v9025_v61  ;;  %v2754_v11 = vld [vmem:[%s5192_s24 + $0x330] sm:$0xff]  ;;  %v2755_v9 = vld [vmem:[%s5192_s24 + $0x338] sm:$0xff]  ;;  %3944 = vst [vmem:[%s5192_s24 + $0x2e0] sm:$0xff] %v3288_v43  ;;  %3945 = vst [vmem:[%s5192_s24 + $0x2e8] sm:$0xff] %v3289_v39 }
 0x478   : > { %3946 = vst [vmem:[%s5192_s24 + $0x2f0] sm:$0xff] %v3290_v26  ;;  %3947 = vst [vmem:[%s5192_s24 + $0x2f8] sm:$0xff] %v3291_v49  ;;  %v9026_v57 = vld [vmem:[#allocation57_spill] sm:$0xff]  ;;  %v9027_v62 = vld [vmem:[#allocation59_spill] sm:$0xff]  ;;  %v3292_v26 = vadd.f32 %v3164_v44, %v2748_v1  ;;  %v3293_v39 = vadd.f32 %v3165_v5, %v2749_v51 }
 0x479   : > { %v3168_v60 = vmul.f32 %v9026_v57, %v9026_v57  ;;  %v3169_v58 = vmul.f32 %v9027_v62, %v9027_v62  ;;  %v9028_v25 = vld [vmem:[#allocation56_spill] sm:$0xff]  ;;  %v9029_v16 = vld [vmem:[#allocation58_spill] sm:$0xff]  ;;  %v3294_v49 = vadd.f32 %v3166_v42, %v2750_v22  ;;  %v3295_v48 = vadd.f32 %v3167_v38, %v2751_v17  ;;  %v2757_v57 = vld [vmem:[%s5192_s24 + $0x348] sm:$0xff] }
 0x47a   : > { %v3170_v36 = vmul.f32 %v9028_v25, %v9028_v25  ;;  %v3171_v43 = vmul.f32 %v9029_v16, %v9029_v16  ;;  %v2756_v61 = vld [vmem:[%s5192_s24 + $0x340] sm:$0xff]  ;;  %v2758_v8 = vld [vmem:[%s5192_s24 + $0x350] sm:$0xff]  ;;  %v2759_v16 = vld [vmem:[%s5192_s24 + $0x358] sm:$0xff]  ;;  %3948 = vst [vmem:[%s5192_s24 + $0x300] sm:$0xff] %v3292_v26 }
 0x47b   : > { %v3296_v24 = vadd.f32 %v3168_v60, %v2752_v21  ;;  %v3297_v62 = vadd.f32 %v3169_v58, %v2753_v4  ;;  %v2760_v1 = vld [vmem:[%s5192_s24 + $0x360] sm:$0xff]  ;;  %3949 = vst [vmem:[%s5192_s24 + $0x308] sm:$0xff] %v3293_v39  ;;  %3950 = vst [vmem:[%s5192_s24 + $0x310] sm:$0xff] %v3294_v49  ;;  %v9030_v22 = vld [vmem:[#allocation61_spill] sm:$0xff] }
 0x47c   : > { %v3298_v14 = vadd.f32 %v3170_v36, %v2754_v11  ;;  %v3299_v25 = vadd.f32 %v3171_v43, %v2755_v9  ;;  %3951 = vst [vmem:[%s5192_s24 + $0x318] sm:$0xff] %v3295_v48  ;;  %v3172_v51 = vmul.f32 %v9030_v22, %v9030_v22  ;;  %v9031_v17 = vld [vmem:[#allocation63_spill] sm:$0xff]  ;;  %v9032_v44 = vld [vmem:[#allocation60_spill] sm:$0xff]  ;;  %v9033_v42 = vld [vmem:[#allocation62_spill] sm:$0xff] }
 0x47d   : > { %v3173_v21 = vmul.f32 %v9031_v17, %v9031_v17  ;;  %v3174_v5 = vmul.f32 %v9032_v44, %v9032_v44  ;;  %v3175_v38 = vmul.f32 %v9033_v42, %v9033_v42  ;;  %v2761_v4 = vld [vmem:[%s5192_s24 + $0x368] sm:$0xff]  ;;  %v2762_v11 = vld [vmem:[%s5192_s24 + $0x370] sm:$0xff]  ;;  %v2763_v9 = vld [vmem:[%s5192_s24 + $0x378] sm:$0xff]  ;;  %3952 = vst [vmem:[%s5192_s24 + $0x320] sm:$0xff] %v3296_v24 }
 0x47e   : > { %3953 = vst [vmem:[%s5192_s24 + $0x328] sm:$0xff] %v3297_v62  ;;  %3954 = vst [vmem:[%s5192_s24 + $0x330] sm:$0xff] %v3298_v14  ;;  %v9034_v60 = vld [vmem:[#allocation65_spill] sm:$0xff]  ;;  %v9035_v36 = vld [vmem:[#allocation68_spill] sm:$0xff]  ;;  %v3300_v14 = vadd.f32 %v3172_v51, %v2756_v61 }
 0x47f   : > { %3955 = vst [vmem:[%s5192_s24 + $0x338] sm:$0xff] %v3299_v25  ;;  %v3176_v58 = vmul.f32 %v9034_v60, %v9034_v60  ;;  %v3177_v43 = vmul.f32 %v9035_v36, %v9035_v36  ;;  %v9036_v26 = vld [vmem:[#allocation64_spill] sm:$0xff]  ;;  %v9037_v49 = vld [vmem:[#allocation67_spill] sm:$0xff]  ;;  %v3301_v62 = vadd.f32 %v3173_v21, %v2757_v57  ;;  %v3302_v25 = vadd.f32 %v3174_v5, %v2758_v8  ;;  %v2764_v42 = vld [vmem:[%s5192_s24 + $0x380] sm:$0xff] }
 0x480   : > { %v3178_v39 = vmul.f32 %v9036_v26, %v9036_v26  ;;  %v3179_v24 = vmul.f32 %v9037_v49, %v9037_v49  ;;  %v3303_v48 = vadd.f32 %v3175_v38, %v2759_v16  ;;  %v2765_v60 = vld [vmem:[%s5192_s24 + $0x388] sm:$0xff]  ;;  %v2766_v22 = vld [vmem:[%s5192_s24 + $0x390] sm:$0xff]  ;;  %v2767_v49 = vld [vmem:[%s5192_s24 + $0x398] sm:$0xff]  ;;  %3956 = vst [vmem:[%s5192_s24 + $0x340] sm:$0xff] %v3300_v14 }
 0x481   : > { %v3304_v44 = vadd.f32 %v3176_v58, %v2760_v1  ;;  %v3305_v36 = vadd.f32 %v3177_v43, %v2761_v4  ;;  %v2768_v61 = vld [vmem:[%s5192_s24 + $0x3a0] sm:$0xff]  ;;  %3957 = vst [vmem:[%s5192_s24 + $0x348] sm:$0xff] %v3301_v62  ;;  %3958 = vst [vmem:[%s5192_s24 + $0x350] sm:$0xff] %v3302_v25  ;;  %v9038_v8 = vld [vmem:[#allocation72_spill] sm:$0xff] }
 0x482   : > { %v3306_v17 = vadd.f32 %v3178_v39, %v2762_v11  ;;  %v3307_v26 = vadd.f32 %v3179_v24, %v2763_v9  ;;  %3959 = vst [vmem:[%s5192_s24 + $0x358] sm:$0xff] %v3303_v48  ;;  %v3180_v57 = vmul.f32 %v9038_v8, %v9038_v8  ;;  %v9039_v16 = vld [vmem:[#allocation76_spill] sm:$0xff]  ;;  %v9040_v51 = vld [vmem:[#allocation70_spill] sm:$0xff]  ;;  %v2769_v4 = vld [vmem:[%s5192_s24 + $0x3a8] sm:$0xff] }
 0x483   : > { %v3181_v1 = vmul.f32 %v9039_v16, %v9039_v16  ;;  %v3182_v21 = vmul.f32 %v9040_v51, %v9040_v51  ;;  %v9041_v5 = vld [vmem:[#allocation74_spill] sm:$0xff]  ;;  %v2770_v11 = vld [vmem:[%s5192_s24 + $0x3b0] sm:$0xff]  ;;  %v2771_v9 = vld [vmem:[%s5192_s24 + $0x3b8] sm:$0xff]  ;;  %3960 = vst [vmem:[%s5192_s24 + $0x360] sm:$0xff] %v3304_v44 }
 0x484   : > { %v3183_v38 = vmul.f32 %v9041_v5, %v9041_v5  ;;  %3961 = vst [vmem:[%s5192_s24 + $0x368] sm:$0xff] %v3305_v36  ;;  %3962 = vst [vmem:[%s5192_s24 + $0x370] sm:$0xff] %v3306_v17  ;;  %v9042_v58 = vld [vmem:[#allocation80_spill] sm:$0xff]  ;;  %v9044_v14 = vld [vmem:[#allocation78_spill] sm:$0xff]  ;;  %v3308_v17 = vadd.f32 %v3180_v57, %v2764_v42 }
 0x485   : > { %3963 = vst [vmem:[%s5192_s24 + $0x378] sm:$0xff] %v3307_v26  ;;  %v3184_v43 = vmul.f32 %v9042_v58, %v9042_v58  ;;  %v9043_v39 = vld [vmem:[#allocation84_spill] sm:$0xff]  ;;  %v3186_v62 = vmul.f32 %v9044_v14, %v9044_v14  ;;  %v9045_v25 = vld [vmem:[#allocation82_spill] sm:$0xff]  ;;  %v3309_v36 = vadd.f32 %v3181_v1, %v2765_v60  ;;  %v3310_v26 = vadd.f32 %v3182_v21, %v2766_v22  ;;  %v2773_v58 = vld [vmem:[%s5192_s24 + $0x3c8] sm:$0xff] }
 0x486   : > { %v3185_v24 = vmul.f32 %v9043_v39, %v9043_v39  ;;  %v3187_v44 = vmul.f32 %v9045_v25, %v9045_v25  ;;  %v3311_v48 = vadd.f32 %v3183_v38, %v2767_v49  ;;  %v2772_v5 = vld [vmem:[%s5192_s24 + $0x3c0] sm:$0xff]  ;;  %v2774_v8 = vld [vmem:[%s5192_s24 + $0x3d0] sm:$0xff]  ;;  %v2775_v25 = vld [vmem:[%s5192_s24 + $0x3d8] sm:$0xff]  ;;  %3964 = vst [vmem:[%s5192_s24 + $0x380] sm:$0xff] %v3308_v17 }
 0x487   : > { %v3312_v51 = vadd.f32 %v3184_v43, %v2768_v61  ;;  %v3314_v16 = vadd.f32 %v3186_v62, %v2770_v11  ;;  %v2776_v42 = vld [vmem:[%s5192_s24 + $0x3e0] sm:$0xff]  ;;  %3965 = vst [vmem:[%s5192_s24 + $0x388] sm:$0xff] %v3309_v36  ;;  %3966 = vst [vmem:[%s5192_s24 + $0x390] sm:$0xff] %v3310_v26  ;;  %v9046_v22 = vld [vmem:[#allocation88_spill] sm:$0xff] }
 0x488   : > { %v3313_v39 = vadd.f32 %v3185_v24, %v2769_v4  ;;  %v3315_v14 = vadd.f32 %v3187_v44, %v2771_v9  ;;  %3967 = vst [vmem:[%s5192_s24 + $0x398] sm:$0xff] %v3311_v48  ;;  %v3188_v60 = vmul.f32 %v9046_v22, %v9046_v22  ;;  %v9047_v49 = vld [vmem:[#allocation92_spill] sm:$0xff]  ;;  %v9048_v57 = vld [vmem:[#allocation86_spill] sm:$0xff]  ;;  %v2777_v4 = vld [vmem:[%s5192_s24 + $0x3e8] sm:$0xff] }
 0x489   : > { %v3189_v61 = vmul.f32 %v9047_v49, %v9047_v49  ;;  %v3190_v1 = vmul.f32 %v9048_v57, %v9048_v57  ;;  %v9049_v21 = vld [vmem:[#allocation90_spill] sm:$0xff]  ;;  %v2778_v11 = vld [vmem:[%s5192_s24 + $0x3f0] sm:$0xff]  ;;  %v2779_v9 = vld [vmem:[%s5192_s24 + $0x3f8] sm:$0xff]  ;;  %3968 = vst [vmem:[%s5192_s24 + $0x3a0] sm:$0xff] %v3312_v51 }
 0x48a   : > { %v3191_v38 = vmul.f32 %v9049_v21, %v9049_v21  ;;  %3969 = vst [vmem:[%s5192_s24 + $0x3a8] sm:$0xff] %v3313_v39  ;;  %3970 = vst [vmem:[%s5192_s24 + $0x3b0] sm:$0xff] %v3314_v16  ;;  %v9050_v43 = vld [vmem:[#allocation96_spill] sm:$0xff]  ;;  %v9052_v17 = vld [vmem:[#allocation94_spill] sm:$0xff]  ;;  %v3316_v16 = vadd.f32 %v3188_v60, %v2772_v5 }
 0x48b   : > { %3971 = vst [vmem:[%s5192_s24 + $0x3b8] sm:$0xff] %v3315_v14  ;;  %v3192_v24 = vmul.f32 %v9050_v43, %v9050_v43  ;;  %v9051_v62 = vld [vmem:[#allocation100_spill] sm:$0xff]  ;;  %v3194_v36 = vmul.f32 %v9052_v17, %v9052_v17  ;;  %v9053_v26 = vld [vmem:[#allocation98_spill] sm:$0xff]  ;;  %v3317_v39 = vadd.f32 %v3189_v61, %v2773_v58  ;;  %v3318_v14 = vadd.f32 %v3190_v1, %v2774_v8  ;;  %v2781_v43 = vld [vmem:[%s5197_s14 + $0x8] sm:$0xff] }
 0x48c   : > { %v3193_v44 = vmul.f32 %v9051_v62, %v9051_v62  ;;  %v3195_v51 = vmul.f32 %v9053_v26, %v9053_v26  ;;  %v3319_v48 = vadd.f32 %v3191_v38, %v2775_v25  ;;  %v2780_v21 = vld [vmem:[%s5197_s14] sm:$0xff]  ;;  %v2782_v22 = vld [vmem:[%s5197_s14 + $0x10] sm:$0xff]  ;;  %v2783_v26 = vld [vmem:[%s5197_s14 + $0x18] sm:$0xff]  ;;  %3972 = vst [vmem:[%s5192_s24 + $0x3c0] sm:$0xff] %v3316_v16 }
 0x48d   : > { %v3320_v57 = vadd.f32 %v3192_v24, %v2776_v42  ;;  %v3322_v49 = vadd.f32 %v3194_v36, %v2778_v11  ;;  %v2784_v5 = vld [vmem:[%s5197_s14 + $0x20] sm:$0xff]  ;;  %3973 = vst [vmem:[%s5192_s24 + $0x3c8] sm:$0xff] %v3317_v39  ;;  %3974 = vst [vmem:[%s5192_s24 + $0x3d0] sm:$0xff] %v3318_v14  ;;  %v9054_v8 = vld [vmem:[#allocation7_spill] sm:$0xff] }
 0x48e   : > { %v3321_v62 = vadd.f32 %v3193_v44, %v2777_v4  ;;  %v3323_v17 = vadd.f32 %v3195_v51, %v2779_v9  ;;  %3975 = vst [vmem:[%s5192_s24 + $0x3d8] sm:$0xff] %v3319_v48  ;;  %v3052_v58 = vunpack.c.l.bf16 %v9054_v8  ;;  %v3053_v25 = vunpack.c.h.bf16 %v9054_v8  ;;  %v9055_v42 = vld [vmem:[#allocation6_spill] sm:$0xff]  ;;  %v2785_v1 = vld [vmem:[%s5197_s14 + $0x28] sm:$0xff]  ;;  %v2786_v38 = vld [vmem:[%s5197_s14 + $0x30] sm:$0xff] }
 0x48f   : > { %v3054_v60 = vunpack.c.l.bf16 %v9055_v42  ;;  %v3055_v61 = vunpack.c.h.bf16 %v9055_v42  ;;  %v2787_v4 = vld [vmem:[%s5197_s14 + $0x38] sm:$0xff]  ;;  %3976 = vst [vmem:[%s5192_s24 + $0x3e0] sm:$0xff] %v3320_v57  ;;  %3978 = vst [vmem:[%s5192_s24 + $0x3f0] sm:$0xff] %v3322_v49  ;;  %v9057_v44 = vld [vmem:[#allocation8_spill] sm:$0xff] }
 0x490   : > { %3977 = vst [vmem:[%s5192_s24 + $0x3e8] sm:$0xff] %v3321_v62  ;;  %3979 = vst [vmem:[%s5192_s24 + $0x3f8] sm:$0xff] %v3323_v17  ;;  %v9056_v11 = vld [vmem:[#allocation9_spill] sm:$0xff]  ;;  %v3058_v36 = vunpack.c.l.bf16 %v9057_v44  ;;  %v3059_v51 = vunpack.c.h.bf16 %v9057_v44  ;;  %v3324_v16 = vadd.f32 %v3052_v58, %v2780_v21  ;;  %v3325_v57 = vadd.f32 %v3053_v25, %v2781_v43  ;;  %v2788_v39 = vld [vmem:[%s5197_s14 + $0x40] sm:$0xff] }
 0x491   : > { %v3056_v9 = vunpack.c.l.bf16 %v9056_v11  ;;  %v3057_v24 = vunpack.c.h.bf16 %v9056_v11  ;;  %v3326_v62 = vadd.f32 %v3054_v60, %v2782_v22  ;;  %v3327_v49 = vadd.f32 %v3055_v61, %v2783_v26  ;;  %v2789_v17 = vld [vmem:[%s5197_s14 + $0x48] sm:$0xff]  ;;  %v2790_v11 = vld [vmem:[%s5197_s14 + $0x50] sm:$0xff]  ;;  %v2791_v44 = vld [vmem:[%s5197_s14 + $0x58] sm:$0xff] }
 0x492   : > { %v3330_v8 = vadd.f32 %v3058_v36, %v2786_v38  ;;  %v3331_v42 = vadd.f32 %v3059_v51, %v2787_v4  ;;  %v2792_v21 = vld [vmem:[%s5197_s14 + $0x60] sm:$0xff]  ;;  %3980 = vst [vmem:[%s5197_s14] sm:$0xff] %v3324_v16  ;;  %3981 = vst [vmem:[%s5197_s14 + $0x8] sm:$0xff] %v3325_v57  ;;  %v9058_v22 = vld [vmem:[#allocation11_spill] sm:$0xff] }
 0x493   : > { %v3328_v14 = vadd.f32 %v3056_v9, %v2784_v5  ;;  %v3329_v48 = vadd.f32 %v3057_v24, %v2785_v1  ;;  %3982 = vst [vmem:[%s5197_s14 + $0x10] sm:$0xff] %v3326_v62  ;;  %3983 = vst [vmem:[%s5197_s14 + $0x18] sm:$0xff] %v3327_v49  ;;  %v3060_v43 = vunpack.c.l.bf16 %v9058_v22  ;;  %v3061_v26 = vunpack.c.h.bf16 %v9058_v22  ;;  %v9059_v5 = vld [vmem:[#allocation10_spill] sm:$0xff]  ;;  %v2793_v60 = vld [vmem:[%s5197_s14 + $0x68] sm:$0xff] }
 0x494   : > { %v3062_v58 = vunpack.c.l.bf16 %v9059_v5  ;;  %v3063_v25 = vunpack.c.h.bf16 %v9059_v5  ;;  %v2794_v61 = vld [vmem:[%s5197_s14 + $0x70] sm:$0xff]  ;;  %v2795_v1 = vld [vmem:[%s5197_s14 + $0x78] sm:$0xff]  ;;  %3986 = vst [vmem:[%s5197_s14 + $0x30] sm:$0xff] %v3330_v8  ;;  %3987 = vst [vmem:[%s5197_s14 + $0x38] sm:$0xff] %v3331_v42 }
 0x495   : > { %3984 = vst [vmem:[%s5197_s14 + $0x20] sm:$0xff] %v3328_v14  ;;  %3985 = vst [vmem:[%s5197_s14 + $0x28] sm:$0xff] %v3329_v48  ;;  %v9060_v38 = vld [vmem:[#allocation13_spill] sm:$0xff]  ;;  %v9061_v24 = vld [vmem:[#allocation12_spill] sm:$0xff]  ;;  %v3332_v57 = vadd.f32 %v3060_v43, %v2788_v39  ;;  %v3333_v62 = vadd.f32 %v3061_v26, %v2789_v17 }
 0x496   : > { %v3064_v4 = vunpack.c.l.bf16 %v9060_v38  ;;  %v3065_v9 = vunpack.c.h.bf16 %v9060_v38  ;;  %v3066_v36 = vunpack.c.l.bf16 %v9061_v24  ;;  %v3067_v51 = vunpack.c.h.bf16 %v9061_v24  ;;  %v2796_v16 = vld [vmem:[%s5202_s26] sm:$0xff]  ;;  %v2797_v48 = vld [vmem:[%s5202_s26 + $0x8] sm:$0xff]  ;;  %v2798_v8 = vld [vmem:[%s5202_s26 + $0x10] sm:$0xff] }
 0x497   : > { %v3334_v49 = vadd.f32 %v3062_v58, %v2790_v11  ;;  %v3335_v14 = vadd.f32 %v3063_v25, %v2791_v44  ;;  %v2799_v42 = vld [vmem:[%s5202_s26 + $0x18] sm:$0xff]  ;;  %v2800_v59 = vld [vmem:[%s5202_s26 + $0x20] sm:$0xff]  ;;  %v2801_v13 = vld [vmem:[%s5202_s26 + $0x28] sm:$0xff]  ;;  %3988 = vst [vmem:[%s5197_s14 + $0x40] sm:$0xff] %v3332_v57 }
 0x498   : > { %v3336_v22 = vadd.f32 %v3064_v4, %v2792_v21  ;;  %v3337_v5 = vadd.f32 %v3065_v9, %v2793_v60  ;;  %v3338_v38 = vadd.f32 %v3066_v36, %v2794_v61  ;;  %v3339_v24 = vadd.f32 %v3067_v51, %v2795_v1  ;;  %3989 = vst [vmem:[%s5197_s14 + $0x48] sm:$0xff] %v3333_v62  ;;  %v9062_v39 = vld [vmem:[#allocation16_spill] sm:$0xff]  ;;  %v9065_v43 = vld [vmem:[#allocation14_spill] sm:$0xff]  ;;  %v2803_v61 = vld [vmem:[%s5202_s26 + $0x38] sm:$0xff] }
 0x499   : > { %3990 = vst [vmem:[%s5197_s14 + $0x50] sm:$0xff] %v3334_v49  ;;  %3991 = vst [vmem:[%s5197_s14 + $0x58] sm:$0xff] %v3335_v14  ;;  %v3340_v11 = vsel %vm1164_vm4, %v9062_v39, -inf  ;;  %v9064_v44 = vld [vmem:[#allocation20_spill] sm:$0xff]  ;;  %v3342_v26 = vsel %vm1164_vm4, %v9065_v43, -inf  ;;  %v9066_v58 = vld [vmem:[#allocation18_spill] sm:$0xff] }
 0x49a   : > { %v3341_v21 = vsel %vm1164_vm4, %v9064_v44, -inf  ;;  %v3343_v25 = vsel %vm1164_vm4, %v9066_v58, -inf  ;;  %v2802_v60 = vld [vmem:[%s5202_s26 + $0x30] sm:$0xff]  ;;  %3992 = vst [vmem:[%s5197_s14 + $0x60] sm:$0xff] %v3336_v22  ;;  %3993 = vst [vmem:[%s5197_s14 + $0x68] sm:$0xff] %v3337_v5  ;;  %v3468_v1 = vmax.f32 %v2796_v16, %v3340_v11  ;;  %v3470_v9 = vmax.f32 %v2798_v8, %v3342_v26  ;;  %v2804_v51 = vld [vmem:[%s5202_s26 + $0x40] sm:$0xff] }
 0x49b   : > { %3994 = vst [vmem:[%s5197_s14 + $0x70] sm:$0xff] %v3338_v38  ;;  %3995 = vst [vmem:[%s5197_s14 + $0x78] sm:$0xff] %v3339_v24  ;;  %v3469_v4 = vmax.f32 %v2797_v48, %v3341_v21  ;;  %v3471_v36 = vmax.f32 %v2799_v42, %v3343_v25  ;;  %v2805_v57 = vld [vmem:[%s5202_s26 + $0x48] sm:$0xff]  ;;  %v9067_v62 = vld [vmem:[#allocation24_spill] sm:$0xff] }
 0x49c   : > { %v3344_v49 = vsel %vm1164_vm4, %v9067_v62, -inf  ;;  %v9068_v14 = vld [vmem:[#allocation28_spill] sm:$0xff]  ;;  %v9069_v5 = vld [vmem:[#allocation22_spill] sm:$0xff]  ;;  %v2807_v42 = vld [vmem:[%s5202_s26 + $0x58] sm:$0xff]  ;;  %3996 = vst [vmem:[%s5202_s26] sm:$0xff] %v3468_v1  ;;  %v3349_v1 = vsel %vm1164_vm4, %v5852_v56, -inf }
 0x49d   : > { %v3345_v22 = vsel %vm1164_vm4, %v9068_v14, -inf  ;;  %v3346_v38 = vsel %vm1164_vm4, %v9069_v5, -inf  ;;  %v9070_v16 = vld [vmem:[#allocation26_spill] sm:$0xff]  ;;  %v2806_v8 = vld [vmem:[%s5202_s26 + $0x50] sm:$0xff]  ;;  %3997 = vst [vmem:[%s5202_s26 + $0x8] sm:$0xff] %v3469_v4  ;;  %3998 = vst [vmem:[%s5202_s26 + $0x10] sm:$0xff] %v3470_v9  ;;  %v3472_v24 = vmax.f32 %v2800_v59, %v3344_v49  ;;  %v3477_v9 = vmax.f32 %v2805_v57, %v3349_v1 }
 0x49e   : > { %v3347_v48 = vsel %vm1164_vm4, %v9070_v16, -inf  ;;  %3999 = vst [vmem:[%s5202_s26 + $0x18] sm:$0xff] %v3471_v36  ;;  %v3473_v11 = vmax.f32 %v2801_v13, %v3345_v22  ;;  %v3474_v21 = vmax.f32 %v2802_v60, %v3346_v38  ;;  %v2808_v25 = vld [vmem:[%s5202_s26 + $0x60] sm:$0xff]  ;;  %v2809_v5 = vld [vmem:[%s5202_s26 + $0x68] sm:$0xff]  ;;  %v3348_v16 = vsel %vm1164_vm4, %v5844_v10, -inf  ;;  %v2810_v59 = vld [vmem:[%s5202_s26 + $0x70] sm:$0xff] }
 0x49f   : > { %v3475_v26 = vmax.f32 %v2803_v61, %v3347_v48  ;;  %v3350_v4 = vsel %vm1164_vm4, %v5840_v50, -inf  ;;  %v3351_v13 = vsel %vm1164_vm4, %v5848_v55, -inf  ;;  %v2811_v60 = vld [vmem:[%s5202_s26 + $0x78] sm:$0xff]  ;;  %4000 = vst [vmem:[%s5202_s26 + $0x20] sm:$0xff] %v3472_v24  ;;  %v3476_v61 = vmax.f32 %v2804_v51, %v3348_v16  ;;  %v2812_v22 = vld [vmem:[%s5202_s26 + $0x80] sm:$0xff]  ;;  %v2813_v38 = vld [vmem:[%s5202_s26 + $0x88] sm:$0xff] }
 0x4a0   : > { %4001 = vst [vmem:[%s5202_s26 + $0x28] sm:$0xff] %v3473_v11  ;;  %4002 = vst [vmem:[%s5202_s26 + $0x30] sm:$0xff] %v3474_v21  ;;  %v3478_v36 = vmax.f32 %v2806_v8, %v3350_v4  ;;  %v3479_v49 = vmax.f32 %v2807_v42, %v3351_v13  ;;  %v3352_v48 = vsel %vm1164_vm4, %v5860_v7, -inf  ;;  %v3353_v24 = vsel %vm1164_vm4, %v5868_v23, -inf  ;;  %v9071_v11 = vld [vmem:[#allocation34_spill] sm:$0xff]  ;;  %v9072_v51 = vld [vmem:[#allocation37_spill] sm:$0xff] }
 0x4a1   : > { %4003 = vst [vmem:[%s5202_s26 + $0x38] sm:$0xff] %v3475_v26  ;;  %v3354_v21 = vsel %vm1164_vm4, %v9071_v11, -inf  ;;  %v3355_v57 = vsel %vm1164_vm4, %v9072_v51, -inf  ;;  %v2814_v16 = vld [vmem:[%s5202_s26 + $0x90] sm:$0xff]  ;;  %v2815_v8 = vld [vmem:[%s5202_s26 + $0x98] sm:$0xff]  ;;  %4004 = vst [vmem:[%s5202_s26 + $0x40] sm:$0xff] %v3476_v61  ;;  %v3480_v42 = vmax.f32 %v2808_v25, %v3352_v48  ;;  %v3481_v26 = vmax.f32 %v2809_v5, %v3353_v24 }
 0x4a2   : > { %4005 = vst [vmem:[%s5202_s26 + $0x48] sm:$0xff] %v3477_v9  ;;  %4006 = vst [vmem:[%s5202_s26 + $0x50] sm:$0xff] %v3478_v36  ;;  %v3482_v1 = vmax.f32 %v2810_v59, %v3354_v21  ;;  %v3483_v4 = vmax.f32 %v2811_v60, %v3355_v57  ;;  %v2816_v13 = vld [vmem:[%s5202_s26 + $0xa0] sm:$0xff]  ;;  %v2817_v11 = vld [vmem:[%s5202_s26 + $0xa8] sm:$0xff]  ;;  %v3356_v51 = vsel %vm1164_vm4, %v5876_v18, -inf  ;;  %v3357_v61 = vsel %vm1164_vm4, %v5884_v15, -inf }
 0x4a3   : > { %4007 = vst [vmem:[%s5202_s26 + $0x58] sm:$0xff] %v3479_v49  ;;  %v3358_v9 = vsel %vm1164_vm4, %v5872_v27, -inf  ;;  %v3359_v5 = vsel %vm1164_vm4, %v5880_v0, -inf  ;;  %v2818_v25 = vld [vmem:[%s5202_s26 + $0xb0] sm:$0xff]  ;;  %v2819_v59 = vld [vmem:[%s5202_s26 + $0xb8] sm:$0xff]  ;;  %4008 = vst [vmem:[%s5202_s26 + $0x60] sm:$0xff] %v3480_v42  ;;  %v3484_v60 = vmax.f32 %v2812_v22, %v3356_v51  ;;  %v3485_v36 = vmax.f32 %v2813_v38, %v3357_v61 }
 0x4a4   : > { %4009 = vst [vmem:[%s5202_s26 + $0x68] sm:$0xff] %v3481_v26  ;;  %4010 = vst [vmem:[%s5202_s26 + $0x70] sm:$0xff] %v3482_v1  ;;  %v3486_v49 = vmax.f32 %v2814_v16, %v3358_v9  ;;  %v3487_v48 = vmax.f32 %v2815_v8, %v3359_v5  ;;  %v2820_v24 = vld [vmem:[%s5202_s26 + $0xc0] sm:$0xff]  ;;  %v2821_v21 = vld [vmem:[%s5202_s26 + $0xc8] sm:$0xff]  ;;  %v3360_v57 = vsel %vm1164_vm4, %v5892_v30, -inf  ;;  %v3361_v42 = vsel %vm1164_vm4, %v5900_v20, -inf }
 0x4a5   : > { %4011 = vst [vmem:[%s5202_s26 + $0x78] sm:$0xff] %v3483_v4  ;;  %v3362_v26 = vsel %vm1164_vm4, %v5888_v28, -inf  ;;  %v3363_v22 = vsel %vm1164_vm4, %v5896_v33, -inf  ;;  %v2822_v38 = vld [vmem:[%s5202_s26 + $0xd0] sm:$0xff]  ;;  %v2823_v51 = vld [vmem:[%s5202_s26 + $0xd8] sm:$0xff]  ;;  %4012 = vst [vmem:[%s5202_s26 + $0x80] sm:$0xff] %v3484_v60  ;;  %v3488_v16 = vmax.f32 %v2816_v13, %v3360_v57  ;;  %v3489_v8 = vmax.f32 %v2817_v11, %v3361_v42 }
 0x4a6   : > { %4013 = vst [vmem:[%s5202_s26 + $0x88] sm:$0xff] %v3485_v36  ;;  %4014 = vst [vmem:[%s5202_s26 + $0x90] sm:$0xff] %v3486_v49  ;;  %v3490_v1 = vmax.f32 %v2818_v25, %v3362_v26  ;;  %v3491_v4 = vmax.f32 %v2819_v59, %v3363_v22  ;;  %v2824_v61 = vld [vmem:[%s5202_s26 + $0xe0] sm:$0xff]  ;;  %v2825_v9 = vld [vmem:[%s5202_s26 + $0xe8] sm:$0xff]  ;;  %v3364_v5 = vsel %vm1164_vm4, %v5908_v41, -inf  ;;  %v3365_v60 = vsel %vm1164_vm4, %v5916_v52, -inf }
 0x4a7   : > { %4015 = vst [vmem:[%s5202_s26 + $0x98] sm:$0xff] %v3487_v48  ;;  %v3366_v36 = vsel %vm1164_vm4, %v5904_v40, -inf  ;;  %v3367_v11 = vsel %vm1164_vm4, %v5912_v46, -inf  ;;  %v2826_v13 = vld [vmem:[%s5202_s26 + $0xf0] sm:$0xff]  ;;  %v2827_v25 = vld [vmem:[%s5202_s26 + $0xf8] sm:$0xff]  ;;  %4016 = vst [vmem:[%s5202_s26 + $0xa0] sm:$0xff] %v3488_v16  ;;  %v3492_v59 = vmax.f32 %v2820_v24, %v3364_v5  ;;  %v3493_v49 = vmax.f32 %v2821_v21, %v3365_v60 }
 0x4a8   : > { %4017 = vst [vmem:[%s5202_s26 + $0xa8] sm:$0xff] %v3489_v8  ;;  %4018 = vst [vmem:[%s5202_s26 + $0xb0] sm:$0xff] %v3490_v1  ;;  %v3494_v48 = vmax.f32 %v2822_v38, %v3366_v36  ;;  %v3495_v57 = vmax.f32 %v2823_v51, %v3367_v11  ;;  %v2828_v42 = vld [vmem:[%s5202_s26 + $0x100] sm:$0xff]  ;;  %v2829_v26 = vld [vmem:[%s5202_s26 + $0x108] sm:$0xff]  ;;  %v3368_v22 = vsel %vm1164_vm4, %v5924_v6, -inf  ;;  %v3369_v16 = vsel %vm1164_vm4, %v5932_v54, -inf }
 0x4a9   : > { %4019 = vst [vmem:[%s5202_s26 + $0xb8] sm:$0xff] %v3491_v4  ;;  %v3370_v8 = vsel %vm1164_vm4, %v5920_v63, -inf  ;;  %v3371_v24 = vsel %vm1164_vm4, %v5928_v29, -inf  ;;  %v2830_v21 = vld [vmem:[%s5202_s26 + $0x110] sm:$0xff]  ;;  %v2831_v38 = vld [vmem:[%s5202_s26 + $0x118] sm:$0xff]  ;;  %4020 = vst [vmem:[%s5202_s26 + $0xc0] sm:$0xff] %v3492_v59  ;;  %v3496_v51 = vmax.f32 %v2824_v61, %v3368_v22  ;;  %v3497_v1 = vmax.f32 %v2825_v9, %v3369_v16 }
 0x4aa   : > { %4021 = vst [vmem:[%s5202_s26 + $0xc8] sm:$0xff] %v3493_v49  ;;  %4022 = vst [vmem:[%s5202_s26 + $0xd0] sm:$0xff] %v3494_v48  ;;  %v3498_v4 = vmax.f32 %v2826_v13, %v3370_v8  ;;  %v3499_v5 = vmax.f32 %v2827_v25, %v3371_v24  ;;  %v2832_v60 = vld [vmem:[%s5202_s26 + $0x120] sm:$0xff]  ;;  %v2833_v36 = vld [vmem:[%s5202_s26 + $0x128] sm:$0xff]  ;;  %v3372_v11 = vsel %vm1164_vm4, %v5940_v35, -inf  ;;  %v3373_v59 = vsel %vm1164_vm4, %v5948_v3, -inf }
 0x4ab   : > { %4023 = vst [vmem:[%s5202_s26 + $0xd8] sm:$0xff] %v3495_v57  ;;  %v3374_v49 = vsel %vm1164_vm4, %v5936_v47, -inf  ;;  %v3375_v61 = vsel %vm1164_vm4, %v5944_v2, -inf  ;;  %v2834_v9 = vld [vmem:[%s5202_s26 + $0x130] sm:$0xff]  ;;  %v2835_v13 = vld [vmem:[%s5202_s26 + $0x138] sm:$0xff]  ;;  %4024 = vst [vmem:[%s5202_s26 + $0xe0] sm:$0xff] %v3496_v51  ;;  %v3500_v25 = vmax.f32 %v2828_v42, %v3372_v11  ;;  %v3501_v48 = vmax.f32 %v2829_v26, %v3373_v59 }
 0x4ac   : > { %4025 = vst [vmem:[%s5202_s26 + $0xe8] sm:$0xff] %v3497_v1  ;;  %4026 = vst [vmem:[%s5202_s26 + $0xf0] sm:$0xff] %v3498_v4  ;;  %v3502_v57 = vmax.f32 %v2830_v21, %v3374_v49  ;;  %v3503_v22 = vmax.f32 %v2831_v38, %v3375_v61  ;;  %v2836_v16 = vld [vmem:[%s5202_s26 + $0x140] sm:$0xff]  ;;  %v2837_v8 = vld [vmem:[%s5202_s26 + $0x148] sm:$0xff]  ;;  %v3376_v24 = vsel %vm1164_vm4, %v5956_v12, -inf  ;;  %v3377_v51 = vsel %vm1164_vm4, %v5964_v45, -inf }
 0x4ad   : > { %4027 = vst [vmem:[%s5202_s26 + $0xf8] sm:$0xff] %v3499_v5  ;;  %v3378_v1 = vsel %vm1164_vm4, %v5952_v34, -inf  ;;  %v3379_v42 = vsel %vm1164_vm4, %v5960_v37, -inf  ;;  %v2838_v26 = vld [vmem:[%s5202_s26 + $0x150] sm:$0xff]  ;;  %v2839_v21 = vld [vmem:[%s5202_s26 + $0x158] sm:$0xff]  ;;  %4028 = vst [vmem:[%s5202_s26 + $0x100] sm:$0xff] %v3500_v25  ;;  %v3504_v38 = vmax.f32 %v2832_v60, %v3376_v24  ;;  %v3505_v4 = vmax.f32 %v2833_v36, %v3377_v51 }
 0x4ae   : > { %4029 = vst [vmem:[%s5202_s26 + $0x108] sm:$0xff] %v3501_v48  ;;  %4030 = vst [vmem:[%s5202_s26 + $0x110] sm:$0xff] %v3502_v57  ;;  %v3506_v5 = vmax.f32 %v2834_v9, %v3378_v1  ;;  %v3507_v11 = vmax.f32 %v2835_v13, %v3379_v42  ;;  %v2840_v59 = vld [vmem:[%s5202_s26 + $0x160] sm:$0xff]  ;;  %v2841_v49 = vld [vmem:[%s5202_s26 + $0x168] sm:$0xff]  ;;  %v3380_v61 = vsel %vm1164_vm4, %v5972_v19, -inf  ;;  %v3381_v25 = vsel %vm1164_vm4, %v5980_v31, -inf }
 0x4af   : > { %4031 = vst [vmem:[%s5202_s26 + $0x118] sm:$0xff] %v3503_v22  ;;  %v3382_v48 = vsel %vm1164_vm4, %v5968_v53, -inf  ;;  %v3383_v60 = vsel %vm1164_vm4, %v5976_v32, -inf  ;;  %v2842_v36 = vld [vmem:[%s5202_s26 + $0x170] sm:$0xff]  ;;  %v2843_v9 = vld [vmem:[%s5202_s26 + $0x178] sm:$0xff]  ;;  %4032 = vst [vmem:[%s5202_s26 + $0x120] sm:$0xff] %v3504_v38  ;;  %v3508_v13 = vmax.f32 %v2836_v16, %v3380_v61  ;;  %v3509_v57 = vmax.f32 %v2837_v8, %v3381_v25 }
 0x4b0   : > { %4033 = vst [vmem:[%s5202_s26 + $0x128] sm:$0xff] %v3505_v4  ;;  %4034 = vst [vmem:[%s5202_s26 + $0x130] sm:$0xff] %v3506_v5  ;;  %v3510_v22 = vmax.f32 %v2838_v26, %v3382_v48  ;;  %v3511_v24 = vmax.f32 %v2839_v21, %v3383_v60  ;;  %v2844_v51 = vld [vmem:[%s5202_s26 + $0x180] sm:$0xff]  ;;  %v2845_v1 = vld [vmem:[%s5202_s26 + $0x188] sm:$0xff] }
 0x4b1   : > { %4035 = vst [vmem:[%s5202_s26 + $0x138] sm:$0xff] %v3507_v11  ;;  %v9073_v42 = vld [vmem:[#allocation71_spill] sm:$0xff]  ;;  %v9075_v5 = vld [vmem:[#allocation69_spill] sm:$0xff]  ;;  %v2846_v26 = vld [vmem:[%s5202_s26 + $0x190] sm:$0xff] }
 0x4b2   : > { %v3384_v32 = vsel %vm1164_vm4, %v9073_v42, -inf  ;;  %v9074_v38 = vld [vmem:[#allocation75_spill] sm:$0xff]  ;;  %v3386_v11 = vsel %vm1164_vm4, %v9075_v5, -inf  ;;  %v9076_v16 = vld [vmem:[#allocation73_spill] sm:$0xff]  ;;  %4036 = vst [vmem:[%s5202_s26 + $0x140] sm:$0xff] %v3508_v13  ;;  %4037 = vst [vmem:[%s5202_s26 + $0x148] sm:$0xff] %v3509_v57 }
 0x4b3   : > { %v3385_v4 = vsel %vm1164_vm4, %v9074_v38, -inf  ;;  %v3387_v8 = vsel %vm1164_vm4, %v9076_v16, -inf  ;;  %v2847_v21 = vld [vmem:[%s5202_s26 + $0x198] sm:$0xff]  ;;  %4038 = vst [vmem:[%s5202_s26 + $0x150] sm:$0xff] %v3510_v22  ;;  %4039 = vst [vmem:[%s5202_s26 + $0x158] sm:$0xff] %v3511_v24  ;;  %v3512_v61 = vmax.f32 %v2840_v59, %v3384_v32  ;;  %v3514_v48 = vmax.f32 %v2842_v36, %v3386_v11  ;;  %v2848_v5 = vld [vmem:[%s5202_s26 + $0x1a0] sm:$0xff] }
 0x4b4   : > { %v3513_v25 = vmax.f32 %v2841_v49, %v3385_v4  ;;  %v3515_v60 = vmax.f32 %v2843_v9, %v3387_v8  ;;  %v2849_v38 = vld [vmem:[%s5202_s26 + $0x1a8] sm:$0xff]  ;;  %v9079_v22 = vld [vmem:[#allocation77_spill] sm:$0xff]  ;;  %v2850_v49 = vld [vmem:[%s5202_s26 + $0x1b0] sm:$0xff] }
 0x4b5   : > { %v9077_v16 = vld [vmem:[#allocation79_spill] sm:$0xff]  ;;  %v3390_v24 = vsel %vm1164_vm4, %v9079_v22, -inf  ;;  %v9080_v32 = vld [vmem:[#allocation81_spill] sm:$0xff]  ;;  %4040 = vst [vmem:[%s5202_s26 + $0x160] sm:$0xff] %v3512_v61  ;;  %4042 = vst [vmem:[%s5202_s26 + $0x170] sm:$0xff] %v3514_v48 }
 0x4b6   : > { %v3388_v42 = vsel %vm1164_vm4, %v9077_v16, -inf  ;;  %v9078_v13 = vld [vmem:[#allocation83_spill] sm:$0xff]  ;;  %v3391_v59 = vsel %vm1164_vm4, %v9080_v32, -inf  ;;  %v2851_v36 = vld [vmem:[%s5202_s26 + $0x1b8] sm:$0xff]  ;;  %4041 = vst [vmem:[%s5202_s26 + $0x168] sm:$0xff] %v3513_v25  ;;  %4043 = vst [vmem:[%s5202_s26 + $0x178] sm:$0xff] %v3515_v60  ;;  %v3518_v11 = vmax.f32 %v2846_v26, %v3390_v24 }
 0x4b7   : > { %v3389_v57 = vsel %vm1164_vm4, %v9078_v13, -inf  ;;  %v3516_v9 = vmax.f32 %v2844_v51, %v3388_v42  ;;  %v3519_v8 = vmax.f32 %v2847_v21, %v3391_v59  ;;  %v2852_v22 = vld [vmem:[%s5202_s26 + $0x1c0] sm:$0xff]  ;;  %v2853_v13 = vld [vmem:[%s5202_s26 + $0x1c8] sm:$0xff]  ;;  %v9083_v48 = vld [vmem:[#allocation85_spill] sm:$0xff] }
 0x4b8   : > { %v3517_v4 = vmax.f32 %v2845_v1, %v3389_v57  ;;  %v9081_v32 = vld [vmem:[#allocation87_spill] sm:$0xff]  ;;  %v3394_v60 = vsel %vm1164_vm4, %v9083_v48, -inf  ;;  %v9084_v51 = vld [vmem:[#allocation89_spill] sm:$0xff]  ;;  %v2854_v42 = vld [vmem:[%s5202_s26 + $0x1d0] sm:$0xff]  ;;  %4046 = vst [vmem:[%s5202_s26 + $0x190] sm:$0xff] %v3518_v11 }
 0x4b9   : > { %v3392_v16 = vsel %vm1164_vm4, %v9081_v32, -inf  ;;  %v9082_v61 = vld [vmem:[#allocation91_spill] sm:$0xff]  ;;  %v3395_v1 = vsel %vm1164_vm4, %v9084_v51, -inf  ;;  %v2855_v26 = vld [vmem:[%s5202_s26 + $0x1d8] sm:$0xff]  ;;  %4044 = vst [vmem:[%s5202_s26 + $0x180] sm:$0xff] %v3516_v9  ;;  %4047 = vst [vmem:[%s5202_s26 + $0x198] sm:$0xff] %v3519_v8  ;;  %v3522_v24 = vmax.f32 %v2850_v49, %v3394_v60 }
 0x4ba   : > { %v3393_v25 = vsel %vm1164_vm4, %v9082_v61, -inf  ;;  %4045 = vst [vmem:[%s5202_s26 + $0x188] sm:$0xff] %v3517_v4  ;;  %v3520_v21 = vmax.f32 %v2848_v5, %v3392_v16  ;;  %v3523_v59 = vmax.f32 %v2851_v36, %v3395_v1  ;;  %v2856_v48 = vld [vmem:[%s5202_s26 + $0x1e0] sm:$0xff]  ;;  %v2857_v61 = vld [vmem:[%s5202_s26 + $0x1e8] sm:$0xff]  ;;  %v9087_v11 = vld [vmem:[#allocation93_spill] sm:$0xff] }
 0x4bb   : > { %v3521_v57 = vmax.f32 %v2849_v38, %v3393_v25  ;;  %v9085_v51 = vld [vmem:[#allocation95_spill] sm:$0xff]  ;;  %v3398_v8 = vsel %vm1164_vm4, %v9087_v11, -inf  ;;  %v9088_v5 = vld [vmem:[#allocation97_spill] sm:$0xff]  ;;  %v2858_v16 = vld [vmem:[%s5202_s26 + $0x1f0] sm:$0xff]  ;;  %4050 = vst [vmem:[%s5202_s26 + $0x1b0] sm:$0xff] %v3522_v24 }
 0x4bc   : > { %v3396_v32 = vsel %vm1164_vm4, %v9085_v51, -inf  ;;  %v9086_v9 = vld [vmem:[#allocation99_spill] sm:$0xff]  ;;  %v3399_v38 = vsel %vm1164_vm4, %v9088_v5, -inf  ;;  %v2859_v49 = vld [vmem:[%s5202_s26 + $0x1f8] sm:$0xff]  ;;  %4048 = vst [vmem:[%s5202_s26 + $0x1a0] sm:$0xff] %v3520_v21  ;;  %4051 = vst [vmem:[%s5202_s26 + $0x1b8] sm:$0xff] %v3523_v59  ;;  %v3526_v60 = vmax.f32 %v2854_v42, %v3398_v8 }
 0x4bd   : > { %v3397_v4 = vsel %vm1164_vm4, %v9086_v9, -inf  ;;  %4049 = vst [vmem:[%s5202_s26 + $0x1a8] sm:$0xff] %v3521_v57  ;;  %v3524_v36 = vmax.f32 %v2852_v22, %v3396_v32  ;;  %v3527_v1 = vmax.f32 %v2855_v26, %v3399_v38  ;;  %v2860_v11 = vld [vmem:[%s5202_s26 + $0x200] sm:$0xff]  ;;  %v2861_v9 = vld [vmem:[%s5202_s26 + $0x208] sm:$0xff]  ;;  %v9090_v21 = vld [vmem:[#allocation104_spill] sm:$0xff] }
 0x4be   : > { %v3525_v25 = vmax.f32 %v2853_v13, %v3397_v4  ;;  %v9089_v5 = vld [vmem:[#allocation102_spill] sm:$0xff]  ;;  %v3401_v57 = vsel %vm1164_vm4, %v9090_v21, -inf  ;;  %v9091_v24 = vld [vmem:[#allocation101_spill] sm:$0xff]  ;;  %v9092_v22 = vld [vmem:[#allocation103_spill] sm:$0xff]  ;;  %4054 = vst [vmem:[%s5202_s26 + $0x1d0] sm:$0xff] %v3526_v60 }
 0x4bf   : > { %v3400_v51 = vsel %vm1164_vm4, %v9089_v5, -inf  ;;  %v3402_v59 = vsel %vm1164_vm4, %v9091_v24, -inf  ;;  %v3403_v13 = vsel %vm1164_vm4, %v9092_v22, -inf  ;;  %v2862_v32 = vld [vmem:[%s5202_s26 + $0x210] sm:$0xff]  ;;  %v2863_v42 = vld [vmem:[%s5202_s26 + $0x218] sm:$0xff]  ;;  %4052 = vst [vmem:[%s5202_s26 + $0x1c0] sm:$0xff] %v3524_v36  ;;  %v3529_v4 = vmax.f32 %v2857_v61, %v3401_v57 }
 0x4c0   : > { %4053 = vst [vmem:[%s5202_s26 + $0x1c8] sm:$0xff] %v3525_v25  ;;  %4055 = vst [vmem:[%s5202_s26 + $0x1d8] sm:$0xff] %v3527_v1  ;;  %v3528_v26 = vmax.f32 %v2856_v48, %v3400_v51  ;;  %v3530_v8 = vmax.f32 %v2858_v16, %v3402_v59  ;;  %v3531_v38 = vmax.f32 %v2859_v49, %v3403_v13  ;;  %v2864_v24 = vld [vmem:[%s5202_s26 + $0x220] sm:$0xff]  ;;  %v2865_v21 = vld [vmem:[%s5202_s26 + $0x228] sm:$0xff] }
 0x4c1   : > { %v9093_v22 = vld [vmem:[#allocation106_spill] sm:$0xff]  ;;  %v9094_v36 = vld [vmem:[#allocation108_spill] sm:$0xff]  ;;  %v9095_v60 = vld [vmem:[#allocation105_spill] sm:$0xff]  ;;  %4057 = vst [vmem:[%s5202_s26 + $0x1e8] sm:$0xff] %v3529_v4 }
 0x4c2   : > { %v3404_v5 = vsel %vm1164_vm4, %v9093_v22, -inf  ;;  %v3405_v25 = vsel %vm1164_vm4, %v9094_v36, -inf  ;;  %v3406_v1 = vsel %vm1164_vm4, %v9095_v60, -inf  ;;  %v9096_v48 = vld [vmem:[#allocation107_spill] sm:$0xff]  ;;  %v2866_v51 = vld [vmem:[%s5202_s26 + $0x230] sm:$0xff]  ;;  %v2867_v16 = vld [vmem:[%s5202_s26 + $0x238] sm:$0xff] }
 0x4c3   : > { %v3407_v61 = vsel %vm1164_vm4, %v9096_v48, -inf  ;;  %4056 = vst [vmem:[%s5202_s26 + $0x1e0] sm:$0xff] %v3528_v26  ;;  %4058 = vst [vmem:[%s5202_s26 + $0x1f0] sm:$0xff] %v3530_v8  ;;  %v3532_v49 = vmax.f32 %v2860_v11, %v3404_v5  ;;  %v3533_v57 = vmax.f32 %v2861_v9, %v3405_v25  ;;  %v3534_v59 = vmax.f32 %v2862_v32, %v3406_v1  ;;  %v2868_v60 = vld [vmem:[%s5202_s26 + $0x240] sm:$0xff]  ;;  %v2869_v36 = vld [vmem:[%s5202_s26 + $0x248] sm:$0xff] }
 0x4c4   : > { %4059 = vst [vmem:[%s5202_s26 + $0x1f8] sm:$0xff] %v3531_v38  ;;  %v3535_v13 = vmax.f32 %v2863_v42, %v3407_v61  ;;  %v9097_v48 = vld [vmem:[#allocation17_spill] sm:$0xff]  ;;  %v9099_v8 = vld [vmem:[#allocation15_spill] sm:$0xff]  ;;  %v2870_v5 = vld [vmem:[%s5202_s26 + $0x250] sm:$0xff] }
 0x4c5   : > { %v3408_v22 = vsel %vm1164_vm4, %v9097_v48, -inf  ;;  %v9098_v26 = vld [vmem:[#allocation21_spill] sm:$0xff]  ;;  %v3410_v38 = vsel %vm1164_vm4, %v9099_v8, -inf  ;;  %v9100_v11 = vld [vmem:[#allocation19_spill] sm:$0xff]  ;;  %4060 = vst [vmem:[%s5202_s26 + $0x200] sm:$0xff] %v3532_v49  ;;  %4061 = vst [vmem:[%s5202_s26 + $0x208] sm:$0xff] %v3533_v57 }
 0x4c6   : > { %v3409_v4 = vsel %vm1164_vm4, %v9098_v26, -inf  ;;  %v3411_v9 = vsel %vm1164_vm4, %v9100_v11, -inf  ;;  %v2871_v32 = vld [vmem:[%s5202_s26 + $0x258] sm:$0xff]  ;;  %4062 = vst [vmem:[%s5202_s26 + $0x210] sm:$0xff] %v3534_v59  ;;  %4063 = vst [vmem:[%s5202_s26 + $0x218] sm:$0xff] %v3535_v13  ;;  %v3536_v42 = vmax.f32 %v2864_v24, %v3408_v22  ;;  %v3538_v1 = vmax.f32 %v2866_v51, %v3410_v38  ;;  %v2872_v8 = vld [vmem:[%s5202_s26 + $0x260] sm:$0xff] }
 0x4c7   : > { %v3537_v25 = vmax.f32 %v2865_v21, %v3409_v4  ;;  %v3539_v61 = vmax.f32 %v2867_v16, %v3411_v9  ;;  %v2873_v26 = vld [vmem:[%s5202_s26 + $0x268] sm:$0xff]  ;;  %v9101_v11 = vld [vmem:[#allocation25_spill] sm:$0xff]  ;;  %v2874_v22 = vld [vmem:[%s5202_s26 + $0x270] sm:$0xff] }
 0x4c8   : > { %v3412_v48 = vsel %vm1164_vm4, %v9101_v11, -inf  ;;  %v9102_v49 = vld [vmem:[#allocation29_spill] sm:$0xff]  ;;  %v9103_v59 = vld [vmem:[#allocation23_spill] sm:$0xff]  ;;  %4064 = vst [vmem:[%s5202_s26 + $0x220] sm:$0xff] %v3536_v42  ;;  %4066 = vst [vmem:[%s5202_s26 + $0x230] sm:$0xff] %v3538_v1 }
 0x4c9   : > { %v3413_v57 = vsel %vm1164_vm4, %v9102_v49, -inf  ;;  %v3414_v13 = vsel %vm1164_vm4, %v9103_v59, -inf  ;;  %v9104_v24 = vld [vmem:[#allocation27_spill] sm:$0xff]  ;;  %v2875_v51 = vld [vmem:[%s5202_s26 + $0x278] sm:$0xff]  ;;  %4065 = vst [vmem:[%s5202_s26 + $0x228] sm:$0xff] %v3537_v25  ;;  %4067 = vst [vmem:[%s5202_s26 + $0x238] sm:$0xff] %v3539_v61  ;;  %v3540_v16 = vmax.f32 %v2868_v60, %v3412_v48 }
 0x4ca   : > { %v3415_v21 = vsel %vm1164_vm4, %v9104_v24, -inf  ;;  %v3541_v4 = vmax.f32 %v2869_v36, %v3413_v57  ;;  %v3542_v38 = vmax.f32 %v2870_v5, %v3414_v13  ;;  %v2876_v59 = vld [vmem:[%s5202_s26 + $0x280] sm:$0xff]  ;;  %v2877_v49 = vld [vmem:[%s5202_s26 + $0x288] sm:$0xff]  ;;  %v9106_v42 = vld [vmem:[#allocation33_spill] sm:$0xff] }
 0x4cb   : > { %v3543_v9 = vmax.f32 %v2871_v32, %v3415_v21  ;;  %v9105_v24 = vld [vmem:[#allocation31_spill] sm:$0xff]  ;;  %v3417_v25 = vsel %vm1164_vm4, %v9106_v42, -inf  ;;  %v9107_v1 = vld [vmem:[#allocation30_spill] sm:$0xff]  ;;  %v9108_v60 = vld [vmem:[#allocation32_spill] sm:$0xff]  ;;  %4068 = vst [vmem:[%s5202_s26 + $0x240] sm:$0xff] %v3540_v16 }
 0x4cc   : > { %v3416_v11 = vsel %vm1164_vm4, %v9105_v24, -inf  ;;  %v3418_v61 = vsel %vm1164_vm4, %v9107_v1, -inf  ;;  %v3419_v36 = vsel %vm1164_vm4, %v9108_v60, -inf  ;;  %v2878_v48 = vld [vmem:[%s5202_s26 + $0x290] sm:$0xff]  ;;  %v2879_v5 = vld [vmem:[%s5202_s26 + $0x298] sm:$0xff]  ;;  %4069 = vst [vmem:[%s5202_s26 + $0x248] sm:$0xff] %v3541_v4  ;;  %v3545_v57 = vmax.f32 %v2873_v26, %v3417_v25 }
 0x4cd   : > { %4070 = vst [vmem:[%s5202_s26 + $0x250] sm:$0xff] %v3542_v38  ;;  %4071 = vst [vmem:[%s5202_s26 + $0x258] sm:$0xff] %v3543_v9  ;;  %v3544_v32 = vmax.f32 %v2872_v8, %v3416_v11  ;;  %v3546_v13 = vmax.f32 %v2874_v22, %v3418_v61  ;;  %v3547_v21 = vmax.f32 %v2875_v51, %v3419_v36  ;;  %v2880_v1 = vld [vmem:[%s5202_s26 + $0x2a0] sm:$0xff]  ;;  %v2881_v42 = vld [vmem:[%s5202_s26 + $0x2a8] sm:$0xff] }
 0x4ce   : > { %v9109_v60 = vld [vmem:[#allocation36_spill] sm:$0xff]  ;;  %v9110_v16 = vld [vmem:[#allocation39_spill] sm:$0xff]  ;;  %v9112_v8 = vld [vmem:[#allocation38_spill] sm:$0xff]  ;;  %4073 = vst [vmem:[%s5202_s26 + $0x268] sm:$0xff] %v3545_v57 }
 0x4cf   : > { %v3420_v24 = vsel %vm1164_vm4, %v9109_v60, -inf  ;;  %v3421_v4 = vsel %vm1164_vm4, %v9110_v16, -inf  ;;  %v9111_v38 = vld [vmem:[#allocation35_spill] sm:$0xff]  ;;  %v3423_v26 = vsel %vm1164_vm4, %v9112_v8, -inf  ;;  %v2882_v11 = vld [vmem:[%s5202_s26 + $0x2b0] sm:$0xff]  ;;  %v2883_v22 = vld [vmem:[%s5202_s26 + $0x2b8] sm:$0xff] }
 0x4d0   : > { %v3422_v9 = vsel %vm1164_vm4, %v9111_v38, -inf  ;;  %4072 = vst [vmem:[%s5202_s26 + $0x260] sm:$0xff] %v3544_v32  ;;  %4074 = vst [vmem:[%s5202_s26 + $0x270] sm:$0xff] %v3546_v13  ;;  %v3548_v51 = vmax.f32 %v2876_v59, %v3420_v24  ;;  %v3549_v25 = vmax.f32 %v2877_v49, %v3421_v4  ;;  %v3551_v36 = vmax.f32 %v2879_v5, %v3423_v26  ;;  %v2884_v38 = vld [vmem:[%s5202_s26 + $0x2c0] sm:$0xff]  ;;  %v2885_v16 = vld [vmem:[%s5202_s26 + $0x2c8] sm:$0xff] }
 0x4d1   : > { %4075 = vst [vmem:[%s5202_s26 + $0x278] sm:$0xff] %v3547_v21  ;;  %v3550_v61 = vmax.f32 %v2878_v48, %v3422_v9  ;;  %v9113_v8 = vld [vmem:[#allocation41_spill] sm:$0xff]  ;;  %v9114_v32 = vld [vmem:[#allocation43_spill] sm:$0xff]  ;;  %v9115_v13 = vld [vmem:[#allocation40_spill] sm:$0xff] }
 0x4d2   : > { %v3424_v60 = vsel %vm1164_vm4, %v9113_v8, -inf  ;;  %v3425_v57 = vsel %vm1164_vm4, %v9114_v32, -inf  ;;  %v3426_v21 = vsel %vm1164_vm4, %v9115_v13, -inf  ;;  %v9116_v59 = vld [vmem:[#allocation42_spill] sm:$0xff]  ;;  %v2886_v24 = vld [vmem:[%s5202_s26 + $0x2d0] sm:$0xff]  ;;  %v2887_v48 = vld [vmem:[%s5202_s26 + $0x2d8] sm:$0xff] }
 0x4d3   : > { %v3427_v49 = vsel %vm1164_vm4, %v9116_v59, -inf  ;;  %4076 = vst [vmem:[%s5202_s26 + $0x280] sm:$0xff] %v3548_v51  ;;  %4077 = vst [vmem:[%s5202_s26 + $0x288] sm:$0xff] %v3549_v25  ;;  %v3552_v5 = vmax.f32 %v2880_v1, %v3424_v60  ;;  %v3553_v4 = vmax.f32 %v2881_v42, %v3425_v57  ;;  %v3554_v9 = vmax.f32 %v2882_v11, %v3426_v21  ;;  %v2888_v13 = vld [vmem:[%s5202_s26 + $0x2e0] sm:$0xff]  ;;  %v2889_v32 = vld [vmem:[%s5202_s26 + $0x2e8] sm:$0xff] }
 0x4d4   : > { %4078 = vst [vmem:[%s5202_s26 + $0x290] sm:$0xff] %v3550_v61  ;;  %4079 = vst [vmem:[%s5202_s26 + $0x298] sm:$0xff] %v3551_v36  ;;  %v3555_v26 = vmax.f32 %v2883_v22, %v3427_v49  ;;  %v9117_v59 = vld [vmem:[#allocation45_spill] sm:$0xff]  ;;  %v9118_v51 = vld [vmem:[#allocation47_spill] sm:$0xff] }
 0x4d5   : > { %v3428_v8 = vsel %vm1164_vm4, %v9117_v59, -inf  ;;  %v3429_v25 = vsel %vm1164_vm4, %v9118_v51, -inf  ;;  %v9119_v61 = vld [vmem:[#allocation44_spill] sm:$0xff]  ;;  %v9120_v1 = vld [vmem:[#allocation46_spill] sm:$0xff]  ;;  %v2891_v11 = vld [vmem:[%s5202_s26 + $0x2f8] sm:$0xff]  ;;  %4080 = vst [vmem:[%s5202_s26 + $0x2a0] sm:$0xff] %v3552_v5 }
 0x4d6   : > { %v3430_v36 = vsel %vm1164_vm4, %v9119_v61, -inf  ;;  %v3431_v42 = vsel %vm1164_vm4, %v9120_v1, -inf  ;;  %v2890_v60 = vld [vmem:[%s5202_s26 + $0x2f0] sm:$0xff]  ;;  %4081 = vst [vmem:[%s5202_s26 + $0x2a8] sm:$0xff] %v3553_v4  ;;  %4082 = vst [vmem:[%s5202_s26 + $0x2b0] sm:$0xff] %v3554_v9  ;;  %v3556_v22 = vmax.f32 %v2884_v38, %v3428_v8  ;;  %v3557_v57 = vmax.f32 %v2885_v16, %v3429_v25  ;;  %v2892_v61 = vld [vmem:[%s5202_s26 + $0x300] sm:$0xff] }
 0x4d7   : > { %4083 = vst [vmem:[%s5202_s26 + $0x2b8] sm:$0xff] %v3555_v26  ;;  %v3558_v21 = vmax.f32 %v2886_v24, %v3430_v36  ;;  %v3559_v49 = vmax.f32 %v2887_v48, %v3431_v42  ;;  %v2893_v51 = vld [vmem:[%s5202_s26 + $0x308] sm:$0xff]  ;;  %v9121_v1 = vld [vmem:[#allocation49_spill] sm:$0xff]  ;;  %v9123_v9 = vld [vmem:[#allocation48_spill] sm:$0xff] }
 0x4d8   : > { %v3432_v59 = vsel %vm1164_vm4, %v9121_v1, -inf  ;;  %v9122_v5 = vld [vmem:[#allocation51_spill] sm:$0xff]  ;;  %v3434_v26 = vsel %vm1164_vm4, %v9123_v9, -inf  ;;  %v9124_v38 = vld [vmem:[#allocation50_spill] sm:$0xff]  ;;  %v2894_v8 = vld [vmem:[%s5202_s26 + $0x310] sm:$0xff]  ;;  %4084 = vst [vmem:[%s5202_s26 + $0x2c0] sm:$0xff] %v3556_v22 }
 0x4d9   : > { %v3433_v4 = vsel %vm1164_vm4, %v9122_v5, -inf  ;;  %v3435_v16 = vsel %vm1164_vm4, %v9124_v38, -inf  ;;  %v2895_v24 = vld [vmem:[%s5202_s26 + $0x318] sm:$0xff]  ;;  %4085 = vst [vmem:[%s5202_s26 + $0x2c8] sm:$0xff] %v3557_v57  ;;  %4086 = vst [vmem:[%s5202_s26 + $0x2d0] sm:$0xff] %v3558_v21  ;;  %v3560_v48 = vmax.f32 %v2888_v13, %v3432_v59  ;;  %v3562_v36 = vmax.f32 %v2890_v60, %v3434_v26  ;;  %v2896_v9 = vld [vmem:[%s5202_s26 + $0x320] sm:$0xff] }
 0x4da   : > { %4087 = vst [vmem:[%s5202_s26 + $0x2d8] sm:$0xff] %v3559_v49  ;;  %v3561_v25 = vmax.f32 %v2889_v32, %v3433_v4  ;;  %v3563_v42 = vmax.f32 %v2891_v11, %v3435_v16  ;;  %v2897_v5 = vld [vmem:[%s5202_s26 + $0x328] sm:$0xff]  ;;  %v9125_v38 = vld [vmem:[#allocation53_spill] sm:$0xff]  ;;  %v9127_v21 = vld [vmem:[#allocation52_spill] sm:$0xff] }
 0x4db   : > { %v3436_v1 = vsel %vm1164_vm4, %v9125_v38, -inf  ;;  %v9126_v22 = vld [vmem:[#allocation55_spill] sm:$0xff]  ;;  %v3438_v49 = vsel %vm1164_vm4, %v9127_v21, -inf  ;;  %v9128_v13 = vld [vmem:[#allocation54_spill] sm:$0xff]  ;;  %v2898_v59 = vld [vmem:[%s5202_s26 + $0x330] sm:$0xff]  ;;  %4088 = vst [vmem:[%s5202_s26 + $0x2e0] sm:$0xff] %v3560_v48 }
 0x4dc   : > { %v3437_v57 = vsel %vm1164_vm4, %v9126_v22, -inf  ;;  %v3439_v32 = vsel %vm1164_vm4, %v9128_v13, -inf  ;;  %v2899_v60 = vld [vmem:[%s5202_s26 + $0x338] sm:$0xff]  ;;  %4089 = vst [vmem:[%s5202_s26 + $0x2e8] sm:$0xff] %v3561_v25  ;;  %4090 = vst [vmem:[%s5202_s26 + $0x2f0] sm:$0xff] %v3562_v36  ;;  %v3564_v11 = vmax.f32 %v2892_v61, %v3436_v1  ;;  %v3566_v26 = vmax.f32 %v2894_v8, %v3438_v49  ;;  %v2900_v21 = vld [vmem:[%s5202_s26 + $0x340] sm:$0xff] }
 0x4dd   : > { %4091 = vst [vmem:[%s5202_s26 + $0x2f8] sm:$0xff] %v3563_v42  ;;  %v3565_v4 = vmax.f32 %v2893_v51, %v3437_v57  ;;  %v3567_v16 = vmax.f32 %v2895_v24, %v3439_v32  ;;  %v2901_v22 = vld [vmem:[%s5202_s26 + $0x348] sm:$0xff]  ;;  %v9129_v13 = vld [vmem:[#allocation57_spill] sm:$0xff]  ;;  %v9131_v36 = vld [vmem:[#allocation56_spill] sm:$0xff] }
 0x4de   : > { %v3440_v38 = vsel %vm1164_vm4, %v9129_v13, -inf  ;;  %v9130_v48 = vld [vmem:[#allocation59_spill] sm:$0xff]  ;;  %v3442_v42 = vsel %vm1164_vm4, %v9131_v36, -inf  ;;  %v9132_v61 = vld [vmem:[#allocation58_spill] sm:$0xff]  ;;  %v2902_v1 = vld [vmem:[%s5202_s26 + $0x350] sm:$0xff]  ;;  %4092 = vst [vmem:[%s5202_s26 + $0x300] sm:$0xff] %v3564_v11 }
 0x4df   : > { %v3441_v25 = vsel %vm1164_vm4, %v9130_v48, -inf  ;;  %v3443_v51 = vsel %vm1164_vm4, %v9132_v61, -inf  ;;  %v2903_v8 = vld [vmem:[%s5202_s26 + $0x358] sm:$0xff]  ;;  %4093 = vst [vmem:[%s5202_s26 + $0x308] sm:$0xff] %v3565_v4  ;;  %4094 = vst [vmem:[%s5202_s26 + $0x310] sm:$0xff] %v3566_v26  ;;  %v3568_v24 = vmax.f32 %v2896_v9, %v3440_v38  ;;  %v3570_v49 = vmax.f32 %v2898_v59, %v3442_v42  ;;  %v2904_v36 = vld [vmem:[%s5202_s26 + $0x360] sm:$0xff] }
 0x4e0   : > { %4095 = vst [vmem:[%s5202_s26 + $0x318] sm:$0xff] %v3567_v16  ;;  %v3569_v57 = vmax.f32 %v2897_v5, %v3441_v25  ;;  %v3571_v32 = vmax.f32 %v2899_v60, %v3443_v51  ;;  %v2905_v48 = vld [vmem:[%s5202_s26 + $0x368] sm:$0xff]  ;;  %v9133_v61 = vld [vmem:[#allocation61_spill] sm:$0xff]  ;;  %v9135_v26 = vld [vmem:[#allocation60_spill] sm:$0xff] }
 0x4e1   : > { %v3444_v13 = vsel %vm1164_vm4, %v9133_v61, -inf  ;;  %v9134_v11 = vld [vmem:[#allocation63_spill] sm:$0xff]  ;;  %v3446_v16 = vsel %vm1164_vm4, %v9135_v26, -inf  ;;  %v9136_v9 = vld [vmem:[#allocation62_spill] sm:$0xff]  ;;  %v2906_v38 = vld [vmem:[%s5202_s26 + $0x370] sm:$0xff]  ;;  %4096 = vst [vmem:[%s5202_s26 + $0x320] sm:$0xff] %v3568_v24 }
 0x4e2   : > { %v3445_v4 = vsel %vm1164_vm4, %v9134_v11, -inf  ;;  %v3447_v5 = vsel %vm1164_vm4, %v9136_v9, -inf  ;;  %v2907_v59 = vld [vmem:[%s5202_s26 + $0x378] sm:$0xff]  ;;  %4097 = vst [vmem:[%s5202_s26 + $0x328] sm:$0xff] %v3569_v57  ;;  %4098 = vst [vmem:[%s5202_s26 + $0x330] sm:$0xff] %v3570_v49  ;;  %v3572_v60 = vmax.f32 %v2900_v21, %v3444_v13  ;;  %v3574_v42 = vmax.f32 %v2902_v1, %v3446_v16  ;;  %v2908_v26 = vld [vmem:[%s5202_s26 + $0x380] sm:$0xff] }
 0x4e3   : > { %4099 = vst [vmem:[%s5202_s26 + $0x338] sm:$0xff] %v3571_v32  ;;  %v3573_v25 = vmax.f32 %v2901_v22, %v3445_v4  ;;  %v3575_v51 = vmax.f32 %v2903_v8, %v3447_v5  ;;  %v2909_v11 = vld [vmem:[%s5202_s26 + $0x388] sm:$0xff]  ;;  %v9137_v9 = vld [vmem:[#allocation65_spill] sm:$0xff]  ;;  %v9138_v24 = vld [vmem:[#allocation68_spill] sm:$0xff] }
 0x4e4   : > { %v3448_v61 = vsel %vm1164_vm4, %v9137_v9, -inf  ;;  %v3449_v57 = vsel %vm1164_vm4, %v9138_v24, -inf  ;;  %v9139_v49 = vld [vmem:[#allocation64_spill] sm:$0xff]  ;;  %v9140_v21 = vld [vmem:[#allocation67_spill] sm:$0xff]  ;;  %v2911_v1 = vld [vmem:[%s5202_s26 + $0x398] sm:$0xff]  ;;  %4100 = vst [vmem:[%s5202_s26 + $0x340] sm:$0xff] %v3572_v60 }
 0x4e5   : > { %v3450_v32 = vsel %vm1164_vm4, %v9139_v49, -inf  ;;  %v3451_v22 = vsel %vm1164_vm4, %v9140_v21, -inf  ;;  %v2910_v13 = vld [vmem:[%s5202_s26 + $0x390] sm:$0xff]  ;;  %4101 = vst [vmem:[%s5202_s26 + $0x348] sm:$0xff] %v3573_v25  ;;  %4102 = vst [vmem:[%s5202_s26 + $0x350] sm:$0xff] %v3574_v42  ;;  %v3576_v8 = vmax.f32 %v2904_v36, %v3448_v61  ;;  %v3577_v4 = vmax.f32 %v2905_v48, %v3449_v57  ;;  %v2912_v49 = vld [vmem:[%s5202_s26 + $0x3a0] sm:$0xff] }
 0x4e6   : > { %4103 = vst [vmem:[%s5202_s26 + $0x358] sm:$0xff] %v3575_v51  ;;  %v3578_v16 = vmax.f32 %v2906_v38, %v3450_v32  ;;  %v3579_v5 = vmax.f32 %v2907_v59, %v3451_v22  ;;  %v2913_v24 = vld [vmem:[%s5202_s26 + $0x3a8] sm:$0xff]  ;;  %v9141_v21 = vld [vmem:[#allocation72_spill] sm:$0xff]  ;;  %v9143_v42 = vld [vmem:[#allocation70_spill] sm:$0xff] }
 0x4e7   : > { %v3452_v9 = vsel %vm1164_vm4, %v9141_v21, -inf  ;;  %v9142_v60 = vld [vmem:[#allocation76_spill] sm:$0xff]  ;;  %v3454_v51 = vsel %vm1164_vm4, %v9143_v42, -inf  ;;  %v9144_v36 = vld [vmem:[#allocation74_spill] sm:$0xff]  ;;  %v2915_v38 = vld [vmem:[%s5202_s26 + $0x3b8] sm:$0xff]  ;;  %4104 = vst [vmem:[%s5202_s26 + $0x360] sm:$0xff] %v3576_v8 }
 0x4e8   : > { %v3453_v25 = vsel %vm1164_vm4, %v9142_v60, -inf  ;;  %v3455_v48 = vsel %vm1164_vm4, %v9144_v36, -inf  ;;  %v2914_v61 = vld [vmem:[%s5202_s26 + $0x3b0] sm:$0xff]  ;;  %4105 = vst [vmem:[%s5202_s26 + $0x368] sm:$0xff] %v3577_v4  ;;  %4106 = vst [vmem:[%s5202_s26 + $0x370] sm:$0xff] %v3578_v16  ;;  %v3580_v59 = vmax.f32 %v2908_v26, %v3452_v9  ;;  %v3582_v32 = vmax.f32 %v2910_v13, %v3454_v51  ;;  %v2916_v42 = vld [vmem:[%s5202_s26 + $0x3c0] sm:$0xff] }
 0x4e9   : > { %4107 = vst [vmem:[%s5202_s26 + $0x378] sm:$0xff] %v3579_v5  ;;  %v3581_v57 = vmax.f32 %v2909_v11, %v3453_v25  ;;  %v3583_v22 = vmax.f32 %v2911_v1, %v3455_v48  ;;  %v2917_v60 = vld [vmem:[%s5202_s26 + $0x3c8] sm:$0xff]  ;;  %v9145_v36 = vld [vmem:[#allocation80_spill] sm:$0xff]  ;;  %v9147_v16 = vld [vmem:[#allocation78_spill] sm:$0xff] }
 0x4ea   : > { %v3456_v21 = vsel %vm1164_vm4, %v9145_v36, -inf  ;;  %v9146_v8 = vld [vmem:[#allocation84_spill] sm:$0xff]  ;;  %v3458_v5 = vsel %vm1164_vm4, %v9147_v16, -inf  ;;  %v9148_v26 = vld [vmem:[#allocation82_spill] sm:$0xff]  ;;  %v2919_v13 = vld [vmem:[%s5202_s26 + $0x3d8] sm:$0xff]  ;;  %4108 = vst [vmem:[%s5202_s26 + $0x380] sm:$0xff] %v3580_v59 }
 0x4eb   : > { %v3457_v4 = vsel %vm1164_vm4, %v9146_v8, -inf  ;;  %v3459_v11 = vsel %vm1164_vm4, %v9148_v26, -inf  ;;  %v2918_v9 = vld [vmem:[%s5202_s26 + $0x3d0] sm:$0xff]  ;;  %4109 = vst [vmem:[%s5202_s26 + $0x388] sm:$0xff] %v3581_v57  ;;  %4110 = vst [vmem:[%s5202_s26 + $0x390] sm:$0xff] %v3582_v32  ;;  %v3584_v1 = vmax.f32 %v2912_v49, %v3456_v21  ;;  %v3586_v51 = vmax.f32 %v2914_v61, %v3458_v5  ;;  %v2920_v16 = vld [vmem:[%s5202_s26 + $0x3e0] sm:$0xff] }
 0x4ec   : > { %4111 = vst [vmem:[%s5202_s26 + $0x398] sm:$0xff] %v3583_v22  ;;  %v3585_v25 = vmax.f32 %v2913_v24, %v3457_v4  ;;  %v3587_v48 = vmax.f32 %v2915_v38, %v3459_v11  ;;  %v2921_v8 = vld [vmem:[%s5202_s26 + $0x3e8] sm:$0xff]  ;;  %v9149_v26 = vld [vmem:[#allocation88_spill] sm:$0xff]  ;;  %v9151_v32 = vld [vmem:[#allocation86_spill] sm:$0xff] }
 0x4ed   : > { %v3460_v36 = vsel %vm1164_vm4, %v9149_v26, -inf  ;;  %v9150_v59 = vld [vmem:[#allocation92_spill] sm:$0xff]  ;;  %v3462_v22 = vsel %vm1164_vm4, %v9151_v32, -inf  ;;  %v9152_v49 = vld [vmem:[#allocation90_spill] sm:$0xff]  ;;  %v2923_v61 = vld [vmem:[%s5202_s26 + $0x3f8] sm:$0xff]  ;;  %4112 = vst [vmem:[%s5202_s26 + $0x3a0] sm:$0xff] %v3584_v1 }
 0x4ee   : > { %v3461_v57 = vsel %vm1164_vm4, %v9150_v59, -inf  ;;  %v3463_v24 = vsel %vm1164_vm4, %v9152_v49, -inf  ;;  %v2922_v21 = vld [vmem:[%s5202_s26 + $0x3f0] sm:$0xff]  ;;  %4113 = vst [vmem:[%s5202_s26 + $0x3a8] sm:$0xff] %v3585_v25  ;;  %4114 = vst [vmem:[%s5202_s26 + $0x3b0] sm:$0xff] %v3586_v51  ;;  %v3588_v38 = vmax.f32 %v2916_v42, %v3460_v36  ;;  %v3590_v5 = vmax.f32 %v2918_v9, %v3462_v22  ;;  %v2924_v32 = vld [vmem:[%s5207_s29] sm:$0xff] }
 0x4ef   : > { %4115 = vst [vmem:[%s5202_s26 + $0x3b8] sm:$0xff] %v3587_v48  ;;  %v3589_v4 = vmax.f32 %v2917_v60, %v3461_v57  ;;  %v3591_v11 = vmax.f32 %v2919_v13, %v3463_v24  ;;  %v2925_v59 = vld [vmem:[%s5207_s29 + $0x8] sm:$0xff]  ;;  %v9153_v49 = vld [vmem:[#allocation96_spill] sm:$0xff]  ;;  %v9155_v51 = vld [vmem:[#allocation94_spill] sm:$0xff] }
 0x4f0   : > { %v3464_v26 = vsel %vm1164_vm4, %v9153_v49, -inf  ;;  %v9154_v1 = vld [vmem:[#allocation100_spill] sm:$0xff]  ;;  %v3466_v48 = vsel %vm1164_vm4, %v9155_v51, -inf  ;;  %v9156_v42 = vld [vmem:[#allocation98_spill] sm:$0xff]  ;;  %v2927_v9 = vld [vmem:[%s5207_s29 + $0x18] sm:$0xff]  ;;  %4116 = vst [vmem:[%s5202_s26 + $0x3c0] sm:$0xff] %v3588_v38 }
 0x4f1   : > { %v3465_v25 = vsel %vm1164_vm4, %v9154_v1, -inf  ;;  %v3467_v60 = vsel %vm1164_vm4, %v9156_v42, -inf  ;;  %v2926_v36 = vld [vmem:[%s5207_s29 + $0x10] sm:$0xff]  ;;  %4117 = vst [vmem:[%s5202_s26 + $0x3c8] sm:$0xff] %v3589_v4  ;;  %4118 = vst [vmem:[%s5202_s26 + $0x3d0] sm:$0xff] %v3590_v5  ;;  %v3592_v13 = vmax.f32 %v2920_v16, %v3464_v26  ;;  %v3594_v22 = vmax.f32 %v2922_v21, %v3466_v48  ;;  %v2928_v51 = vld [vmem:[%s5207_s29 + $0x20] sm:$0xff] }
 0x4f2   : > { %4119 = vst [vmem:[%s5202_s26 + $0x3d8] sm:$0xff] %v3591_v11  ;;  %v3593_v57 = vmax.f32 %v2921_v8, %v3465_v25  ;;  %v3595_v24 = vmax.f32 %v2923_v61, %v3467_v60  ;;  %v2929_v1 = vld [vmem:[%s5207_s29 + $0x28] sm:$0xff]  ;;  %v3596_v42 = vsel %vm1164_vm4, %v9062_v39, inf  ;;  %v3597_v38 = vsel %vm1164_vm4, %v9064_v44, inf  ;;  %v2930_v16 = vld [vmem:[%s5207_s29 + $0x30] sm:$0xff]  ;;  %v2931_v26 = vld [vmem:[%s5207_s29 + $0x38] sm:$0xff] }
 0x4f3   : > { %v3598_v4 = vsel %vm1164_vm4, %v9065_v43, inf  ;;  %v3599_v8 = vsel %vm1164_vm4, %v9066_v58, inf  ;;  %4120 = vst [vmem:[%s5202_s26 + $0x3e0] sm:$0xff] %v3592_v13  ;;  %4122 = vst [vmem:[%s5202_s26 + $0x3f0] sm:$0xff] %v3594_v22  ;;  %v3724_v39 = vmin.f32 %v2924_v32, %v3596_v42  ;;  %v3725_v44 = vmin.f32 %v2925_v59, %v3597_v38  ;;  %v2932_v61 = vld [vmem:[%s5207_s29 + $0x40] sm:$0xff]  ;;  %v2933_v5 = vld [vmem:[%s5207_s29 + $0x48] sm:$0xff] }
 0x4f4   : > { %4121 = vst [vmem:[%s5202_s26 + $0x3e8] sm:$0xff] %v3593_v57  ;;  %4123 = vst [vmem:[%s5202_s26 + $0x3f8] sm:$0xff] %v3595_v24  ;;  %v3726_v21 = vmin.f32 %v2926_v36, %v3598_v4  ;;  %v3727_v43 = vmin.f32 %v2927_v9, %v3599_v8  ;;  %v3600_v58 = vsel %vm1164_vm4, %v9067_v62, inf  ;;  %v3601_v11 = vsel %vm1164_vm4, %v9068_v14, inf  ;;  %v9157_v25 = vld [vmem:[#allocation22_spill] sm:$0xff]  ;;  %v2934_v42 = vld [vmem:[%s5207_s29 + $0x50] sm:$0xff] }
 0x4f5   : > { %v3602_v48 = vsel %vm1164_vm4, %v9157_v25, inf  ;;  %v9158_v32 = vld [vmem:[#allocation26_spill] sm:$0xff]  ;;  %v2935_v60 = vld [vmem:[%s5207_s29 + $0x58] sm:$0xff]  ;;  %4124 = vst [vmem:[%s5207_s29] sm:$0xff] %v3724_v39  ;;  %4125 = vst [vmem:[%s5207_s29 + $0x8] sm:$0xff] %v3725_v44  ;;  %v3728_v62 = vmin.f32 %v2928_v51, %v3600_v58  ;;  %v3729_v14 = vmin.f32 %v2929_v1, %v3601_v11  ;;  %v3604_v22 = vsel %vm1164_vm4, %v5844_v10, inf }
 0x4f6   : > { %v3603_v59 = vsel %vm1164_vm4, %v9158_v32, inf  ;;  %4126 = vst [vmem:[%s5207_s29 + $0x10] sm:$0xff] %v3726_v21  ;;  %4127 = vst [vmem:[%s5207_s29 + $0x18] sm:$0xff] %v3727_v43  ;;  %v3730_v36 = vmin.f32 %v2930_v16, %v3602_v48  ;;  %v2936_v13 = vld [vmem:[%s5207_s29 + $0x60] sm:$0xff]  ;;  %v2937_v57 = vld [vmem:[%s5207_s29 + $0x68] sm:$0xff]  ;;  %v3605_v24 = vsel %vm1164_vm4, %v5852_v56, inf  ;;  %v3732_v10 = vmin.f32 %v2932_v61, %v3604_v22 }
 0x4f7   : > { %v3731_v9 = vmin.f32 %v2931_v26, %v3603_v59  ;;  %v3606_v38 = vsel %vm1164_vm4, %v5840_v50, inf  ;;  %v3607_v1 = vsel %vm1164_vm4, %v5848_v55, inf  ;;  %v2938_v51 = vld [vmem:[%s5207_s29 + $0x70] sm:$0xff]  ;;  %v2939_v4 = vld [vmem:[%s5207_s29 + $0x78] sm:$0xff]  ;;  %4128 = vst [vmem:[%s5207_s29 + $0x20] sm:$0xff] %v3728_v62  ;;  %4129 = vst [vmem:[%s5207_s29 + $0x28] sm:$0xff] %v3729_v14  ;;  %v3733_v56 = vmin.f32 %v2933_v5, %v3605_v24 }
 0x4f8   : > { %4130 = vst [vmem:[%s5207_s29 + $0x30] sm:$0xff] %v3730_v36  ;;  %v3734_v8 = vmin.f32 %v2934_v42, %v3606_v38  ;;  %v3735_v50 = vmin.f32 %v2935_v60, %v3607_v1  ;;  %v2940_v16 = vld [vmem:[%s5207_s29 + $0x80] sm:$0xff]  ;;  %v2941_v26 = vld [vmem:[%s5207_s29 + $0x88] sm:$0xff]  ;;  %v3608_v55 = vsel %vm1164_vm4, %v5860_v7, inf  ;;  %v3609_v39 = vsel %vm1164_vm4, %v5868_v23, inf  ;;  %v9160_v43 = vld [vmem:[#allocation37_spill] sm:$0xff] }
 0x4f9   : > { %4131 = vst [vmem:[%s5207_s29 + $0x38] sm:$0xff] %v3731_v9  ;;  %v9159_v44 = vld [vmem:[#allocation34_spill] sm:$0xff]  ;;  %v3611_v61 = vsel %vm1164_vm4, %v9160_v43, inf  ;;  %v2942_v5 = vld [vmem:[%s5207_s29 + $0x90] sm:$0xff]  ;;  %v2943_v58 = vld [vmem:[%s5207_s29 + $0x98] sm:$0xff]  ;;  %v3736_v7 = vmin.f32 %v2936_v13, %v3608_v55  ;;  %v3737_v23 = vmin.f32 %v2937_v57, %v3609_v39  ;;  %v3612_v59 = vsel %vm1164_vm4, %v5876_v18, inf }
 0x4fa   : > { %v3610_v21 = vsel %vm1164_vm4, %v9159_v44, inf  ;;  %4132 = vst [vmem:[%s5207_s29 + $0x40] sm:$0xff] %v3732_v10  ;;  %4133 = vst [vmem:[%s5207_s29 + $0x48] sm:$0xff] %v3733_v56  ;;  %v3739_v25 = vmin.f32 %v2939_v4, %v3611_v61  ;;  %v2944_v48 = vld [vmem:[%s5207_s29 + $0xa0] sm:$0xff]  ;;  %v2945_v32 = vld [vmem:[%s5207_s29 + $0xa8] sm:$0xff]  ;;  %v3613_v42 = vsel %vm1164_vm4, %v5884_v15, inf  ;;  %v3740_v18 = vmin.f32 %v2940_v16, %v3612_v59 }
 0x4fb   : > { %4134 = vst [vmem:[%s5207_s29 + $0x50] sm:$0xff] %v3734_v8  ;;  %4135 = vst [vmem:[%s5207_s29 + $0x58] sm:$0xff] %v3735_v50  ;;  %v3738_v11 = vmin.f32 %v2938_v51, %v3610_v21  ;;  %v3614_v60 = vsel %vm1164_vm4, %v5872_v27, inf  ;;  %v3615_v62 = vsel %vm1164_vm4, %v5880_v0, inf  ;;  %v2946_v14 = vld [vmem:[%s5207_s29 + $0xb0] sm:$0xff]  ;;  %v2947_v36 = vld [vmem:[%s5207_s29 + $0xb8] sm:$0xff]  ;;  %v3741_v15 = vmin.f32 %v2941_v26, %v3613_v42 }
 0x4fc   : > { %4136 = vst [vmem:[%s5207_s29 + $0x60] sm:$0xff] %v3736_v7  ;;  %4137 = vst [vmem:[%s5207_s29 + $0x68] sm:$0xff] %v3737_v23  ;;  %v3742_v9 = vmin.f32 %v2942_v5, %v3614_v60  ;;  %v3743_v27 = vmin.f32 %v2943_v58, %v3615_v62  ;;  %v2948_v13 = vld [vmem:[%s5207_s29 + $0xc0] sm:$0xff]  ;;  %v2949_v57 = vld [vmem:[%s5207_s29 + $0xc8] sm:$0xff]  ;;  %v3616_v0 = vsel %vm1164_vm4, %v5892_v30, inf  ;;  %v3617_v22 = vsel %vm1164_vm4, %v5900_v20, inf }
 0x4fd   : > { %4138 = vst [vmem:[%s5207_s29 + $0x70] sm:$0xff] %v3738_v11  ;;  %4139 = vst [vmem:[%s5207_s29 + $0x78] sm:$0xff] %v3739_v25  ;;  %v3618_v24 = vsel %vm1164_vm4, %v5888_v28, inf  ;;  %v3619_v38 = vsel %vm1164_vm4, %v5896_v33, inf  ;;  %v2950_v1 = vld [vmem:[%s5207_s29 + $0xd0] sm:$0xff]  ;;  %v2951_v51 = vld [vmem:[%s5207_s29 + $0xd8] sm:$0xff]  ;;  %v3744_v30 = vmin.f32 %v2944_v48, %v3616_v0  ;;  %v3745_v20 = vmin.f32 %v2945_v32, %v3617_v22 }
 0x4fe   : > { %4140 = vst [vmem:[%s5207_s29 + $0x80] sm:$0xff] %v3740_v18  ;;  %4141 = vst [vmem:[%s5207_s29 + $0x88] sm:$0xff] %v3741_v15  ;;  %v3746_v4 = vmin.f32 %v2946_v14, %v3618_v24  ;;  %v3747_v28 = vmin.f32 %v2947_v36, %v3619_v38  ;;  %v2952_v10 = vld [vmem:[%s5207_s29 + $0xe0] sm:$0xff]  ;;  %v2953_v56 = vld [vmem:[%s5207_s29 + $0xe8] sm:$0xff]  ;;  %v3620_v33 = vsel %vm1164_vm4, %v5908_v41, inf  ;;  %v3621_v8 = vsel %vm1164_vm4, %v5916_v52, inf }
 0x4ff   : > { %4142 = vst [vmem:[%s5207_s29 + $0x90] sm:$0xff] %v3742_v9  ;;  %4143 = vst [vmem:[%s5207_s29 + $0x98] sm:$0xff] %v3743_v27  ;;  %v3622_v50 = vsel %vm1164_vm4, %v5904_v40, inf  ;;  %v3623_v16 = vsel %vm1164_vm4, %v5912_v46, inf  ;;  %v2954_v26 = vld [vmem:[%s5207_s29 + $0xf0] sm:$0xff]  ;;  %v2955_v55 = vld [vmem:[%s5207_s29 + $0xf8] sm:$0xff]  ;;  %v3748_v41 = vmin.f32 %v2948_v13, %v3620_v33  ;;  %v3749_v52 = vmin.f32 %v2949_v57, %v3621_v8 }
 0x500   : > { %4144 = vst [vmem:[%s5207_s29 + $0xa0] sm:$0xff] %v3744_v30  ;;  %4145 = vst [vmem:[%s5207_s29 + $0xa8] sm:$0xff] %v3745_v20  ;;  %v3750_v39 = vmin.f32 %v2950_v1, %v3622_v50  ;;  %v3751_v40 = vmin.f32 %v2951_v51, %v3623_v16  ;;  %v2956_v44 = vld [vmem:[%s5207_s29 + $0x100] sm:$0xff]  ;;  %v2957_v21 = vld [vmem:[%s5207_s29 + $0x108] sm:$0xff]  ;;  %v3624_v46 = vsel %vm1164_vm4, %v5924_v6, inf  ;;  %v3625_v43 = vsel %vm1164_vm4, %v5932_v54, inf }
 0x501   : > { %4146 = vst [vmem:[%s5207_s29 + $0xb0] sm:$0xff] %v3746_v4  ;;  %4147 = vst [vmem:[%s5207_s29 + $0xb8] sm:$0xff] %v3747_v28  ;;  %v3626_v61 = vsel %vm1164_vm4, %v5920_v63, inf  ;;  %v3627_v5 = vsel %vm1164_vm4, %v5928_v29, inf  ;;  %v2958_v58 = vld [vmem:[%s5207_s29 + $0x110] sm:$0xff]  ;;  %v2959_v7 = vld [vmem:[%s5207_s29 + $0x118] sm:$0xff]  ;;  %v3752_v54 = vmin.f32 %v2952_v10, %v3624_v46  ;;  %v3753_v6 = vmin.f32 %v2953_v56, %v3625_v43 }
 0x502   : > { %4148 = vst [vmem:[%s5207_s29 + $0xc0] sm:$0xff] %v3748_v41  ;;  %4149 = vst [vmem:[%s5207_s29 + $0xc8] sm:$0xff] %v3749_v52  ;;  %v3754_v23 = vmin.f32 %v2954_v26, %v3626_v61  ;;  %v3755_v63 = vmin.f32 %v2955_v55, %v3627_v5  ;;  %v2960_v11 = vld [vmem:[%s5207_s29 + $0x120] sm:$0xff]  ;;  %v2961_v25 = vld [vmem:[%s5207_s29 + $0x128] sm:$0xff]  ;;  %v3628_v29 = vsel %vm1164_vm4, %v5940_v35, inf  ;;  %v3629_v48 = vsel %vm1164_vm4, %v5948_v3, inf }
 0x503   : > { %4150 = vst [vmem:[%s5207_s29 + $0xd0] sm:$0xff] %v3750_v39  ;;  %4151 = vst [vmem:[%s5207_s29 + $0xd8] sm:$0xff] %v3751_v40  ;;  %v3630_v32 = vsel %vm1164_vm4, %v5936_v47, inf  ;;  %v3631_v59 = vsel %vm1164_vm4, %v5944_v2, inf  ;;  %v2962_v42 = vld [vmem:[%s5207_s29 + $0x130] sm:$0xff]  ;;  %v2963_v60 = vld [vmem:[%s5207_s29 + $0x138] sm:$0xff]  ;;  %v3756_v35 = vmin.f32 %v2956_v44, %v3628_v29  ;;  %v3757_v3 = vmin.f32 %v2957_v21, %v3629_v48 }
 0x504   : > { %4152 = vst [vmem:[%s5207_s29 + $0xe0] sm:$0xff] %v3752_v54  ;;  %4153 = vst [vmem:[%s5207_s29 + $0xe8] sm:$0xff] %v3753_v6  ;;  %v3758_v62 = vmin.f32 %v2958_v58, %v3630_v32  ;;  %v3759_v47 = vmin.f32 %v2959_v7, %v3631_v59  ;;  %v2964_v14 = vld [vmem:[%s5207_s29 + $0x140] sm:$0xff]  ;;  %v2965_v36 = vld [vmem:[%s5207_s29 + $0x148] sm:$0xff]  ;;  %v3632_v2 = vsel %vm1164_vm4, %v5956_v12, inf  ;;  %v3633_v18 = vsel %vm1164_vm4, %v5964_v45, inf }
 0x505   : > { %4154 = vst [vmem:[%s5207_s29 + $0xf0] sm:$0xff] %v3754_v23  ;;  %4155 = vst [vmem:[%s5207_s29 + $0xf8] sm:$0xff] %v3755_v63  ;;  %v3634_v15 = vsel %vm1164_vm4, %v5952_v34, inf  ;;  %v3635_v9 = vsel %vm1164_vm4, %v5960_v37, inf  ;;  %v2966_v27 = vld [vmem:[%s5207_s29 + $0x150] sm:$0xff]  ;;  %v2967_v13 = vld [vmem:[%s5207_s29 + $0x158] sm:$0xff]  ;;  %v3760_v12 = vmin.f32 %v2960_v11, %v3632_v2  ;;  %v3761_v45 = vmin.f32 %v2961_v25, %v3633_v18 }
 0x506   : > { %4156 = vst [vmem:[%s5207_s29 + $0x100] sm:$0xff] %v3756_v35  ;;  %4157 = vst [vmem:[%s5207_s29 + $0x108] sm:$0xff] %v3757_v3  ;;  %v3762_v57 = vmin.f32 %v2962_v42, %v3634_v15  ;;  %v3763_v34 = vmin.f32 %v2963_v60, %v3635_v9  ;;  %v2968_v0 = vld [vmem:[%s5207_s29 + $0x160] sm:$0xff]  ;;  %v2969_v22 = vld [vmem:[%s5207_s29 + $0x168] sm:$0xff]  ;;  %v3636_v37 = vsel %vm1164_vm4, %v5972_v19, inf  ;;  %v3637_v24 = vsel %vm1164_vm4, %v5980_v31, inf }
 0x507   : > { %4158 = vst [vmem:[%s5207_s29 + $0x110] sm:$0xff] %v3758_v62  ;;  %4159 = vst [vmem:[%s5207_s29 + $0x118] sm:$0xff] %v3759_v47  ;;  %v3638_v38 = vsel %vm1164_vm4, %v5968_v53, inf  ;;  %v9161_v1 = vld [vmem:[#allocation66_spill] sm:$0xff]  ;;  %v2970_v30 = vld [vmem:[%s5207_s29 + $0x170] sm:$0xff]  ;;  %v3764_v19 = vmin.f32 %v2964_v14, %v3636_v37  ;;  %v3765_v31 = vmin.f32 %v2965_v36, %v3637_v24 }
 0x508   : > { %v3639_v51 = vsel %vm1164_vm4, %v9161_v1, inf  ;;  %v2971_v20 = vld [vmem:[%s5207_s29 + $0x178] sm:$0xff]  ;;  %4160 = vst [vmem:[%s5207_s29 + $0x120] sm:$0xff] %v3760_v12  ;;  %4161 = vst [vmem:[%s5207_s29 + $0x128] sm:$0xff] %v3761_v45  ;;  %v3766_v4 = vmin.f32 %v2966_v27, %v3638_v38  ;;  %v2972_v28 = vld [vmem:[%s5207_s29 + $0x180] sm:$0xff] }
 0x509   : > { %4162 = vst [vmem:[%s5207_s29 + $0x130] sm:$0xff] %v3762_v57  ;;  %4163 = vst [vmem:[%s5207_s29 + $0x138] sm:$0xff] %v3763_v34  ;;  %v3767_v53 = vmin.f32 %v2967_v13, %v3639_v51  ;;  %v2973_v10 = vld [vmem:[%s5207_s29 + $0x188] sm:$0xff]  ;;  %v9164_v16 = vld [vmem:[#allocation69_spill] sm:$0xff] }
 0x50a   : > { %v9162_v56 = vld [vmem:[#allocation71_spill] sm:$0xff]  ;;  %v3642_v26 = vsel %vm1164_vm4, %v9164_v16, inf  ;;  %v9165_v55 = vld [vmem:[#allocation73_spill] sm:$0xff]  ;;  %v2974_v52 = vld [vmem:[%s5207_s29 + $0x190] sm:$0xff]  ;;  %4164 = vst [vmem:[%s5207_s29 + $0x140] sm:$0xff] %v3764_v19 }
 0x50b   : > { %v3640_v33 = vsel %vm1164_vm4, %v9162_v56, inf  ;;  %v9163_v8 = vld [vmem:[#allocation75_spill] sm:$0xff]  ;;  %v3643_v41 = vsel %vm1164_vm4, %v9165_v55, inf  ;;  %v2975_v39 = vld [vmem:[%s5207_s29 + $0x198] sm:$0xff]  ;;  %4165 = vst [vmem:[%s5207_s29 + $0x148] sm:$0xff] %v3765_v31  ;;  %4166 = vst [vmem:[%s5207_s29 + $0x150] sm:$0xff] %v3766_v4  ;;  %v3770_v21 = vmin.f32 %v2970_v30, %v3642_v26 }
 0x50c   : > { %v3641_v50 = vsel %vm1164_vm4, %v9163_v8, inf  ;;  %4167 = vst [vmem:[%s5207_s29 + $0x158] sm:$0xff] %v3767_v53  ;;  %v3768_v40 = vmin.f32 %v2968_v0, %v3640_v33  ;;  %v3771_v46 = vmin.f32 %v2971_v20, %v3643_v41  ;;  %v2976_v43 = vld [vmem:[%s5207_s29 + $0x1a0] sm:$0xff]  ;;  %v2977_v61 = vld [vmem:[%s5207_s29 + $0x1a8] sm:$0xff]  ;;  %v9168_v6 = vld [vmem:[#allocation77_spill] sm:$0xff] }
 0x50d   : > { %v3769_v44 = vmin.f32 %v2969_v22, %v3641_v50  ;;  %v9166_v5 = vld [vmem:[#allocation79_spill] sm:$0xff]  ;;  %v3646_v23 = vsel %vm1164_vm4, %v9168_v6, inf  ;;  %v9169_v63 = vld [vmem:[#allocation81_spill] sm:$0xff]  ;;  %v2978_v25 = vld [vmem:[%s5207_s29 + $0x1b0] sm:$0xff]  ;;  %4170 = vst [vmem:[%s5207_s29 + $0x170] sm:$0xff] %v3770_v21 }
 0x50e   : > { %v3644_v58 = vsel %vm1164_vm4, %v9166_v5, inf  ;;  %v9167_v7 = vld [vmem:[#allocation83_spill] sm:$0xff]  ;;  %v3647_v11 = vsel %vm1164_vm4, %v9169_v63, inf  ;;  %v2979_v29 = vld [vmem:[%s5207_s29 + $0x1b8] sm:$0xff]  ;;  %4168 = vst [vmem:[%s5207_s29 + $0x160] sm:$0xff] %v3768_v40  ;;  %4171 = vst [vmem:[%s5207_s29 + $0x178] sm:$0xff] %v3771_v46  ;;  %v3774_v59 = vmin.f32 %v2974_v52, %v3646_v23 }
 0x50f   : > { %v3645_v54 = vsel %vm1164_vm4, %v9167_v7, inf  ;;  %4169 = vst [vmem:[%s5207_s29 + $0x168] sm:$0xff] %v3769_v44  ;;  %v3772_v48 = vmin.f32 %v2972_v28, %v3644_v58  ;;  %v3775_v42 = vmin.f32 %v2975_v39, %v3647_v11  ;;  %v2980_v60 = vld [vmem:[%s5207_s29 + $0x1c0] sm:$0xff]  ;;  %v2981_v35 = vld [vmem:[%s5207_s29 + $0x1c8] sm:$0xff]  ;;  %v9172_v36 = vld [vmem:[#allocation85_spill] sm:$0xff] }
 0x510   : > { %v3773_v32 = vmin.f32 %v2973_v10, %v3645_v54  ;;  %v9170_v3 = vld [vmem:[#allocation87_spill] sm:$0xff]  ;;  %v3650_v2 = vsel %vm1164_vm4, %v9172_v36, inf  ;;  %v9173_v18 = vld [vmem:[#allocation89_spill] sm:$0xff]  ;;  %v2982_v9 = vld [vmem:[%s5207_s29 + $0x1d0] sm:$0xff]  ;;  %4174 = vst [vmem:[%s5207_s29 + $0x190] sm:$0xff] %v3774_v59 }
 0x511   : > { %v3648_v62 = vsel %vm1164_vm4, %v9170_v3, inf  ;;  %v9171_v47 = vld [vmem:[#allocation91_spill] sm:$0xff]  ;;  %v3651_v15 = vsel %vm1164_vm4, %v9173_v18, inf  ;;  %v2983_v27 = vld [vmem:[%s5207_s29 + $0x1d8] sm:$0xff]  ;;  %4172 = vst [vmem:[%s5207_s29 + $0x180] sm:$0xff] %v3772_v48  ;;  %4175 = vst [vmem:[%s5207_s29 + $0x198] sm:$0xff] %v3775_v42  ;;  %v3778_v45 = vmin.f32 %v2978_v25, %v3650_v2 }
 0x512   : > { %v3649_v14 = vsel %vm1164_vm4, %v9171_v47, inf  ;;  %4173 = vst [vmem:[%s5207_s29 + $0x188] sm:$0xff] %v3773_v32  ;;  %v3776_v13 = vmin.f32 %v2976_v43, %v3648_v62  ;;  %v3779_v57 = vmin.f32 %v2979_v29, %v3651_v15  ;;  %v2984_v34 = vld [vmem:[%s5207_s29 + $0x1e0] sm:$0xff]  ;;  %v2985_v0 = vld [vmem:[%s5207_s29 + $0x1e8] sm:$0xff]  ;;  %v9176_v1 = vld [vmem:[#allocation93_spill] sm:$0xff] }
 0x513   : > { %v3777_v12 = vmin.f32 %v2977_v61, %v3649_v14  ;;  %v9174_v22 = vld [vmem:[#allocation95_spill] sm:$0xff]  ;;  %v3654_v51 = vsel %vm1164_vm4, %v9176_v1, inf  ;;  %v9177_v30 = vld [vmem:[#allocation97_spill] sm:$0xff]  ;;  %v2986_v19 = vld [vmem:[%s5207_s29 + $0x1f0] sm:$0xff]  ;;  %4178 = vst [vmem:[%s5207_s29 + $0x1b0] sm:$0xff] %v3778_v45 }
 0x514   : > { %v3652_v37 = vsel %vm1164_vm4, %v9174_v22, inf  ;;  %v9175_v24 = vld [vmem:[#allocation99_spill] sm:$0xff]  ;;  %v3655_v20 = vsel %vm1164_vm4, %v9177_v30, inf  ;;  %v2987_v31 = vld [vmem:[%s5207_s29 + $0x1f8] sm:$0xff]  ;;  %4176 = vst [vmem:[%s5207_s29 + $0x1a0] sm:$0xff] %v3776_v13  ;;  %4179 = vst [vmem:[%s5207_s29 + $0x1b8] sm:$0xff] %v3779_v57  ;;  %v3782_v28 = vmin.f32 %v2982_v9, %v3654_v51 }
 0x515   : > { %v3653_v38 = vsel %vm1164_vm4, %v9175_v24, inf  ;;  %4177 = vst [vmem:[%s5207_s29 + $0x1a8] sm:$0xff] %v3777_v12  ;;  %v3780_v4 = vmin.f32 %v2980_v60, %v3652_v37  ;;  %v3783_v10 = vmin.f32 %v2983_v27, %v3655_v20  ;;  %v2988_v56 = vld [vmem:[%s5207_s29 + $0x200] sm:$0xff]  ;;  %v2989_v33 = vld [vmem:[%s5207_s29 + $0x208] sm:$0xff]  ;;  %v9179_v16 = vld [vmem:[#allocation104_spill] sm:$0xff] }
 0x516   : > { %v3781_v53 = vmin.f32 %v2981_v35, %v3653_v38  ;;  %v9178_v8 = vld [vmem:[#allocation102_spill] sm:$0xff]  ;;  %v3657_v26 = vsel %vm1164_vm4, %v9179_v16, inf  ;;  %v9180_v55 = vld [vmem:[#allocation101_spill] sm:$0xff]  ;;  %v9181_v52 = vld [vmem:[#allocation103_spill] sm:$0xff]  ;;  %4182 = vst [vmem:[%s5207_s29 + $0x1d0] sm:$0xff] %v3782_v28 }
 0x517   : > { %v3656_v50 = vsel %vm1164_vm4, %v9178_v8, inf  ;;  %v3658_v41 = vsel %vm1164_vm4, %v9180_v55, inf  ;;  %v3659_v39 = vsel %vm1164_vm4, %v9181_v52, inf  ;;  %v2990_v40 = vld [vmem:[%s5207_s29 + $0x210] sm:$0xff]  ;;  %v2991_v44 = vld [vmem:[%s5207_s29 + $0x218] sm:$0xff]  ;;  %4180 = vst [vmem:[%s5207_s29 + $0x1c0] sm:$0xff] %v3780_v4  ;;  %v3785_v46 = vmin.f32 %v2985_v0, %v3657_v26 }
 0x518   : > { %4181 = vst [vmem:[%s5207_s29 + $0x1c8] sm:$0xff] %v3781_v53  ;;  %4183 = vst [vmem:[%s5207_s29 + $0x1d8] sm:$0xff] %v3783_v10  ;;  %v3784_v21 = vmin.f32 %v2984_v34, %v3656_v50  ;;  %v3786_v43 = vmin.f32 %v2986_v19, %v3658_v41  ;;  %v3787_v61 = vmin.f32 %v2987_v31, %v3659_v39  ;;  %v2992_v5 = vld [vmem:[%s5207_s29 + $0x220] sm:$0xff]  ;;  %v2993_v58 = vld [vmem:[%s5207_s29 + $0x228] sm:$0xff] }
 0x519   : > { %v9182_v7 = vld [vmem:[#allocation106_spill] sm:$0xff]  ;;  %v9183_v6 = vld [vmem:[#allocation108_spill] sm:$0xff]  ;;  %v9184_v63 = vld [vmem:[#allocation105_spill] sm:$0xff]  ;;  %4185 = vst [vmem:[%s5207_s29 + $0x1e8] sm:$0xff] %v3785_v46 }
 0x51a   : > { %v3660_v54 = vsel %vm1164_vm4, %v9182_v7, inf  ;;  %v3661_v23 = vsel %vm1164_vm4, %v9183_v6, inf  ;;  %v3662_v11 = vsel %vm1164_vm4, %v9184_v63, inf  ;;  %v9185_v25 = vld [vmem:[#allocation107_spill] sm:$0xff]  ;;  %v2994_v48 = vld [vmem:[%s5207_s29 + $0x230] sm:$0xff]  ;;  %v2995_v32 = vld [vmem:[%s5207_s29 + $0x238] sm:$0xff] }
 0x51b   : > { %v3663_v29 = vsel %vm1164_vm4, %v9185_v25, inf  ;;  %4184 = vst [vmem:[%s5207_s29 + $0x1e0] sm:$0xff] %v3784_v21  ;;  %4186 = vst [vmem:[%s5207_s29 + $0x1f0] sm:$0xff] %v3786_v43  ;;  %v3788_v59 = vmin.f32 %v2988_v56, %v3660_v54  ;;  %v3789_v42 = vmin.f32 %v2989_v33, %v3661_v23  ;;  %v3790_v60 = vmin.f32 %v2990_v40, %v3662_v11  ;;  %v2996_v3 = vld [vmem:[%s5207_s29 + $0x240] sm:$0xff]  ;;  %v2997_v62 = vld [vmem:[%s5207_s29 + $0x248] sm:$0xff] }
 0x51c   : > { %4187 = vst [vmem:[%s5207_s29 + $0x1f8] sm:$0xff] %v3787_v61  ;;  %v3791_v35 = vmin.f32 %v2991_v44, %v3663_v29  ;;  %v9186_v47 = vld [vmem:[#allocation17_spill] sm:$0xff]  ;;  %v9188_v18 = vld [vmem:[#allocation15_spill] sm:$0xff]  ;;  %v2998_v13 = vld [vmem:[%s5207_s29 + $0x250] sm:$0xff] }
 0x51d   : > { %v3664_v14 = vsel %vm1164_vm4, %v9186_v47, inf  ;;  %v9187_v36 = vld [vmem:[#allocation21_spill] sm:$0xff]  ;;  %v3666_v15 = vsel %vm1164_vm4, %v9188_v18, inf  ;;  %v9189_v9 = vld [vmem:[#allocation19_spill] sm:$0xff]  ;;  %4188 = vst [vmem:[%s5207_s29 + $0x200] sm:$0xff] %v3788_v59  ;;  %4189 = vst [vmem:[%s5207_s29 + $0x208] sm:$0xff] %v3789_v42 }
 0x51e   : > { %v3665_v2 = vsel %vm1164_vm4, %v9187_v36, inf  ;;  %v3667_v27 = vsel %vm1164_vm4, %v9189_v9, inf  ;;  %v2999_v12 = vld [vmem:[%s5207_s29 + $0x258] sm:$0xff]  ;;  %4190 = vst [vmem:[%s5207_s29 + $0x210] sm:$0xff] %v3790_v60  ;;  %4191 = vst [vmem:[%s5207_s29 + $0x218] sm:$0xff] %v3791_v35  ;;  %v3792_v45 = vmin.f32 %v2992_v5, %v3664_v14  ;;  %v3794_v34 = vmin.f32 %v2994_v48, %v3666_v15  ;;  %v3000_v22 = vld [vmem:[%s5207_s29 + $0x260] sm:$0xff] }
 0x51f   : > { %v3793_v57 = vmin.f32 %v2993_v58, %v3665_v2  ;;  %v3795_v0 = vmin.f32 %v2995_v32, %v3667_v27  ;;  %v3001_v37 = vld [vmem:[%s5207_s29 + $0x268] sm:$0xff]  ;;  %v9190_v24 = vld [vmem:[#allocation25_spill] sm:$0xff]  ;;  %v3002_v4 = vld [vmem:[%s5207_s29 + $0x270] sm:$0xff] }
 0x520   : > { %v3668_v38 = vsel %vm1164_vm4, %v9190_v24, inf  ;;  %v9191_v1 = vld [vmem:[#allocation29_spill] sm:$0xff]  ;;  %v9192_v30 = vld [vmem:[#allocation23_spill] sm:$0xff]  ;;  %4192 = vst [vmem:[%s5207_s29 + $0x220] sm:$0xff] %v3792_v45  ;;  %4194 = vst [vmem:[%s5207_s29 + $0x230] sm:$0xff] %v3794_v34 }
 0x521   : > { %v3669_v51 = vsel %vm1164_vm4, %v9191_v1, inf  ;;  %v3670_v20 = vsel %vm1164_vm4, %v9192_v30, inf  ;;  %v9193_v19 = vld [vmem:[#allocation27_spill] sm:$0xff]  ;;  %v3003_v53 = vld [vmem:[%s5207_s29 + $0x278] sm:$0xff]  ;;  %4193 = vst [vmem:[%s5207_s29 + $0x228] sm:$0xff] %v3793_v57  ;;  %4195 = vst [vmem:[%s5207_s29 + $0x238] sm:$0xff] %v3795_v0  ;;  %v3796_v28 = vmin.f32 %v2996_v3, %v3668_v38 }
 0x522   : > { %v3671_v31 = vsel %vm1164_vm4, %v9193_v19, inf  ;;  %v3797_v10 = vmin.f32 %v2997_v62, %v3669_v51  ;;  %v3798_v56 = vmin.f32 %v2998_v13, %v3670_v20  ;;  %v3004_v8 = vld [vmem:[%s5207_s29 + $0x280] sm:$0xff]  ;;  %v3005_v50 = vld [vmem:[%s5207_s29 + $0x288] sm:$0xff]  ;;  %v9195_v55 = vld [vmem:[#allocation33_spill] sm:$0xff] }
 0x523   : > { %v3799_v33 = vmin.f32 %v2999_v12, %v3671_v31  ;;  %v9194_v16 = vld [vmem:[#allocation31_spill] sm:$0xff]  ;;  %v3673_v41 = vsel %vm1164_vm4, %v9195_v55, inf  ;;  %v9196_v52 = vld [vmem:[#allocation30_spill] sm:$0xff]  ;;  %v9197_v40 = vld [vmem:[#allocation32_spill] sm:$0xff]  ;;  %4196 = vst [vmem:[%s5207_s29 + $0x240] sm:$0xff] %v3796_v28 }
 0x524   : > { %v3672_v26 = vsel %vm1164_vm4, %v9194_v16, inf  ;;  %v3674_v39 = vsel %vm1164_vm4, %v9196_v52, inf  ;;  %v3675_v44 = vsel %vm1164_vm4, %v9197_v40, inf  ;;  %v3006_v21 = vld [vmem:[%s5207_s29 + $0x290] sm:$0xff]  ;;  %v3007_v46 = vld [vmem:[%s5207_s29 + $0x298] sm:$0xff]  ;;  %4197 = vst [vmem:[%s5207_s29 + $0x248] sm:$0xff] %v3797_v10  ;;  %v3801_v61 = vmin.f32 %v3001_v37, %v3673_v41 }
 0x525   : > { %4198 = vst [vmem:[%s5207_s29 + $0x250] sm:$0xff] %v3798_v56  ;;  %4199 = vst [vmem:[%s5207_s29 + $0x258] sm:$0xff] %v3799_v33  ;;  %v3800_v43 = vmin.f32 %v3000_v22, %v3672_v26  ;;  %v3802_v5 = vmin.f32 %v3002_v4, %v3674_v39  ;;  %v3803_v58 = vmin.f32 %v3003_v53, %v3675_v44  ;;  %v3008_v7 = vld [vmem:[%s5207_s29 + $0x2a0] sm:$0xff]  ;;  %v3009_v54 = vld [vmem:[%s5207_s29 + $0x2a8] sm:$0xff] }
 0x526   : > { %v9198_v6 = vld [vmem:[#allocation36_spill] sm:$0xff]  ;;  %v9199_v63 = vld [vmem:[#allocation39_spill] sm:$0xff]  ;;  %v9201_v48 = vld [vmem:[#allocation38_spill] sm:$0xff]  ;;  %4201 = vst [vmem:[%s5207_s29 + $0x268] sm:$0xff] %v3801_v61 }
 0x527   : > { %v3676_v23 = vsel %vm1164_vm4, %v9198_v6, inf  ;;  %v3677_v11 = vsel %vm1164_vm4, %v9199_v63, inf  ;;  %v9200_v25 = vld [vmem:[#allocation35_spill] sm:$0xff]  ;;  %v3679_v32 = vsel %vm1164_vm4, %v9201_v48, inf  ;;  %v3010_v59 = vld [vmem:[%s5207_s29 + $0x2b0] sm:$0xff]  ;;  %v3011_v42 = vld [vmem:[%s5207_s29 + $0x2b8] sm:$0xff] }
 0x528   : > { %v3678_v29 = vsel %vm1164_vm4, %v9200_v25, inf  ;;  %4200 = vst [vmem:[%s5207_s29 + $0x260] sm:$0xff] %v3800_v43  ;;  %4202 = vst [vmem:[%s5207_s29 + $0x270] sm:$0xff] %v3802_v5  ;;  %v3804_v60 = vmin.f32 %v3004_v8, %v3676_v23  ;;  %v3805_v35 = vmin.f32 %v3005_v50, %v3677_v11  ;;  %v3807_v62 = vmin.f32 %v3007_v46, %v3679_v32  ;;  %v3012_v47 = vld [vmem:[%s5207_s29 + $0x2c0] sm:$0xff]  ;;  %v3013_v14 = vld [vmem:[%s5207_s29 + $0x2c8] sm:$0xff] }
 0x529   : > { %4203 = vst [vmem:[%s5207_s29 + $0x278] sm:$0xff] %v3803_v58  ;;  %v3806_v3 = vmin.f32 %v3006_v21, %v3678_v29  ;;  %v9202_v36 = vld [vmem:[#allocation41_spill] sm:$0xff]  ;;  %v9203_v18 = vld [vmem:[#allocation43_spill] sm:$0xff]  ;;  %v9204_v9 = vld [vmem:[#allocation40_spill] sm:$0xff] }
 0x52a   : > { %v3680_v2 = vsel %vm1164_vm4, %v9202_v36, inf  ;;  %v3681_v15 = vsel %vm1164_vm4, %v9203_v18, inf  ;;  %v3682_v27 = vsel %vm1164_vm4, %v9204_v9, inf  ;;  %v9205_v13 = vld [vmem:[#allocation42_spill] sm:$0xff]  ;;  %v3014_v45 = vld [vmem:[%s5207_s29 + $0x2d0] sm:$0xff]  ;;  %v3015_v57 = vld [vmem:[%s5207_s29 + $0x2d8] sm:$0xff] }
 0x52b   : > { %v3683_v12 = vsel %vm1164_vm4, %v9205_v13, inf  ;;  %4204 = vst [vmem:[%s5207_s29 + $0x280] sm:$0xff] %v3804_v60  ;;  %4205 = vst [vmem:[%s5207_s29 + $0x288] sm:$0xff] %v3805_v35  ;;  %v3808_v34 = vmin.f32 %v3008_v7, %v3680_v2  ;;  %v3809_v0 = vmin.f32 %v3009_v54, %v3681_v15  ;;  %v3810_v22 = vmin.f32 %v3010_v59, %v3682_v27  ;;  %v3016_v24 = vld [vmem:[%s5207_s29 + $0x2e0] sm:$0xff]  ;;  %v3017_v38 = vld [vmem:[%s5207_s29 + $0x2e8] sm:$0xff] }
 0x52c   : > { %4206 = vst [vmem:[%s5207_s29 + $0x290] sm:$0xff] %v3806_v3  ;;  %4207 = vst [vmem:[%s5207_s29 + $0x298] sm:$0xff] %v3807_v62  ;;  %v3811_v37 = vmin.f32 %v3011_v42, %v3683_v12  ;;  %v9206_v1 = vld [vmem:[#allocation45_spill] sm:$0xff]  ;;  %v9207_v30 = vld [vmem:[#allocation47_spill] sm:$0xff] }
 0x52d   : > { %v3684_v51 = vsel %vm1164_vm4, %v9206_v1, inf  ;;  %v3685_v20 = vsel %vm1164_vm4, %v9207_v30, inf  ;;  %v9208_v19 = vld [vmem:[#allocation44_spill] sm:$0xff]  ;;  %v9209_v4 = vld [vmem:[#allocation46_spill] sm:$0xff]  ;;  %v3019_v10 = vld [vmem:[%s5207_s29 + $0x2f8] sm:$0xff]  ;;  %4208 = vst [vmem:[%s5207_s29 + $0x2a0] sm:$0xff] %v3808_v34 }
 0x52e   : > { %v3686_v31 = vsel %vm1164_vm4, %v9208_v19, inf  ;;  %v3687_v53 = vsel %vm1164_vm4, %v9209_v4, inf  ;;  %v3018_v28 = vld [vmem:[%s5207_s29 + $0x2f0] sm:$0xff]  ;;  %4209 = vst [vmem:[%s5207_s29 + $0x2a8] sm:$0xff] %v3809_v0  ;;  %4210 = vst [vmem:[%s5207_s29 + $0x2b0] sm:$0xff] %v3810_v22  ;;  %v3812_v56 = vmin.f32 %v3012_v47, %v3684_v51  ;;  %v3813_v33 = vmin.f32 %v3013_v14, %v3685_v20  ;;  %v3020_v16 = vld [vmem:[%s5207_s29 + $0x300] sm:$0xff] }
 0x52f   : > { %4211 = vst [vmem:[%s5207_s29 + $0x2b8] sm:$0xff] %v3811_v37  ;;  %v3814_v8 = vmin.f32 %v3014_v45, %v3686_v31  ;;  %v3815_v50 = vmin.f32 %v3015_v57, %v3687_v53  ;;  %v3021_v26 = vld [vmem:[%s5207_s29 + $0x308] sm:$0xff]  ;;  %v9210_v55 = vld [vmem:[#allocation49_spill] sm:$0xff]  ;;  %v9212_v40 = vld [vmem:[#allocation48_spill] sm:$0xff] }
 0x530   : > { %v3688_v41 = vsel %vm1164_vm4, %v9210_v55, inf  ;;  %v9211_v52 = vld [vmem:[#allocation51_spill] sm:$0xff]  ;;  %v3690_v44 = vsel %vm1164_vm4, %v9212_v40, inf  ;;  %v9213_v21 = vld [vmem:[#allocation50_spill] sm:$0xff]  ;;  %v3022_v43 = vld [vmem:[%s5207_s29 + $0x310] sm:$0xff]  ;;  %4212 = vst [vmem:[%s5207_s29 + $0x2c0] sm:$0xff] %v3812_v56 }
 0x531   : > { %v3689_v39 = vsel %vm1164_vm4, %v9211_v52, inf  ;;  %v3691_v46 = vsel %vm1164_vm4, %v9213_v21, inf  ;;  %v3023_v61 = vld [vmem:[%s5207_s29 + $0x318] sm:$0xff]  ;;  %4213 = vst [vmem:[%s5207_s29 + $0x2c8] sm:$0xff] %v3813_v33  ;;  %4214 = vst [vmem:[%s5207_s29 + $0x2d0] sm:$0xff] %v3814_v8  ;;  %v3816_v5 = vmin.f32 %v3016_v24, %v3688_v41  ;;  %v3818_v7 = vmin.f32 %v3018_v28, %v3690_v44  ;;  %v3024_v6 = vld [vmem:[%s5207_s29 + $0x320] sm:$0xff] }
 0x532   : > { %4215 = vst [vmem:[%s5207_s29 + $0x2d8] sm:$0xff] %v3815_v50  ;;  %v3817_v58 = vmin.f32 %v3017_v38, %v3689_v39  ;;  %v3819_v54 = vmin.f32 %v3019_v10, %v3691_v46  ;;  %v3025_v23 = vld [vmem:[%s5207_s29 + $0x328] sm:$0xff]  ;;  %v9214_v63 = vld [vmem:[#allocation53_spill] sm:$0xff]  ;;  %v9216_v48 = vld [vmem:[#allocation52_spill] sm:$0xff] }
 0x533   : > { %v3692_v11 = vsel %vm1164_vm4, %v9214_v63, inf  ;;  %v9215_v25 = vld [vmem:[#allocation55_spill] sm:$0xff]  ;;  %v3694_v32 = vsel %vm1164_vm4, %v9216_v48, inf  ;;  %v9217_v59 = vld [vmem:[#allocation54_spill] sm:$0xff]  ;;  %v3026_v60 = vld [vmem:[%s5207_s29 + $0x330] sm:$0xff]  ;;  %4216 = vst [vmem:[%s5207_s29 + $0x2e0] sm:$0xff] %v3816_v5 }
 0x534   : > { %v3693_v29 = vsel %vm1164_vm4, %v9215_v25, inf  ;;  %v3695_v42 = vsel %vm1164_vm4, %v9217_v59, inf  ;;  %v3027_v35 = vld [vmem:[%s5207_s29 + $0x338] sm:$0xff]  ;;  %4217 = vst [vmem:[%s5207_s29 + $0x2e8] sm:$0xff] %v3817_v58  ;;  %4218 = vst [vmem:[%s5207_s29 + $0x2f0] sm:$0xff] %v3818_v7  ;;  %v3820_v3 = vmin.f32 %v3020_v16, %v3692_v11  ;;  %v3822_v47 = vmin.f32 %v3022_v43, %v3694_v32  ;;  %v3028_v36 = vld [vmem:[%s5207_s29 + $0x340] sm:$0xff] }
 0x535   : > { %4219 = vst [vmem:[%s5207_s29 + $0x2f8] sm:$0xff] %v3819_v54  ;;  %v3821_v62 = vmin.f32 %v3021_v26, %v3693_v29  ;;  %v3823_v14 = vmin.f32 %v3023_v61, %v3695_v42  ;;  %v3029_v2 = vld [vmem:[%s5207_s29 + $0x348] sm:$0xff]  ;;  %v9218_v18 = vld [vmem:[#allocation57_spill] sm:$0xff]  ;;  %v9220_v13 = vld [vmem:[#allocation56_spill] sm:$0xff] }
 0x536   : > { %v3696_v15 = vsel %vm1164_vm4, %v9218_v18, inf  ;;  %v9219_v9 = vld [vmem:[#allocation59_spill] sm:$0xff]  ;;  %v3698_v12 = vsel %vm1164_vm4, %v9220_v13, inf  ;;  %v9221_v45 = vld [vmem:[#allocation58_spill] sm:$0xff]  ;;  %v3030_v34 = vld [vmem:[%s5207_s29 + $0x350] sm:$0xff]  ;;  %4220 = vst [vmem:[%s5207_s29 + $0x300] sm:$0xff] %v3820_v3 }
 0x537   : > { %v3697_v27 = vsel %vm1164_vm4, %v9219_v9, inf  ;;  %v3699_v57 = vsel %vm1164_vm4, %v9221_v45, inf  ;;  %v3031_v0 = vld [vmem:[%s5207_s29 + $0x358] sm:$0xff]  ;;  %4221 = vst [vmem:[%s5207_s29 + $0x308] sm:$0xff] %v3821_v62  ;;  %4222 = vst [vmem:[%s5207_s29 + $0x310] sm:$0xff] %v3822_v47  ;;  %v3824_v22 = vmin.f32 %v3024_v6, %v3696_v15  ;;  %v3826_v24 = vmin.f32 %v3026_v60, %v3698_v12  ;;  %v3032_v1 = vld [vmem:[%s5207_s29 + $0x360] sm:$0xff] }
 0x538   : > { %4223 = vst [vmem:[%s5207_s29 + $0x318] sm:$0xff] %v3823_v14  ;;  %v3825_v37 = vmin.f32 %v3025_v23, %v3697_v27  ;;  %v3827_v38 = vmin.f32 %v3027_v35, %v3699_v57  ;;  %v3033_v51 = vld [vmem:[%s5207_s29 + $0x368] sm:$0xff]  ;;  %v9222_v30 = vld [vmem:[#allocation61_spill] sm:$0xff]  ;;  %v9224_v4 = vld [vmem:[#allocation60_spill] sm:$0xff] }
 0x539   : > { %v3700_v20 = vsel %vm1164_vm4, %v9222_v30, inf  ;;  %v9223_v19 = vld [vmem:[#allocation63_spill] sm:$0xff]  ;;  %v3702_v53 = vsel %vm1164_vm4, %v9224_v4, inf  ;;  %v9225_v28 = vld [vmem:[#allocation62_spill] sm:$0xff]  ;;  %v3034_v56 = vld [vmem:[%s5207_s29 + $0x370] sm:$0xff]  ;;  %4224 = vst [vmem:[%s5207_s29 + $0x320] sm:$0xff] %v3824_v22 }
 0x53a   : > { %v3701_v31 = vsel %vm1164_vm4, %v9223_v19, inf  ;;  %v3703_v10 = vsel %vm1164_vm4, %v9225_v28, inf  ;;  %v3035_v33 = vld [vmem:[%s5207_s29 + $0x378] sm:$0xff]  ;;  %4225 = vst [vmem:[%s5207_s29 + $0x328] sm:$0xff] %v3825_v37  ;;  %4226 = vst [vmem:[%s5207_s29 + $0x330] sm:$0xff] %v3826_v24  ;;  %v3828_v8 = vmin.f32 %v3028_v36, %v3700_v20  ;;  %v3830_v16 = vmin.f32 %v3030_v34, %v3702_v53  ;;  %v3036_v55 = vld [vmem:[%s5207_s29 + $0x380] sm:$0xff] }
 0x53b   : > { %4227 = vst [vmem:[%s5207_s29 + $0x338] sm:$0xff] %v3827_v38  ;;  %v3829_v50 = vmin.f32 %v3029_v2, %v3701_v31  ;;  %v3831_v26 = vmin.f32 %v3031_v0, %v3703_v10  ;;  %v3037_v41 = vld [vmem:[%s5207_s29 + $0x388] sm:$0xff]  ;;  %v9226_v52 = vld [vmem:[#allocation65_spill] sm:$0xff]  ;;  %v9227_v40 = vld [vmem:[#allocation68_spill] sm:$0xff] }
 0x53c   : > { %v3704_v39 = vsel %vm1164_vm4, %v9226_v52, inf  ;;  %v3705_v44 = vsel %vm1164_vm4, %v9227_v40, inf  ;;  %v9228_v21 = vld [vmem:[#allocation64_spill] sm:$0xff]  ;;  %v9229_v43 = vld [vmem:[#allocation67_spill] sm:$0xff]  ;;  %v3039_v58 = vld [vmem:[%s5207_s29 + $0x398] sm:$0xff]  ;;  %4228 = vst [vmem:[%s5207_s29 + $0x340] sm:$0xff] %v3828_v8 }
 0x53d   : > { %v3706_v46 = vsel %vm1164_vm4, %v9228_v21, inf  ;;  %v3707_v61 = vsel %vm1164_vm4, %v9229_v43, inf  ;;  %v3038_v5 = vld [vmem:[%s5207_s29 + $0x390] sm:$0xff]  ;;  %4229 = vst [vmem:[%s5207_s29 + $0x348] sm:$0xff] %v3829_v50  ;;  %4230 = vst [vmem:[%s5207_s29 + $0x350] sm:$0xff] %v3830_v16  ;;  %v3832_v7 = vmin.f32 %v3032_v1, %v3704_v39  ;;  %v3833_v54 = vmin.f32 %v3033_v51, %v3705_v44  ;;  %v3040_v63 = vld [vmem:[%s5207_s29 + $0x3a0] sm:$0xff] }
 0x53e   : > { %4231 = vst [vmem:[%s5207_s29 + $0x358] sm:$0xff] %v3831_v26  ;;  %v3834_v6 = vmin.f32 %v3034_v56, %v3706_v46  ;;  %v3835_v23 = vmin.f32 %v3035_v33, %v3707_v61  ;;  %v3041_v11 = vld [vmem:[%s5207_s29 + $0x3a8] sm:$0xff]  ;;  %v9230_v25 = vld [vmem:[#allocation72_spill] sm:$0xff]  ;;  %v9232_v59 = vld [vmem:[#allocation70_spill] sm:$0xff]  ;;  %v3720_v52 = vsel %vm1164_vm4, %v9153_v49, inf }
 0x53f   : > { %v3708_v29 = vsel %vm1164_vm4, %v9230_v25, inf  ;;  %v9231_v48 = vld [vmem:[#allocation76_spill] sm:$0xff]  ;;  %v3710_v42 = vsel %vm1164_vm4, %v9232_v59, inf  ;;  %v9233_v60 = vld [vmem:[#allocation74_spill] sm:$0xff]  ;;  %v3043_v62 = vld [vmem:[%s5207_s29 + $0x3b8] sm:$0xff]  ;;  %4232 = vst [vmem:[%s5207_s29 + $0x360] sm:$0xff] %v3832_v7 }
 0x540   : > { %v3709_v32 = vsel %vm1164_vm4, %v9231_v48, inf  ;;  %v3711_v35 = vsel %vm1164_vm4, %v9233_v60, inf  ;;  %v3042_v3 = vld [vmem:[%s5207_s29 + $0x3b0] sm:$0xff]  ;;  %4233 = vst [vmem:[%s5207_s29 + $0x368] sm:$0xff] %v3833_v54  ;;  %4234 = vst [vmem:[%s5207_s29 + $0x370] sm:$0xff] %v3834_v6  ;;  %v3836_v47 = vmin.f32 %v3036_v55, %v3708_v29  ;;  %v3838_v36 = vmin.f32 %v3038_v5, %v3710_v42  ;;  %v3044_v18 = vld [vmem:[%s5207_s29 + $0x3c0] sm:$0xff] }
 0x541   : > { %4235 = vst [vmem:[%s5207_s29 + $0x378] sm:$0xff] %v3835_v23  ;;  %v3837_v14 = vmin.f32 %v3037_v41, %v3709_v32  ;;  %v3839_v2 = vmin.f32 %v3039_v58, %v3711_v35  ;;  %v3045_v15 = vld [vmem:[%s5207_s29 + $0x3c8] sm:$0xff]  ;;  %v9234_v9 = vld [vmem:[#allocation80_spill] sm:$0xff]  ;;  %v9236_v45 = vld [vmem:[#allocation78_spill] sm:$0xff] }
 0x542   : > { %v3712_v27 = vsel %vm1164_vm4, %v9234_v9, inf  ;;  %v9235_v13 = vld [vmem:[#allocation84_spill] sm:$0xff]  ;;  %v3714_v57 = vsel %vm1164_vm4, %v9236_v45, inf  ;;  %v9237_v34 = vld [vmem:[#allocation82_spill] sm:$0xff]  ;;  %v3047_v37 = vld [vmem:[%s5207_s29 + $0x3d8] sm:$0xff]  ;;  %4236 = vst [vmem:[%s5207_s29 + $0x380] sm:$0xff] %v3836_v47 }
 0x543   : > { %v3713_v12 = vsel %vm1164_vm4, %v9235_v13, inf  ;;  %v3715_v0 = vsel %vm1164_vm4, %v9237_v34, inf  ;;  %v3046_v22 = vld [vmem:[%s5207_s29 + $0x3d0] sm:$0xff]  ;;  %4237 = vst [vmem:[%s5207_s29 + $0x388] sm:$0xff] %v3837_v14  ;;  %4238 = vst [vmem:[%s5207_s29 + $0x390] sm:$0xff] %v3838_v36  ;;  %v3840_v24 = vmin.f32 %v3040_v63, %v3712_v27  ;;  %v3842_v1 = vmin.f32 %v3042_v3, %v3714_v57  ;;  %v3048_v30 = vld [vmem:[%s5207_s29 + $0x3e0] sm:$0xff] }
 0x544   : > { %4239 = vst [vmem:[%s5207_s29 + $0x398] sm:$0xff] %v3839_v2  ;;  %v3841_v38 = vmin.f32 %v3041_v11, %v3713_v12  ;;  %v3843_v51 = vmin.f32 %v3043_v62, %v3715_v0  ;;  %v3049_v20 = vld [vmem:[%s5207_s29 + $0x3e8] sm:$0xff]  ;;  %v9238_v19 = vld [vmem:[#allocation88_spill] sm:$0xff]  ;;  %v9240_v28 = vld [vmem:[#allocation86_spill] sm:$0xff]  ;;  %v3848_v61 = vmin.f32 %v3048_v30, %v3720_v52 }
 0x545   : > { %v3716_v31 = vsel %vm1164_vm4, %v9238_v19, inf  ;;  %v9239_v4 = vld [vmem:[#allocation92_spill] sm:$0xff]  ;;  %v3718_v10 = vsel %vm1164_vm4, %v9240_v28, inf  ;;  %v9241_v56 = vld [vmem:[#allocation90_spill] sm:$0xff]  ;;  %v3051_v50 = vld [vmem:[%s5207_s29 + $0x3f8] sm:$0xff]  ;;  %4240 = vst [vmem:[%s5207_s29 + $0x3a0] sm:$0xff] %v3840_v24 }
 0x546   : > { %v3717_v53 = vsel %vm1164_vm4, %v9239_v4, inf  ;;  %v3719_v33 = vsel %vm1164_vm4, %v9241_v56, inf  ;;  %v3050_v8 = vld [vmem:[%s5207_s29 + $0x3f0] sm:$0xff]  ;;  %4241 = vst [vmem:[%s5207_s29 + $0x3a8] sm:$0xff] %v3841_v38  ;;  %4242 = vst [vmem:[%s5207_s29 + $0x3b0] sm:$0xff] %v3842_v1  ;;  %v3844_v16 = vmin.f32 %v3044_v18, %v3716_v31  ;;  %v3846_v55 = vmin.f32 %v3046_v22, %v3718_v10  ;;  %v9243_v44 = vld [vmem:[#allocation94_spill] sm:$0xff] }
 0x547   : > { %4243 = vst [vmem:[%s5207_s29 + $0x3b8] sm:$0xff] %v3843_v51  ;;  %v3845_v26 = vmin.f32 %v3045_v15, %v3717_v53  ;;  %v3847_v41 = vmin.f32 %v3047_v37, %v3719_v33  ;;  %v9242_v39 = vld [vmem:[#allocation100_spill] sm:$0xff]  ;;  %v3722_v21 = vsel %vm1164_vm4, %v9243_v44, inf  ;;  %v9244_v46 = vld [vmem:[#allocation98_spill] sm:$0xff]  ;;  %4248 = vst [vmem:[%s5207_s29 + $0x3e0] sm:$0xff] %v3848_v61 }
 0x548   : > { %v3721_v40 = vsel %vm1164_vm4, %v9242_v39, inf  ;;  %v3723_v43 = vsel %vm1164_vm4, %v9244_v46, inf  ;;  %4244 = vst [vmem:[%s5207_s29 + $0x3c0] sm:$0xff] %v3844_v16  ;;  %4246 = vst [vmem:[%s5207_s29 + $0x3d0] sm:$0xff] %v3846_v55  ;;  %v3850_v58 = vmin.f32 %v3050_v8, %v3722_v21 }
 0x549   : > { %4245 = vst [vmem:[%s5207_s29 + $0x3c8] sm:$0xff] %v3845_v26  ;;  %4247 = vst [vmem:[%s5207_s29 + $0x3d8] sm:$0xff] %v3847_v41  ;;  %v3849_v5 = vmin.f32 %v3049_v20, %v3721_v40  ;;  %v3851_v49 = vmin.f32 %v3051_v50, %v3723_v43 }
 0x54a   : > { %4250 = vst [vmem:[%s5207_s29 + $0x3f0] sm:$0xff] %v3850_v58 }
 0x54b   : > { %4249 = vst [vmem:[%s5207_s29 + $0x3e8] sm:$0xff] %v3849_v5  ;;  %4251 = vst [vmem:[%s5207_s29 + $0x3f8] sm:$0xff] %v3851_v49 }
 0x54c PF: > { %s22_s23 = sadd.s32 1, %s5045_s23   ;;  %s9245_s24 = sld [smem:[#allocation4_spill]] }
 0x54d   : > { %p19_p12 = scmp.ge.s32.totalorder %s22_s23, 14   ;;  %s9246_s17 = smov %s5025_s18 }
 0x54e   : > { %s9247_s18 = smov %s5163_s30  ;;  %s9248_s19 = smov %s5037_s21 }
 0x54f   : > { %s9249_s20 = smov %s5041_s22  ;;  %s9251_s22 = smov %s9257_s25 }
 0x550   :  { %21 = sbr.rel (!%p19_p12) target bundleno = 8 (0x8), region = 168 }
 0x552   : > { %s9250_s21 = smov %s9245_s24 }

// kernel: stnkd_forward.7
= control target key start
LH: loop header
LB: loop body
LE: loop exit
PB: predicated region body
PF: predicated region fallthrough
CT: control target
= control target key end

     0   :  { %v56_v38 = vlaneseq  ;;  %v4296_v60 = vmov 0   ;;  %vm2109_vm9 = vcmask 1043456   ;;  %vm3334_vm10 = vcmask 855040   ;;  %s5743_s4 = inlined_call_operand.vmem [shape: bf16[1024,512], index: 4, kind: input, shape index: {}]   ;;  %s5744_s2 = inlined_call_operand.vmem [shape: f32[1,1024], index: 2, kind: input, shape index: {}]   ;;  %s5745_s0 = inlined_call_operand.vmem [shape: f32[4,1024], index: 0, kind: input, shape index: {}]   ;;  %s5746_s1 = inlined_call_operand.vmem [shape: f32[4,1024], index: 1, kind: input, shape index: {}]   ;;  %s5747_s3 = inlined_call_operand.vmem [shape: f32[1,1024], index: 3, kind: input, shape index: {}]   ;;  %s5748_s7 = inlined_call_operand.vmem [shape: bf16[512,256], index: 7, kind: input, shape index: {}]   ;;  %s5749_s5 = inlined_call_operand.vmem [shape: f32[1,512], index: 5, kind: input, shape index: {}]   ;;  %s5750_s6 = inlined_call_operand.vmem [shape: f32[1,512], index: 6, kind: input, shape index: {}]   ;;  %s5751_s10 = inlined_call_operand.vmem [shape: bf16[256,361], index: 10, kind: input, shape index: {}]   ;;  %s5752_s8 = inlined_call_operand.vmem [shape: f32[1,256], index: 8, kind: input, shape index: {}]   ;;  %s5753_s9 = inlined_call_operand.vmem [shape: f32[1,256], index: 9, kind: input, shape index: {}]   ;;  %s5754_s11 = inlined_call_operand.vmem [shape: f32[1,361], index: 11, kind: input, shape index: {}]   ;;  %s5755_s12 = inlined_call_operand.vmem [shape: f32[1,361], index: 12, kind: input, shape index: {}]   ;;  %s5756_s13 = inlined_call_operand.vmem [shape: f32[4,361], index: 13, kind: output, shape index: {}]  }
   0x1   :  { %v3732_v0 = vld [vmem:[%s5743_s4 + $0xe4] ss:$16 sps:$4 sm:$0xff]   ;;  %v3736_v2 = vld [vmem:[%s5743_s4 + $0xe0] ss:$16 sps:$4 sm:$0xff]  }
   0x2   :  { %v3734_v1 = vld [vmem:[%s5743_s4 + $0x2e4] ss:$16 sps:$4 sm:$0xff]   ;;  %1779 = vmatprep.subr.bf16.mxu0 %v3732_v0  ;;  %v3737_v3 = vld [vmem:[%s5743_s4 + $0x2e0] ss:$16 sps:$4 sm:$0xff]   ;;  %v4494_v43 = vshrl.u32 %v56_v38, 7  ;;  %v48_v0 = vld [vmem:[%s5745_s0 + $0x8] sm:$0xff] }
   0x3   :  { %1820 = vmatprep.subr.bf16.mxu1 %v3734_v1  ;;  %v3738_v4 = vld [vmem:[%s5743_s4 + $0xc4] ss:$16 sps:$4 sm:$0xff]   ;;  %1780 = vmatpush1.bf16.msra.mxu0 %v3736_v2  ;;  %v3742_v6 = vld [vmem:[%s5743_s4 + $0xc0] ss:$16 sps:$4 sm:$0xff]   ;;  %v52_v1 = vld [vmem:[%s5746_s1 + $0x8] sm:$0xff] }
   0x4   :  { %1821 = vmatpush1.bf16.msra.mxu1 %v3737_v3  ;;  %v3740_v5 = vld [vmem:[%s5743_s4 + $0x2c4] ss:$16 sps:$4 sm:$0xff]   ;;  %1781 = vmatprep.subr.bf16.mxu0 %v3738_v4  ;;  %v3743_v7 = vld [vmem:[%s5743_s4 + $0x2c0] ss:$16 sps:$4 sm:$0xff]   ;;  %v4509_v48 = vsub.s32 1, %v4494_v43  ;;  %v4512_v49 = vsub.s32 3, %v4494_v43 }
   0x5   :  { %1822 = vmatprep.subr.bf16.mxu1 %v3740_v5  ;;  %v3744_v8 = vld [vmem:[%s5743_s4 + $0xa4] ss:$16 sps:$4 sm:$0xff]   ;;  %v3748_v10 = vld [vmem:[%s5743_s4 + $0xa0] ss:$16 sps:$4 sm:$0xff]   ;;  %v4526_v53 = vsub.s32 0, %v4494_v43  ;;  %v4545_v59 = vsub.s32 2, %v4494_v43 }
   0x6   :  { %v3746_v9 = vld [vmem:[%s5743_s4 + $0x2a4] ss:$16 sps:$4 sm:$0xff]   ;;  %v3749_v11 = vld [vmem:[%s5743_s4 + $0x2a0] ss:$16 sps:$4 sm:$0xff]  }
   0x7   :  { %1782 = vmatpush1.bf16.msra.mxu0 %v3742_v6  ;;  %v3750_v12 = vld [vmem:[%s5743_s4 + $0x84] ss:$16 sps:$4 sm:$0xff]   ;;  %v3754_v14 = vld [vmem:[%s5743_s4 + $0x80] ss:$16 sps:$4 sm:$0xff]  }
   0x8   :  { %1823 = vmatpush1.bf16.msra.mxu1 %v3743_v7  ;;  %1783 = vmatprep.subr.bf16.mxu0 %v3744_v8  ;;  %v3752_v13 = vld [vmem:[%s5743_s4 + $0x284] ss:$16 sps:$4 sm:$0xff]   ;;  %v3755_v15 = vld [vmem:[%s5743_s4 + $0x280] ss:$16 sps:$4 sm:$0xff]   ;;  %v101_v7 = vcombine.high %v48_v0, %v48_v0 }
   0x9   :  { %1824 = vmatprep.subr.bf16.mxu1 %v3746_v9  ;;  %v3756_v16 = vld [vmem:[%s5743_s4 + $0x64] ss:$16 sps:$4 sm:$0xff]   ;;  %v3760_v18 = vld [vmem:[%s5743_s4 + $0x60] ss:$16 sps:$4 sm:$0xff]   ;;  %v113_v9 = vcombine.high %v52_v1, %v52_v1 }
   0xa   :  { %v3758_v17 = vld [vmem:[%s5743_s4 + $0x264] ss:$16 sps:$4 sm:$0xff]   ;;  %v3761_v19 = vld [vmem:[%s5743_s4 + $0x260] ss:$16 sps:$4 sm:$0xff]  }
   0xb   :  { %1784 = vmatpush1.bf16.msra.mxu0 %v3748_v10  ;;  %v3762_v20 = vld [vmem:[%s5743_s4 + $0x44] ss:$16 sps:$4 sm:$0xff]   ;;  %v3766_v22 = vld [vmem:[%s5743_s4 + $0x40] ss:$16 sps:$4 sm:$0xff]  }
   0xc   :  { %1825 = vmatpush1.bf16.msra.mxu1 %v3749_v11  ;;  %1785 = vmatprep.subr.bf16.mxu0 %v3750_v12  ;;  %v3764_v21 = vld [vmem:[%s5743_s4 + $0x244] ss:$16 sps:$4 sm:$0xff]   ;;  %v3767_v23 = vld [vmem:[%s5743_s4 + $0x240] ss:$16 sps:$4 sm:$0xff]  }
   0xd   :  { %1826 = vmatprep.subr.bf16.mxu1 %v3752_v13  ;;  %v3768_v24 = vld [vmem:[%s5743_s4 + $0x24] ss:$16 sps:$4 sm:$0xff]   ;;  %v3772_v26 = vld [vmem:[%s5743_s4 + $0x20] ss:$16 sps:$4 sm:$0xff]  }
   0xe   :  { %v3770_v25 = vld [vmem:[%s5743_s4 + $0x224] ss:$16 sps:$4 sm:$0xff]   ;;  %v3773_v27 = vld [vmem:[%s5743_s4 + $0x220] ss:$16 sps:$4 sm:$0xff]  }
   0xf   :  { %1786 = vmatpush1.bf16.msra.mxu0 %v3754_v14  ;;  %v3774_v28 = vld [vmem:[%s5743_s4 + $0x4] ss:$16 sps:$4 sm:$0xff]   ;;  %v3778_v30 = vld [vmem:[%s5743_s4] ss:$16 sps:$4 sm:$0xff]  }
  0x10   :  { %1827 = vmatpush1.bf16.msra.mxu1 %v3755_v15  ;;  %1787 = vmatprep.subr.bf16.mxu0 %v3756_v16  ;;  %v3776_v29 = vld [vmem:[%s5743_s4 + $0x204] ss:$16 sps:$4 sm:$0xff]   ;;  %v3779_v31 = vld [vmem:[%s5743_s4 + $0x200] ss:$16 sps:$4 sm:$0xff]  }
  0x11   :  { %1828 = vmatprep.subr.bf16.mxu1 %v3758_v17  ;;  %v3780_v32 = vld [vmem:[%s5743_s4 + $0x1e4] ss:$16 sps:$4 sm:$0xff]   ;;  %v3784_v34 = vld [vmem:[%s5743_s4 + $0x1e0] ss:$16 sps:$4 sm:$0xff]  }
  0x12   :  { %v3782_v33 = vld [vmem:[%s5743_s4 + $0x3e4] ss:$16 sps:$4 sm:$0xff]   ;;  %v3785_v35 = vld [vmem:[%s5743_s4 + $0x3e0] ss:$16 sps:$4 sm:$0xff]  }
  0x13   :  { %1788 = vmatpush1.bf16.msra.mxu0 %v3760_v18  ;;  %v3786_v36 = vld [vmem:[%s5743_s4 + $0x1c4] ss:$16 sps:$4 sm:$0xff]   ;;  %v3790_v39 = vld [vmem:[%s5743_s4 + $0x1c0] ss:$16 sps:$4 sm:$0xff]  }
  0x14   :  { %1829 = vmatpush1.bf16.msra.mxu1 %v3761_v19  ;;  %1789 = vmatprep.subr.bf16.mxu0 %v3762_v20  ;;  %v3788_v37 = vld [vmem:[%s5743_s4 + $0x3c4] ss:$16 sps:$4 sm:$0xff]   ;;  %v3791_v40 = vld [vmem:[%s5743_s4 + $0x3c0] ss:$16 sps:$4 sm:$0xff]  }
  0x15   :  { %1830 = vmatprep.subr.bf16.mxu1 %v3764_v21  ;;  %v3792_v41 = vld [vmem:[%s5743_s4 + $0x1a4] ss:$16 sps:$4 sm:$0xff]   ;;  %v3796_v44 = vld [vmem:[%s5743_s4 + $0x1a0] ss:$16 sps:$4 sm:$0xff]  }
  0x16   :  { %v3794_v42 = vld [vmem:[%s5743_s4 + $0x3a4] ss:$16 sps:$4 sm:$0xff]   ;;  %v3797_v45 = vld [vmem:[%s5743_s4 + $0x3a0] ss:$16 sps:$4 sm:$0xff]  }
  0x17   :  { %1790 = vmatpush1.bf16.msra.mxu0 %v3766_v22  ;;  %v3798_v46 = vld [vmem:[%s5743_s4 + $0x184] ss:$16 sps:$4 sm:$0xff]   ;;  %v3802_v50 = vld [vmem:[%s5743_s4 + $0x180] ss:$16 sps:$4 sm:$0xff]  }
  0x18   :  { %1831 = vmatpush1.bf16.msra.mxu1 %v3767_v23  ;;  %1791 = vmatprep.subr.bf16.mxu0 %v3768_v24  ;;  %v3800_v47 = vld [vmem:[%s5743_s4 + $0x384] ss:$16 sps:$4 sm:$0xff]   ;;  %v3803_v51 = vld [vmem:[%s5743_s4 + $0x380] ss:$16 sps:$4 sm:$0xff]  }
  0x19   :  { %1832 = vmatprep.subr.bf16.mxu1 %v3770_v25  ;;  %v4523_v52 = vld [vmem:[%s5744_s2] sm:$0xff] }
  0x1a   :  { %vm46_vm0 = vcmp.ge.f32.partialorder %v4523_v52, 0.0  ;;  %v47_v54 = vld [vmem:[%s5745_s0] sm:$0xff]  ;;  %v136_v56 = vrot.slane %v4523_v52, %v4509_v48  ;;  %v144_v58 = vrot.slane %v4523_v52, %v4512_v49  ;;  %v132_v2 = vrot.slane %v4523_v52, %v4526_v53 }
  0x1b   :  { %1792 = vmatpush1.bf16.msra.mxu0 %v3772_v26  ;;  %v51_v55 = vld [vmem:[%s5746_s1] sm:$0xff]  ;;  %v4547_v61 = vsel %vm46_vm0, 1, %v4296_v60  ;;  %v100_v62 = vcombine.high %v47_v54, %v47_v54  ;;  %v140_v13 = vrot.slane %v4523_v52, %v4545_v59 }
  0x1c   :  { %1833 = vmatpush1.bf16.msra.mxu1 %v3773_v27  ;;  %1793 = vmatprep.subr.bf16.mxu0 %v3774_v28  ;;  %v4540_v57 = vld [vmem:[%s5747_s3] sm:$0xff]  ;;  %v112_v63 = vcombine.high %v51_v55, %v51_v55  ;;  %v63_v5 = vrot.slane %v4547_v61, %v4509_v48  ;;  %v71_v6 = vrot.slane %v4547_v61, %v4512_v49 }
  0x1d   :  { %1834 = vmatprep.subr.bf16.mxu1 %v3776_v29  ;;  %v3804_v3 = vld [vmem:[%s5743_s4 + $0x164] ss:$16 sps:$4 sm:$0xff]   ;;  %v186_v8 = vrot.slane %v4540_v57, %v4509_v48  ;;  %v194_v10 = vrot.slane %v4540_v57, %v4512_v49  ;;  %v59_v11 = vrot.slane %v4547_v61, %v4526_v53  ;;  %v67_v12 = vrot.slane %v4547_v61, %v4545_v59  ;;  %v3808_v14 = vld [vmem:[%s5743_s4 + $0x160] ss:$16 sps:$4 sm:$0xff]  }
  0x1e   :  { %v3806_v4 = vld [vmem:[%s5743_s4 + $0x364] ss:$16 sps:$4 sm:$0xff]   ;;  %vm89_vm1 = vcmp.eq.s32.totalorder %v63_v5, 1  ;;  %vm91_vm2 = vcmp.eq.s32.totalorder %v71_v6, 1  ;;  %v3809_v15 = vld [vmem:[%s5743_s4 + $0x360] ss:$16 sps:$4 sm:$0xff]   ;;  %v182_v23 = vrot.slane %v4540_v57, %v4526_v53  ;;  %v190_v25 = vrot.slane %v4540_v57, %v4545_v59 }
  0x1f   :  { %1794 = vmatpush1.bf16.msra.mxu0 %v3778_v30  ;;  %v121_v16 = vsel %vm89_vm1, %v100_v62, %v112_v63  ;;  %v123_v17 = vsel %vm91_vm2, %v101_v7, %v113_v9  ;;  %vm88_vm3 = vcmp.eq.s32.totalorder %v59_v11, 1  ;;  %v3810_v18 = vld [vmem:[%s5743_s4 + $0x144] ss:$16 sps:$4 sm:$0xff]   ;;  %vm90_vm4 = vcmp.eq.s32.totalorder %v67_v12, 1  ;;  %v3814_v26 = vld [vmem:[%s5743_s4 + $0x140] ss:$16 sps:$4 sm:$0xff]  }
  0x20   :  { %1835 = vmatpush1.bf16.msra.mxu1 %v3779_v31  ;;  %1795 = vmatprep.subr.bf16.mxu0 %v3780_v32  ;;  %v3812_v19 = vld [vmem:[%s5743_s4 + $0x344] ss:$16 sps:$4 sm:$0xff]   ;;  %v170_v20 = vmul.f32 %v136_v56, %v121_v16  ;;  %v172_v21 = vmul.f32 %v144_v58, %v123_v17  ;;  %v120_v22 = vsel %vm88_vm3, %v47_v54, %v51_v55  ;;  %v3815_v31 = vld [vmem:[%s5743_s4 + $0x340] ss:$16 sps:$4 sm:$0xff]   ;;  %v74_v12 = vsub.s32 4, %v4494_v43 }
  0x21   :  { %1836 = vmatprep.subr.bf16.mxu1 %v3782_v33  ;;  %v122_v24 = vsel %vm90_vm4, %v48_v0, %v52_v1  ;;  %v169_v29 = vmul.f32 %v132_v2, %v120_v22  ;;  %v3816_v32 = vld [vmem:[%s5743_s4 + $0x124] ss:$16 sps:$4 sm:$0xff]   ;;  %v3832_v58 = vld [vmem:[%s5743_s4 + $0x4e0] ss:$16 sps:$4 sm:$0xff]   ;;  %v4703_v17 = vsub.s32 7, %v4494_v43 }
  0x22   :  { %v220_v27 = vadd.f32 %v186_v8, %v170_v20  ;;  %v222_v28 = vadd.f32 %v194_v10, %v172_v21  ;;  %v171_v30 = vmul.f32 %v140_v13, %v122_v24  ;;  %v3818_v33 = vld [vmem:[%s5743_s4 + $0x324] ss:$16 sps:$4 sm:$0xff]   ;;  %v3835_v60 = vld [vmem:[%s5743_s4 + $0x6e0] ss:$16 sps:$4 sm:$0xff]   ;;  %v4691_v13 = vsub.s32 5, %v4494_v43 }
  0x23   :  { %1796 = vmatpush2.bf16.msra.mxu0 %v3784_v34  ;;  %v219_v38 = vadd.f32 %v182_v23, %v169_v29  ;;  %v3837_v54 = vld [vmem:[%s5743_s4 + $0x6e4] ss:$16 sps:$4 sm:$0xff]   ;;  %v3838_v0 = vld [vmem:[%s5743_s4 + $0x4c0] ss:$16 sps:$4 sm:$0xff]   ;;  %v75_v20 = vrot.slane %v4547_v61, %v74_v12  ;;  %v148_v29 = vrot.slane %v4523_v52, %v74_v12 }
  0x24   :  { %1837 = vmatpush2.bf16.msra.mxu1 %v3785_v35  ;;  %1797 = vmatprep.subr.bf16.mxu0 %v3786_v36  ;;  %v228_v34 = vmax.f32 %v220_v27, 0.0  ;;  %v230_v35 = vmax.f32 %v222_v28, 0.0  ;;  %v3840_v62 = vld [vmem:[%s5743_s4 + $0x4c4] ss:$16 sps:$4 sm:$0xff]   ;;  %v3841_v1 = vld [vmem:[%s5743_s4 + $0x6c0] ss:$16 sps:$4 sm:$0xff]   ;;  %v79_v21 = vrot.slane %v4547_v61, %v4691_v13 }
  0x25   :  { %1838 = vmatprep.subr.bf16.mxu1 %v3788_v37  ;;  %v3843_v63 = vld [vmem:[%s5743_s4 + $0x6c4] ss:$16 sps:$4 sm:$0xff]   ;;  %v3847_v5 = vld [vmem:[%s5743_s4 + $0x6a0] ss:$16 sps:$4 sm:$0xff]   ;;  %vm4730_vm5 = vcmp.eq.s32.totalorder %v75_v20, 1 }
  0x26   :  { %v4605_v36 = vpack.c.bf16 %v228_v34, %v228_v34  ;;  %v4607_v37 = vpack.c.bf16 %v230_v35, %v230_v35  ;;  %v3846_v2 = vld [vmem:[%s5743_s4 + $0x4a4] ss:$16 sps:$4 sm:$0xff]   ;;  %v3850_v8 = vld [vmem:[%s5743_s4 + $0x480] ss:$16 sps:$4 sm:$0xff]   ;;  %vm4738_vm6 = vcmp.eq.s32.totalorder %v79_v21, 1 }
  0x27   :  { %1798 = vmatpush2.bf16.msra.mxu0 %v3790_v39  ;;  %v221_v39 = vadd.f32 %v190_v25, %v171_v30  ;;  %v3852_v6 = vld [vmem:[%s5743_s4 + $0x484] ss:$16 sps:$4 sm:$0xff]   ;;  %v3853_v9 = vld [vmem:[%s5743_s4 + $0x680] ss:$16 sps:$4 sm:$0xff]   ;;  %v87_v25 = vrot.slane %v4547_v61, %v4703_v17 }
  0x28   :  { %1839 = vmatpush2.bf16.msra.mxu1 %v3791_v40  ;;  %1799 = vmatprep.subr.bf16.mxu0 %v3792_v41  ;;  %v3820_v40 = vld [vmem:[%s5743_s4 + $0x120] ss:$16 sps:$4 sm:$0xff]   ;;  %v3855_v7 = vld [vmem:[%s5743_s4 + $0x684] ss:$16 sps:$4 sm:$0xff]  }
  0x29   :  { %1840 = vmatprep.subr.bf16.mxu1 %v3794_v42  ;;  %v3821_v41 = vld [vmem:[%s5743_s4 + $0x320] ss:$16 sps:$4 sm:$0xff]   ;;  %v3822_v42 = vld [vmem:[%s5743_s4 + $0x104] ss:$16 sps:$4 sm:$0xff]   ;;  %1811 = vmatprep.mubr.bf16.mxu0 %v4605_v36  ;;  %vm95_vm8 = vcmp.eq.s32.totalorder %v87_v25, 1 }
  0x2a   :  { %1852 = vmatprep.mubr.bf16.mxu1 %v4607_v37  ;;  %v3858_v10 = vld [vmem:[%s5743_s4 + $0x464] ss:$16 sps:$4 sm:$0xff]   ;;  %v3859_v16 = vld [vmem:[%s5743_s4 + $0x660] ss:$16 sps:$4 sm:$0xff]  }
  0x2b   :  { %1800 = vmatpush2.bf16.msra.mxu0 %v3796_v44  ;;  %v3824_v44 = vld [vmem:[%s5743_s4 + $0x304] ss:$16 sps:$4 sm:$0xff]   ;;  %v3862_v23 = vld [vmem:[%s5743_s4 + $0x440] ss:$16 sps:$4 sm:$0xff]  }
  0x2c   :  { %1841 = vmatpush2.bf16.msra.mxu1 %v3797_v45  ;;  %1801 = vmatprep.subr.bf16.mxu0 %v3798_v46  ;;  %v227_v45 = vmax.f32 %v219_v38, 0.0  ;;  %v229_v46 = vmax.f32 %v221_v39, 0.0  ;;  %v3861_v11 = vld [vmem:[%s5743_s4 + $0x664] ss:$16 sps:$4 sm:$0xff]   ;;  %v3865_v24 = vld [vmem:[%s5743_s4 + $0x640] ss:$16 sps:$4 sm:$0xff]   ;;  %v198_v39 = vrot.slane %v4540_v57, %v74_v12 }
  0x2d   :  { %1842 = vmatprep.subr.bf16.mxu1 %v3800_v47  ;;  %v3826_v47 = vld [vmem:[%s5743_s4 + $0x100] ss:$16 sps:$4 sm:$0xff]   ;;  %v3873_v27 = vld [vmem:[%s5743_s4 + $0x624] ss:$16 sps:$4 sm:$0xff]  }
  0x2e   :  { %v4635_v55 = vpack.c.bf16 %v227_v45, %v227_v45  ;;  %v4637_v56 = vpack.c.bf16 %v229_v46, %v229_v46  ;;  %v3871_v34 = vld [vmem:[%s5743_s4 + $0x620] ss:$16 sps:$4 sm:$0xff]   ;;  %v50_v46 = vld [vmem:[%s5745_s0 + $0x18] sm:$0xff]  ;;  %v3909_v30 = vld [vmem:[%s5743_s4 + $0x764] ss:$16 sps:$4 sm:$0xff]  }
  0x2f   :  { %1802 = vmatpush2.bf16.msra.mxu0 %v3802_v50  ;;  %v3827_v50 = vld [vmem:[%s5743_s4 + $0x300] ss:$16 sps:$4 sm:$0xff]  }
  0x30   :  { %1843 = vmatpush2.bf16.msra.mxu1 %v3803_v51  ;;  %1803 = vmatprep.subr.bf16.mxu0 %v3804_v3  ;;  %v3834_v51 = vld [vmem:[%s5743_s4 + $0x4e4] ss:$16 sps:$4 sm:$0xff]   ;;  %v3886_v20 = vld [vmem:[%s5743_s4 + $0x5c0] ss:$16 sps:$4 sm:$0xff]  }
  0x31   :  { %1844 = vmatprep.subr.bf16.mxu1 %v3806_v4  ;;  %v3849_v3 = vld [vmem:[%s5743_s4 + $0x6a4] ss:$16 sps:$4 sm:$0xff]   ;;  %v3844_v4 = vld [vmem:[%s5743_s4 + $0x4a0] ss:$16 sps:$4 sm:$0xff]  }
  0x32   :  { %v49_v35 = vld [vmem:[%s5745_s0 + $0x10] sm:$0xff] }
  0x33   :  { %1804 = vmatpush2.bf16.msra.mxu0 %v3808_v14  ;;  %v4694_v14 = vsub.s32 6, %v4494_v43  ;;  %v53_v38 = vld [vmem:[%s5746_s1 + $0x10] sm:$0xff] }
  0x34   :  { %1845 = vmatpush2.bf16.msra.mxu1 %v3809_v15  ;;  %1805 = vmatprep.subr.bf16.mxu0 %v3810_v18  ;;  %v3856_v15 = vld [vmem:[%s5743_s4 + $0x460] ss:$16 sps:$4 sm:$0xff]   ;;  %v3864_v18 = vld [vmem:[%s5743_s4 + $0x444] ss:$16 sps:$4 sm:$0xff]   ;;  %v114_v45 = vcombine.high %v53_v38, %v53_v38 }
  0x35   :  { %1846 = vmatprep.subr.bf16.mxu1 %v3812_v19  ;;  %v3867_v19 = vld [vmem:[%s5743_s4 + $0x644] ss:$16 sps:$4 sm:$0xff]   ;;  %v83_v22 = vrot.slane %v4547_v61, %v4694_v14  ;;  %v3868_v61 = vld [vmem:[%s5743_s4 + $0x420] ss:$16 sps:$4 sm:$0xff]  }
  0x36   :  { %v3889_v21 = vld [vmem:[%s5743_s4 + $0x7c0] ss:$16 sps:$4 sm:$0xff]  }
  0x37   :  { %1806 = vmatpush2.bf16.msra.mxu0 %v3814_v26  ;;  %v3870_v26 = vld [vmem:[%s5743_s4 + $0x424] ss:$16 sps:$4 sm:$0xff]   ;;  %vm4758_vm7 = vcmp.eq.s32.totalorder %v83_v22, 1  ;;  %v3895_v25 = vld [vmem:[%s5743_s4 + $0x7a0] ss:$16 sps:$4 sm:$0xff]  }
  0x38   :  { %1847 = vmatpush2.bf16.msra.mxu1 %v3815_v31  ;;  %1807 = vmatprep.subr.bf16.mxu0 %v3816_v32  ;;  %v152_v31 = vrot.slane %v4523_v52, %v4691_v13  ;;  %v202_v32 = vrot.slane %v4540_v57, %v4691_v13  ;;  %v3880_v13 = vld [vmem:[%s5743_s4 + $0x5e0] ss:$16 sps:$4 sm:$0xff]   ;;  %v3894_v22 = vld [vmem:[%s5743_s4 + $0x5a4] ss:$16 sps:$4 sm:$0xff]  }
  0x39   :  { %1848 = vmatprep.subr.bf16.mxu1 %v3818_v33  ;;  %v160_v33 = vrot.slane %v4523_v52, %v4703_v17  ;;  %v3898_v28 = vld [vmem:[%s5743_s4 + $0x580] ss:$16 sps:$4 sm:$0xff]  }
  0x3b   :  { %1808 = vmatpush2.bf16.msra.mxu0 %v3820_v40  ;;  %v3921_v40 = vld [vmem:[%s5743_s4 + $0x724] ss:$16 sps:$4 sm:$0xff]  }
  0x3c   :  { %1849 = vmatpush2.bf16.msra.mxu1 %v3821_v41  ;;  %1809 = vmatprep.subr.bf16.mxu0 %v3822_v42  ;;  %v156_v41 = vrot.slane %v4523_v52, %v4694_v14  ;;  %v206_v42 = vrot.slane %v4540_v57, %v4694_v14  ;;  %v3876_v52 = vld [vmem:[%s5743_s4 + $0x404] ss:$16 sps:$4 sm:$0xff]   ;;  %v3883_v14 = vld [vmem:[%s5743_s4 + $0x7e0] ss:$16 sps:$4 sm:$0xff]  }
  0x3d   :  { %1850 = vmatprep.subr.bf16.mxu1 %v3824_v44  ;;  %v102_v44 = vcombine.high %v49_v35, %v49_v35 }
  0x3f   :  { %1810 = vmatpush2.bf16.msra.mxu0 %v3826_v47  ;;  %v54_v47 = vld [vmem:[%s5746_s1 + $0x18] sm:$0xff] }
  0x40   :  { %1851 = vmatpush2.bf16.msra.mxu1 %v3827_v50  ;;  %1861 = vmatprep.subr.bf16.mxu0 %v3834_v51  ;;  %v124_v50 = vsel %vm4730_vm5, %v49_v35, %v53_v38  ;;  %v3879_v51 = vld [vmem:[%s5743_s4 + $0x604] ss:$16 sps:$4 sm:$0xff]   ;;  %v3910_v35 = vld [vmem:[%s5743_s4 + $0x540] ss:$16 sps:$4 sm:$0xff]  }
  0x41   :  { %1902 = vmatprep.subr.bf16.mxu1 %v3837_v54  ;;  %v103_v54 = vcombine.high %v50_v46, %v50_v46  ;;  %v3913_v38 = vld [vmem:[%s5743_s4 + $0x740] ss:$16 sps:$4 sm:$0xff]  }
  0x42   :  { %1812 = vmatmul.mubr.bf16.vlgmr.msra.gmra.mxu0 %v4635_v55 }
  0x43   :  { %1853 = vmatmul.mubr.bf16.vlgmr.msra.gmra.mxu1 %v4637_v56  ;;  %1862 = vmatpush1.bf16.msra.mxu0 %v3832_v58  ;;  %v115_v58 = vcombine.high %v54_v47, %v54_v47 }
  0x44   :  { %1903 = vmatpush1.bf16.msra.mxu1 %v3835_v60  ;;  %1863 = vmatprep.subr.bf16.mxu0 %v3840_v62  ;;  %v173_v60 = vmul.f32 %v148_v29, %v124_v50  ;;  %v125_v62 = vsel %vm4738_vm6, %v102_v44, %v114_v45  ;;  %v3901_v29 = vld [vmem:[%s5743_s4 + $0x780] ss:$16 sps:$4 sm:$0xff]   ;;  %v3924_v44 = vld [vmem:[%s5743_s4 + $0x504] ss:$16 sps:$4 sm:$0xff]  }
  0x45   :  { %1904 = vmatprep.subr.bf16.mxu1 %v3843_v63  ;;  %v210_v63 = vrot.slane %v4540_v57, %v4703_v17  ;;  %v3882_v57 = vld [vmem:[%s5743_s4 + $0x5e4] ss:$16 sps:$4 sm:$0xff]   ;;  %v3922_v50 = vld [vmem:[%s5743_s4 + $0x500] ss:$16 sps:$4 sm:$0xff]  }
  0x46   :  { %v3891_v17 = vld [vmem:[%s5743_s4 + $0x7c4] ss:$16 sps:$4 sm:$0xff]  }
  0x47   :  { %1864 = vmatpush1.bf16.msra.mxu0 %v3838_v0  ;;  %v126_v0 = vsel %vm4758_vm7, %v50_v46, %v54_v47  ;;  %v3927_v45 = vld [vmem:[%s5743_s4 + $0x704] ss:$16 sps:$4 sm:$0xff]  }
  0x48   :  { %1905 = vmatpush1.bf16.msra.mxu1 %v3841_v1  ;;  %1865 = vmatprep.subr.bf16.mxu0 %v3846_v2  ;;  %v174_v1 = vmul.f32 %v152_v31, %v125_v62  ;;  %v127_v2 = vsel %vm95_vm8, %v103_v54, %v115_v58  ;;  %v3904_v31 = vld [vmem:[%s5743_s4 + $0x560] ss:$16 sps:$4 sm:$0xff]   ;;  %v3937_v54 = vld [vmem:[%s5743_s4 + $0x2ec] ss:$16 sps:$4 sm:$0xff]   ;;  %v3932_v62 = vld [vmem:[%s5743_s4 + $0xe8] ss:$16 sps:$4 sm:$0xff]  }
  0x49   :  { %1906 = vmatprep.subr.bf16.mxu1 %v3849_v3  ;;  %v4786_v3 = vadd.f32 %v198_v39, %v173_v60  ;;  %v3918_v39 = vld [vmem:[%s5743_s4 + $0x524] ss:$16 sps:$4 sm:$0xff]  }
  0x4b   :  { %1866 = vmatpush1.bf16.msra.mxu0 %v3844_v4  ;;  %v175_v4 = vmul.f32 %v156_v41, %v126_v0  ;;  %v3916_v41 = vld [vmem:[%s5743_s4 + $0x520] ss:$16 sps:$4 sm:$0xff]   ;;  %v231_v46 = vmax.f32 %v4786_v3, 0.0  ;;  %v3940_v0 = vld [vmem:[%s5743_s4 + $0xcc] ss:$16 sps:$4 sm:$0xff]  }
  0x4c   :  { %1907 = vmatpush1.bf16.msra.mxu1 %v3847_v5  ;;  %1867 = vmatprep.subr.bf16.mxu0 %v3852_v6  ;;  %v3874_v5 = vld [vmem:[%s5743_s4 + $0x400] ss:$16 sps:$4 sm:$0xff]   ;;  %v3941_v3 = vld [vmem:[%s5743_s4 + $0x2c8] ss:$16 sps:$4 sm:$0xff]  }
  0x4d   :  { %1908 = vmatprep.subr.bf16.mxu1 %v3855_v7  ;;  %v3877_v6 = vld [vmem:[%s5743_s4 + $0x600] ss:$16 sps:$4 sm:$0xff]   ;;  %v176_v7 = vmul.f32 %v160_v33, %v127_v2  ;;  %v3912_v33 = vld [vmem:[%s5743_s4 + $0x544] ss:$16 sps:$4 sm:$0xff]   ;;  %v4906_v58 = vpack.c.bf16 %v231_v46, %v231_v46  ;;  %v3938_v2 = vld [vmem:[%s5743_s4 + $0xc8] ss:$16 sps:$4 sm:$0xff]  }
  0x4e   :  { %v4009_v46 = vld [vmem:[%s5743_s4 + $0x36c] ss:$16 sps:$4 sm:$0xff]  }
  0x4f   :  { %1868 = vmatpush1.bf16.msra.mxu0 %v3850_v8  ;;  %v3885_v8 = vld [vmem:[%s5743_s4 + $0x7e4] ss:$16 sps:$4 sm:$0xff]  }
  0x50   :  { %1909 = vmatpush1.bf16.msra.mxu1 %v3853_v9  ;;  %1869 = vmatprep.subr.bf16.mxu0 %v3858_v10  ;;  %v224_v9 = vadd.f32 %v202_v32, %v174_v1  ;;  %v4800_v10 = vadd.f32 %v206_v42, %v175_v4  ;;  %v3907_v32 = vld [vmem:[%s5743_s4 + $0x760] ss:$16 sps:$4 sm:$0xff]   ;;  %v3943_v1 = vld [vmem:[%s5743_s4 + $0x2cc] ss:$16 sps:$4 sm:$0xff]  }
  0x51   :  { %1910 = vmatprep.subr.bf16.mxu1 %v3861_v11  ;;  %v226_v11 = vadd.f32 %v210_v63, %v176_v7  ;;  %v3919_v42 = vld [vmem:[%s5743_s4 + $0x720] ss:$16 sps:$4 sm:$0xff]   ;;  %v3935_v63 = vld [vmem:[%s5743_s4 + $0x2e8] ss:$16 sps:$4 sm:$0xff]   ;;  %v3946_v4 = vld [vmem:[%s5743_s4 + $0xac] ss:$16 sps:$4 sm:$0xff]  }
  0x52   :  { %v232_v12 = vmax.f32 %v224_v9, 0.0  ;;  %v233_v47 = vmax.f32 %v4800_v10, 0.0  ;;  %v3947_v7 = vld [vmem:[%s5743_s4 + $0x2a8] ss:$16 sps:$4 sm:$0xff]   ;;  %v3958_v9 = vld [vmem:[%s5743_s4 + $0x6c] ss:$16 sps:$4 sm:$0xff]  }
  0x53   :  { %1870 = vmatpush1.bf16.msra.mxu0 %v3856_v15  ;;  %v234_v15 = vmax.f32 %v226_v11, 0.0  ;;  %v3961_v10 = vld [vmem:[%s5743_s4 + $0x26c] ss:$16 sps:$4 sm:$0xff]   ;;  %v3956_v11 = vld [vmem:[%s5743_s4 + $0x68] ss:$16 sps:$4 sm:$0xff]  }
  0x54   :  { %1911 = vmatpush1.bf16.msra.mxu1 %v3859_v16  ;;  %1871 = vmatprep.subr.bf16.mxu0 %v3864_v18  ;;  %v3888_v16 = vld [vmem:[%s5743_s4 + $0x5c4] ss:$16 sps:$4 sm:$0xff]   ;;  %v4814_v18 = vpack.c.bf16 %v232_v12, %v232_v12  ;;  %v4908_v60 = vpack.c.bf16 %v233_v47, %v233_v47  ;;  %v3959_v12 = vld [vmem:[%s5743_s4 + $0x268] ss:$16 sps:$4 sm:$0xff]  }
  0x55   :  { %1912 = vmatprep.subr.bf16.mxu1 %v3867_v19  ;;  %v4816_v19 = vpack.c.bf16 %v234_v15, %v234_v15  ;;  %v3962_v15 = vld [vmem:[%s5743_s4 + $0x48] ss:$16 sps:$4 sm:$0xff]  }
  0x56   :  { %1893 = vmatprep.mubr.bf16.mxu0 %v4814_v18  ;;  %v4004_v47 = vld [vmem:[%s5743_s4 + $0x168] ss:$16 sps:$4 sm:$0xff]  }
  0x57   :  { %1872 = vmatpush1.bf16.msra.mxu0 %v3862_v23  ;;  %v3897_v23 = vld [vmem:[%s5743_s4 + $0x7a4] ss:$16 sps:$4 sm:$0xff]   ;;  %1934 = vmatprep.mubr.bf16.mxu1 %v4816_v19 }
  0x58   :  { %1913 = vmatpush1.bf16.msra.mxu1 %v3865_v24  ;;  %1873 = vmatprep.subr.bf16.mxu0 %v3870_v26  ;;  %v3892_v24 = vld [vmem:[%s5743_s4 + $0x5a0] ss:$16 sps:$4 sm:$0xff]   ;;  %v3900_v26 = vld [vmem:[%s5743_s4 + $0x584] ss:$16 sps:$4 sm:$0xff]  }
  0x59   :  { %1914 = vmatprep.subr.bf16.mxu1 %v3873_v27  ;;  %v3903_v27 = vld [vmem:[%s5743_s4 + $0x784] ss:$16 sps:$4 sm:$0xff]  }
  0x5b   :  { %1874 = vmatpush1.bf16.msra.mxu0 %v3868_v61  ;;  %v3906_v61 = vld [vmem:[%s5743_s4 + $0x564] ss:$16 sps:$4 sm:$0xff]  }
  0x5c   :  { %1915 = vmatpush1.bf16.msra.mxu1 %v3871_v34  ;;  %1875 = vmatprep.subr.bf16.mxu0 %v3876_v52  ;;  %v3915_v34 = vld [vmem:[%s5743_s4 + $0x744] ss:$16 sps:$4 sm:$0xff]   ;;  %v3925_v52 = vld [vmem:[%s5743_s4 + $0x700] ss:$16 sps:$4 sm:$0xff]  }
  0x5d   :  { %1916 = vmatprep.subr.bf16.mxu1 %v3879_v51  ;;  %v3934_v51 = vld [vmem:[%s5743_s4 + $0xec] ss:$16 sps:$4 sm:$0xff]  }
  0x5f   :  { %1876 = vmatpush1.bf16.msra.mxu0 %v3874_v5  ;;  %v3949_v5 = vld [vmem:[%s5743_s4 + $0x2ac] ss:$16 sps:$4 sm:$0xff]  }
  0x60   :  { %1917 = vmatpush1.bf16.msra.mxu1 %v3877_v6  ;;  %1877 = vmatprep.subr.bf16.mxu0 %v3882_v57  ;;  %v3944_v6 = vld [vmem:[%s5743_s4 + $0xa8] ss:$16 sps:$4 sm:$0xff]   ;;  %v3952_v57 = vld [vmem:[%s5743_s4 + $0x8c] ss:$16 sps:$4 sm:$0xff]  }
  0x61   :  { %1918 = vmatprep.subr.bf16.mxu1 %v3885_v8  ;;  %v3953_v8 = vld [vmem:[%s5743_s4 + $0x288] ss:$16 sps:$4 sm:$0xff]  }
  0x63   :  { %1878 = vmatpush2.bf16.msra.mxu0 %v3880_v13  ;;  %v3964_v13 = vld [vmem:[%s5743_s4 + $0x4c] ss:$16 sps:$4 sm:$0xff]  }
  0x64   :  { %1919 = vmatpush2.bf16.msra.mxu1 %v3883_v14  ;;  %1879 = vmatprep.subr.bf16.mxu0 %v3888_v16  ;;  %v3967_v14 = vld [vmem:[%s5743_s4 + $0x24c] ss:$16 sps:$4 sm:$0xff]   ;;  %v3965_v16 = vld [vmem:[%s5743_s4 + $0x248] ss:$16 sps:$4 sm:$0xff]  }
  0x65   :  { %1920 = vmatprep.subr.bf16.mxu1 %v3891_v17  ;;  %v3970_v17 = vld [vmem:[%s5743_s4 + $0x2c] ss:$16 sps:$4 sm:$0xff]  }
  0x67   :  { %1880 = vmatpush2.bf16.msra.mxu0 %v3886_v20  ;;  %v3973_v20 = vld [vmem:[%s5743_s4 + $0x22c] ss:$16 sps:$4 sm:$0xff]  }
  0x68   :  { %1921 = vmatpush2.bf16.msra.mxu1 %v3889_v21  ;;  %1881 = vmatprep.subr.bf16.mxu0 %v3894_v22  ;;  %v3968_v21 = vld [vmem:[%s5743_s4 + $0x28] ss:$16 sps:$4 sm:$0xff]  }
  0x69   :  { %1922 = vmatprep.subr.bf16.mxu1 %v3897_v23  ;;  %v3971_v22 = vld [vmem:[%s5743_s4 + $0x228] ss:$16 sps:$4 sm:$0xff]   ;;  %v3976_v23 = vld [vmem:[%s5743_s4 + $0xc] ss:$16 sps:$4 sm:$0xff]  }
  0x6b   :  { %1882 = vmatpush2.bf16.msra.mxu0 %v3892_v24  ;;  %v3979_v24 = vld [vmem:[%s5743_s4 + $0x20c] ss:$16 sps:$4 sm:$0xff]  }
  0x6c   :  { %1923 = vmatpush2.bf16.msra.mxu1 %v3895_v25  ;;  %1883 = vmatprep.subr.bf16.mxu0 %v3900_v26  ;;  %v3974_v25 = vld [vmem:[%s5743_s4 + $0x8] ss:$16 sps:$4 sm:$0xff]  }
  0x6d   :  { %1924 = vmatprep.subr.bf16.mxu1 %v3903_v27  ;;  %v3977_v26 = vld [vmem:[%s5743_s4 + $0x208] ss:$16 sps:$4 sm:$0xff]   ;;  %v3982_v27 = vld [vmem:[%s5743_s4 + $0x1ec] ss:$16 sps:$4 sm:$0xff]  }
  0x6f   :  { %1884 = vmatpush2.bf16.msra.mxu0 %v3898_v28  ;;  %v3985_v28 = vld [vmem:[%s5743_s4 + $0x3ec] ss:$16 sps:$4 sm:$0xff]  }
  0x70   :  { %1925 = vmatpush2.bf16.msra.mxu1 %v3901_v29  ;;  %1885 = vmatprep.subr.bf16.mxu0 %v3906_v61  ;;  %v3980_v29 = vld [vmem:[%s5743_s4 + $0x1e8] ss:$16 sps:$4 sm:$0xff]  }
  0x71   :  { %1926 = vmatprep.subr.bf16.mxu1 %v3909_v30  ;;  %v3983_v61 = vld [vmem:[%s5743_s4 + $0x3e8] ss:$16 sps:$4 sm:$0xff]   ;;  %v3988_v30 = vld [vmem:[%s5743_s4 + $0x1cc] ss:$16 sps:$4 sm:$0xff]  }
  0x73   :  { %1886 = vmatpush2.bf16.msra.mxu0 %v3904_v31  ;;  %v3991_v31 = vld [vmem:[%s5743_s4 + $0x3cc] ss:$16 sps:$4 sm:$0xff]  }
  0x74   :  { %1927 = vmatpush2.bf16.msra.mxu1 %v3907_v32  ;;  %1887 = vmatprep.subr.bf16.mxu0 %v3912_v33  ;;  %v3986_v32 = vld [vmem:[%s5743_s4 + $0x1c8] ss:$16 sps:$4 sm:$0xff]  }
  0x75   :  { %1928 = vmatprep.subr.bf16.mxu1 %v3915_v34  ;;  %v3989_v33 = vld [vmem:[%s5743_s4 + $0x3c8] ss:$16 sps:$4 sm:$0xff]   ;;  %v3994_v34 = vld [vmem:[%s5743_s4 + $0x1ac] ss:$16 sps:$4 sm:$0xff]  }
  0x77   :  { %1888 = vmatpush2.bf16.msra.mxu0 %v3910_v35  ;;  %v3997_v35 = vld [vmem:[%s5743_s4 + $0x3ac] ss:$16 sps:$4 sm:$0xff]  }
  0x78   :  { %1929 = vmatpush2.bf16.msra.mxu1 %v3913_v38  ;;  %1889 = vmatprep.subr.bf16.mxu0 %v3918_v39  ;;  %v3992_v38 = vld [vmem:[%s5743_s4 + $0x1a8] ss:$16 sps:$4 sm:$0xff]  }
  0x79   :  { %1930 = vmatprep.subr.bf16.mxu1 %v3921_v40  ;;  %v3995_v39 = vld [vmem:[%s5743_s4 + $0x3a8] ss:$16 sps:$4 sm:$0xff]   ;;  %v4000_v40 = vld [vmem:[%s5743_s4 + $0x18c] ss:$16 sps:$4 sm:$0xff]  }
  0x7b   :  { %1890 = vmatpush2.bf16.msra.mxu0 %v3916_v41  ;;  %v4003_v41 = vld [vmem:[%s5743_s4 + $0x38c] ss:$16 sps:$4 sm:$0xff]  }
  0x7c   :  { %1931 = vmatpush2.bf16.msra.mxu1 %v3919_v42  ;;  %1891 = vmatprep.subr.bf16.mxu0 %v3924_v44  ;;  %v3998_v42 = vld [vmem:[%s5743_s4 + $0x188] ss:$16 sps:$4 sm:$0xff]  }
  0x7d   :  { %1932 = vmatprep.subr.bf16.mxu1 %v3927_v45  ;;  %v4001_v44 = vld [vmem:[%s5743_s4 + $0x388] ss:$16 sps:$4 sm:$0xff]   ;;  %v4006_v45 = vld [vmem:[%s5743_s4 + $0x16c] ss:$16 sps:$4 sm:$0xff]  }
  0x7f   :  { %1892 = vmatpush2.bf16.msra.mxu0 %v3922_v50  ;;  %v4007_v50 = vld [vmem:[%s5743_s4 + $0x368] ss:$16 sps:$4 sm:$0xff]  }
  0x80   :  { %1933 = vmatpush2.bf16.msra.mxu1 %v3925_v52  ;;  %1943 = vmatprep.subr.bf16.mxu0 %v3934_v51  ;;  %v4012_v52 = vld [vmem:[%s5743_s4 + $0x14c] ss:$16 sps:$4 sm:$0xff]  }
  0x81   :  { %1984 = vmatprep.subr.bf16.mxu1 %v3937_v54  ;;  %v4015_v51 = vld [vmem:[%s5743_s4 + $0x34c] ss:$16 sps:$4 sm:$0xff]   ;;  %v4010_v54 = vld [vmem:[%s5743_s4 + $0x148] ss:$16 sps:$4 sm:$0xff]  }
  0x82   :  { %1894 = vmatmul.mubr.bf16.vlgmr.msra.gmra.mxu0 %v4906_v58 }
  0x83   :  { %1935 = vmatmul.mubr.bf16.vlgmr.msra.gmra.mxu1 %v4908_v60  ;;  %1944 = vmatpush1.bf16.msra.mxu0 %v3932_v62  ;;  %v4013_v62 = vld [vmem:[%s5743_s4 + $0x348] ss:$16 sps:$4 sm:$0xff]  }
  0x84   :  { %1985 = vmatpush1.bf16.msra.mxu1 %v3935_v63  ;;  %1945 = vmatprep.subr.bf16.mxu0 %v3940_v0  ;;  %v4018_v63 = vld [vmem:[%s5743_s4 + $0x12c] ss:$16 sps:$4 sm:$0xff]  }
  0x85   :  { %1986 = vmatprep.subr.bf16.mxu1 %v3943_v1  ;;  %1975 = vmatprep.mubr.bf16.mxu0 %v4605_v36  ;;  %v3955_v36 = vld [vmem:[%s5743_s4 + $0x28c] ss:$16 sps:$4 sm:$0xff]   ;;  %v4016_v1 = vld [vmem:[%s5743_s4 + $0x128] ss:$16 sps:$4 sm:$0xff]  }
  0x86   :  { %2016 = vmatprep.mubr.bf16.mxu1 %v4607_v37  ;;  %v3950_v37 = vld [vmem:[%s5743_s4 + $0x88] ss:$16 sps:$4 sm:$0xff]   ;;  %v4021_v0 = vld [vmem:[%s5743_s4 + $0x32c] ss:$16 sps:$4 sm:$0xff]  }
  0x87   :  { %1946 = vmatpush1.bf16.msra.mxu0 %v3938_v2  ;;  %v4019_v2 = vld [vmem:[%s5743_s4 + $0x328] ss:$16 sps:$4 sm:$0xff]  }
  0x88   :  { %1987 = vmatpush1.bf16.msra.mxu1 %v3941_v3  ;;  %1947 = vmatprep.subr.bf16.mxu0 %v3946_v4  ;;  %v4024_v3 = vld [vmem:[%s5743_s4 + $0x10c] ss:$16 sps:$4 sm:$0xff]  }
  0x89   :  { %1988 = vmatprep.subr.bf16.mxu1 %v3949_v5  ;;  %v4027_v4 = vld [vmem:[%s5743_s4 + $0x30c] ss:$16 sps:$4 sm:$0xff]   ;;  %v4022_v5 = vld [vmem:[%s5743_s4 + $0x108] ss:$16 sps:$4 sm:$0xff]  }
  0x8b   :  { %1948 = vmatpush1.bf16.msra.mxu0 %v3944_v6  ;;  %v4025_v6 = vld [vmem:[%s5743_s4 + $0x308] ss:$16 sps:$4 sm:$0xff]  }
  0x8c   :  { %1989 = vmatpush1.bf16.msra.mxu1 %v3947_v7  ;;  %1949 = vmatprep.subr.bf16.mxu0 %v3952_v57  ;;  %v4030_v7 = vld [vmem:[%s5743_s4 + $0x4ec] ss:$16 sps:$4 sm:$0xff]  }
  0x8d   :  { %1990 = vmatprep.subr.bf16.mxu1 %v3955_v36  ;;  %v4033_v57 = vld [vmem:[%s5743_s4 + $0x6ec] ss:$16 sps:$4 sm:$0xff]   ;;  %v4028_v36 = vld [vmem:[%s5743_s4 + $0x4e8] ss:$16 sps:$4 sm:$0xff]  }
  0x8f   :  { %1950 = vmatpush1.bf16.msra.mxu0 %v3950_v37  ;;  %v4031_v37 = vld [vmem:[%s5743_s4 + $0x6e8] ss:$16 sps:$4 sm:$0xff]  }
  0x90   :  { %1991 = vmatpush1.bf16.msra.mxu1 %v3953_v8  ;;  %1951 = vmatprep.subr.bf16.mxu0 %v3958_v9  ;;  %v4036_v8 = vld [vmem:[%s5743_s4 + $0x4cc] ss:$16 sps:$4 sm:$0xff]  }
  0x91   :  { %1992 = vmatprep.subr.bf16.mxu1 %v3961_v10  ;;  %v4039_v9 = vld [vmem:[%s5743_s4 + $0x6cc] ss:$16 sps:$4 sm:$0xff]   ;;  %v4034_v10 = vld [vmem:[%s5743_s4 + $0x4c8] ss:$16 sps:$4 sm:$0xff]  }
  0x93   :  { %1952 = vmatpush1.bf16.msra.mxu0 %v3956_v11  ;;  %v4037_v11 = vld [vmem:[%s5743_s4 + $0x6c8] ss:$16 sps:$4 sm:$0xff]  }
  0x94   :  { %1993 = vmatpush1.bf16.msra.mxu1 %v3959_v12  ;;  %1953 = vmatprep.subr.bf16.mxu0 %v3964_v13  ;;  %v4042_v12 = vld [vmem:[%s5743_s4 + $0x4ac] ss:$16 sps:$4 sm:$0xff]   ;;  %v4043_v13 = vld [vmem:[%s5743_s4 + $0x6a8] ss:$16 sps:$4 sm:$0xff]  }
  0x95   :  { %1994 = vmatprep.subr.bf16.mxu1 %v3967_v14  ;;  %v4048_v14 = vld [vmem:[%s5743_s4 + $0x48c] ss:$16 sps:$4 sm:$0xff]  }
  0x97   :  { %1954 = vmatpush1.bf16.msra.mxu0 %v3962_v15  ;;  %v4049_v15 = vld [vmem:[%s5743_s4 + $0x688] ss:$16 sps:$4 sm:$0xff]  }
  0x98   :  { %1995 = vmatpush1.bf16.msra.mxu1 %v3965_v16  ;;  %1955 = vmatprep.subr.bf16.mxu0 %v3970_v17  ;;  %v4054_v16 = vld [vmem:[%s5743_s4 + $0x46c] ss:$16 sps:$4 sm:$0xff]  }
  0x99   :  { %1996 = vmatprep.subr.bf16.mxu1 %v3973_v20  ;;  %v4057_v17 = vld [vmem:[%s5743_s4 + $0x66c] ss:$16 sps:$4 sm:$0xff]   ;;  %v4052_v20 = vld [vmem:[%s5743_s4 + $0x468] ss:$16 sps:$4 sm:$0xff]  }
  0x9b   :  { %1956 = vmatpush1.bf16.msra.mxu0 %v3968_v21  ;;  %v4055_v21 = vld [vmem:[%s5743_s4 + $0x668] ss:$16 sps:$4 sm:$0xff]  }
  0x9c   :  { %1997 = vmatpush1.bf16.msra.mxu1 %v3971_v22  ;;  %1957 = vmatprep.subr.bf16.mxu0 %v3976_v23  ;;  %v4060_v22 = vld [vmem:[%s5743_s4 + $0x44c] ss:$16 sps:$4 sm:$0xff]  }
  0x9d   :  { %1998 = vmatprep.subr.bf16.mxu1 %v3979_v24  ;;  %v4063_v23 = vld [vmem:[%s5743_s4 + $0x64c] ss:$16 sps:$4 sm:$0xff]   ;;  %v4058_v24 = vld [vmem:[%s5743_s4 + $0x448] ss:$16 sps:$4 sm:$0xff]  }
  0x9f   :  { %1958 = vmatpush1.bf16.msra.mxu0 %v3974_v25  ;;  %v4061_v25 = vld [vmem:[%s5743_s4 + $0x648] ss:$16 sps:$4 sm:$0xff]  }
  0xa0   :  { %1999 = vmatpush1.bf16.msra.mxu1 %v3977_v26  ;;  %1959 = vmatprep.subr.bf16.mxu0 %v3982_v27  ;;  %v4066_v26 = vld [vmem:[%s5743_s4 + $0x42c] ss:$16 sps:$4 sm:$0xff]  }
  0xa1   :  { %2000 = vmatprep.subr.bf16.mxu1 %v3985_v28  ;;  %v4069_v27 = vld [vmem:[%s5743_s4 + $0x62c] ss:$16 sps:$4 sm:$0xff]   ;;  %v4064_v28 = vld [vmem:[%s5743_s4 + $0x428] ss:$16 sps:$4 sm:$0xff]  }
  0xa3   :  { %1960 = vmatpush2.bf16.msra.mxu0 %v3980_v29  ;;  %v4067_v29 = vld [vmem:[%s5743_s4 + $0x628] ss:$16 sps:$4 sm:$0xff]  }
  0xa4   :  { %2001 = vmatpush2.bf16.msra.mxu1 %v3983_v61  ;;  %1961 = vmatprep.subr.bf16.mxu0 %v3988_v30  ;;  %v4072_v61 = vld [vmem:[%s5743_s4 + $0x40c] ss:$16 sps:$4 sm:$0xff]  }
  0xa5   :  { %2002 = vmatprep.subr.bf16.mxu1 %v3991_v31  ;;  %v4075_v30 = vld [vmem:[%s5743_s4 + $0x60c] ss:$16 sps:$4 sm:$0xff]   ;;  %v4070_v31 = vld [vmem:[%s5743_s4 + $0x408] ss:$16 sps:$4 sm:$0xff]  }
  0xa7   :  { %1962 = vmatpush2.bf16.msra.mxu0 %v3986_v32  ;;  %v4073_v32 = vld [vmem:[%s5743_s4 + $0x608] ss:$16 sps:$4 sm:$0xff]  }
  0xa8   :  { %2003 = vmatpush2.bf16.msra.mxu1 %v3989_v33  ;;  %1963 = vmatprep.subr.bf16.mxu0 %v3994_v34  ;;  %v4078_v33 = vld [vmem:[%s5743_s4 + $0x5ec] ss:$16 sps:$4 sm:$0xff]  }
  0xa9   :  { %2004 = vmatprep.subr.bf16.mxu1 %v3997_v35  ;;  %v4081_v34 = vld [vmem:[%s5743_s4 + $0x7ec] ss:$16 sps:$4 sm:$0xff]   ;;  %v4076_v35 = vld [vmem:[%s5743_s4 + $0x5e8] ss:$16 sps:$4 sm:$0xff]  }
  0xab   :  { %1964 = vmatpush2.bf16.msra.mxu0 %v3992_v38  ;;  %v4079_v38 = vld [vmem:[%s5743_s4 + $0x7e8] ss:$16 sps:$4 sm:$0xff]  }
  0xac   :  { %2005 = vmatpush2.bf16.msra.mxu1 %v3995_v39  ;;  %1965 = vmatprep.subr.bf16.mxu0 %v4000_v40  ;;  %v4084_v39 = vld [vmem:[%s5743_s4 + $0x5cc] ss:$16 sps:$4 sm:$0xff]  }
  0xad   :  { %2006 = vmatprep.subr.bf16.mxu1 %v4003_v41  ;;  %v4087_v40 = vld [vmem:[%s5743_s4 + $0x7cc] ss:$16 sps:$4 sm:$0xff]   ;;  %v4082_v41 = vld [vmem:[%s5743_s4 + $0x5c8] ss:$16 sps:$4 sm:$0xff]  }
  0xaf   :  { %1966 = vmatpush2.bf16.msra.mxu0 %v3998_v42  ;;  %v4085_v42 = vld [vmem:[%s5743_s4 + $0x7c8] ss:$16 sps:$4 sm:$0xff]  }
  0xb0   :  { %2007 = vmatpush2.bf16.msra.mxu1 %v4001_v44  ;;  %1967 = vmatprep.subr.bf16.mxu0 %v4006_v45  ;;  %v4090_v44 = vld [vmem:[%s5743_s4 + $0x5ac] ss:$16 sps:$4 sm:$0xff]  }
  0xb1   :  { %2008 = vmatprep.subr.bf16.mxu1 %v4009_v46  ;;  %v4093_v45 = vld [vmem:[%s5743_s4 + $0x7ac] ss:$16 sps:$4 sm:$0xff]   ;;  %v4088_v46 = vld [vmem:[%s5743_s4 + $0x5a8] ss:$16 sps:$4 sm:$0xff]  }
  0xb3   :  { %1968 = vmatpush2.bf16.msra.mxu0 %v4004_v47  ;;  %v4091_v47 = vld [vmem:[%s5743_s4 + $0x7a8] ss:$16 sps:$4 sm:$0xff]  }
  0xb4   :  { %2009 = vmatpush2.bf16.msra.mxu1 %v4007_v50  ;;  %1969 = vmatprep.subr.bf16.mxu0 %v4012_v52  ;;  %v4096_v50 = vld [vmem:[%s5743_s4 + $0x58c] ss:$16 sps:$4 sm:$0xff]  }
  0xb5   :  { %2010 = vmatprep.subr.bf16.mxu1 %v4015_v51  ;;  %v4099_v52 = vld [vmem:[%s5743_s4 + $0x78c] ss:$16 sps:$4 sm:$0xff]   ;;  %v4094_v51 = vld [vmem:[%s5743_s4 + $0x588] ss:$16 sps:$4 sm:$0xff]  }
  0xb7   :  { %1970 = vmatpush2.bf16.msra.mxu0 %v4010_v54  ;;  %v4097_v54 = vld [vmem:[%s5743_s4 + $0x788] ss:$16 sps:$4 sm:$0xff]  }
  0xb8   :  { %2011 = vmatpush2.bf16.msra.mxu1 %v4013_v62  ;;  %1971 = vmatprep.subr.bf16.mxu0 %v4018_v63  ;;  %v4102_v62 = vld [vmem:[%s5743_s4 + $0x56c] ss:$16 sps:$4 sm:$0xff]  }
  0xb9   :  { %2012 = vmatprep.subr.bf16.mxu1 %v4021_v0  ;;  %v4105_v63 = vld [vmem:[%s5743_s4 + $0x76c] ss:$16 sps:$4 sm:$0xff]   ;;  %v4100_v0 = vld [vmem:[%s5743_s4 + $0x568] ss:$16 sps:$4 sm:$0xff]  }
  0xbb   :  { %1972 = vmatpush2.bf16.msra.mxu0 %v4016_v1  ;;  %v4103_v1 = vld [vmem:[%s5743_s4 + $0x768] ss:$16 sps:$4 sm:$0xff]  }
  0xbc   :  { %2013 = vmatpush2.bf16.msra.mxu1 %v4019_v2  ;;  %1973 = vmatprep.subr.bf16.mxu0 %v4024_v3  ;;  %v4108_v2 = vld [vmem:[%s5743_s4 + $0x54c] ss:$16 sps:$4 sm:$0xff]  }
  0xbd   :  { %2014 = vmatprep.subr.bf16.mxu1 %v4027_v4  ;;  %v4111_v3 = vld [vmem:[%s5743_s4 + $0x74c] ss:$16 sps:$4 sm:$0xff]   ;;  %v4106_v4 = vld [vmem:[%s5743_s4 + $0x548] ss:$16 sps:$4 sm:$0xff]  }
  0xbf   :  { %1974 = vmatpush2.bf16.msra.mxu0 %v4022_v5  ;;  %v4109_v5 = vld [vmem:[%s5743_s4 + $0x748] ss:$16 sps:$4 sm:$0xff]  }
  0xc0   :  { %2015 = vmatpush2.bf16.msra.mxu1 %v4025_v6  ;;  %2025 = vmatprep.subr.bf16.mxu0 %v4030_v7  ;;  %v4114_v6 = vld [vmem:[%s5743_s4 + $0x52c] ss:$16 sps:$4 sm:$0xff]  }
  0xc1   :  { %2066 = vmatprep.subr.bf16.mxu1 %v4033_v57  ;;  %v4117_v7 = vld [vmem:[%s5743_s4 + $0x72c] ss:$16 sps:$4 sm:$0xff]   ;;  %v4112_v57 = vld [vmem:[%s5743_s4 + $0x528] ss:$16 sps:$4 sm:$0xff]  }
  0xc2   :  { %1976 = vmatmul.mubr.bf16.vlgmr.msra.gmra.mxu0 %v4635_v55  ;;  %v4045_v55 = vld [vmem:[%s5743_s4 + $0x6ac] ss:$16 sps:$4 sm:$0xff]  }
  0xc3   :  { %2017 = vmatmul.mubr.bf16.vlgmr.msra.gmra.mxu1 %v4637_v56  ;;  %2026 = vmatpush1.bf16.msra.mxu0 %v4028_v36  ;;  %v4040_v56 = vld [vmem:[%s5743_s4 + $0x4a8] ss:$16 sps:$4 sm:$0xff]  }
  0xc4   :  { %2067 = vmatpush1.bf16.msra.mxu1 %v4031_v37  ;;  %2027 = vmatprep.subr.bf16.mxu0 %v4036_v8  ;;  %v4115_v36 = vld [vmem:[%s5743_s4 + $0x728] ss:$16 sps:$4 sm:$0xff]   ;;  %v4120_v37 = vld [vmem:[%s5743_s4 + $0x50c] ss:$16 sps:$4 sm:$0xff]  }
  0xc5   :  { %2068 = vmatprep.subr.bf16.mxu1 %v4039_v9  ;;  %2057 = vmatprep.mubr.bf16.mxu0 %v4814_v18  ;;  %v4051_v18 = vld [vmem:[%s5743_s4 + $0x68c] ss:$16 sps:$4 sm:$0xff]   ;;  %v4118_v9 = vld [vmem:[%s5743_s4 + $0x508] ss:$16 sps:$4 sm:$0xff]  }
  0xc6   :  { %2098 = vmatprep.mubr.bf16.mxu1 %v4816_v19  ;;  %v4046_v19 = vld [vmem:[%s5743_s4 + $0x488] ss:$16 sps:$4 sm:$0xff]   ;;  %v4123_v8 = vld [vmem:[%s5743_s4 + $0x70c] ss:$16 sps:$4 sm:$0xff]  }
  0xc7   :  { %2028 = vmatpush1.bf16.msra.mxu0 %v4034_v10  ;;  %v4121_v10 = vld [vmem:[%s5743_s4 + $0x708] ss:$16 sps:$4 sm:$0xff]  }
  0xc8   :  { %2069 = vmatpush1.bf16.msra.mxu1 %v4037_v11  ;;  %2029 = vmatprep.subr.bf16.mxu0 %v4042_v12 }
  0xc9   :  { %2070 = vmatprep.subr.bf16.mxu1 %v4045_v55 }
  0xcb   :  { %2030 = vmatpush1.bf16.msra.mxu0 %v4040_v56 }
  0xcc   :  { %2071 = vmatpush1.bf16.msra.mxu1 %v4043_v13  ;;  %2031 = vmatprep.subr.bf16.mxu0 %v4048_v14 }
  0xcd   :  { %2072 = vmatprep.subr.bf16.mxu1 %v4051_v18 }
  0xcf   :  { %2032 = vmatpush1.bf16.msra.mxu0 %v4046_v19 }
  0xd0   :  { %2073 = vmatpush1.bf16.msra.mxu1 %v4049_v15  ;;  %2033 = vmatprep.subr.bf16.mxu0 %v4054_v16 }
  0xd1   :  { %2074 = vmatprep.subr.bf16.mxu1 %v4057_v17 }
  0xd3   :  { %2034 = vmatpush1.bf16.msra.mxu0 %v4052_v20 }
  0xd4   :  { %2075 = vmatpush1.bf16.msra.mxu1 %v4055_v21  ;;  %2035 = vmatprep.subr.bf16.mxu0 %v4060_v22 }
  0xd5   :  { %2076 = vmatprep.subr.bf16.mxu1 %v4063_v23 }
  0xd7   :  { %2036 = vmatpush1.bf16.msra.mxu0 %v4058_v24 }
  0xd8   :  { %2077 = vmatpush1.bf16.msra.mxu1 %v4061_v25  ;;  %2037 = vmatprep.subr.bf16.mxu0 %v4066_v26 }
  0xd9   :  { %2078 = vmatprep.subr.bf16.mxu1 %v4069_v27 }
  0xdb   :  { %2038 = vmatpush1.bf16.msra.mxu0 %v4064_v28 }
  0xdc   :  { %2079 = vmatpush1.bf16.msra.mxu1 %v4067_v29  ;;  %2039 = vmatprep.subr.bf16.mxu0 %v4072_v61  ;;  %v4126_v29 = vld [vmem:[%s5748_s7 + $0x74] ss:$8 sps:$4 sm:$0xff]   ;;  %v4124_v61 = vld [vmem:[%s5748_s7 + $0x70] ss:$8 sps:$4 sm:$0xff]  }
  0xdd   :  { %2080 = vmatprep.subr.bf16.mxu1 %v4075_v30  ;;  %v4127_v30 = vld [vmem:[%s5748_s7 + $0x170] ss:$8 sps:$4 sm:$0xff]  }
  0xdf   :  { %2040 = vmatpush1.bf16.msra.mxu0 %v4070_v31  ;;  %v4129_v31 = vld [vmem:[%s5748_s7 + $0x174] ss:$8 sps:$4 sm:$0xff]  }
  0xe0   :  { %2081 = vmatpush1.bf16.msra.mxu1 %v4073_v32  ;;  %2041 = vmatprep.subr.bf16.mxu0 %v4078_v33  ;;  %v4132_v32 = vld [vmem:[%s5748_s7 + $0x64] ss:$8 sps:$4 sm:$0xff]  }
  0xe1   :  { %2082 = vmatprep.subr.bf16.mxu1 %v4081_v34  ;;  %v4135_v33 = vld [vmem:[%s5748_s7 + $0x164] ss:$8 sps:$4 sm:$0xff]   ;;  %v4130_v34 = vld [vmem:[%s5748_s7 + $0x60] ss:$8 sps:$4 sm:$0xff]  }
  0xe3   :  { %2042 = vmatpush2.bf16.msra.mxu0 %v4076_v35  ;;  %v4133_v35 = vld [vmem:[%s5748_s7 + $0x160] ss:$8 sps:$4 sm:$0xff]  }
  0xe4   :  { %2083 = vmatpush2.bf16.msra.mxu1 %v4079_v38  ;;  %2043 = vmatprep.subr.bf16.mxu0 %v4084_v39  ;;  %v4138_v38 = vld [vmem:[%s5748_s7 + $0x54] ss:$8 sps:$4 sm:$0xff]  }
  0xe5   :  { %2084 = vmatprep.subr.bf16.mxu1 %v4087_v40  ;;  %v4141_v39 = vld [vmem:[%s5748_s7 + $0x154] ss:$8 sps:$4 sm:$0xff]   ;;  %v4136_v40 = vld [vmem:[%s5748_s7 + $0x50] ss:$8 sps:$4 sm:$0xff]  }
  0xe7   :  { %2044 = vmatpush2.bf16.msra.mxu0 %v4082_v41  ;;  %v4139_v41 = vld [vmem:[%s5748_s7 + $0x150] ss:$8 sps:$4 sm:$0xff]  }
  0xe8   :  { %2085 = vmatpush2.bf16.msra.mxu1 %v4085_v42  ;;  %2045 = vmatprep.subr.bf16.mxu0 %v4090_v44  ;;  %v4144_v42 = vld [vmem:[%s5748_s7 + $0x44] ss:$8 sps:$4 sm:$0xff]  }
  0xe9   :  { %2086 = vmatprep.subr.bf16.mxu1 %v4093_v45  ;;  %v4147_v44 = vld [vmem:[%s5748_s7 + $0x144] ss:$8 sps:$4 sm:$0xff]   ;;  %v4142_v45 = vld [vmem:[%s5748_s7 + $0x40] ss:$8 sps:$4 sm:$0xff]  }
  0xeb   :  { %2046 = vmatpush2.bf16.msra.mxu0 %v4088_v46  ;;  %v4145_v46 = vld [vmem:[%s5748_s7 + $0x140] ss:$8 sps:$4 sm:$0xff]  }
  0xec   :  { %2087 = vmatpush2.bf16.msra.mxu1 %v4091_v47  ;;  %2047 = vmatprep.subr.bf16.mxu0 %v4096_v50  ;;  %v4150_v47 = vld [vmem:[%s5748_s7 + $0x34] ss:$8 sps:$4 sm:$0xff]  }
  0xed   :  { %2088 = vmatprep.subr.bf16.mxu1 %v4099_v52  ;;  %v4153_v50 = vld [vmem:[%s5748_s7 + $0x134] ss:$8 sps:$4 sm:$0xff]   ;;  %v4148_v52 = vld [vmem:[%s5748_s7 + $0x30] ss:$8 sps:$4 sm:$0xff]  }
  0xef   :  { %2048 = vmatpush2.bf16.msra.mxu0 %v4094_v51  ;;  %v4151_v51 = vld [vmem:[%s5748_s7 + $0x130] ss:$8 sps:$4 sm:$0xff]  }
  0xf0   :  { %2089 = vmatpush2.bf16.msra.mxu1 %v4097_v54  ;;  %2049 = vmatprep.subr.bf16.mxu0 %v4102_v62  ;;  %v4156_v54 = vld [vmem:[%s5748_s7 + $0x24] ss:$8 sps:$4 sm:$0xff]  }
  0xf1   :  { %2090 = vmatprep.subr.bf16.mxu1 %v4105_v63  ;;  %v4159_v62 = vld [vmem:[%s5748_s7 + $0x124] ss:$8 sps:$4 sm:$0xff]   ;;  %v4154_v63 = vld [vmem:[%s5748_s7 + $0x20] ss:$8 sps:$4 sm:$0xff]  }
  0xf3   :  { %2050 = vmatpush2.bf16.msra.mxu0 %v4100_v0  ;;  %v4157_v0 = vld [vmem:[%s5748_s7 + $0x120] ss:$8 sps:$4 sm:$0xff]  }
  0xf4   :  { %2091 = vmatpush2.bf16.msra.mxu1 %v4103_v1  ;;  %2051 = vmatprep.subr.bf16.mxu0 %v4108_v2  ;;  %v4162_v1 = vld [vmem:[%s5748_s7 + $0x14] ss:$8 sps:$4 sm:$0xff]  }
  0xf5   :  { %2092 = vmatprep.subr.bf16.mxu1 %v4111_v3  ;;  %v4165_v2 = vld [vmem:[%s5748_s7 + $0x114] ss:$8 sps:$4 sm:$0xff]   ;;  %v4160_v3 = vld [vmem:[%s5748_s7 + $0x10] ss:$8 sps:$4 sm:$0xff]  }
  0xf7   :  { %2052 = vmatpush2.bf16.msra.mxu0 %v4106_v4  ;;  %v4163_v4 = vld [vmem:[%s5748_s7 + $0x110] ss:$8 sps:$4 sm:$0xff]  }
  0xf8   :  { %2093 = vmatpush2.bf16.msra.mxu1 %v4109_v5  ;;  %2053 = vmatprep.subr.bf16.mxu0 %v4114_v6  ;;  %v4168_v5 = vld [vmem:[%s5748_s7 + $0x4] ss:$8 sps:$4 sm:$0xff]  }
  0xf9   :  { %2094 = vmatprep.subr.bf16.mxu1 %v4117_v7  ;;  %v4171_v6 = vld [vmem:[%s5748_s7 + $0x104] ss:$8 sps:$4 sm:$0xff]   ;;  %v4166_v7 = vld [vmem:[%s5748_s7] ss:$8 sps:$4 sm:$0xff]  }
  0xfb   :  { %2054 = vmatpush2.bf16.msra.mxu0 %v4112_v57  ;;  %v4169_v57 = vld [vmem:[%s5748_s7 + $0x100] ss:$8 sps:$4 sm:$0xff]  }
  0xfc   :  { %2095 = vmatpush2.bf16.msra.mxu1 %v4115_v36  ;;  %2055 = vmatprep.subr.bf16.mxu0 %v4120_v37  ;;  %v4174_v36 = vld [vmem:[%s5748_s7 + $0xf4] ss:$8 sps:$4 sm:$0xff]  }
  0xfd   :  { %2096 = vmatprep.subr.bf16.mxu1 %v4123_v8  ;;  %v4177_v37 = vld [vmem:[%s5748_s7 + $0x1f4] ss:$8 sps:$4 sm:$0xff]   ;;  %v4172_v8 = vld [vmem:[%s5748_s7 + $0xf0] ss:$8 sps:$4 sm:$0xff]  }
  0xff   :  { %2056 = vmatpush2.bf16.msra.mxu0 %v4118_v9  ;;  %v4175_v9 = vld [vmem:[%s5748_s7 + $0x1f0] ss:$8 sps:$4 sm:$0xff]  }
 0x100   :  { %2097 = vmatpush2.bf16.msra.mxu1 %v4121_v10  ;;  %2697 = vmatprep.subr.bf16.mxu0 %v4126_v29  ;;  %v4180_v10 = vld [vmem:[%s5748_s7 + $0xe4] ss:$8 sps:$4 sm:$0xff]   ;;  %v4198_v29 = vld [vmem:[%s5748_s7 + $0xb4] ss:$8 sps:$4 sm:$0xff]  }
 0x101   :  { %2738 = vmatprep.subr.bf16.mxu1 %v4129_v31  ;;  %v4199_v31 = vld [vmem:[%s5748_s7 + $0x1b0] ss:$8 sps:$4 sm:$0xff]  }
 0x102   :  { %v1813_v11 = vpop.f32.mrf.mxu0  ;;  %2058 = vmatmul.mubr.bf16.vlgmr.msra.gmra.mxu0 %v4906_v58 }
 0x103   :  { %v1854_v12 = vpop.f32.mrf.mxu1  ;;  %2099 = vmatmul.mubr.bf16.vlgmr.msra.gmra.mxu1 %v4908_v60  ;;  %2698 = vmatpush1.bf16.msra.mxu0 %v4124_v61  ;;  %v4201_v61 = vld [vmem:[%s5748_s7 + $0x1b4] ss:$8 sps:$4 sm:$0xff]  }
 0x104   :  { %v1855_v55 = vadd.f32 %v1854_v12, %v1813_v11  ;;  %v1815_v56 = vpop.f32.mrf.mxu0  ;;  %2739 = vmatpush1.bf16.msra.mxu1 %v4127_v30  ;;  %2699 = vmatprep.subr.bf16.mxu0 %v4132_v32  ;;  %v4183_v11 = vld [vmem:[%s5748_s7 + $0x1e4] ss:$8 sps:$4 sm:$0xff]   ;;  %v4178_v12 = vld [vmem:[%s5748_s7 + $0xe0] ss:$8 sps:$4 sm:$0xff]   ;;  %v4196_v30 = vld [vmem:[%s5748_s7 + $0xb0] ss:$8 sps:$4 sm:$0xff]  }
 0x105   :  { %v1856_v13 = vpop.f32.mrf.mxu1  ;;  %2740 = vmatprep.subr.bf16.mxu1 %v4135_v33  ;;  %v4204_v32 = vld [vmem:[%s5748_s7 + $0xa4] ss:$8 sps:$4 sm:$0xff]  }
 0x106   :  { %v1857_v14 = vadd.f32 %v1856_v13, %v1815_v56  ;;  %v1817_v18 = vpop.f32.mrf.mxu0  ;;  %v4207_v33 = vld [vmem:[%s5748_s7 + $0x1a4] ss:$8 sps:$4 sm:$0xff]  }
 0x107   :  { %v1858_v19 = vpop.f32.mrf.mxu1  ;;  %2700 = vmatpush1.bf16.msra.mxu0 %v4130_v34  ;;  %v4189_v18 = vld [vmem:[%s5748_s7 + $0x1d4] ss:$8 sps:$4 sm:$0xff]   ;;  %v4202_v34 = vld [vmem:[%s5748_s7 + $0xa0] ss:$8 sps:$4 sm:$0xff]  }
 0x108   :  { %v1818_v15 = vpop.f32.mrf.mxu0  ;;  %2741 = vmatpush1.bf16.msra.mxu1 %v4133_v35  ;;  %2701 = vmatprep.subr.bf16.mxu0 %v4138_v38  ;;  %v4210_v35 = vld [vmem:[%s5748_s7 + $0x94] ss:$8 sps:$4 sm:$0xff]   ;;  %v4205_v38 = vld [vmem:[%s5748_s7 + $0x1a0] ss:$8 sps:$4 sm:$0xff]  }
 0x109   :  { %v1859_v16 = vpop.f32.mrf.mxu1  ;;  %2742 = vmatprep.subr.bf16.mxu1 %v4141_v39  ;;  %v4184_v15 = vld [vmem:[%s5748_s7 + $0xd0] ss:$8 sps:$4 sm:$0xff]   ;;  %v4213_v39 = vld [vmem:[%s5748_s7 + $0x194] ss:$8 sps:$4 sm:$0xff]  }
 0x10a   :  { %v4187_v16 = vld [vmem:[%s5748_s7 + $0x1d0] ss:$8 sps:$4 sm:$0xff]  }
 0x10b   :  { %2702 = vmatpush1.bf16.msra.mxu0 %v4136_v40  ;;  %v4208_v40 = vld [vmem:[%s5748_s7 + $0x90] ss:$8 sps:$4 sm:$0xff]  }
 0x10c   :  { %2743 = vmatpush1.bf16.msra.mxu1 %v4139_v41  ;;  %2703 = vmatprep.subr.bf16.mxu0 %v4144_v42  ;;  %v4216_v41 = vld [vmem:[%s5748_s7 + $0x84] ss:$8 sps:$4 sm:$0xff]   ;;  %v4211_v42 = vld [vmem:[%s5748_s7 + $0x190] ss:$8 sps:$4 sm:$0xff]  }
 0x10d   :  { %2744 = vmatprep.subr.bf16.mxu1 %v4147_v44  ;;  %v4219_v44 = vld [vmem:[%s5748_s7 + $0x184] ss:$8 sps:$4 sm:$0xff]  }
 0x10f   :  { %2704 = vmatpush1.bf16.msra.mxu0 %v4142_v45  ;;  %v4214_v45 = vld [vmem:[%s5748_s7 + $0x80] ss:$8 sps:$4 sm:$0xff]  }
 0x110   :  { %2745 = vmatpush1.bf16.msra.mxu1 %v4145_v46  ;;  %2705 = vmatprep.subr.bf16.mxu0 %v4150_v47  ;;  %v4217_v46 = vld [vmem:[%s5748_s7 + $0x180] ss:$8 sps:$4 sm:$0xff]  }
 0x111   :  { %2746 = vmatprep.subr.bf16.mxu1 %v4153_v50 }
 0x113   :  { %2706 = vmatpush1.bf16.msra.mxu0 %v4148_v52 }
 0x114   :  { %2747 = vmatpush1.bf16.msra.mxu1 %v4151_v51  ;;  %2707 = vmatprep.subr.bf16.mxu0 %v4156_v54 }
 0x115   :  { %2748 = vmatprep.subr.bf16.mxu1 %v4159_v62 }
 0x117   :  { %2708 = vmatpush1.bf16.msra.mxu0 %v4154_v63 }
 0x118   :  { %2749 = vmatpush1.bf16.msra.mxu1 %v4157_v0  ;;  %2709 = vmatprep.subr.bf16.mxu0 %v4162_v1 }
 0x119   :  { %2750 = vmatprep.subr.bf16.mxu1 %v4165_v2 }
 0x11b   :  { %2710 = vmatpush1.bf16.msra.mxu0 %v4160_v3 }
 0x11c   :  { %2751 = vmatpush1.bf16.msra.mxu1 %v4163_v4  ;;  %2711 = vmatprep.subr.bf16.mxu0 %v4168_v5 }
 0x11d   :  { %2752 = vmatprep.subr.bf16.mxu1 %v4171_v6 }
 0x11f   :  { %2712 = vmatpush1.bf16.msra.mxu0 %v4166_v7 }
 0x120   :  { %2753 = vmatpush1.bf16.msra.mxu1 %v4169_v57  ;;  %2713 = vmatprep.subr.bf16.mxu0 %v4174_v36 }
 0x121   :  { %2754 = vmatprep.subr.bf16.mxu1 %v4177_v37 }
 0x123   :  { %2714 = vmatpush2.bf16.msra.mxu0 %v4172_v8 }
 0x124   :  { %2755 = vmatpush2.bf16.msra.mxu1 %v4175_v9  ;;  %2715 = vmatprep.subr.bf16.mxu0 %v4180_v10 }
 0x125   :  { %2756 = vmatprep.subr.bf16.mxu1 %v4183_v11 }
 0x127   :  { %2716 = vmatpush2.bf16.msra.mxu0 %v4178_v12 }
 0x142   :  { %v1895_v17 = vpop.f32.mrf.mxu0 }
 0x143   :  { %v1936_v20 = vpop.f32.mrf.mxu1  ;;  %v1896_v21 = vadd.f32 %v1895_v17, %v1855_v55  ;;  %v4181_v55 = vld [vmem:[%s5748_s7 + $0x1e0] ss:$8 sps:$4 sm:$0xff]  }
 0x144   :  { %v1897_v22 = vpop.f32.mrf.mxu0  ;;  %2757 = vmatpush2.bf16.msra.mxu1 %v4181_v55 }
 0x145   :  { %v1938_v23 = vpop.f32.mrf.mxu1  ;;  %v5298_v24 = vadd.f32 %v1936_v20, %v1896_v21  ;;  %v1898_v25 = vadd.f32 %v1897_v22, %v1857_v14  ;;  %v4186_v14 = vld [vmem:[%s5748_s7 + $0xd4] ss:$8 sps:$4 sm:$0xff]   ;;  %2758 = vmatprep.subr.bf16.mxu1 %v4189_v18 }
 0x146   :  { %v1899_v26 = vpop.f32.mrf.mxu0  ;;  %2717 = vmatprep.subr.bf16.mxu0 %v4186_v14 }
 0x147   :  { %v1940_v58 = vpop.f32.mrf.mxu1  ;;  %v5300_v27 = vadd.f32 %v1938_v23, %v1898_v25  ;;  %2718 = vmatpush2.bf16.msra.mxu0 %v4184_v15  ;;  %v4192_v23 = vld [vmem:[%s5748_s7 + $0xc4] ss:$8 sps:$4 sm:$0xff]   ;;  %v4190_v26 = vld [vmem:[%s5748_s7 + $0xc0] ss:$8 sps:$4 sm:$0xff]   ;;  %v2110_v50 = vsel %vm2109_vm9, %v5298_v24, 0.0 }
 0x148   :  { %v1900_v60 = vpop.f32.mrf.mxu0  ;;  %v4195_v25 = vld [vmem:[%s5748_s7 + $0x1c4] ss:$8 sps:$4 sm:$0xff]   ;;  %2759 = vmatpush2.bf16.msra.mxu1 %v4187_v16  ;;  %v4193_v58 = vld [vmem:[%s5748_s7 + $0x1c0] ss:$8 sps:$4 sm:$0xff]   ;;  %2719 = vmatprep.subr.bf16.mxu0 %v4192_v23  ;;  %v2111_v51 = vrot.slane %v2110_v50, 4 }
 0x149   :  { %v1941_v28 = vpop.f32.mrf.mxu1  ;;  %2760 = vmatprep.subr.bf16.mxu1 %v4195_v25  ;;  %v2117_v47 = vsel %vm2109_vm9, %v5300_v27, 0.0 }
 0x14a   :  { %v2118_v52 = vrot.slane %v2117_v47, 4  ;;  %v2112_v62 = vadd.f32 %v2111_v51, %v2110_v50 }
 0x14b   :  { %2720 = vmatpush2.bf16.msra.mxu0 %v4190_v26 }
 0x14c   :  { %2761 = vmatpush2.bf16.msra.mxu1 %v4193_v58  ;;  %2721 = vmatprep.subr.bf16.mxu0 %v4198_v29  ;;  %v2119_v54 = vadd.f32 %v2118_v52, %v2117_v47  ;;  %v2113_v0 = vrot.slane %v2112_v62, 2 }
 0x14d   :  { %2762 = vmatprep.subr.bf16.mxu1 %v4201_v61 }
 0x14e   :  { %v2120_v63 = vrot.slane %v2119_v54, 2  ;;  %v2114_v2 = vadd.f32 %v2113_v0, %v2112_v62 }
 0x14f   :  { %2722 = vmatpush2.bf16.msra.mxu0 %v4196_v30 }
 0x150   :  { %2723 = vmatprep.subr.bf16.mxu0 %v4204_v32  ;;  %2763 = vmatpush2.bf16.msra.mxu1 %v4199_v31  ;;  %v2121_v1 = vadd.f32 %v2120_v63, %v2119_v54  ;;  %v2115_v4 = vrot.slane %v2114_v2, 1 }
 0x151   :  { %2764 = vmatprep.subr.bf16.mxu1 %v4207_v33 }
 0x152   :  { %v2122_v3 = vrot.slane %v2121_v1, 1  ;;  %v2116_v6 = vadd.f32 %v2115_v4, %v2114_v2 }
 0x153   :  { %2724 = vmatpush2.bf16.msra.mxu0 %v4202_v34 }
 0x154   :  { %2725 = vmatprep.subr.bf16.mxu0 %v4210_v35  ;;  %2765 = vmatpush2.bf16.msra.mxu1 %v4205_v38  ;;  %v2123_v5 = vadd.f32 %v2122_v3, %v2121_v1  ;;  %v5506_v57 = vmul.f32 0.25, %v2116_v6 }
 0x155   :  { %2766 = vmatprep.subr.bf16.mxu1 %v4213_v39 }
 0x156   :  { %v5504_v7 = vmul.f32 0.25, %v2123_v5  ;;  %v2143_v37 = vsub.f32 %v5298_v24, %v5506_v57 }
 0x157   :  { %2726 = vmatpush2.bf16.msra.mxu0 %v4208_v40 }
 0x158   :  { %2727 = vmatprep.subr.bf16.mxu0 %v4216_v41  ;;  %2767 = vmatpush2.bf16.msra.mxu1 %v4211_v42  ;;  %v2144_v36 = vsub.f32 %v5300_v27, %v5504_v7  ;;  %v2147_v55 = vmul.f32 %v2143_v37, %v2143_v37 }
 0x159   :  { %2768 = vmatprep.subr.bf16.mxu1 %v4219_v44 }
 0x15a   :  { %v2148_v8 = vmul.f32 %v2144_v36, %v2144_v36  ;;  %v2151_v25 = vsel %vm2109_vm9, %v2147_v55, 0.0 }
 0x15b   :  { %2728 = vmatpush2.bf16.msra.mxu0 %v4214_v45  ;;  %v2152_v29 = vrot.slane %v2151_v25, 4 }
 0x15c   :  { %2769 = vmatpush2.bf16.msra.mxu1 %v4217_v46  ;;  %v2158_v15 = vsel %vm2109_vm9, %v2148_v8, 0.0 }
 0x15d   :  { %v2159_v26 = vrot.slane %v2158_v15, 4  ;;  %v2153_v34 = vadd.f32 %v2152_v29, %v2151_v25 }
 0x15f   :  { %v2160_v31 = vadd.f32 %v2159_v26, %v2158_v15  ;;  %v2154_v42 = vrot.slane %v2153_v34, 2 }
 0x161   :  { %v2161_v39 = vrot.slane %v2160_v31, 2  ;;  %v2155_v52 = vadd.f32 %v2154_v42, %v2153_v34 }
 0x163   :  { %v2162_v46 = vadd.f32 %v2161_v39, %v2160_v31  ;;  %v2156_v1 = vrot.slane %v2155_v52, 1 }
 0x165   :  { %v2163_v62 = vrot.slane %v2162_v46, 1  ;;  %v2157_v36 = vadd.f32 %v2156_v1, %v2155_v52 }
 0x167   :  { %v2164_v4 = vadd.f32 %v2163_v62, %v2162_v46 }
 0x182   :  { %v1977_v56 = vpop.f32.mrf.mxu0 }
 0x183   :  { %v2018_v13 = vpop.f32.mrf.mxu1 }
 0x184   :  { %v5428_v19 = vadd.f32 %v2018_v13, %v1977_v56  ;;  %v5436_v17 = vpop.f32.mrf.mxu0 }
 0x185   :  { %v5438_v20 = vpop.f32.mrf.mxu1 }
 0x186   :  { %v1981_v21 = vpop.f32.mrf.mxu0  ;;  %v2021_v11 = vadd.f32 %v5438_v20, %v5436_v17 }
 0x187   :  { %v2022_v22 = vpop.f32.mrf.mxu1 }
 0x188   :  { %v1982_v60 = vpop.f32.mrf.mxu0 }
 0x189   :  { %v2023_v28 = vpop.f32.mrf.mxu1 }
 0x1c2   :  { %v2059_v9 = vpop.f32.mrf.mxu0 }
 0x1c3   :  { %v2100_v10 = vpop.f32.mrf.mxu1  ;;  %v2060_v12 = vadd.f32 %v2059_v9, %v5428_v19  ;;  %v2180_v9 = vmul.f32 0.25, %v2164_v4 }
 0x1c4   :  { %v2061_v56 = vpop.f32.mrf.mxu0 }
 0x1c5   :  { %v2102_v13 = vpop.f32.mrf.mxu1  ;;  %v5515_v14 = vadd.f32 %v2100_v10, %v2060_v12  ;;  %v2062_v18 = vadd.f32 %v2061_v56, %v2021_v11  ;;  %v2179_v12 = vmul.f32 0.25, %v2157_v36 }
 0x1c6   :  { %v2063_v16 = vpop.f32.mrf.mxu0 }
 0x1c7   :  { %v2104_v21 = vpop.f32.mrf.mxu1  ;;  %v2124_v22 = vsel %vm2109_vm9, %v5515_v14, 0.0  ;;  %v5520_v23 = vadd.f32 %v2102_v13, %v2062_v18  ;;  %v2184_v13 = vadd.f32 1e-05, %v2180_v9  ;;  %v2183_v16 = vadd.f32 1e-05, %v2179_v12 }
 0x1c8   :  { %v2125_v17 = vrot.slane %v2124_v22, 4  ;;  %v2064_v20 = vpop.f32.mrf.mxu0 }
 0x1c9   :  { %v2105_v19 = vpop.f32.mrf.mxu1  ;;  %v2131_v58 = vsel %vm2109_vm9, %v5520_v23, 0.0  ;;  %4284 = vrsqrt.f32 %v2184_v13 }
 0x1ca   :  { %v2126_v60 = vadd.f32 %v2125_v17, %v2124_v22  ;;  %v2132_v28 = vrot.slane %v2131_v58, 4  ;;  %4286 = vrsqrt.f32 %v2183_v16  ;;  %v4297_v19 = vmov 1966171168   ;;  %v4223_v16 = vld [vmem:[%s5751_s10 + $0x90] ss:$12 sps:$4 sm:$0xff]  }
 0x1cb   :  { %v2198_v26 = vunpack.c.l.s4 %v4297_v19  ;;  %v4232_v19 = vld [vmem:[%s5751_s10 + $0x48] ss:$12 sps:$4 sm:$0xff]  }
 0x1cc   :  { %v2127_v61 = vrot.slane %v2126_v60, 2  ;;  %v2133_v30 = vadd.f32 %v2132_v28, %v2131_v58 }
 0x1cd   :  { %v2199_v58 = vunpack.c.0.s8 %v2198_v26  ;;  %v4237_v26 = vld [vmem:[%s5751_s10 + $0x34] ss:$12 sps:$4 sm:$0xff]  }
 0x1ce   :  { %v2128_v32 = vadd.f32 %v2127_v61, %v2126_v60  ;;  %v2134_v33 = vrot.slane %v2133_v30, 2 }
 0x1d0   :  { %v2129_v35 = vrot.slane %v2128_v32, 1  ;;  %v2135_v38 = vadd.f32 %v2134_v33, %v2133_v30  ;;  %v5530_v30 = vsub.s32 %v2199_v58, %v4494_v43  ;;  %v4235_v58 = vld [vmem:[%s5751_s10 + $0x30] ss:$12 sps:$4 sm:$0xff]  }
 0x1d2   :  { %v2130_v40 = vadd.f32 %v2129_v35, %v2128_v32  ;;  %v2136_v41 = vrot.slane %v2135_v38, 1 }
 0x1d4   :  { %v2141_v44 = vmul.f32 0.25, %v2130_v40  ;;  %v2137_v45 = vadd.f32 %v2136_v41, %v2135_v38  ;;  %v2107_v38 = vld [vmem:[%s5749_s5] sm:$0xf] }
 0x1d6   :  { %v2145_v47 = vsub.f32 %v5515_v14, %v2141_v44  ;;  %v2142_v50 = vmul.f32 0.25, %v2137_v45  ;;  %v4285_v60 = vpop.eup %4284 }
 0x1d7   :  { %v4287_v28 = vpop.eup %4286 }
 0x1d8   :  { %v2149_v51 = vmul.f32 %v2145_v47, %v2145_v47  ;;  %v2146_v54 = vsub.f32 %v5520_v23, %v2142_v50  ;;  %v2195_v61 = vcombine.low %v4287_v28, %v4285_v60  ;;  %v4240_v60 = vld [vmem:[%s5751_s10 + $0x1c] ss:$12 sps:$4 sm:$0xff]   ;;  %v4238_v28 = vld [vmem:[%s5751_s10 + $0x18] ss:$12 sps:$4 sm:$0xff]  }
 0x1da   :  { %v2165_v63 = vsel %vm2109_vm9, %v2149_v51, 0.0  ;;  %v2150_v0 = vmul.f32 %v2146_v54, %v2146_v54  ;;  %v2203_v33 = vrot.slane %v2195_v61, %v5530_v30  ;;  %v4241_v61 = vld [vmem:[%s5751_s10] ss:$12 sps:$4 sm:$0xff]  }
 0x1db   :  { %v2166_v2 = vrot.slane %v2165_v63, 4 }
 0x1dc   :  { %v2172_v3 = vsel %vm2109_vm9, %v2150_v0, 0.0 }
 0x1dd   :  { %v2167_v5 = vadd.f32 %v2166_v2, %v2165_v63  ;;  %v2173_v6 = vrot.slane %v2172_v3, 4  ;;  %v2108_v2 = vld [vmem:[%s5750_s6] sm:$0xf] }
 0x1df   :  { %v2168_v37 = vrot.slane %v2167_v5, 2  ;;  %v2174_v8 = vadd.f32 %v2173_v6, %v2172_v3 }
 0x1e1   :  { %v2169_v10 = vadd.f32 %v2168_v37, %v2167_v5  ;;  %v2175_v11 = vrot.slane %v2174_v8, 2 }
 0x1e3   :  { %v2170_v55 = vrot.slane %v2169_v10, 1  ;;  %v2176_v56 = vadd.f32 %v2175_v11, %v2174_v8 }
 0x1e5   :  { %v2171_v18 = vadd.f32 %v2170_v55, %v2169_v10  ;;  %v2177_v15 = vrot.slane %v2176_v56, 1 }
 0x1e7   :  { %v2181_v21 = vmul.f32 0.25, %v2171_v18  ;;  %v2178_v22 = vadd.f32 %v2177_v15, %v2176_v56  ;;  %v4220_v18 = vld [vmem:[%s5751_s10 + $0xa8] ss:$12 sps:$4 sm:$0xff]  }
 0x1e8   :  { %v4225_v15 = vld [vmem:[%s5751_s10 + $0x94] ss:$12 sps:$4 sm:$0xff]  }
 0x1e9   :  { %v2185_v25 = vadd.f32 1e-05, %v2181_v21  ;;  %v2182_v17 = vmul.f32 0.25, %v2178_v22  ;;  %v4228_v21 = vld [vmem:[%s5751_s10 + $0x7c] ss:$12 sps:$4 sm:$0xff]  }
 0x1ea   :  { %v4226_v22 = vld [vmem:[%s5751_s10 + $0x78] ss:$12 sps:$4 sm:$0xff]  }
 0x1eb   :  { %v2186_v20 = vadd.f32 1e-05, %v2182_v17  ;;  %4288 = vrsqrt.f32 %v2185_v25  ;;  %v4231_v25 = vld [vmem:[%s5751_s10 + $0x64] ss:$12 sps:$4 sm:$0xff]   ;;  %v4229_v17 = vld [vmem:[%s5751_s10 + $0x60] ss:$12 sps:$4 sm:$0xff]  }
 0x1ed   :  { %4290 = vrsqrt.f32 %v2186_v20  ;;  %v4234_v20 = vld [vmem:[%s5751_s10 + $0x4c] ss:$12 sps:$4 sm:$0xff]  }
 0x1f8   :  { %v4289_v29 = vpop.eup %4288 }
 0x1fa   :  { %v4291_v31 = vpop.eup %4290 }
 0x1fb   :  { %v2196_v32 = vcombine.low %v4289_v29, %v4291_v31  ;;  %v4243_v29 = vld [vmem:[%s5751_s10 + $0x4] ss:$12 sps:$4 sm:$0xff]   ;;  %v4246_v31 = vld [vmem:[%s5751_s10 + $0x16c] ss:$12 sps:$4 sm:$0xff]  }
 0x1fd   :  { %v2210_v34 = vrot.slane %v2196_v32, %v5530_v30  ;;  %v4247_v32 = vld [vmem:[%s5751_s10 + $0x170] ss:$12 sps:$4 sm:$0xff]  }
 0x1fe   :  { %3708 = vmatprep.subr.bf16.mxu1 %v4247_v32 }
 0x1ff   :  { %v2211_v35 = vcombine.low %v2203_v33, %v2210_v34  ;;  %v4244_v33 = vld [vmem:[%s5751_s10 + $0x168] ss:$12 sps:$4 sm:$0xff]   ;;  %v4248_v34 = vld [vmem:[%s5751_s10 + $0xb0] ss:$12 sps:$4 sm:$0xff]  }
 0x201   :  { %v2218_v39 = vrot.slane %v2211_v35, %v5530_v30  ;;  %v4251_v35 = vld [vmem:[%s5751_s10 + $0x154] ss:$12 sps:$4 sm:$0xff]  }
 0x203   :  { %v2220_v40 = vmul.f32 %v2218_v39, %v2107_v38  ;;  %v4252_v38 = vld [vmem:[%s5751_s10 + $0x158] ss:$12 sps:$4 sm:$0xff]   ;;  %v4249_v39 = vld [vmem:[%s5751_s10 + $0x150] ss:$12 sps:$4 sm:$0xff]  }
 0x205   :  { %v2233_v41 = vrot.slane %v2220_v40, %v4545_v59  ;;  %v2237_v42 = vrot.slane %v2220_v40, %v4512_v49  ;;  %v2225_v43 = vrot.slane %v2220_v40, %v4526_v53  ;;  %v2229_v45 = vrot.slane %v2220_v40, %v4509_v48  ;;  %v4253_v40 = vld [vmem:[%s5751_s10 + $0x98] ss:$12 sps:$4 sm:$0xff]  }
 0x207   :  { %v2244_v46 = vmul.f32 %v2233_v41, %v2141_v44  ;;  %v2245_v47 = vmul.f32 %v2237_v42, %v2142_v50  ;;  %v2242_v52 = vmul.f32 %v2225_v43, %v5506_v57  ;;  %v2243_v51 = vmul.f32 %v2229_v45, %v5504_v7 }
 0x208   :  { %v2279_v44 = vmul.f32 %v2237_v42, %v5520_v23  ;;  %v2277_v57 = vmul.f32 %v2229_v45, %v5300_v27  ;;  %v2276_v7 = vmul.f32 %v2225_v43, %v5298_v24  ;;  %v2278_v50 = vmul.f32 %v2233_v41, %v5515_v14  ;;  %v4256_v41 = vld [vmem:[%s5751_s10 + $0x13c] ss:$12 sps:$4 sm:$0xff]   ;;  %v4257_v42 = vld [vmem:[%s5751_s10 + $0x140] ss:$12 sps:$4 sm:$0xff]   ;;  %v4254_v43 = vld [vmem:[%s5751_s10 + $0x138] ss:$12 sps:$4 sm:$0xff]  }
 0x209   :  { %v2251_v54 = vcombine.low %v2244_v46, %v2245_v47  ;;  %v2250_v62 = vcombine.low %v2242_v52, %v2243_v51  ;;  %v4258_v45 = vld [vmem:[%s5751_s10 + $0x80] ss:$12 sps:$4 sm:$0xff]   ;;  %v4261_v46 = vld [vmem:[%s5751_s10 + $0x124] ss:$12 sps:$4 sm:$0xff]   ;;  %v4262_v47 = vld [vmem:[%s5751_s10 + $0x128] ss:$12 sps:$4 sm:$0xff]  }
 0x20a   :  { %v4259_v52 = vld [vmem:[%s5751_s10 + $0x120] ss:$12 sps:$4 sm:$0xff]   ;;  %v4263_v51 = vld [vmem:[%s5751_s10 + $0x68] ss:$12 sps:$4 sm:$0xff]  }
 0x20b   :  { %v2265_v63 = vrot.slane %v2251_v54, %v5530_v30  ;;  %v2258_v0 = vrot.slane %v2250_v62, %v5530_v30  ;;  %v4266_v54 = vld [vmem:[%s5751_s10 + $0x10c] ss:$12 sps:$4 sm:$0xff]   ;;  %v4267_v62 = vld [vmem:[%s5751_s10 + $0x110] ss:$12 sps:$4 sm:$0xff]  }
 0x20d   :  { %v2266_v1 = vcombine.low %v2258_v0, %v2265_v63  ;;  %v4264_v63 = vld [vmem:[%s5751_s10 + $0x108] ss:$12 sps:$4 sm:$0xff]   ;;  %v4268_v0 = vld [vmem:[%s5751_s10 + $0x50] ss:$12 sps:$4 sm:$0xff]  }
 0x20f   :  { %v2273_v3 = vrot.slane %v2266_v1, %v5530_v30  ;;  %v4271_v1 = vld [vmem:[%s5751_s10 + $0xf4] ss:$12 sps:$4 sm:$0xff]  }
 0x211   :  { %v2275_v4 = vsub.f32 %v2108_v2, %v2273_v3  ;;  %v4272_v2 = vld [vmem:[%s5751_s10 + $0xf8] ss:$12 sps:$4 sm:$0xff]   ;;  %v4269_v3 = vld [vmem:[%s5751_s10 + $0xf0] ss:$12 sps:$4 sm:$0xff]  }
 0x213   :  { %v2288_v5 = vrot.slane %v2275_v4, %v4509_v48  ;;  %v2296_v6 = vrot.slane %v2275_v4, %v4512_v49  ;;  %v2284_v36 = vrot.slane %v2275_v4, %v4526_v53  ;;  %v2292_v37 = vrot.slane %v2275_v4, %v4545_v59  ;;  %v4222_v49 = vld [vmem:[%s5751_s10 + $0xac] ss:$12 sps:$4 sm:$0xff]  }
 0x214   :  { %3228 = vmatprep.subr.bf16.mxu0 %v4222_v49  ;;  %v4273_v4 = vld [vmem:[%s5751_s10 + $0x38] ss:$12 sps:$4 sm:$0xff]  }
 0x215   :  { %v2302_v8 = vadd.f32 %v2288_v5, %v2277_v57  ;;  %v2304_v9 = vadd.f32 %v2296_v6, %v2279_v44  ;;  %v2301_v10 = vadd.f32 %v2284_v36, %v2276_v7  ;;  %v2303_v11 = vadd.f32 %v2292_v37, %v2278_v50  ;;  %v4276_v44 = vld [vmem:[%s5751_s10 + $0xdc] ss:$12 sps:$4 sm:$0xff]   ;;  %v4277_v57 = vld [vmem:[%s5751_s10 + $0xe0] ss:$12 sps:$4 sm:$0xff]   ;;  %v4274_v7 = vld [vmem:[%s5751_s10 + $0xd8] ss:$12 sps:$4 sm:$0xff]  }
 0x216   :  { %v4278_v50 = vld [vmem:[%s5751_s10 + $0x20] ss:$12 sps:$4 sm:$0xff]   ;;  %v4281_v5 = vld [vmem:[%s5751_s10 + $0xc4] ss:$12 sps:$4 sm:$0xff]   ;;  %v4282_v6 = vld [vmem:[%s5751_s10 + $0xc8] ss:$12 sps:$4 sm:$0xff]  }
 0x217   :  { %v2306_v12 = vmax.f32 %v2302_v8, 0.0  ;;  %v2308_v23 = vmax.f32 %v2304_v9, 0.0  ;;  %v2305_v55 = vmax.f32 %v2301_v10, 0.0  ;;  %v2307_v27 = vmax.f32 %v2303_v11, 0.0  ;;  %v4279_v36 = vld [vmem:[%s5751_s10 + $0xc0] ss:$12 sps:$4 sm:$0xff]  }
 0x218   :  { %v4283_v37 = vld [vmem:[%s5751_s10 + $0x8] ss:$12 sps:$4 sm:$0xff]  }
 0x219   :  { %v2310_v56 = vpack.c.bf16 %v2306_v12, %v2306_v12  ;;  %v2312_v24 = vpack.c.bf16 %v2308_v23, %v2308_v23  ;;  %v2309_v13 = vpack.c.bf16 %v2305_v55, %v2305_v55  ;;  %v2311_v14 = vpack.c.bf16 %v2307_v27, %v2307_v27 }
 0x21b   :  { %2729 = vmatprep.mubr.bf16.mxu0 %v2310_v56  ;;  %2770 = vmatprep.mubr.bf16.mxu1 %v2312_v24 }
 0x21c   :  { %2730 = vmatmul.mubr.bf16.vlgmr.msra.gmra.mxu0 %v2309_v13  ;;  %2771 = vmatmul.mubr.bf16.vlgmr.msra.gmra.mxu1 %v2311_v14 }
 0x21d   :  { %3229 = vmatpush1.bf16.msra.mxu0 %v4220_v18  ;;  %3709 = vmatpush3.bf16.msra.mxu1 %v4248_v34 }
 0x21e   :  { %3230 = vmatprep.subr.bf16.mxu0 %v4225_v15  ;;  %3710 = vmatprep.subr.bf16.mxu1 %v4252_v38 }
 0x221   :  { %3231 = vmatpush1.bf16.msra.mxu0 %v4223_v16  ;;  %3711 = vmatpush3.bf16.msra.mxu1 %v4253_v40 }
 0x222   :  { %3232 = vmatprep.subr.bf16.mxu0 %v4228_v21  ;;  %3712 = vmatprep.subr.bf16.mxu1 %v4257_v42 }
 0x225   :  { %3233 = vmatpush1.bf16.msra.mxu0 %v4226_v22  ;;  %3713 = vmatpush3.bf16.msra.mxu1 %v4258_v45 }
 0x226   :  { %3234 = vmatprep.subr.bf16.mxu0 %v4231_v25  ;;  %3714 = vmatprep.subr.bf16.mxu1 %v4262_v47 }
 0x229   :  { %3235 = vmatpush1.bf16.msra.mxu0 %v4229_v17  ;;  %3715 = vmatpush3.bf16.msra.mxu1 %v4263_v51 }
 0x22a   :  { %3236 = vmatprep.subr.bf16.mxu0 %v4234_v20  ;;  %3716 = vmatprep.subr.bf16.mxu1 %v4267_v62 }
 0x22d   :  { %3237 = vmatpush1.bf16.msra.mxu0 %v4232_v19  ;;  %3717 = vmatpush3.bf16.msra.mxu1 %v4268_v0 }
 0x22e   :  { %3238 = vmatprep.subr.bf16.mxu0 %v4237_v26  ;;  %3718 = vmatprep.subr.bf16.mxu1 %v4272_v2 }
 0x231   :  { %3239 = vmatpush1.bf16.msra.mxu0 %v4235_v58  ;;  %3719 = vmatpush3.bf16.msra.mxu1 %v4273_v4 }
 0x232   :  { %3240 = vmatprep.subr.bf16.mxu0 %v4240_v60  ;;  %3720 = vmatprep.subr.bf16.mxu1 %v4277_v57 }
 0x235   :  { %3241 = vmatpush1.bf16.msra.mxu0 %v4238_v28  ;;  %3721 = vmatpush3.bf16.msra.mxu1 %v4278_v50 }
 0x236   :  { %3242 = vmatprep.subr.bf16.mxu0 %v4243_v29  ;;  %3722 = vmatprep.subr.bf16.mxu1 %v4282_v6 }
 0x239   :  { %3243 = vmatpush1.bf16.msra.mxu0 %v4241_v61  ;;  %3723 = vmatpush3.bf16.msra.mxu1 %v4283_v37 }
 0x23a   :  { %3244 = vmatprep.subr.bf16.mxu0 %v4246_v31 }
 0x23d   :  { %3245 = vmatpush2.bf16.msra.mxu0 %v4244_v33 }
 0x23e   :  { %3246 = vmatprep.subr.bf16.mxu0 %v4251_v35 }
 0x241   :  { %3247 = vmatpush2.bf16.msra.mxu0 %v4249_v39 }
 0x242   :  { %3248 = vmatprep.subr.bf16.mxu0 %v4256_v41 }
 0x245   :  { %3249 = vmatpush2.bf16.msra.mxu0 %v4254_v43 }
 0x246   :  { %3250 = vmatprep.subr.bf16.mxu0 %v4261_v46 }
 0x249   :  { %3251 = vmatpush2.bf16.msra.mxu0 %v4259_v52 }
 0x24a   :  { %3252 = vmatprep.subr.bf16.mxu0 %v4266_v54 }
 0x24d   :  { %3253 = vmatpush2.bf16.msra.mxu0 %v4264_v63 }
 0x24e   :  { %3254 = vmatprep.subr.bf16.mxu0 %v4271_v1 }
 0x251   :  { %3255 = vmatpush2.bf16.msra.mxu0 %v4269_v3 }
 0x252   :  { %3256 = vmatprep.subr.bf16.mxu0 %v4276_v44  ;;  %v2779_v44 = vld [vmem:[%s5752_s8] sm:$0x3] }
 0x255   :  { %3257 = vmatpush2.bf16.msra.mxu0 %v4274_v7 }
 0x256   :  { %3258 = vmatprep.subr.bf16.mxu0 %v4281_v5 }
 0x259   :  { %3259 = vmatpush2.bf16.msra.mxu0 %v4279_v36 }
 0x2dc   :  { %v2731_v8 = vpop.f32.mrf.mxu0  ;;  %v2772_v9 = vpop.f32.mrf.mxu1 }
 0x2dd   :  { %v5702_v10 = vadd.f32 %v2772_v9, %v2731_v8  ;;  %v2780_v9 = vld [vmem:[%s5753_s9] sm:$0x3] }
 0x2de   :  { %v2733_v11 = vpop.f32.mrf.mxu0  ;;  %v2774_v12 = vpop.f32.mrf.mxu1 }
 0x2df   :  { %v2781_v23 = vsel %vm2109_vm9, %v5702_v10, 0.0  ;;  %v2775_v55 = vadd.f32 %v2774_v12, %v2733_v11 }
 0x2e0   :  { %v2782_v27 = vrot.slane %v2781_v23, 4  ;;  %v2735_v56 = vpop.f32.mrf.mxu0  ;;  %v2776_v24 = vpop.f32.mrf.mxu1 }
 0x2e1   :  { %v2788_v13 = vsel %vm2109_vm9, %v2775_v55, 0.0 }
 0x2e2   :  { %v2783_v14 = vadd.f32 %v2782_v27, %v2781_v23  ;;  %v2789_v49 = vrot.slane %v2788_v13, 4  ;;  %v2736_v18 = vpop.f32.mrf.mxu0  ;;  %v2777_v15 = vpop.f32.mrf.mxu1 }
 0x2e4   :  { %v2784_v16 = vrot.slane %v2783_v14, 2  ;;  %v2790_v21 = vadd.f32 %v2789_v49, %v2788_v13 }
 0x2e6   :  { %v2785_v22 = vadd.f32 %v2784_v16, %v2783_v14  ;;  %v2791_v25 = vrot.slane %v2790_v21, 2 }
 0x2e8   :  { %v2786_v17 = vrot.slane %v2785_v22, 1  ;;  %v2792_v20 = vadd.f32 %v2791_v25, %v2790_v21 }
 0x2ea   :  { %v2787_v19 = vadd.f32 %v2786_v17, %v2785_v22  ;;  %v2793_v26 = vrot.slane %v2792_v20, 1 }
 0x2ec   :  { %v2795_v58 = vmul.f32 0.25, %v2787_v19  ;;  %v2794_v60 = vadd.f32 %v2793_v26, %v2792_v20 }
 0x2ee   :  { %v2797_v28 = vsub.f32 %v5702_v10, %v2795_v58  ;;  %v2796_v29 = vmul.f32 0.25, %v2794_v60 }
 0x2f0   :  { %v2799_v61 = vmul.f32 %v2797_v28, %v2797_v28  ;;  %v2798_v31 = vsub.f32 %v2775_v55, %v2796_v29 }
 0x2f2   :  { %v2801_v32 = vsel %vm2109_vm9, %v2799_v61, 0.0  ;;  %v2800_v33 = vmul.f32 %v2798_v31, %v2798_v31 }
 0x2f3   :  { %v2802_v34 = vrot.slane %v2801_v32, 4 }
 0x2f4   :  { %v2808_v35 = vsel %vm2109_vm9, %v2800_v33, 0.0 }
 0x2f5   :  { %v2803_v38 = vadd.f32 %v2802_v34, %v2801_v32  ;;  %v2809_v39 = vrot.slane %v2808_v35, 4 }
 0x2f7   :  { %v2804_v40 = vrot.slane %v2803_v38, 2  ;;  %v2810_v41 = vadd.f32 %v2809_v39, %v2808_v35 }
 0x2f9   :  { %v2805_v42 = vadd.f32 %v2804_v40, %v2803_v38  ;;  %v2811_v43 = vrot.slane %v2810_v41, 2 }
 0x2fb   :  { %v2806_v45 = vrot.slane %v2805_v42, 1  ;;  %v2812_v46 = vadd.f32 %v2811_v43, %v2810_v41 }
 0x2fd   :  { %v2807_v47 = vadd.f32 %v2806_v45, %v2805_v42  ;;  %v2813_v52 = vrot.slane %v2812_v46, 1 }
 0x2ff   :  { %v2815_v51 = vmul.f32 0.25, %v2807_v47  ;;  %v2814_v54 = vadd.f32 %v2813_v52, %v2812_v46 }
 0x301   :  { %v2817_v62 = vadd.f32 1e-05, %v2815_v51  ;;  %v2816_v63 = vmul.f32 0.25, %v2814_v54 }
 0x303   :  { %v2818_v0 = vadd.f32 1e-05, %v2816_v63  ;;  %4292 = vrsqrt.f32 %v2817_v62 }
 0x305   :  { %4294 = vrsqrt.f32 %v2818_v0 }
 0x310   :  { %v4293_v1 = vpop.eup %4292 }
 0x312   :  { %v4295_v2 = vpop.eup %4294 }
 0x313   :  { %v2823_v3 = vcombine.low %v4293_v1, %v4295_v2 }
 0x315   :  { %v2830_v4 = vrot.slane %v2823_v3, %v5530_v30 }
 0x317   :  { %v2837_v57 = vrot.slane %v2830_v4, %v5530_v30 }
 0x319   :  { %v2839_v7 = vmul.f32 %v2837_v57, %v2779_v44 }
 0x31b   :  { %v2844_v50 = vrot.slane %v2839_v7, %v4526_v53  ;;  %v2848_v5 = vrot.slane %v2839_v7, %v4509_v48 }
 0x31d   :  { %v2851_v6 = vmul.f32 %v2844_v50, %v2795_v58  ;;  %v2852_v36 = vmul.f32 %v2848_v5, %v2796_v29  ;;  %v2873_v23 = vmul.f32 %v2848_v5, %v2775_v55  ;;  %v2872_v56 = vmul.f32 %v2844_v50, %v5702_v10  ;;  %v3309_v10 = vld [vmem:[%s5755_s12] sm:$0x7] }
 0x31e   :  { %v3314_v20 = vrot.slane %v3309_v10, %v4526_v53  ;;  %v3318_v19 = vrot.slane %v3309_v10, %v4509_v48  ;;  %v3322_v61 = vrot.slane %v3309_v10, %v4545_v59 }
 0x31f   :  { %v2855_v37 = vcombine.low %v2851_v6, %v2852_v36 }
 0x321   :  { %v2862_v8 = vrot.slane %v2855_v37, %v5530_v30 }
 0x323   :  { %v2869_v11 = vrot.slane %v2862_v8, %v5530_v30  ;;  %v2955_v30 = vld [vmem:[%s5754_s11] sm:$0x7] }
 0x324   :  { %v2960_v55 = vrot.slane %v2955_v30, %v4526_v53  ;;  %v2964_v21 = vrot.slane %v2955_v30, %v4509_v48  ;;  %v2968_v26 = vrot.slane %v2955_v30, %v4545_v59 }
 0x325   :  { %v2871_v12 = vsub.f32 %v2780_v9, %v2869_v11 }
 0x327   :  { %v2882_v27 = vrot.slane %v2871_v12, %v4509_v48  ;;  %v2878_v24 = vrot.slane %v2871_v12, %v4526_v53 }
 0x329   :  { %v2886_v13 = vadd.f32 %v2882_v27, %v2873_v23  ;;  %v2885_v14 = vadd.f32 %v2878_v24, %v2872_v56 }
 0x32b   :  { %v2888_v49 = vmax.f32 %v2886_v13, 0.0  ;;  %v2887_v18 = vmax.f32 %v2885_v14, 0.0 }
 0x32d   :  { %v2890_v15 = vpack.c.bf16 %v2888_v49, %v2888_v49  ;;  %v2889_v16 = vpack.c.bf16 %v2887_v18, %v2887_v18 }
 0x32f   :  { %3260 = vmatprep.mubr.bf16.mxu0 %v2890_v15  ;;  %3301 = vmatprep.mubr.bf16.mxu1 %v2890_v15 }
 0x330   :  { %3261 = vmatmul.mubr.bf16.vlgmr.msra.gmra.mxu0 %v2889_v16  ;;  %3302 = vmatmul.mubr.bf16.vlgmr.msra.gmra.mxu1 %v2889_v16 }
 0x3f0   :  { %v3262_v22 = vpop.f32.mrf.mxu0  ;;  %v3724_v25 = vpop.f32.mrf.mxu1 }
 0x3f1   :  { %v3263_v17 = vadd.f32 %v3262_v22, %v2960_v55 }
 0x3f2   :  { %v3264_v58 = vpop.f32.mrf.mxu0  ;;  %v3725_v60 = vpop.f32.mrf.mxu1 }
 0x3f3   :  { %v3265_v28 = vadd.f32 %v3264_v58, %v2964_v21  ;;  %v3726_v29 = vadd.f32 %v3725_v60, %v3724_v25  ;;  %v3326_v33 = vadd.f32 %v3314_v20, %v3263_v17 }
 0x3f4   :  { %v3266_v31 = vpop.f32.mrf.mxu0  ;;  %v3727_v32 = vpop.f32.mrf.mxu1 }
 0x3f5   :  { %v3327_v34 = vadd.f32 %v3318_v19, %v3265_v28  ;;  %v3304_v35 = vadd.f32 %v3726_v29, %v2968_v26 }
 0x3f6   :  { %v3267_v38 = vpop.f32.mrf.mxu0  ;;  %v3728_v39 = vpop.f32.mrf.mxu1 }
 0x3f7   :  { %v3331_v40 = vcombine.low %v3326_v33, %v3327_v34  ;;  %v3328_v53 = vadd.f32 %v3322_v61, %v3304_v35 }
 0x3f9   :  { %3333 = vst [vmem:[%s5756_s13] sm:$0xff] %v3331_v40  ;;  %3335 = vst.msk [vmem:[%s5756_s13 + $0x8] sm:$0xf] %vm3334_vm10, %v3328_v53 }

</bundles_post_ra>
